<compile_context>
chip_gen: v7x
topology: tpu7x:2x2x1
jax: 0.10.0
libtpu: 0.0.40
codegen_flags: <defaults>
</compile_context>

<pallas_src>
import math
from functools import partial

import numpy as np
import jax
import jax.numpy as jnp
from jax.experimental import pallas as pl
from jax.experimental.pallas import tpu as pltpu


_LANES = 128
_VMEM_LIMIT = 48 * 1024 * 1024      # explicit scoped-VMEM limit for all calls
_TILE_BUDGET = 8 * 1024 * 1024      # budget for per-Wo-tile intermediates
_PLANE_BUDGET = 8 * 1024 * 1024     # budget for double-buffered input planes


def _round_up(a: int, b: int) -> int:
    return -(-a // b) * b


def _conv_out(n: int, ws: int) -> int:
    # F.conv2d output size with padding = ws // 2, stride 1.
    return n + 2 * (ws // 2) - ws + 1


# ----------------------------------------------------------------------------
# Gaussian window (same construction as the PyTorch gaussian/create_window).
# The reference uses sigma = 1.5 * window_size / 11 -- kept verbatim.
# ----------------------------------------------------------------------------
def _gaussian_1d(window_size: int, sigma: float) -> np.ndarray:
    x = np.arange(window_size, dtype=np.float64)
    g = np.exp(-((x - window_size // 2) ** 2) / (2.0 * sigma ** 2))
    return g / g.sum()


def _band_matrices(H, W, ws, sigma, Ho, Wo, wo_pad):
    """Band matrices with the zero padding of conv2d(padding=ws//2) folded in.

    conv2d(x, outer(g, g), padding=ws//2) == Bh @ x @ Bw with
        Bh[ho, h] = g[h - ho + pad]   (Ho, H)
        Bw[w, wo] = g[w - wo + pad]   (W, Wo)   (zero-padded to wo_pad cols)
    """
    g = _gaussian_1d(ws, sigma)
    pad = ws // 2

    bh = np.zeros((Ho, H), np.float32)
    for ho in range(Ho):
        for h in range(H):
            k = h - ho + pad
            if 0 <= k < ws:
                bh[ho, h] = g[k]

    bw = np.zeros((W, wo_pad), np.float32)
    for w in range(W):
        for wo in range(Wo):
            k = w - wo + pad
            if 0 <= k < ws:
                bw[w, wo] = g[k]
    return bh, bw


def _choose_tiles(NB, H, W, Ho, Wo):
    """Pick (plane batch, Wo tile, padded Wo) from simple VMEM budgets."""
    wo_pad = _round_up(Wo, _LANES)

    # Largest Wo tile (multiple of 128 dividing wo_pad) whose per-tile
    # intermediates (t in f32+bf16, mu/e maps, pointwise temps) fit the budget.
    def tile_bytes(t):
        return 5 * H * t * (4 + 2) + 20 * Ho * t * 4

    tile = _LANES
    for cand in range(_LANES, wo_pad + 1, _LANES):
        if wo_pad % cand == 0 and tile_bytes(cand) <= _TILE_BUDGET:
            tile = cand

    # Largest plane batch (divisor of NB) whose double-buffered f32 input
    # blocks fit the budget; keep >= 2 plane-blocks so the "parallel" axis can
    # shard across v7x's two TensorCores and the pipeline has >1 step.
    pb = 1
    pb_cap = NB if NB == 1 else NB // 2
    for cand in range(1, pb_cap + 1):
        if NB % cand == 0 and 2 * 2 * cand * H * W * 4 <= _PLANE_BUDGET:
            pb = cand
    return pb, tile, wo_pad


# ----------------------------------------------------------------------------
# SSIM level kernel: PB planes x one Wo tile per grid step.
# ----------------------------------------------------------------------------
def _make_ssim_kernel(PB, H, Ho, Wo, TILE_WO, C1, C2, needs_mask):
    def kernel(i1_ref, i2_ref, bh_ref, bw_ref, ssim_ref, mcs_ref):
        bh = bh_ref[...]                               # (Ho, H) bf16
        bw = bw_ref[...]                               # (W, TILE_WO) bf16

        ssim_acc = jnp.zeros((Ho, TILE_WO), jnp.float32)
        mcs_acc = jnp.zeros((Ho, TILE_WO), jnp.float32)

        def sep_conv(m_bf16):                          # (H, W) bf16
            # Separable gaussian conv (padding folded into the band matrices):
            # W-conv then H-conv, dense MXU matmuls with f32 accumulation.
            t = jnp.dot(m_bf16, bw, preferred_element_type=jnp.float32)
            return jnp.dot(bh, t.astype(jnp.bfloat16),
                           preferred_element_type=jnp.float32)   # (Ho, TILE_WO)

        for p in range(PB):                            # unrolled, PB is static
            x1 = i1_ref[p]                             # (H, W) f32
            x2 = i2_ref[p]
            # TODO(synk): bf16 conv operands can drift sigma = E[x^2] - mu^2 by
            # O(C2); switch to f32 operands + precision=HIGHEST if tighter
            # agreement with the f32 torch reference is required.
            mu1 = sep_conv(x1.astype(jnp.bfloat16))
            mu2 = sep_conv(x2.astype(jnp.bfloat16))
            e11 = sep_conv((x1 * x1).astype(jnp.bfloat16))
            e22 = sep_conv((x2 * x2).astype(jnp.bfloat16))
            e12 = sep_conv((x1 * x2).astype(jnp.bfloat16))

            mu1_sq = mu1 * mu1
            mu2_sq = mu2 * mu2
            mu1_mu2 = mu1 * mu2
            sigma1_sq = e11 - mu1_sq
            sigma2_sq = e22 - mu2_sq
            sigma12 = e12 - mu1_mu2

            V1 = 2.0 * sigma12 + C2
            V2 = sigma1_sq + sigma2_sq + C2
            # EUP reciprocals instead of VPU divides; mcs_map reused below.
            inv_v2 = pl.reciprocal(V2, approx=True)
            inv_b = pl.reciprocal(mu1_sq + mu2_sq + C1, approx=True)
            mcs_map = V1 * inv_v2
            ssim_map = (2.0 * mu1_mu2 + C1) * inv_b * mcs_map

            ssim_acc = ssim_acc + ssim_map
            mcs_acc = mcs_acc + mcs_map

        if needs_mask:
            # Mask the lane-padding columns (bw was zero-padded to a multiple
            # of 128 -> those columns would otherwise contribute ssim=mcs=1).
            col = (jax.lax.broadcasted_iota(jnp.int32, (Ho, TILE_WO), 1)
                   + pl.program_id(1) * TILE_WO)
            valid = (col < Wo).astype(jnp.float32)
            ssim_acc = ssim_acc * valid
            mcs_acc = mcs_acc * valid

        # One (1, 1) partial-sum store per grid step; both grid axes write
        # distinct output blocks so they stay "parallel".
        ssim_ref[...] = jnp.sum(ssim_acc, keepdims=True)
        mcs_ref[...] = jnp.sum(mcs_acc, keepdims=True)

    return kernel


def _ssim_level(img1, img2, max_val):
    """One MS_SSIM._ssim level. img1/img2: (N, 3, H, W) -> (mean ssim, mean mcs)."""
    N, C, H, W = img1.shape
    NB = N * C
    ws = min(H, W, 11)
    sigma = 1.5 * ws / 11.0                   # matches the reference module
    Ho = _conv_out(H, ws)
    Wo = _conv_out(W, ws)

    PB, TILE_WO, wo_pad = _choose_tiles(NB, H, W, Ho, Wo)
    NBLK = NB // PB
    NJ = wo_pad // TILE_WO

    bh_np, bw_np = _band_matrices(H, W, ws, sigma, Ho, Wo, wo_pad)
    bh = jnp.asarray(bh_np, jnp.bfloat16)     # (Ho, H)  -- dense, not block-diag
    bw = jnp.asarray(bw_np, jnp.bfloat16)     # (W, wo_pad)

    C1 = float((0.01 * max_val) ** 2)
    C2 = float((0.03 * max_val) ** 2)

    i1 = img1.reshape(NB, H, W).astype(jnp.float32)
    i2 = img2.reshape(NB, H, W).astype(jnp.float32)

    # TODO(synk): for >=1080p frames on v7x, consider bf16 input planes or
    # pl.Buffered(1) on the input specs to halve the resident input footprint.
    kernel = _make_ssim_kernel(PB, H, Ho, Wo, TILE_WO, C1, C2, wo_pad != Wo)

    ssim_pp, mcs_pp = pl.pallas_call(
        kernel,
        out_shape=(jax.ShapeDtypeStruct((NBLK, NJ, 1, 1), jnp.float32),
                   jax.ShapeDtypeStruct((NBLK, NJ, 1, 1), jnp.float32)),
        grid=(NBLK, NJ),
        in_specs=[
            pl.BlockSpec((PB, H, W), lambda b, j: (b, 0, 0)),
            pl.BlockSpec((PB, H, W), lambda b, j: (b, 0, 0)),
            pl.BlockSpec((Ho, H), lambda b, j: (0, 0)),
            pl.BlockSpec((W, TILE_WO), lambda b, j: (0, j)),
        ],
        out_specs=(pl.BlockSpec((None, None, 1, 1), lambda b, j: (b, j, 0, 0)),
                   pl.BlockSpec((None, None, 1, 1), lambda b, j: (b, j, 0, 0))),
        compiler_params=pltpu.CompilerParams(
            dimension_semantics=("parallel", "parallel"),
            vmem_limit_bytes=_VMEM_LIMIT),
    )(i1, i2, bh, bw)

    denom = float(NB * Ho * Wo)
    return jnp.sum(ssim_pp) / denom, jnp.sum(mcs_pp) / denom


def _avg_pool2(x):
    # F.avg_pool2d(kernel_size=2, stride=2): full 2x2 windows only (odd edge dropped).
    N, C, H, W = x.shape
    H2, W2 = H // 2, W // 2
    x = x[:, :, :2 * H2, :2 * W2]
    return x.reshape(N, C, H2, 2, W2, 2).mean(axis=(3, 5))


def ms_ssim(img1, img2, max_val=1.0, levels=5):
    weight = jnp.asarray([0.0448, 0.2856, 0.3001, 0.2363, 0.1333], jnp.float32)
    msssim, mcs = [], []
    for i in range(levels):
        s, m = _ssim_level(img1, img2, max_val)
        msssim.append(s)
        mcs.append(m)
        if i < levels - 1:                    # last pooling is unused -> skip
            img1 = _avg_pool2(img1)
            img2 = _avg_pool2(img2)
    # NOTE: like the reference, a negative mcs raised to a fractional weight
    # would NaN; reference semantics are kept (no clamping).
    value = (jnp.prod(jnp.stack(mcs[:levels - 1]) ** weight[:levels - 1])
             * (msssim[levels - 1] ** weight[levels - 1]))
    return value


# ----------------------------------------------------------------------------
# bpp loss kernel: lane-dense sum(log(likelihoods)) reduction.
# ----------------------------------------------------------------------------
def _logsum_kernel(x_ref, o_ref):
    # Per-block partial sum kept lane-dense (sublane reduce only); the final
    # cross-lane / cross-block reduction happens outside the kernel.
    o_ref[...] = jnp.sum(jnp.log(x_ref[...]), axis=0, keepdims=True)


def _log_sum(x):
    xf = x.reshape(-1).astype(jnp.float32)
    n = xf.shape[0]
    rows = -(-n // _LANES)
    block_rows = min(512, _round_up(rows, 8))      # 512x128 f32 = 256 KiB/block
    rows_p = _round_up(rows, block_rows)
    total = rows_p * _LANES
    # Pad with 1.0 -> log(1) = 0, contributes nothing to the sum.
    xf = jnp.pad(xf, (0, total - n), constant_values=1.0)
    x2 = xf.reshape(rows_p, _LANES)
    nblk = rows_p // block_rows

    partial = pl.pallas_call(
        _logsum_kernel,
        out_shape=jax.ShapeDtypeStruct((nblk, 1, _LANES), jnp.float32),
        grid=(nblk,),
        in_specs=[pl.BlockSpec((block_rows, _LANES), lambda i: (i, 0))],
        out_specs=pl.BlockSpec((None, 1, _LANES), lambda i: (i, 0, 0)),
        compiler_params=pltpu.CompilerParams(
            dimension_semantics=("parallel",),
            vmem_limit_bytes=_VMEM_LIMIT),
    )(x2)
    return jnp.sum(partial)


# ----------------------------------------------------------------------------
# DVC_MS_SSIM_Loss.forward (fully on-device, single jit, no host sync).
# ----------------------------------------------------------------------------
@partial(jax.jit, static_argnames=("max_val",))
def _dvc_loss_device(x_hat, target, likelihoods, lmbda, max_val):
    N, _, H, W = target.shape
    num_pixels = N * H * W

    bpp_loss = jnp.float32(0.0)
    for lk in likelihoods.values():
        bpp_loss = bpp_loss + _log_sum(lk) / (-math.log(2) * num_pixels)

    ms_ssim_val = ms_ssim(x_hat, target, max_val=max_val)
    ms_ssim_loss = 1.0 - ms_ssim_val
    loss = lmbda * ms_ssim_loss + bpp_loss

    # Reference branches on .item(); equivalent on-device select (no sync).
    ms_ssim_db = jnp.where(
        ms_ssim_loss > 0,
        10.0 * jnp.log10(1.0 / jnp.maximum(ms_ssim_loss, jnp.float32(1e-30))),
        jnp.float32(0.0))

    return {'bpp_loss': bpp_loss, 'ms_ssim_loss': ms_ssim_loss,
            'ms_ssim_db': ms_ssim_db, 'loss': loss}


def dvc_ms_ssim_loss(output, target, lmbda, max_val=1.0):
    return _dvc_loss_device(output['x_hat'], target, output['likelihoods'],
                            lmbda, max_val=max_val)


if __name__ == "__main__":
    key = jax.random.PRNGKey(0)
    k1, k2, k3, k4 = jax.random.split(key, 4)

    # MS_SSIM hard-codes channel=3; 32x32 keeps all 5 pyramid levels valid.
    N, C, H, W = 2, 3, 32, 32
    target = jax.random.uniform(k1, (N, C, H, W), jnp.float32)
    x_hat = jnp.clip(
        target + 0.05 * jax.random.normal(k2, (N, C, H, W), jnp.float32),
        0.0, 1.0)
    lk_y = jax.random.uniform(k3, (N, 8, H // 4, W // 4), jnp.float32,
                              minval=0.05, maxval=1.0)
    lk_z = jax.random.uniform(k4, (N, 8, H // 16, W // 16), jnp.float32,
                              minval=0.05, maxval=1.0)

    output = {'x_hat': x_hat, 'likelihoods': {'y': lk_y, 'z': lk_z}}

    out = dvc_ms_ssim_loss(output, target, lmbda=8.0)
    for name in ('loss', 'bpp_loss', 'ms_ssim_loss', 'ms_ssim_db'):
        v = jax.block_until_ready(out[name])
        assert bool(jnp.isfinite(v)), f"non-finite {name}"
    print("KERNEL_OK")
</pallas_src>

<mosaic_0001>
module attributes {stable_mosaic.version = 11 : i64} {
  func.func @kernel(%arg0: i32, %arg1: i32, %arg2: memref<3x4x4xf32, #tpu.memory_space<vmem>>, %arg3: memref<3x4x4xf32, #tpu.memory_space<vmem>>, %arg4: memref<5x4xbf16, #tpu.memory_space<vmem>>, %arg5: memref<4x128xbf16, #tpu.memory_space<vmem>>, %arg6: memref<1x1x1x1xf32, #tpu.memory_space<vmem>>, %arg7: memref<1x1x1x1xf32, #tpu.memory_space<vmem>>) attributes {dimension_semantics = [#tpu.dimension_semantics<parallel>, #tpu.dimension_semantics<parallel>], iteration_bounds = array<i64: 2, 1>, scalar_prefetch = 0 : i64, scratch_operands = 0 : i64, tpu.core_type = #tpu.core_type<tc>, window_params = [{transform_indices = @transform_0, window_bounds = array<i64: 3, 4, 4>}, {transform_indices = @transform_1, window_bounds = array<i64: 3, 4, 4>}, {pipeline_mode = #tpu.pipeline_mode<synchronous>, transform_indices = @transform_2, window_bounds = array<i64: 5, 4>}, {transform_indices = @transform_3, window_bounds = array<i64: 4, 128>}, {transform_indices = @transform_4, window_bounds = array<i64: 1, 1, 1, 1>}, {transform_indices = @transform_5, window_bounds = array<i64: 1, 1, 1, 1>}]} {
    %c0 = arith.constant 0 : index
    %c0_0 = arith.constant 0 : index
    %0 = vector.load %arg4[%c0, %c0_0] : memref<5x4xbf16, #tpu.memory_space<vmem>>, vector<5x4xbf16>
    %c0_1 = arith.constant 0 : index
    %c0_2 = arith.constant 0 : index
    %1 = vector.load %arg5[%c0_1, %c0_2] : memref<4x128xbf16, #tpu.memory_space<vmem>>, vector<4x128xbf16>
    %cst = arith.constant 0.000000e+00 : f32
    %2 = vector.broadcast %cst : f32 to vector<5x128xf32>
    %cst_3 = arith.constant 0.000000e+00 : f32
    %3 = vector.broadcast %cst_3 : f32 to vector<5x128xf32>
    %c0_4 = arith.constant 0 : index
    %c0_5 = arith.constant 0 : index
    %c0_6 = arith.constant 0 : index
    %4 = vector.load %arg2[%c0_4, %c0_5, %c0_6] : memref<3x4x4xf32, #tpu.memory_space<vmem>>, vector<1x4x4xf32>
    %5 = vector.shape_cast %4 : vector<1x4x4xf32> to vector<4x4xf32>
    %c0_7 = arith.constant 0 : index
    %c0_8 = arith.constant 0 : index
    %c0_9 = arith.constant 0 : index
    %6 = vector.load %arg3[%c0_7, %c0_8, %c0_9] : memref<3x4x4xf32, #tpu.memory_space<vmem>>, vector<1x4x4xf32>
    %7 = vector.shape_cast %6 : vector<1x4x4xf32> to vector<4x4xf32>
    %8 = arith.truncf %5 : vector<4x4xf32> to vector<4x4xbf16>
    %cst_10 = arith.constant dense<0.000000e+00> : vector<4x128xf32>
    %9 = tpu.matmul %8, %1, %cst_10 {dimension_numbers = #tpu.dot_dimension_numbers<[1], [0], [0], [1], [0, 0, 1, 1], [], []>} : vector<4x4xbf16>, vector<4x128xbf16>, vector<4x128xf32> -> vector<4x128xf32>
    %10 = arith.truncf %9 : vector<4x128xf32> to vector<4x128xbf16>
    %cst_11 = arith.constant dense<0.000000e+00> : vector<5x128xf32>
    %11 = tpu.matmul %0, %10, %cst_11 {dimension_numbers = #tpu.dot_dimension_numbers<[1], [0], [0], [1], [0, 0, 1, 1], [], []>} : vector<5x4xbf16>, vector<4x128xbf16>, vector<5x128xf32> -> vector<5x128xf32>
    %12 = arith.truncf %7 : vector<4x4xf32> to vector<4x4xbf16>
    %cst_12 = arith.constant dense<0.000000e+00> : vector<4x128xf32>
    %13 = tpu.matmul %12, %1, %cst_12 {dimension_numbers = #tpu.dot_dimension_numbers<[1], [0], [0], [1], [0, 0, 1, 1], [], []>} : vector<4x4xbf16>, vector<4x128xbf16>, vector<4x128xf32> -> vector<4x128xf32>
    %14 = arith.truncf %13 : vector<4x128xf32> to vector<4x128xbf16>
    %cst_13 = arith.constant dense<0.000000e+00> : vector<5x128xf32>
    %15 = tpu.matmul %0, %14, %cst_13 {dimension_numbers = #tpu.dot_dimension_numbers<[1], [0], [0], [1], [0, 0, 1, 1], [], []>} : vector<5x4xbf16>, vector<4x128xbf16>, vector<5x128xf32> -> vector<5x128xf32>
    %16 = arith.mulf %5, %5 : vector<4x4xf32>
    %17 = arith.truncf %16 : vector<4x4xf32> to vector<4x4xbf16>
    %cst_14 = arith.constant dense<0.000000e+00> : vector<4x128xf32>
    %18 = tpu.matmul %17, %1, %cst_14 {dimension_numbers = #tpu.dot_dimension_numbers<[1], [0], [0], [1], [0, 0, 1, 1], [], []>} : vector<4x4xbf16>, vector<4x128xbf16>, vector<4x128xf32> -> vector<4x128xf32>
    %19 = arith.truncf %18 : vector<4x128xf32> to vector<4x128xbf16>
    %cst_15 = arith.constant dense<0.000000e+00> : vector<5x128xf32>
    %20 = tpu.matmul %0, %19, %cst_15 {dimension_numbers = #tpu.dot_dimension_numbers<[1], [0], [0], [1], [0, 0, 1, 1], [], []>} : vector<5x4xbf16>, vector<4x128xbf16>, vector<5x128xf32> -> vector<5x128xf32>
    %21 = arith.mulf %7, %7 : vector<4x4xf32>
    %22 = arith.truncf %21 : vector<4x4xf32> to vector<4x4xbf16>
    %cst_16 = arith.constant dense<0.000000e+00> : vector<4x128xf32>
    %23 = tpu.matmul %22, %1, %cst_16 {dimension_numbers = #tpu.dot_dimension_numbers<[1], [0], [0], [1], [0, 0, 1, 1], [], []>} : vector<4x4xbf16>, vector<4x128xbf16>, vector<4x128xf32> -> vector<4x128xf32>
    %24 = arith.truncf %23 : vector<4x128xf32> to vector<4x128xbf16>
    %cst_17 = arith.constant dense<0.000000e+00> : vector<5x128xf32>
    %25 = tpu.matmul %0, %24, %cst_17 {dimension_numbers = #tpu.dot_dimension_numbers<[1], [0], [0], [1], [0, 0, 1, 1], [], []>} : vector<5x4xbf16>, vector<4x128xbf16>, vector<5x128xf32> -> vector<5x128xf32>
    %26 = arith.mulf %5, %7 : vector<4x4xf32>
    %27 = arith.truncf %26 : vector<4x4xf32> to vector<4x4xbf16>
    %cst_18 = arith.constant dense<0.000000e+00> : vector<4x128xf32>
    %28 = tpu.matmul %27, %1, %cst_18 {dimension_numbers = #tpu.dot_dimension_numbers<[1], [0], [0], [1], [0, 0, 1, 1], [], []>} : vector<4x4xbf16>, vector<4x128xbf16>, vector<4x128xf32> -> vector<4x128xf32>
    %29 = arith.truncf %28 : vector<4x128xf32> to vector<4x128xbf16>
    %cst_19 = arith.constant dense<0.000000e+00> : vector<5x128xf32>
    %30 = tpu.matmul %0, %29, %cst_19 {dimension_numbers = #tpu.dot_dimension_numbers<[1], [0], [0], [1], [0, 0, 1, 1], [], []>} : vector<5x4xbf16>, vector<4x128xbf16>, vector<5x128xf32> -> vector<5x128xf32>
    %31 = arith.mulf %11, %11 : vector<5x128xf32>
    %32 = arith.mulf %15, %15 : vector<5x128xf32>
    %33 = arith.mulf %11, %15 : vector<5x128xf32>
    %34 = arith.subf %20, %31 : vector<5x128xf32>
    %35 = arith.subf %25, %32 : vector<5x128xf32>
    %36 = arith.subf %30, %33 : vector<5x128xf32>
    %cst_20 = arith.constant 2.000000e+00 : f32
    %37 = vector.broadcast %cst_20 : f32 to vector<5x128xf32>
    %38 = arith.mulf %37, %36 : vector<5x128xf32>
    %cst_21 = arith.constant 8.99999984E-4 : f32
    %39 = vector.broadcast %cst_21 : f32 to vector<5x128xf32>
    %40 = arith.addf %38, %39 : vector<5x128xf32>
    %41 = arith.addf %34, %35 : vector<5x128xf32>
    %cst_22 = arith.constant 8.99999984E-4 : f32
    %42 = vector.broadcast %cst_22 : f32 to vector<5x128xf32>
    %43 = arith.addf %41, %42 : vector<5x128xf32>
    %44 = tpu.reciprocal %43 {approx = true} : vector<5x128xf32> -> vector<5x128xf32>
    %45 = arith.addf %31, %32 : vector<5x128xf32>
    %cst_23 = arith.constant 9.99999974E-5 : f32
    %46 = vector.broadcast %cst_23 : f32 to vector<5x128xf32>
    %47 = arith.addf %45, %46 : vector<5x128xf32>
    %48 = tpu.reciprocal %47 {approx = true} : vector<5x128xf32> -> vector<5x128xf32>
    %49 = arith.mulf %40, %44 : vector<5x128xf32>
    %cst_24 = arith.constant 2.000000e+00 : f32
    %50 = vector.broadcast %cst_24 : f32 to vector<5x128xf32>
    %51 = arith.mulf %50, %33 : vector<5x128xf32>
    %cst_25 = arith.constant 9.99999974E-5 : f32
    %52 = vector.broadcast %cst_25 : f32 to vector<5x128xf32>
    %53 = arith.addf %51, %52 : vector<5x128xf32>
    %54 = arith.mulf %53, %48 : vector<5x128xf32>
    %55 = arith.mulf %54, %49 : vector<5x128xf32>
    %56 = arith.addf %2, %55 : vector<5x128xf32>
    %57 = arith.addf %3, %49 : vector<5x128xf32>
    %c1 = arith.constant 1 : index
    %c0_26 = arith.constant 0 : index
    %c0_27 = arith.constant 0 : index
    %58 = vector.load %arg2[%c1, %c0_26, %c0_27] : memref<3x4x4xf32, #tpu.memory_space<vmem>>, vector<1x4x4xf32>
    %59 = vector.shape_cast %58 : vector<1x4x4xf32> to vector<4x4xf32>
    %c1_28 = arith.constant 1 : index
    %c0_29 = arith.constant 0 : index
    %c0_30 = arith.constant 0 : index
    %60 = vector.load %arg3[%c1_28, %c0_29, %c0_30] : memref<3x4x4xf32, #tpu.memory_space<vmem>>, vector<1x4x4xf32>
    %61 = vector.shape_cast %60 : vector<1x4x4xf32> to vector<4x4xf32>
    %62 = arith.truncf %59 : vector<4x4xf32> to vector<4x4xbf16>
    %cst_31 = arith.constant dense<0.000000e+00> : vector<4x128xf32>
    %63 = tpu.matmul %62, %1, %cst_31 {dimension_numbers = #tpu.dot_dimension_numbers<[1], [0], [0], [1], [0, 0, 1, 1], [], []>} : vector<4x4xbf16>, vector<4x128xbf16>, vector<4x128xf32> -> vector<4x128xf32>
    %64 = arith.truncf %63 : vector<4x128xf32> to vector<4x128xbf16>
    %cst_32 = arith.constant dense<0.000000e+00> : vector<5x128xf32>
    %65 = tpu.matmul %0, %64, %cst_32 {dimension_numbers = #tpu.dot_dimension_numbers<[1], [0], [0], [1], [0, 0, 1, 1], [], []>} : vector<5x4xbf16>, vector<4x128xbf16>, vector<5x128xf32> -> vector<5x128xf32>
    %66 = arith.truncf %61 : vector<4x4xf32> to vector<4x4xbf16>
    %cst_33 = arith.constant dense<0.000000e+00> : vector<4x128xf32>
    %67 = tpu.matmul %66, %1, %cst_33 {dimension_numbers = #tpu.dot_dimension_numbers<[1], [0], [0], [1], [0, 0, 1, 1], [], []>} : vector<4x4xbf16>, vector<4x128xbf16>, vector<4x128xf32> -> vector<4x128xf32>
    %68 = arith.truncf %67 : vector<4x128xf32> to vector<4x128xbf16>
    %cst_34 = arith.constant dense<0.000000e+00> : vector<5x128xf32>
    %69 = tpu.matmul %0, %68, %cst_34 {dimension_numbers = #tpu.dot_dimension_numbers<[1], [0], [0], [1], [0, 0, 1, 1], [], []>} : vector<5x4xbf16>, vector<4x128xbf16>, vector<5x128xf32> -> vector<5x128xf32>
    %70 = arith.mulf %59, %59 : vector<4x4xf32>
    %71 = arith.truncf %70 : vector<4x4xf32> to vector<4x4xbf16>
    %cst_35 = arith.constant dense<0.000000e+00> : vector<4x128xf32>
    %72 = tpu.matmul %71, %1, %cst_35 {dimension_numbers = #tpu.dot_dimension_numbers<[1], [0], [0], [1], [0, 0, 1, 1], [], []>} : vector<4x4xbf16>, vector<4x128xbf16>, vector<4x128xf32> -> vector<4x128xf32>
    %73 = arith.truncf %72 : vector<4x128xf32> to vector<4x128xbf16>
    %cst_36 = arith.constant dense<0.000000e+00> : vector<5x128xf32>
    %74 = tpu.matmul %0, %73, %cst_36 {dimension_numbers = #tpu.dot_dimension_numbers<[1], [0], [0], [1], [0, 0, 1, 1], [], []>} : vector<5x4xbf16>, vector<4x128xbf16>, vector<5x128xf32> -> vector<5x128xf32>
    %75 = arith.mulf %61, %61 : vector<4x4xf32>
    %76 = arith.truncf %75 : vector<4x4xf32> to vector<4x4xbf16>
    %cst_37 = arith.constant dense<0.000000e+00> : vector<4x128xf32>
    %77 = tpu.matmul %76, %1, %cst_37 {dimension_numbers = #tpu.dot_dimension_numbers<[1], [0], [0], [1], [0, 0, 1, 1], [], []>} : vector<4x4xbf16>, vector<4x128xbf16>, vector<4x128xf32> -> vector<4x128xf32>
    %78 = arith.truncf %77 : vector<4x128xf32> to vector<4x128xbf16>
    %cst_38 = arith.constant dense<0.000000e+00> : vector<5x128xf32>
    %79 = tpu.matmul %0, %78, %cst_38 {dimension_numbers = #tpu.dot_dimension_numbers<[1], [0], [0], [1], [0, 0, 1, 1], [], []>} : vector<5x4xbf16>, vector<4x128xbf16>, vector<5x128xf32> -> vector<5x128xf32>
    %80 = arith.mulf %59, %61 : vector<4x4xf32>
    %81 = arith.truncf %80 : vector<4x4xf32> to vector<4x4xbf16>
    %cst_39 = arith.constant dense<0.000000e+00> : vector<4x128xf32>
    %82 = tpu.matmul %81, %1, %cst_39 {dimension_numbers = #tpu.dot_dimension_numbers<[1], [0], [0], [1], [0, 0, 1, 1], [], []>} : vector<4x4xbf16>, vector<4x128xbf16>, vector<4x128xf32> -> vector<4x128xf32>
    %83 = arith.truncf %82 : vector<4x128xf32> to vector<4x128xbf16>
    %cst_40 = arith.constant dense<0.000000e+00> : vector<5x128xf32>
    %84 = tpu.matmul %0, %83, %cst_40 {dimension_numbers = #tpu.dot_dimension_numbers<[1], [0], [0], [1], [0, 0, 1, 1], [], []>} : vector<5x4xbf16>, vector<4x128xbf16>, vector<5x128xf32> -> vector<5x128xf32>
    %85 = arith.mulf %65, %65 : vector<5x128xf32>
    %86 = arith.mulf %69, %69 : vector<5x128xf32>
    %87 = arith.mulf %65, %69 : vector<5x128xf32>
    %88 = arith.subf %74, %85 : vector<5x128xf32>
    %89 = arith.subf %79, %86 : vector<5x128xf32>
    %90 = arith.subf %84, %87 : vector<5x128xf32>
    %cst_41 = arith.constant 2.000000e+00 : f32
    %91 = vector.broadcast %cst_41 : f32 to vector<5x128xf32>
    %92 = arith.mulf %91, %90 : vector<5x128xf32>
    %cst_42 = arith.constant 8.99999984E-4 : f32
    %93 = vector.broadcast %cst_42 : f32 to vector<5x128xf32>
    %94 = arith.addf %92, %93 : vector<5x128xf32>
    %95 = arith.addf %88, %89 : vector<5x128xf32>
    %cst_43 = arith.constant 8.99999984E-4 : f32
    %96 = vector.broadcast %cst_43 : f32 to vector<5x128xf32>
    %97 = arith.addf %95, %96 : vector<5x128xf32>
    %98 = tpu.reciprocal %97 {approx = true} : vector<5x128xf32> -> vector<5x128xf32>
    %99 = arith.addf %85, %86 : vector<5x128xf32>
    %cst_44 = arith.constant 9.99999974E-5 : f32
    %100 = vector.broadcast %cst_44 : f32 to vector<5x128xf32>
    %101 = arith.addf %99, %100 : vector<5x128xf32>
    %102 = tpu.reciprocal %101 {approx = true} : vector<5x128xf32> -> vector<5x128xf32>
    %103 = arith.mulf %94, %98 : vector<5x128xf32>
    %cst_45 = arith.constant 2.000000e+00 : f32
    %104 = vector.broadcast %cst_45 : f32 to vector<5x128xf32>
    %105 = arith.mulf %104, %87 : vector<5x128xf32>
    %cst_46 = arith.constant 9.99999974E-5 : f32
    %106 = vector.broadcast %cst_46 : f32 to vector<5x128xf32>
    %107 = arith.addf %105, %106 : vector<5x128xf32>
    %108 = arith.mulf %107, %102 : vector<5x128xf32>
    %109 = arith.mulf %108, %103 : vector<5x128xf32>
    %110 = arith.addf %56, %109 : vector<5x128xf32>
    %111 = arith.addf %57, %103 : vector<5x128xf32>
    %c2 = arith.constant 2 : index
    %c0_47 = arith.constant 0 : index
    %c0_48 = arith.constant 0 : index
    %112 = vector.load %arg2[%c2, %c0_47, %c0_48] : memref<3x4x4xf32, #tpu.memory_space<vmem>>, vector<1x4x4xf32>
    %113 = vector.shape_cast %112 : vector<1x4x4xf32> to vector<4x4xf32>
    %c2_49 = arith.constant 2 : index
    %c0_50 = arith.constant 0 : index
    %c0_51 = arith.constant 0 : index
    %114 = vector.load %arg3[%c2_49, %c0_50, %c0_51] : memref<3x4x4xf32, #tpu.memory_space<vmem>>, vector<1x4x4xf32>
    %115 = vector.shape_cast %114 : vector<1x4x4xf32> to vector<4x4xf32>
    %116 = arith.truncf %113 : vector<4x4xf32> to vector<4x4xbf16>
    %cst_52 = arith.constant dense<0.000000e+00> : vector<4x128xf32>
    %117 = tpu.matmul %116, %1, %cst_52 {dimension_numbers = #tpu.dot_dimension_numbers<[1], [0], [0], [1], [0, 0, 1, 1], [], []>} : vector<4x4xbf16>, vector<4x128xbf16>, vector<4x128xf32> -> vector<4x128xf32>
    %118 = arith.truncf %117 : vector<4x128xf32> to vector<4x128xbf16>
    %cst_53 = arith.constant dense<0.000000e+00> : vector<5x128xf32>
    %119 = tpu.matmul %0, %118, %cst_53 {dimension_numbers = #tpu.dot_dimension_numbers<[1], [0], [0], [1], [0, 0, 1, 1], [], []>} : vector<5x4xbf16>, vector<4x128xbf16>, vector<5x128xf32> -> vector<5x128xf32>
    %120 = arith.truncf %115 : vector<4x4xf32> to vector<4x4xbf16>
    %cst_54 = arith.constant dense<0.000000e+00> : vector<4x128xf32>
    %121 = tpu.matmul %120, %1, %cst_54 {dimension_numbers = #tpu.dot_dimension_numbers<[1], [0], [0], [1], [0, 0, 1, 1], [], []>} : vector<4x4xbf16>, vector<4x128xbf16>, vector<4x128xf32> -> vector<4x128xf32>
    %122 = arith.truncf %121 : vector<4x128xf32> to vector<4x128xbf16>
    %cst_55 = arith.constant dense<0.000000e+00> : vector<5x128xf32>
    %123 = tpu.matmul %0, %122, %cst_55 {dimension_numbers = #tpu.dot_dimension_numbers<[1], [0], [0], [1], [0, 0, 1, 1], [], []>} : vector<5x4xbf16>, vector<4x128xbf16>, vector<5x128xf32> -> vector<5x128xf32>
    %124 = arith.mulf %113, %113 : vector<4x4xf32>
    %125 = arith.truncf %124 : vector<4x4xf32> to vector<4x4xbf16>
    %cst_56 = arith.constant dense<0.000000e+00> : vector<4x128xf32>
    %126 = tpu.matmul %125, %1, %cst_56 {dimension_numbers = #tpu.dot_dimension_numbers<[1], [0], [0], [1], [0, 0, 1, 1], [], []>} : vector<4x4xbf16>, vector<4x128xbf16>, vector<4x128xf32> -> vector<4x128xf32>
    %127 = arith.truncf %126 : vector<4x128xf32> to vector<4x128xbf16>
    %cst_57 = arith.constant dense<0.000000e+00> : vector<5x128xf32>
    %128 = tpu.matmul %0, %127, %cst_57 {dimension_numbers = #tpu.dot_dimension_numbers<[1], [0], [0], [1], [0, 0, 1, 1], [], []>} : vector<5x4xbf16>, vector<4x128xbf16>, vector<5x128xf32> -> vector<5x128xf32>
    %129 = arith.mulf %115, %115 : vector<4x4xf32>
    %130 = arith.truncf %129 : vector<4x4xf32> to vector<4x4xbf16>
    %cst_58 = arith.constant dense<0.000000e+00> : vector<4x128xf32>
    %131 = tpu.matmul %130, %1, %cst_58 {dimension_numbers = #tpu.dot_dimension_numbers<[1], [0], [0], [1], [0, 0, 1, 1], [], []>} : vector<4x4xbf16>, vector<4x128xbf16>, vector<4x128xf32> -> vector<4x128xf32>
    %132 = arith.truncf %131 : vector<4x128xf32> to vector<4x128xbf16>
    %cst_59 = arith.constant dense<0.000000e+00> : vector<5x128xf32>
    %133 = tpu.matmul %0, %132, %cst_59 {dimension_numbers = #tpu.dot_dimension_numbers<[1], [0], [0], [1], [0, 0, 1, 1], [], []>} : vector<5x4xbf16>, vector<4x128xbf16>, vector<5x128xf32> -> vector<5x128xf32>
    %134 = arith.mulf %113, %115 : vector<4x4xf32>
    %135 = arith.truncf %134 : vector<4x4xf32> to vector<4x4xbf16>
    %cst_60 = arith.constant dense<0.000000e+00> : vector<4x128xf32>
    %136 = tpu.matmul %135, %1, %cst_60 {dimension_numbers = #tpu.dot_dimension_numbers<[1], [0], [0], [1], [0, 0, 1, 1], [], []>} : vector<4x4xbf16>, vector<4x128xbf16>, vector<4x128xf32> -> vector<4x128xf32>
    %137 = arith.truncf %136 : vector<4x128xf32> to vector<4x128xbf16>
    %cst_61 = arith.constant dense<0.000000e+00> : vector<5x128xf32>
    %138 = tpu.matmul %0, %137, %cst_61 {dimension_numbers = #tpu.dot_dimension_numbers<[1], [0], [0], [1], [0, 0, 1, 1], [], []>} : vector<5x4xbf16>, vector<4x128xbf16>, vector<5x128xf32> -> vector<5x128xf32>
    %139 = arith.mulf %119, %119 : vector<5x128xf32>
    %140 = arith.mulf %123, %123 : vector<5x128xf32>
    %141 = arith.mulf %119, %123 : vector<5x128xf32>
    %142 = arith.subf %128, %139 : vector<5x128xf32>
    %143 = arith.subf %133, %140 : vector<5x128xf32>
    %144 = arith.subf %138, %141 : vector<5x128xf32>
    %cst_62 = arith.constant 2.000000e+00 : f32
    %145 = vector.broadcast %cst_62 : f32 to vector<5x128xf32>
    %146 = arith.mulf %145, %144 : vector<5x128xf32>
    %cst_63 = arith.constant 8.99999984E-4 : f32
    %147 = vector.broadcast %cst_63 : f32 to vector<5x128xf32>
    %148 = arith.addf %146, %147 : vector<5x128xf32>
    %149 = arith.addf %142, %143 : vector<5x128xf32>
    %cst_64 = arith.constant 8.99999984E-4 : f32
    %150 = vector.broadcast %cst_64 : f32 to vector<5x128xf32>
    %151 = arith.addf %149, %150 : vector<5x128xf32>
    %152 = tpu.reciprocal %151 {approx = true} : vector<5x128xf32> -> vector<5x128xf32>
    %153 = arith.addf %139, %140 : vector<5x128xf32>
    %cst_65 = arith.constant 9.99999974E-5 : f32
    %154 = vector.broadcast %cst_65 : f32 to vector<5x128xf32>
    %155 = arith.addf %153, %154 : vector<5x128xf32>
    %156 = tpu.reciprocal %155 {approx = true} : vector<5x128xf32> -> vector<5x128xf32>
    %157 = arith.mulf %148, %152 : vector<5x128xf32>
    %cst_66 = arith.constant 2.000000e+00 : f32
    %158 = vector.broadcast %cst_66 : f32 to vector<5x128xf32>
    %159 = arith.mulf %158, %141 : vector<5x128xf32>
    %cst_67 = arith.constant 9.99999974E-5 : f32
    %160 = vector.broadcast %cst_67 : f32 to vector<5x128xf32>
    %161 = arith.addf %159, %160 : vector<5x128xf32>
    %162 = arith.mulf %161, %156 : vector<5x128xf32>
    %163 = arith.mulf %162, %157 : vector<5x128xf32>
    %164 = arith.addf %110, %163 : vector<5x128xf32>
    %165 = arith.addf %111, %157 : vector<5x128xf32>
    %166 = tpu.iota {dimensions = array<i32: 1>} : vector<5x128xi32>
    %c128_i32 = arith.constant 128 : i32
    %167 = arith.muli %arg1, %c128_i32 : i32
    %168 = vector.broadcast %167 : i32 to vector<5x128xi32>
    %169 = arith.addi %166, %168 : vector<5x128xi32>
    %c5_i32 = arith.constant 5 : i32
    %170 = vector.broadcast %c5_i32 : i32 to vector<5x128xi32>
    %171 = arith.cmpi slt, %169, %170 : vector<5x128xi32>
    %172 = arith.extui %171 : vector<5x128xi1> to vector<5x128xi32>
    %173 = arith.sitofp %172 : vector<5x128xi32> to vector<5x128xf32>
    %174 = arith.mulf %164, %173 : vector<5x128xf32>
    %175 = arith.mulf %165, %173 : vector<5x128xf32>
    %176 = vector.shape_cast %174 : vector<5x128xf32> to vector<1x5x128xf32>
    %cst_68 = arith.constant dense<0.000000e+00> : vector<1xf32>
    %177 = vector.multi_reduction <add>, %176, %cst_68 [1, 2] : vector<1x5x128xf32> to vector<1xf32>
    %178 = vector.shape_cast %177 : vector<1xf32> to vector<1x1x1xf32>
    %179 = vector.extract %178[0, 0, 0] : f32 from vector<1x1x1xf32>
    %180 = vector.broadcast %179 : f32 to vector<1x1xf32>
    %c0_69 = arith.constant 0 : index
    %c0_70 = arith.constant 0 : index
    %c0_71 = arith.constant 0 : index
    %c0_72 = arith.constant 0 : index
    %181 = vector.load %arg6[%c0_69, %c0_70, %c0_71, %c0_72] : memref<1x1x1x1xf32, #tpu.memory_space<vmem>>, vector<1x1x1x1xf32>
    %182 = vector.shape_cast %181 : vector<1x1x1x1xf32> to vector<1x1xf32>
    %183 = vector.shape_cast %180 : vector<1x1xf32> to vector<1x1x1x1xf32>
    tpu.vector_store %arg6[%c0_69, %c0_70, %c0_71, %c0_72], %183 {strides = array<i32>} : memref<1x1x1x1xf32, #tpu.memory_space<vmem>>, vector<1x1x1x1xf32>,
    %184 = vector.shape_cast %175 : vector<5x128xf32> to vector<1x5x128xf32>
    %cst_73 = arith.constant dense<0.000000e+00> : vector<1xf32>
    %185 = vector.multi_reduction <add>, %184, %cst_73 [1, 2] : vector<1x5x128xf32> to vector<1xf32>
    %186 = vector.shape_cast %185 : vector<1xf32> to vector<1x1x1xf32>
    %187 = vector.extract %186[0, 0, 0] : f32 from vector<1x1x1xf32>
    %188 = vector.broadcast %187 : f32 to vector<1x1xf32>
    %c0_74 = arith.constant 0 : index
    %c0_75 = arith.constant 0 : index
    %c0_76 = arith.constant 0 : index
    %c0_77 = arith.constant 0 : index
    %189 = vector.load %arg7[%c0_74, %c0_75, %c0_76, %c0_77] : memref<1x1x1x1xf32, #tpu.memory_space<vmem>>, vector<1x1x1x1xf32>
    %190 = vector.shape_cast %189 : vector<1x1x1x1xf32> to vector<1x1xf32>
    %191 = vector.shape_cast %188 : vector<1x1xf32> to vector<1x1x1x1xf32>
    tpu.vector_store %arg7[%c0_74, %c0_75, %c0_76, %c0_77], %191 {strides = array<i32>} : memref<1x1x1x1xf32, #tpu.memory_space<vmem>>, vector<1x1x1x1xf32>,
    return
  }
  func.func @transform_0(%arg0: i32, %arg1: i32) -> (i32, i32, i32) {
    %c0_i32 = arith.constant 0 : i32
    %c0_i32_0 = arith.constant 0 : i32
    %c0_i32_1 = arith.constant 0 : i32
    return %arg0, %c0_i32, %c0_i32_0 : i32, i32, i32
  }
  func.func @transform_1(%arg0: i32, %arg1: i32) -> (i32, i32, i32) {
    %c0_i32 = arith.constant 0 : i32
    %c0_i32_0 = arith.constant 0 : i32
    %c0_i32_1 = arith.constant 0 : i32
    return %arg0, %c0_i32, %c0_i32_0 : i32, i32, i32
  }
  func.func @transform_2(%arg0: i32, %arg1: i32) -> (i32, i32) {
    %c0_i32 = arith.constant 0 : i32
    %c0_i32_0 = arith.constant 0 : i32
    %c0_i32_1 = arith.constant 0 : i32
    return %c0_i32, %c0_i32_0 : i32, i32
  }
  func.func @transform_3(%arg0: i32, %arg1: i32) -> (i32, i32) {
    %c0_i32 = arith.constant 0 : i32
    %c0_i32_0 = arith.constant 0 : i32
    return %c0_i32, %arg1 : i32, i32
  }
  func.func @transform_4(%arg0: i32, %arg1: i32) -> (i32, i32, i32, i32) {
    %c0_i32 = arith.constant 0 : i32
    %c0_i32_0 = arith.constant 0 : i32
    %c0_i32_1 = arith.constant 0 : i32
    return %arg0, %arg1, %c0_i32, %c0_i32_0 : i32, i32, i32, i32
  }
  func.func @transform_5(%arg0: i32, %arg1: i32) -> (i32, i32, i32, i32) {
    %c0_i32 = arith.constant 0 : i32
    %c0_i32_0 = arith.constant 0 : i32
    %c0_i32_1 = arith.constant 0 : i32
    return %arg0, %arg1, %c0_i32, %c0_i32_0 : i32, i32, i32, i32
  }
}

module attributes {stable_mosaic.version = 11 : i64} {
  func.func @kernel(%arg0: i32, %arg1: i32, %arg2: memref<3x8x8xf32, #tpu.memory_space<vmem>>, %arg3: memref<3x8x8xf32, #tpu.memory_space<vmem>>, %arg4: memref<9x8xbf16, #tpu.memory_space<vmem>>, %arg5: memref<8x128xbf16, #tpu.memory_space<vmem>>, %arg6: memref<1x1x1x1xf32, #tpu.memory_space<vmem>>, %arg7: memref<1x1x1x1xf32, #tpu.memory_space<vmem>>) attributes {dimension_semantics = [#tpu.dimension_semantics<parallel>, #tpu.dimension_semantics<parallel>], iteration_bounds = array<i64: 2, 1>, scalar_prefetch = 0 : i64, scratch_operands = 0 : i64, tpu.core_type = #tpu.core_type<tc>, window_params = [{transform_indices = @transform_0, window_bounds = array<i64: 3, 8, 8>}, {transform_indices = @transform_1, window_bounds = array<i64: 3, 8, 8>}, {pipeline_mode = #tpu.pipeline_mode<synchronous>, transform_indices = @transform_2, window_bounds = array<i64: 9, 8>}, {transform_indices = @transform_3, window_bounds = array<i64: 8, 128>}, {transform_indices = @transform_4, window_bounds = array<i64: 1, 1, 1, 1>}, {transform_indices = @transform_5, window_bounds = array<i64: 1, 1, 1, 1>}]} {
    %c0 = arith.constant 0 : index
    %c0_0 = arith.constant 0 : index
    %0 = vector.load %arg4[%c0, %c0_0] : memref<9x8xbf16, #tpu.memory_space<vmem>>, vector<9x8xbf16>
    %c0_1 = arith.constant 0 : index
    %c0_2 = arith.constant 0 : index
    %1 = vector.load %arg5[%c0_1, %c0_2] : memref<8x128xbf16, #tpu.memory_space<vmem>>, vector<8x128xbf16>
    %cst = arith.constant 0.000000e+00 : f32
    %2 = vector.broadcast %cst : f32 to vector<9x128xf32>
    %cst_3 = arith.constant 0.000000e+00 : f32
    %3 = vector.broadcast %cst_3 : f32 to vector<9x128xf32>
    %c0_4 = arith.constant 0 : index
    %c0_5 = arith.constant 0 : index
    %c0_6 = arith.constant 0 : index
    %4 = vector.load %arg2[%c0_4, %c0_5, %c0_6] : memref<3x8x8xf32, #tpu.memory_space<vmem>>, vector<1x8x8xf32>
    %5 = vector.shape_cast %4 : vector<1x8x8xf32> to vector<8x8xf32>
    %c0_7 = arith.constant 0 : index
    %c0_8 = arith.constant 0 : index
    %c0_9 = arith.constant 0 : index
    %6 = vector.load %arg3[%c0_7, %c0_8, %c0_9] : memref<3x8x8xf32, #tpu.memory_space<vmem>>, vector<1x8x8xf32>
    %7 = vector.shape_cast %6 : vector<1x8x8xf32> to vector<8x8xf32>
    %8 = arith.truncf %5 : vector<8x8xf32> to vector<8x8xbf16>
    %cst_10 = arith.constant dense<0.000000e+00> : vector<8x128xf32>
    %9 = tpu.matmul %8, %1, %cst_10 {dimension_numbers = #tpu.dot_dimension_numbers<[1], [0], [0], [1], [0, 0, 1, 1], [], []>} : vector<8x8xbf16>, vector<8x128xbf16>, vector<8x128xf32> -> vector<8x128xf32>
    %10 = arith.truncf %9 : vector<8x128xf32> to vector<8x128xbf16>
    %cst_11 = arith.constant dense<0.000000e+00> : vector<9x128xf32>
    %11 = tpu.matmul %0, %10, %cst_11 {dimension_numbers = #tpu.dot_dimension_numbers<[1], [0], [0], [1], [0, 0, 1, 1], [], []>} : vector<9x8xbf16>, vector<8x128xbf16>, vector<9x128xf32> -> vector<9x128xf32>
    %12 = arith.truncf %7 : vector<8x8xf32> to vector<8x8xbf16>
    %cst_12 = arith.constant dense<0.000000e+00> : vector<8x128xf32>
    %13 = tpu.matmul %12, %1, %cst_12 {dimension_numbers = #tpu.dot_dimension_numbers<[1], [0], [0], [1], [0, 0, 1, 1], [], []>} : vector<8x8xbf16>, vector<8x128xbf16>, vector<8x128xf32> -> vector<8x128xf32>
    %14 = arith.truncf %13 : vector<8x128xf32> to vector<8x128xbf16>
    %cst_13 = arith.constant dense<0.000000e+00> : vector<9x128xf32>
    %15 = tpu.matmul %0, %14, %cst_13 {dimension_numbers = #tpu.dot_dimension_numbers<[1], [0], [0], [1], [0, 0, 1, 1], [], []>} : vector<9x8xbf16>, vector<8x128xbf16>, vector<9x128xf32> -> vector<9x128xf32>
    %16 = arith.mulf %5, %5 : vector<8x8xf32>
    %17 = arith.truncf %16 : vector<8x8xf32> to vector<8x8xbf16>
    %cst_14 = arith.constant dense<0.000000e+00> : vector<8x128xf32>
    %18 = tpu.matmul %17, %1, %cst_14 {dimension_numbers = #tpu.dot_dimension_numbers<[1], [0], [0], [1], [0, 0, 1, 1], [], []>} : vector<8x8xbf16>, vector<8x128xbf16>, vector<8x128xf32> -> vector<8x128xf32>
    %19 = arith.truncf %18 : vector<8x128xf32> to vector<8x128xbf16>
    %cst_15 = arith.constant dense<0.000000e+00> : vector<9x128xf32>
    %20 = tpu.matmul %0, %19, %cst_15 {dimension_numbers = #tpu.dot_dimension_numbers<[1], [0], [0], [1], [0, 0, 1, 1], [], []>} : vector<9x8xbf16>, vector<8x128xbf16>, vector<9x128xf32> -> vector<9x128xf32>
    %21 = arith.mulf %7, %7 : vector<8x8xf32>
    %22 = arith.truncf %21 : vector<8x8xf32> to vector<8x8xbf16>
    %cst_16 = arith.constant dense<0.000000e+00> : vector<8x128xf32>
    %23 = tpu.matmul %22, %1, %cst_16 {dimension_numbers = #tpu.dot_dimension_numbers<[1], [0], [0], [1], [0, 0, 1, 1], [], []>} : vector<8x8xbf16>, vector<8x128xbf16>, vector<8x128xf32> -> vector<8x128xf32>
    %24 = arith.truncf %23 : vector<8x128xf32> to vector<8x128xbf16>
    %cst_17 = arith.constant dense<0.000000e+00> : vector<9x128xf32>
    %25 = tpu.matmul %0, %24, %cst_17 {dimension_numbers = #tpu.dot_dimension_numbers<[1], [0], [0], [1], [0, 0, 1, 1], [], []>} : vector<9x8xbf16>, vector<8x128xbf16>, vector<9x128xf32> -> vector<9x128xf32>
    %26 = arith.mulf %5, %7 : vector<8x8xf32>
    %27 = arith.truncf %26 : vector<8x8xf32> to vector<8x8xbf16>
    %cst_18 = arith.constant dense<0.000000e+00> : vector<8x128xf32>
    %28 = tpu.matmul %27, %1, %cst_18 {dimension_numbers = #tpu.dot_dimension_numbers<[1], [0], [0], [1], [0, 0, 1, 1], [], []>} : vector<8x8xbf16>, vector<8x128xbf16>, vector<8x128xf32> -> vector<8x128xf32>
    %29 = arith.truncf %28 : vector<8x128xf32> to vector<8x128xbf16>
    %cst_19 = arith.constant dense<0.000000e+00> : vector<9x128xf32>
    %30 = tpu.matmul %0, %29, %cst_19 {dimension_numbers = #tpu.dot_dimension_numbers<[1], [0], [0], [1], [0, 0, 1, 1], [], []>} : vector<9x8xbf16>, vector<8x128xbf16>, vector<9x128xf32> -> vector<9x128xf32>
    %31 = arith.mulf %11, %11 : vector<9x128xf32>
    %32 = arith.mulf %15, %15 : vector<9x128xf32>
    %33 = arith.mulf %11, %15 : vector<9x128xf32>
    %34 = arith.subf %20, %31 : vector<9x128xf32>
    %35 = arith.subf %25, %32 : vector<9x128xf32>
    %36 = arith.subf %30, %33 : vector<9x128xf32>
    %cst_20 = arith.constant 2.000000e+00 : f32
    %37 = vector.broadcast %cst_20 : f32 to vector<9x128xf32>
    %38 = arith.mulf %37, %36 : vector<9x128xf32>
    %cst_21 = arith.constant 8.99999984E-4 : f32
    %39 = vector.broadcast %cst_21 : f32 to vector<9x128xf32>
    %40 = arith.addf %38, %39 : vector<9x128xf32>
    %41 = arith.addf %34, %35 : vector<9x128xf32>
    %cst_22 = arith.constant 8.99999984E-4 : f32
    %42 = vector.broadcast %cst_22 : f32 to vector<9x128xf32>
    %43 = arith.addf %41, %42 : vector<9x128xf32>
    %44 = tpu.reciprocal %43 {approx = true} : vector<9x128xf32> -> vector<9x128xf32>
    %45 = arith.addf %31, %32 : vector<9x128xf32>
    %cst_23 = arith.constant 9.99999974E-5 : f32
    %46 = vector.broadcast %cst_23 : f32 to vector<9x128xf32>
    %47 = arith.addf %45, %46 : vector<9x128xf32>
    %48 = tpu.reciprocal %47 {approx = true} : vector<9x128xf32> -> vector<9x128xf32>
    %49 = arith.mulf %40, %44 : vector<9x128xf32>
    %cst_24 = arith.constant 2.000000e+00 : f32
    %50 = vector.broadcast %cst_24 : f32 to vector<9x128xf32>
    %51 = arith.mulf %50, %33 : vector<9x128xf32>
    %cst_25 = arith.constant 9.99999974E-5 : f32
    %52 = vector.broadcast %cst_25 : f32 to vector<9x128xf32>
    %53 = arith.addf %51, %52 : vector<9x128xf32>
    %54 = arith.mulf %53, %48 : vector<9x128xf32>
    %55 = arith.mulf %54, %49 : vector<9x128xf32>
    %56 = arith.addf %2, %55 : vector<9x128xf32>
    %57 = arith.addf %3, %49 : vector<9x128xf32>
    %c1 = arith.constant 1 : index
    %c0_26 = arith.constant 0 : index
    %c0_27 = arith.constant 0 : index
    %58 = vector.load %arg2[%c1, %c0_26, %c0_27] : memref<3x8x8xf32, #tpu.memory_space<vmem>>, vector<1x8x8xf32>
    %59 = vector.shape_cast %58 : vector<1x8x8xf32> to vector<8x8xf32>
    %c1_28 = arith.constant 1 : index
    %c0_29 = arith.constant 0 : index
    %c0_30 = arith.constant 0 : index
    %60 = vector.load %arg3[%c1_28, %c0_29, %c0_30] : memref<3x8x8xf32, #tpu.memory_space<vmem>>, vector<1x8x8xf32>
    %61 = vector.shape_cast %60 : vector<1x8x8xf32> to vector<8x8xf32>
    %62 = arith.truncf %59 : vector<8x8xf32> to vector<8x8xbf16>
    %cst_31 = arith.constant dense<0.000000e+00> : vector<8x128xf32>
    %63 = tpu.matmul %62, %1, %cst_31 {dimension_numbers = #tpu.dot_dimension_numbers<[1], [0], [0], [1], [0, 0, 1, 1], [], []>} : vector<8x8xbf16>, vector<8x128xbf16>, vector<8x128xf32> -> vector<8x128xf32>
    %64 = arith.truncf %63 : vector<8x128xf32> to vector<8x128xbf16>
    %cst_32 = arith.constant dense<0.000000e+00> : vector<9x128xf32>
    %65 = tpu.matmul %0, %64, %cst_32 {dimension_numbers = #tpu.dot_dimension_numbers<[1], [0], [0], [1], [0, 0, 1, 1], [], []>} : vector<9x8xbf16>, vector<8x128xbf16>, vector<9x128xf32> -> vector<9x128xf32>
    %66 = arith.truncf %61 : vector<8x8xf32> to vector<8x8xbf16>
    %cst_33 = arith.constant dense<0.000000e+00> : vector<8x128xf32>
    %67 = tpu.matmul %66, %1, %cst_33 {dimension_numbers = #tpu.dot_dimension_numbers<[1], [0], [0], [1], [0, 0, 1, 1], [], []>} : vector<8x8xbf16>, vector<8x128xbf16>, vector<8x128xf32> -> vector<8x128xf32>
    %68 = arith.truncf %67 : vector<8x128xf32> to vector<8x128xbf16>
    %cst_34 = arith.constant dense<0.000000e+00> : vector<9x128xf32>
    %69 = tpu.matmul %0, %68, %cst_34 {dimension_numbers = #tpu.dot_dimension_numbers<[1], [0], [0], [1], [0, 0, 1, 1], [], []>} : vector<9x8xbf16>, vector<8x128xbf16>, vector<9x128xf32> -> vector<9x128xf32>
    %70 = arith.mulf %59, %59 : vector<8x8xf32>
    %71 = arith.truncf %70 : vector<8x8xf32> to vector<8x8xbf16>
    %cst_35 = arith.constant dense<0.000000e+00> : vector<8x128xf32>
    %72 = tpu.matmul %71, %1, %cst_35 {dimension_numbers = #tpu.dot_dimension_numbers<[1], [0], [0], [1], [0, 0, 1, 1], [], []>} : vector<8x8xbf16>, vector<8x128xbf16>, vector<8x128xf32> -> vector<8x128xf32>
    %73 = arith.truncf %72 : vector<8x128xf32> to vector<8x128xbf16>
    %cst_36 = arith.constant dense<0.000000e+00> : vector<9x128xf32>
    %74 = tpu.matmul %0, %73, %cst_36 {dimension_numbers = #tpu.dot_dimension_numbers<[1], [0], [0], [1], [0, 0, 1, 1], [], []>} : vector<9x8xbf16>, vector<8x128xbf16>, vector<9x128xf32> -> vector<9x128xf32>
    %75 = arith.mulf %61, %61 : vector<8x8xf32>
    %76 = arith.truncf %75 : vector<8x8xf32> to vector<8x8xbf16>
    %cst_37 = arith.constant dense<0.000000e+00> : vector<8x128xf32>
    %77 = tpu.matmul %76, %1, %cst_37 {dimension_numbers = #tpu.dot_dimension_numbers<[1], [0], [0], [1], [0, 0, 1, 1], [], []>} : vector<8x8xbf16>, vector<8x128xbf16>, vector<8x128xf32> -> vector<8x128xf32>
    %78 = arith.truncf %77 : vector<8x128xf32> to vector<8x128xbf16>
    %cst_38 = arith.constant dense<0.000000e+00> : vector<9x128xf32>
    %79 = tpu.matmul %0, %78, %cst_38 {dimension_numbers = #tpu.dot_dimension_numbers<[1], [0], [0], [1], [0, 0, 1, 1], [], []>} : vector<9x8xbf16>, vector<8x128xbf16>, vector<9x128xf32> -> vector<9x128xf32>
    %80 = arith.mulf %59, %61 : vector<8x8xf32>
    %81 = arith.truncf %80 : vector<8x8xf32> to vector<8x8xbf16>
    %cst_39 = arith.constant dense<0.000000e+00> : vector<8x128xf32>
    %82 = tpu.matmul %81, %1, %cst_39 {dimension_numbers = #tpu.dot_dimension_numbers<[1], [0], [0], [1], [0, 0, 1, 1], [], []>} : vector<8x8xbf16>, vector<8x128xbf16>, vector<8x128xf32> -> vector<8x128xf32>
    %83 = arith.truncf %82 : vector<8x128xf32> to vector<8x128xbf16>
    %cst_40 = arith.constant dense<0.000000e+00> : vector<9x128xf32>
    %84 = tpu.matmul %0, %83, %cst_40 {dimension_numbers = #tpu.dot_dimension_numbers<[1], [0], [0], [1], [0, 0, 1, 1], [], []>} : vector<9x8xbf16>, vector<8x128xbf16>, vector<9x128xf32> -> vector<9x128xf32>
    %85 = arith.mulf %65, %65 : vector<9x128xf32>
    %86 = arith.mulf %69, %69 : vector<9x128xf32>
    %87 = arith.mulf %65, %69 : vector<9x128xf32>
    %88 = arith.subf %74, %85 : vector<9x128xf32>
    %89 = arith.subf %79, %86 : vector<9x128xf32>
    %90 = arith.subf %84, %87 : vector<9x128xf32>
    %cst_41 = arith.constant 2.000000e+00 : f32
    %91 = vector.broadcast %cst_41 : f32 to vector<9x128xf32>
    %92 = arith.mulf %91, %90 : vector<9x128xf32>
    %cst_42 = arith.constant 8.99999984E-4 : f32
    %93 = vector.broadcast %cst_42 : f32 to vector<9x128xf32>
    %94 = arith.addf %92, %93 : vector<9x128xf32>
    %95 = arith.addf %88, %89 : vector<9x128xf32>
    %cst_43 = arith.constant 8.99999984E-4 : f32
    %96 = vector.broadcast %cst_43 : f32 to vector<9x128xf32>
    %97 = arith.addf %95, %96 : vector<9x128xf32>
    %98 = tpu.reciprocal %97 {approx = true} : vector<9x128xf32> -> vector<9x128xf32>
    %99 = arith.addf %85, %86 : vector<9x128xf32>
    %cst_44 = arith.constant 9.99999974E-5 : f32
    %100 = vector.broadcast %cst_44 : f32 to vector<9x128xf32>
    %101 = arith.addf %99, %100 : vector<9x128xf32>
    %102 = tpu.reciprocal %101 {approx = true} : vector<9x128xf32> -> vector<9x128xf32>
    %103 = arith.mulf %94, %98 : vector<9x128xf32>
    %cst_45 = arith.constant 2.000000e+00 : f32
    %104 = vector.broadcast %cst_45 : f32 to vector<9x128xf32>
    %105 = arith.mulf %104, %87 : vector<9x128xf32>
    %cst_46 = arith.constant 9.99999974E-5 : f32
    %106 = vector.broadcast %cst_46 : f32 to vector<9x128xf32>
    %107 = arith.addf %105, %106 : vector<9x128xf32>
    %108 = arith.mulf %107, %102 : vector<9x128xf32>
    %109 = arith.mulf %108, %103 : vector<9x128xf32>
    %110 = arith.addf %56, %109 : vector<9x128xf32>
    %111 = arith.addf %57, %103 : vector<9x128xf32>
    %c2 = arith.constant 2 : index
    %c0_47 = arith.constant 0 : index
    %c0_48 = arith.constant 0 : index
    %112 = vector.load %arg2[%c2, %c0_47, %c0_48] : memref<3x8x8xf32, #tpu.memory_space<vmem>>, vector<1x8x8xf32>
    %113 = vector.shape_cast %112 : vector<1x8x8xf32> to vector<8x8xf32>
    %c2_49 = arith.constant 2 : index
    %c0_50 = arith.constant 0 : index
    %c0_51 = arith.constant 0 : index
    %114 = vector.load %arg3[%c2_49, %c0_50, %c0_51] : memref<3x8x8xf32, #tpu.memory_space<vmem>>, vector<1x8x8xf32>
    %115 = vector.shape_cast %114 : vector<1x8x8xf32> to vector<8x8xf32>
    %116 = arith.truncf %113 : vector<8x8xf32> to vector<8x8xbf16>
    %cst_52 = arith.constant dense<0.000000e+00> : vector<8x128xf32>
    %117 = tpu.matmul %116, %1, %cst_52 {dimension_numbers = #tpu.dot_dimension_numbers<[1], [0], [0], [1], [0, 0, 1, 1], [], []>} : vector<8x8xbf16>, vector<8x128xbf16>, vector<8x128xf32> -> vector<8x128xf32>
    %118 = arith.truncf %117 : vector<8x128xf32> to vector<8x128xbf16>
    %cst_53 = arith.constant dense<0.000000e+00> : vector<9x128xf32>
    %119 = tpu.matmul %0, %118, %cst_53 {dimension_numbers = #tpu.dot_dimension_numbers<[1], [0], [0], [1], [0, 0, 1, 1], [], []>} : vector<9x8xbf16>, vector<8x128xbf16>, vector<9x128xf32> -> vector<9x128xf32>
    %120 = arith.truncf %115 : vector<8x8xf32> to vector<8x8xbf16>
    %cst_54 = arith.constant dense<0.000000e+00> : vector<8x128xf32>
    %121 = tpu.matmul %120, %1, %cst_54 {dimension_numbers = #tpu.dot_dimension_numbers<[1], [0], [0], [1], [0, 0, 1, 1], [], []>} : vector<8x8xbf16>, vector<8x128xbf16>, vector<8x128xf32> -> vector<8x128xf32>
    %122 = arith.truncf %121 : vector<8x128xf32> to vector<8x128xbf16>
    %cst_55 = arith.constant dense<0.000000e+00> : vector<9x128xf32>
    %123 = tpu.matmul %0, %122, %cst_55 {dimension_numbers = #tpu.dot_dimension_numbers<[1], [0], [0], [1], [0, 0, 1, 1], [], []>} : vector<9x8xbf16>, vector<8x128xbf16>, vector<9x128xf32> -> vector<9x128xf32>
    %124 = arith.mulf %113, %113 : vector<8x8xf32>
    %125 = arith.truncf %124 : vector<8x8xf32> to vector<8x8xbf16>
    %cst_56 = arith.constant dense<0.000000e+00> : vector<8x128xf32>
    %126 = tpu.matmul %125, %1, %cst_56 {dimension_numbers = #tpu.dot_dimension_numbers<[1], [0], [0], [1], [0, 0, 1, 1], [], []>} : vector<8x8xbf16>, vector<8x128xbf16>, vector<8x128xf32> -> vector<8x128xf32>
    %127 = arith.truncf %126 : vector<8x128xf32> to vector<8x128xbf16>
    %cst_57 = arith.constant dense<0.000000e+00> : vector<9x128xf32>
    %128 = tpu.matmul %0, %127, %cst_57 {dimension_numbers = #tpu.dot_dimension_numbers<[1], [0], [0], [1], [0, 0, 1, 1], [], []>} : vector<9x8xbf16>, vector<8x128xbf16>, vector<9x128xf32> -> vector<9x128xf32>
    %129 = arith.mulf %115, %115 : vector<8x8xf32>
    %130 = arith.truncf %129 : vector<8x8xf32> to vector<8x8xbf16>
    %cst_58 = arith.constant dense<0.000000e+00> : vector<8x128xf32>
    %131 = tpu.matmul %130, %1, %cst_58 {dimension_numbers = #tpu.dot_dimension_numbers<[1], [0], [0], [1], [0, 0, 1, 1], [], []>} : vector<8x8xbf16>, vector<8x128xbf16>, vector<8x128xf32> -> vector<8x128xf32>
    %132 = arith.truncf %131 : vector<8x128xf32> to vector<8x128xbf16>
    %cst_59 = arith.constant dense<0.000000e+00> : vector<9x128xf32>
    %133 = tpu.matmul %0, %132, %cst_59 {dimension_numbers = #tpu.dot_dimension_numbers<[1], [0], [0], [1], [0, 0, 1, 1], [], []>} : vector<9x8xbf16>, vector<8x128xbf16>, vector<9x128xf32> -> vector<9x128xf32>
    %134 = arith.mulf %113, %115 : vector<8x8xf32>
    %135 = arith.truncf %134 : vector<8x8xf32> to vector<8x8xbf16>
    %cst_60 = arith.constant dense<0.000000e+00> : vector<8x128xf32>
    %136 = tpu.matmul %135, %1, %cst_60 {dimension_numbers = #tpu.dot_dimension_numbers<[1], [0], [0], [1], [0, 0, 1, 1], [], []>} : vector<8x8xbf16>, vector<8x128xbf16>, vector<8x128xf32> -> vector<8x128xf32>
    %137 = arith.truncf %136 : vector<8x128xf32> to vector<8x128xbf16>
    %cst_61 = arith.constant dense<0.000000e+00> : vector<9x128xf32>
    %138 = tpu.matmul %0, %137, %cst_61 {dimension_numbers = #tpu.dot_dimension_numbers<[1], [0], [0], [1], [0, 0, 1, 1], [], []>} : vector<9x8xbf16>, vector<8x128xbf16>, vector<9x128xf32> -> vector<9x128xf32>
    %139 = arith.mulf %119, %119 : vector<9x128xf32>
    %140 = arith.mulf %123, %123 : vector<9x128xf32>
    %141 = arith.mulf %119, %123 : vector<9x128xf32>
    %142 = arith.subf %128, %139 : vector<9x128xf32>
    %143 = arith.subf %133, %140 : vector<9x128xf32>
    %144 = arith.subf %138, %141 : vector<9x128xf32>
    %cst_62 = arith.constant 2.000000e+00 : f32
    %145 = vector.broadcast %cst_62 : f32 to vector<9x128xf32>
    %146 = arith.mulf %145, %144 : vector<9x128xf32>
    %cst_63 = arith.constant 8.99999984E-4 : f32
    %147 = vector.broadcast %cst_63 : f32 to vector<9x128xf32>
    %148 = arith.addf %146, %147 : vector<9x128xf32>
    %149 = arith.addf %142, %143 : vector<9x128xf32>
    %cst_64 = arith.constant 8.99999984E-4 : f32
    %150 = vector.broadcast %cst_64 : f32 to vector<9x128xf32>
    %151 = arith.addf %149, %150 : vector<9x128xf32>
    %152 = tpu.reciprocal %151 {approx = true} : vector<9x128xf32> -> vector<9x128xf32>
    %153 = arith.addf %139, %140 : vector<9x128xf32>
    %cst_65 = arith.constant 9.99999974E-5 : f32
    %154 = vector.broadcast %cst_65 : f32 to vector<9x128xf32>
    %155 = arith.addf %153, %154 : vector<9x128xf32>
    %156 = tpu.reciprocal %155 {approx = true} : vector<9x128xf32> -> vector<9x128xf32>
    %157 = arith.mulf %148, %152 : vector<9x128xf32>
    %cst_66 = arith.constant 2.000000e+00 : f32
    %158 = vector.broadcast %cst_66 : f32 to vector<9x128xf32>
    %159 = arith.mulf %158, %141 : vector<9x128xf32>
    %cst_67 = arith.constant 9.99999974E-5 : f32
    %160 = vector.broadcast %cst_67 : f32 to vector<9x128xf32>
    %161 = arith.addf %159, %160 : vector<9x128xf32>
    %162 = arith.mulf %161, %156 : vector<9x128xf32>
    %163 = arith.mulf %162, %157 : vector<9x128xf32>
    %164 = arith.addf %110, %163 : vector<9x128xf32>
    %165 = arith.addf %111, %157 : vector<9x128xf32>
    %166 = tpu.iota {dimensions = array<i32: 1>} : vector<9x128xi32>
    %c128_i32 = arith.constant 128 : i32
    %167 = arith.muli %arg1, %c128_i32 : i32
    %168 = vector.broadcast %167 : i32 to vector<9x128xi32>
    %169 = arith.addi %166, %168 : vector<9x128xi32>
    %c9_i32 = arith.constant 9 : i32
    %170 = vector.broadcast %c9_i32 : i32 to vector<9x128xi32>
    %171 = arith.cmpi slt, %169, %170 : vector<9x128xi32>
    %172 = arith.extui %171 : vector<9x128xi1> to vector<9x128xi32>
    %173 = arith.sitofp %172 : vector<9x128xi32> to vector<9x128xf32>
    %174 = arith.mulf %164, %173 : vector<9x128xf32>
    %175 = arith.mulf %165, %173 : vector<9x128xf32>
    %176 = vector.shape_cast %174 : vector<9x128xf32> to vector<1x9x128xf32>
    %cst_68 = arith.constant dense<0.000000e+00> : vector<1xf32>
    %177 = vector.multi_reduction <add>, %176, %cst_68 [1, 2] : vector<1x9x128xf32> to vector<1xf32>
    %178 = vector.shape_cast %177 : vector<1xf32> to vector<1x1x1xf32>
    %179 = vector.extract %178[0, 0, 0] : f32 from vector<1x1x1xf32>
    %180 = vector.broadcast %179 : f32 to vector<1x1xf32>
    %c0_69 = arith.constant 0 : index
    %c0_70 = arith.constant 0 : index
    %c0_71 = arith.constant 0 : index
    %c0_72 = arith.constant 0 : index
    %181 = vector.load %arg6[%c0_69, %c0_70, %c0_71, %c0_72] : memref<1x1x1x1xf32, #tpu.memory_space<vmem>>, vector<1x1x1x1xf32>
    %182 = vector.shape_cast %181 : vector<1x1x1x1xf32> to vector<1x1xf32>
    %183 = vector.shape_cast %180 : vector<1x1xf32> to vector<1x1x1x1xf32>
    tpu.vector_store %arg6[%c0_69, %c0_70, %c0_71, %c0_72], %183 {strides = array<i32>} : memref<1x1x1x1xf32, #tpu.memory_space<vmem>>, vector<1x1x1x1xf32>,
    %184 = vector.shape_cast %175 : vector<9x128xf32> to vector<1x9x128xf32>
    %cst_73 = arith.constant dense<0.000000e+00> : vector<1xf32>
    %185 = vector.multi_reduction <add>, %184, %cst_73 [1, 2] : vector<1x9x128xf32> to vector<1xf32>
    %186 = vector.shape_cast %185 : vector<1xf32> to vector<1x1x1xf32>
    %187 = vector.extract %186[0, 0, 0] : f32 from vector<1x1x1xf32>
    %188 = vector.broadcast %187 : f32 to vector<1x1xf32>
    %c0_74 = arith.constant 0 : index
    %c0_75 = arith.constant 0 : index
    %c0_76 = arith.constant 0 : index
    %c0_77 = arith.constant 0 : index
    %189 = vector.load %arg7[%c0_74, %c0_75, %c0_76, %c0_77] : memref<1x1x1x1xf32, #tpu.memory_space<vmem>>, vector<1x1x1x1xf32>
    %190 = vector.shape_cast %189 : vector<1x1x1x1xf32> to vector<1x1xf32>
    %191 = vector.shape_cast %188 : vector<1x1xf32> to vector<1x1x1x1xf32>
    tpu.vector_store %arg7[%c0_74, %c0_75, %c0_76, %c0_77], %191 {strides = array<i32>} : memref<1x1x1x1xf32, #tpu.memory_space<vmem>>, vector<1x1x1x1xf32>,
    return
  }
  func.func @transform_0(%arg0: i32, %arg1: i32) -> (i32, i32, i32) {
    %c0_i32 = arith.constant 0 : i32
    %c0_i32_0 = arith.constant 0 : i32
    %c0_i32_1 = arith.constant 0 : i32
    return %arg0, %c0_i32, %c0_i32_0 : i32, i32, i32
  }
  func.func @transform_1(%arg0: i32, %arg1: i32) -> (i32, i32, i32) {
    %c0_i32 = arith.constant 0 : i32
    %c0_i32_0 = arith.constant 0 : i32
    %c0_i32_1 = arith.constant 0 : i32
    return %arg0, %c0_i32, %c0_i32_0 : i32, i32, i32
  }
  func.func @transform_2(%arg0: i32, %arg1: i32) -> (i32, i32) {
    %c0_i32 = arith.constant 0 : i32
    %c0_i32_0 = arith.constant 0 : i32
    %c0_i32_1 = arith.constant 0 : i32
    return %c0_i32, %c0_i32_0 : i32, i32
  }
  func.func @transform_3(%arg0: i32, %arg1: i32) -> (i32, i32) {
    %c0_i32 = arith.constant 0 : i32
    %c0_i32_0 = arith.constant 0 : i32
    return %c0_i32, %arg1 : i32, i32
  }
  func.func @transform_4(%arg0: i32, %arg1: i32) -> (i32, i32, i32, i32) {
    %c0_i32 = arith.constant 0 : i32
    %c0_i32_0 = arith.constant 0 : i32
    %c0_i32_1 = arith.constant 0 : i32
    return %arg0, %arg1, %c0_i32, %c0_i32_0 : i32, i32, i32, i32
  }
  func.func @transform_5(%arg0: i32, %arg1: i32) -> (i32, i32, i32, i32) {
    %c0_i32 = arith.constant 0 : i32
    %c0_i32_0 = arith.constant 0 : i32
    %c0_i32_1 = arith.constant 0 : i32
    return %arg0, %arg1, %c0_i32, %c0_i32_0 : i32, i32, i32, i32
  }
}

module attributes {stable_mosaic.version = 11 : i64} {
  func.func @kernel(%arg0: i32, %arg1: i32, %arg2: memref<3x16x16xf32, #tpu.memory_space<vmem>>, %arg3: memref<3x16x16xf32, #tpu.memory_space<vmem>>, %arg4: memref<16x16xbf16, #tpu.memory_space<vmem>>, %arg5: memref<16x128xbf16, #tpu.memory_space<vmem>>, %arg6: memref<1x1x1x1xf32, #tpu.memory_space<vmem>>, %arg7: memref<1x1x1x1xf32, #tpu.memory_space<vmem>>) attributes {dimension_semantics = [#tpu.dimension_semantics<parallel>, #tpu.dimension_semantics<parallel>], iteration_bounds = array<i64: 2, 1>, scalar_prefetch = 0 : i64, scratch_operands = 0 : i64, tpu.core_type = #tpu.core_type<tc>, window_params = [{transform_indices = @transform_0, window_bounds = array<i64: 3, 16, 16>}, {transform_indices = @transform_1, window_bounds = array<i64: 3, 16, 16>}, {pipeline_mode = #tpu.pipeline_mode<synchronous>, transform_indices = @transform_2, window_bounds = array<i64: 16, 16>}, {transform_indices = @transform_3, window_bounds = array<i64: 16, 128>}, {transform_indices = @transform_4, window_bounds = array<i64: 1, 1, 1, 1>}, {transform_indices = @transform_5, window_bounds = array<i64: 1, 1, 1, 1>}]} {
    %c0 = arith.constant 0 : index
    %c0_0 = arith.constant 0 : index
    %0 = vector.load %arg4[%c0, %c0_0] : memref<16x16xbf16, #tpu.memory_space<vmem>>, vector<16x16xbf16>
    %c0_1 = arith.constant 0 : index
    %c0_2 = arith.constant 0 : index
    %1 = vector.load %arg5[%c0_1, %c0_2] : memref<16x128xbf16, #tpu.memory_space<vmem>>, vector<16x128xbf16>
    %cst = arith.constant 0.000000e+00 : f32
    %2 = vector.broadcast %cst : f32 to vector<16x128xf32>
    %cst_3 = arith.constant 0.000000e+00 : f32
    %3 = vector.broadcast %cst_3 : f32 to vector<16x128xf32>
    %c0_4 = arith.constant 0 : index
    %c0_5 = arith.constant 0 : index
    %c0_6 = arith.constant 0 : index
    %4 = vector.load %arg2[%c0_4, %c0_5, %c0_6] : memref<3x16x16xf32, #tpu.memory_space<vmem>>, vector<1x16x16xf32>
    %5 = vector.shape_cast %4 : vector<1x16x16xf32> to vector<16x16xf32>
    %c0_7 = arith.constant 0 : index
    %c0_8 = arith.constant 0 : index
    %c0_9 = arith.constant 0 : index
    %6 = vector.load %arg3[%c0_7, %c0_8, %c0_9] : memref<3x16x16xf32, #tpu.memory_space<vmem>>, vector<1x16x16xf32>
    %7 = vector.shape_cast %6 : vector<1x16x16xf32> to vector<16x16xf32>
    %8 = arith.truncf %5 : vector<16x16xf32> to vector<16x16xbf16>
    %cst_10 = arith.constant dense<0.000000e+00> : vector<16x128xf32>
    %9 = tpu.matmul %8, %1, %cst_10 {dimension_numbers = #tpu.dot_dimension_numbers<[1], [0], [0], [1], [0, 0, 1, 1], [], []>} : vector<16x16xbf16>, vector<16x128xbf16>, vector<16x128xf32> -> vector<16x128xf32>
    %10 = arith.truncf %9 : vector<16x128xf32> to vector<16x128xbf16>
    %cst_11 = arith.constant dense<0.000000e+00> : vector<16x128xf32>
    %11 = tpu.matmul %0, %10, %cst_11 {dimension_numbers = #tpu.dot_dimension_numbers<[1], [0], [0], [1], [0, 0, 1, 1], [], []>} : vector<16x16xbf16>, vector<16x128xbf16>, vector<16x128xf32> -> vector<16x128xf32>
    %12 = arith.truncf %7 : vector<16x16xf32> to vector<16x16xbf16>
    %cst_12 = arith.constant dense<0.000000e+00> : vector<16x128xf32>
    %13 = tpu.matmul %12, %1, %cst_12 {dimension_numbers = #tpu.dot_dimension_numbers<[1], [0], [0], [1], [0, 0, 1, 1], [], []>} : vector<16x16xbf16>, vector<16x128xbf16>, vector<16x128xf32> -> vector<16x128xf32>
    %14 = arith.truncf %13 : vector<16x128xf32> to vector<16x128xbf16>
    %cst_13 = arith.constant dense<0.000000e+00> : vector<16x128xf32>
    %15 = tpu.matmul %0, %14, %cst_13 {dimension_numbers = #tpu.dot_dimension_numbers<[1], [0], [0], [1], [0, 0, 1, 1], [], []>} : vector<16x16xbf16>, vector<16x128xbf16>, vector<16x128xf32> -> vector<16x128xf32>
    %16 = arith.mulf %5, %5 : vector<16x16xf32>
    %17 = arith.truncf %16 : vector<16x16xf32> to vector<16x16xbf16>
    %cst_14 = arith.constant dense<0.000000e+00> : vector<16x128xf32>
    %18 = tpu.matmul %17, %1, %cst_14 {dimension_numbers = #tpu.dot_dimension_numbers<[1], [0], [0], [1], [0, 0, 1, 1], [], []>} : vector<16x16xbf16>, vector<16x128xbf16>, vector<16x128xf32> -> vector<16x128xf32>
    %19 = arith.truncf %18 : vector<16x128xf32> to vector<16x128xbf16>
    %cst_15 = arith.constant dense<0.000000e+00> : vector<16x128xf32>
    %20 = tpu.matmul %0, %19, %cst_15 {dimension_numbers = #tpu.dot_dimension_numbers<[1], [0], [0], [1], [0, 0, 1, 1], [], []>} : vector<16x16xbf16>, vector<16x128xbf16>, vector<16x128xf32> -> vector<16x128xf32>
    %21 = arith.mulf %7, %7 : vector<16x16xf32>
    %22 = arith.truncf %21 : vector<16x16xf32> to vector<16x16xbf16>
    %cst_16 = arith.constant dense<0.000000e+00> : vector<16x128xf32>
    %23 = tpu.matmul %22, %1, %cst_16 {dimension_numbers = #tpu.dot_dimension_numbers<[1], [0], [0], [1], [0, 0, 1, 1], [], []>} : vector<16x16xbf16>, vector<16x128xbf16>, vector<16x128xf32> -> vector<16x128xf32>
    %24 = arith.truncf %23 : vector<16x128xf32> to vector<16x128xbf16>
    %cst_17 = arith.constant dense<0.000000e+00> : vector<16x128xf32>
    %25 = tpu.matmul %0, %24, %cst_17 {dimension_numbers = #tpu.dot_dimension_numbers<[1], [0], [0], [1], [0, 0, 1, 1], [], []>} : vector<16x16xbf16>, vector<16x128xbf16>, vector<16x128xf32> -> vector<16x128xf32>
    %26 = arith.mulf %5, %7 : vector<16x16xf32>
    %27 = arith.truncf %26 : vector<16x16xf32> to vector<16x16xbf16>
    %cst_18 = arith.constant dense<0.000000e+00> : vector<16x128xf32>
    %28 = tpu.matmul %27, %1, %cst_18 {dimension_numbers = #tpu.dot_dimension_numbers<[1], [0], [0], [1], [0, 0, 1, 1], [], []>} : vector<16x16xbf16>, vector<16x128xbf16>, vector<16x128xf32> -> vector<16x128xf32>
    %29 = arith.truncf %28 : vector<16x128xf32> to vector<16x128xbf16>
    %cst_19 = arith.constant dense<0.000000e+00> : vector<16x128xf32>
    %30 = tpu.matmul %0, %29, %cst_19 {dimension_numbers = #tpu.dot_dimension_numbers<[1], [0], [0], [1], [0, 0, 1, 1], [], []>} : vector<16x16xbf16>, vector<16x128xbf16>, vector<16x128xf32> -> vector<16x128xf32>
    %31 = arith.mulf %11, %11 : vector<16x128xf32>
    %32 = arith.mulf %15, %15 : vector<16x128xf32>
    %33 = arith.mulf %11, %15 : vector<16x128xf32>
    %34 = arith.subf %20, %31 : vector<16x128xf32>
    %35 = arith.subf %25, %32 : vector<16x128xf32>
    %36 = arith.subf %30, %33 : vector<16x128xf32>
    %cst_20 = arith.constant 2.000000e+00 : f32
    %37 = vector.broadcast %cst_20 : f32 to vector<16x128xf32>
    %38 = arith.mulf %37, %36 : vector<16x128xf32>
    %cst_21 = arith.constant 8.99999984E-4 : f32
    %39 = vector.broadcast %cst_21 : f32 to vector<16x128xf32>
    %40 = arith.addf %38, %39 : vector<16x128xf32>
    %41 = arith.addf %34, %35 : vector<16x128xf32>
    %cst_22 = arith.constant 8.99999984E-4 : f32
    %42 = vector.broadcast %cst_22 : f32 to vector<16x128xf32>
    %43 = arith.addf %41, %42 : vector<16x128xf32>
    %44 = tpu.reciprocal %43 {approx = true} : vector<16x128xf32> -> vector<16x128xf32>
    %45 = arith.addf %31, %32 : vector<16x128xf32>
    %cst_23 = arith.constant 9.99999974E-5 : f32
    %46 = vector.broadcast %cst_23 : f32 to vector<16x128xf32>
    %47 = arith.addf %45, %46 : vector<16x128xf32>
    %48 = tpu.reciprocal %47 {approx = true} : vector<16x128xf32> -> vector<16x128xf32>
    %49 = arith.mulf %40, %44 : vector<16x128xf32>
    %cst_24 = arith.constant 2.000000e+00 : f32
    %50 = vector.broadcast %cst_24 : f32 to vector<16x128xf32>
    %51 = arith.mulf %50, %33 : vector<16x128xf32>
    %cst_25 = arith.constant 9.99999974E-5 : f32
    %52 = vector.broadcast %cst_25 : f32 to vector<16x128xf32>
    %53 = arith.addf %51, %52 : vector<16x128xf32>
    %54 = arith.mulf %53, %48 : vector<16x128xf32>
    %55 = arith.mulf %54, %49 : vector<16x128xf32>
    %56 = arith.addf %2, %55 : vector<16x128xf32>
    %57 = arith.addf %3, %49 : vector<16x128xf32>
    %c1 = arith.constant 1 : index
    %c0_26 = arith.constant 0 : index
    %c0_27 = arith.constant 0 : index
    %58 = vector.load %arg2[%c1, %c0_26, %c0_27] : memref<3x16x16xf32, #tpu.memory_space<vmem>>, vector<1x16x16xf32>
    %59 = vector.shape_cast %58 : vector<1x16x16xf32> to vector<16x16xf32>
    %c1_28 = arith.constant 1 : index
    %c0_29 = arith.constant 0 : index
    %c0_30 = arith.constant 0 : index
    %60 = vector.load %arg3[%c1_28, %c0_29, %c0_30] : memref<3x16x16xf32, #tpu.memory_space<vmem>>, vector<1x16x16xf32>
    %61 = vector.shape_cast %60 : vector<1x16x16xf32> to vector<16x16xf32>
    %62 = arith.truncf %59 : vector<16x16xf32> to vector<16x16xbf16>
    %cst_31 = arith.constant dense<0.000000e+00> : vector<16x128xf32>
    %63 = tpu.matmul %62, %1, %cst_31 {dimension_numbers = #tpu.dot_dimension_numbers<[1], [0], [0], [1], [0, 0, 1, 1], [], []>} : vector<16x16xbf16>, vector<16x128xbf16>, vector<16x128xf32> -> vector<16x128xf32>
    %64 = arith.truncf %63 : vector<16x128xf32> to vector<16x128xbf16>
    %cst_32 = arith.constant dense<0.000000e+00> : vector<16x128xf32>
    %65 = tpu.matmul %0, %64, %cst_32 {dimension_numbers = #tpu.dot_dimension_numbers<[1], [0], [0], [1], [0, 0, 1, 1], [], []>} : vector<16x16xbf16>, vector<16x128xbf16>, vector<16x128xf32> -> vector<16x128xf32>
    %66 = arith.truncf %61 : vector<16x16xf32> to vector<16x16xbf16>
    %cst_33 = arith.constant dense<0.000000e+00> : vector<16x128xf32>
    %67 = tpu.matmul %66, %1, %cst_33 {dimension_numbers = #tpu.dot_dimension_numbers<[1], [0], [0], [1], [0, 0, 1, 1], [], []>} : vector<16x16xbf16>, vector<16x128xbf16>, vector<16x128xf32> -> vector<16x128xf32>
    %68 = arith.truncf %67 : vector<16x128xf32> to vector<16x128xbf16>
    %cst_34 = arith.constant dense<0.000000e+00> : vector<16x128xf32>
    %69 = tpu.matmul %0, %68, %cst_34 {dimension_numbers = #tpu.dot_dimension_numbers<[1], [0], [0], [1], [0, 0, 1, 1], [], []>} : vector<16x16xbf16>, vector<16x128xbf16>, vector<16x128xf32> -> vector<16x128xf32>
    %70 = arith.mulf %59, %59 : vector<16x16xf32>
    %71 = arith.truncf %70 : vector<16x16xf32> to vector<16x16xbf16>
    %cst_35 = arith.constant dense<0.000000e+00> : vector<16x128xf32>
    %72 = tpu.matmul %71, %1, %cst_35 {dimension_numbers = #tpu.dot_dimension_numbers<[1], [0], [0], [1], [0, 0, 1, 1], [], []>} : vector<16x16xbf16>, vector<16x128xbf16>, vector<16x128xf32> -> vector<16x128xf32>
    %73 = arith.truncf %72 : vector<16x128xf32> to vector<16x128xbf16>
    %cst_36 = arith.constant dense<0.000000e+00> : vector<16x128xf32>
    %74 = tpu.matmul %0, %73, %cst_36 {dimension_numbers = #tpu.dot_dimension_numbers<[1], [0], [0], [1], [0, 0, 1, 1], [], []>} : vector<16x16xbf16>, vector<16x128xbf16>, vector<16x128xf32> -> vector<16x128xf32>
    %75 = arith.mulf %61, %61 : vector<16x16xf32>
    %76 = arith.truncf %75 : vector<16x16xf32> to vector<16x16xbf16>
    %cst_37 = arith.constant dense<0.000000e+00> : vector<16x128xf32>
    %77 = tpu.matmul %76, %1, %cst_37 {dimension_numbers = #tpu.dot_dimension_numbers<[1], [0], [0], [1], [0, 0, 1, 1], [], []>} : vector<16x16xbf16>, vector<16x128xbf16>, vector<16x128xf32> -> vector<16x128xf32>
    %78 = arith.truncf %77 : vector<16x128xf32> to vector<16x128xbf16>
    %cst_38 = arith.constant dense<0.000000e+00> : vector<16x128xf32>
    %79 = tpu.matmul %0, %78, %cst_38 {dimension_numbers = #tpu.dot_dimension_numbers<[1], [0], [0], [1], [0, 0, 1, 1], [], []>} : vector<16x16xbf16>, vector<16x128xbf16>, vector<16x128xf32> -> vector<16x128xf32>
    %80 = arith.mulf %59, %61 : vector<16x16xf32>
    %81 = arith.truncf %80 : vector<16x16xf32> to vector<16x16xbf16>
    %cst_39 = arith.constant dense<0.000000e+00> : vector<16x128xf32>
    %82 = tpu.matmul %81, %1, %cst_39 {dimension_numbers = #tpu.dot_dimension_numbers<[1], [0], [0], [1], [0, 0, 1, 1], [], []>} : vector<16x16xbf16>, vector<16x128xbf16>, vector<16x128xf32> -> vector<16x128xf32>
    %83 = arith.truncf %82 : vector<16x128xf32> to vector<16x128xbf16>
    %cst_40 = arith.constant dense<0.000000e+00> : vector<16x128xf32>
    %84 = tpu.matmul %0, %83, %cst_40 {dimension_numbers = #tpu.dot_dimension_numbers<[1], [0], [0], [1], [0, 0, 1, 1], [], []>} : vector<16x16xbf16>, vector<16x128xbf16>, vector<16x128xf32> -> vector<16x128xf32>
    %85 = arith.mulf %65, %65 : vector<16x128xf32>
    %86 = arith.mulf %69, %69 : vector<16x128xf32>
    %87 = arith.mulf %65, %69 : vector<16x128xf32>
    %88 = arith.subf %74, %85 : vector<16x128xf32>
    %89 = arith.subf %79, %86 : vector<16x128xf32>
    %90 = arith.subf %84, %87 : vector<16x128xf32>
    %cst_41 = arith.constant 2.000000e+00 : f32
    %91 = vector.broadcast %cst_41 : f32 to vector<16x128xf32>
    %92 = arith.mulf %91, %90 : vector<16x128xf32>
    %cst_42 = arith.constant 8.99999984E-4 : f32
    %93 = vector.broadcast %cst_42 : f32 to vector<16x128xf32>
    %94 = arith.addf %92, %93 : vector<16x128xf32>
    %95 = arith.addf %88, %89 : vector<16x128xf32>
    %cst_43 = arith.constant 8.99999984E-4 : f32
    %96 = vector.broadcast %cst_43 : f32 to vector<16x128xf32>
    %97 = arith.addf %95, %96 : vector<16x128xf32>
    %98 = tpu.reciprocal %97 {approx = true} : vector<16x128xf32> -> vector<16x128xf32>
    %99 = arith.addf %85, %86 : vector<16x128xf32>
    %cst_44 = arith.constant 9.99999974E-5 : f32
    %100 = vector.broadcast %cst_44 : f32 to vector<16x128xf32>
    %101 = arith.addf %99, %100 : vector<16x128xf32>
    %102 = tpu.reciprocal %101 {approx = true} : vector<16x128xf32> -> vector<16x128xf32>
    %103 = arith.mulf %94, %98 : vector<16x128xf32>
    %cst_45 = arith.constant 2.000000e+00 : f32
    %104 = vector.broadcast %cst_45 : f32 to vector<16x128xf32>
    %105 = arith.mulf %104, %87 : vector<16x128xf32>
    %cst_46 = arith.constant 9.99999974E-5 : f32
    %106 = vector.broadcast %cst_46 : f32 to vector<16x128xf32>
    %107 = arith.addf %105, %106 : vector<16x128xf32>
    %108 = arith.mulf %107, %102 : vector<16x128xf32>
    %109 = arith.mulf %108, %103 : vector<16x128xf32>
    %110 = arith.addf %56, %109 : vector<16x128xf32>
    %111 = arith.addf %57, %103 : vector<16x128xf32>
    %c2 = arith.constant 2 : index
    %c0_47 = arith.constant 0 : index
    %c0_48 = arith.constant 0 : index
    %112 = vector.load %arg2[%c2, %c0_47, %c0_48] : memref<3x16x16xf32, #tpu.memory_space<vmem>>, vector<1x16x16xf32>
    %113 = vector.shape_cast %112 : vector<1x16x16xf32> to vector<16x16xf32>
    %c2_49 = arith.constant 2 : index
    %c0_50 = arith.constant 0 : index
    %c0_51 = arith.constant 0 : index
    %114 = vector.load %arg3[%c2_49, %c0_50, %c0_51] : memref<3x16x16xf32, #tpu.memory_space<vmem>>, vector<1x16x16xf32>
    %115 = vector.shape_cast %114 : vector<1x16x16xf32> to vector<16x16xf32>
    %116 = arith.truncf %113 : vector<16x16xf32> to vector<16x16xbf16>
    %cst_52 = arith.constant dense<0.000000e+00> : vector<16x128xf32>
    %117 = tpu.matmul %116, %1, %cst_52 {dimension_numbers = #tpu.dot_dimension_numbers<[1], [0], [0], [1], [0, 0, 1, 1], [], []>} : vector<16x16xbf16>, vector<16x128xbf16>, vector<16x128xf32> -> vector<16x128xf32>
    %118 = arith.truncf %117 : vector<16x128xf32> to vector<16x128xbf16>
    %cst_53 = arith.constant dense<0.000000e+00> : vector<16x128xf32>
    %119 = tpu.matmul %0, %118, %cst_53 {dimension_numbers = #tpu.dot_dimension_numbers<[1], [0], [0], [1], [0, 0, 1, 1], [], []>} : vector<16x16xbf16>, vector<16x128xbf16>, vector<16x128xf32> -> vector<16x128xf32>
    %120 = arith.truncf %115 : vector<16x16xf32> to vector<16x16xbf16>
    %cst_54 = arith.constant dense<0.000000e+00> : vector<16x128xf32>
    %121 = tpu.matmul %120, %1, %cst_54 {dimension_numbers = #tpu.dot_dimension_numbers<[1], [0], [0], [1], [0, 0, 1, 1], [], []>} : vector<16x16xbf16>, vector<16x128xbf16>, vector<16x128xf32> -> vector<16x128xf32>
    %122 = arith.truncf %121 : vector<16x128xf32> to vector<16x128xbf16>
    %cst_55 = arith.constant dense<0.000000e+00> : vector<16x128xf32>
    %123 = tpu.matmul %0, %122, %cst_55 {dimension_numbers = #tpu.dot_dimension_numbers<[1], [0], [0], [1], [0, 0, 1, 1], [], []>} : vector<16x16xbf16>, vector<16x128xbf16>, vector<16x128xf32> -> vector<16x128xf32>
    %124 = arith.mulf %113, %113 : vector<16x16xf32>
    %125 = arith.truncf %124 : vector<16x16xf32> to vector<16x16xbf16>
    %cst_56 = arith.constant dense<0.000000e+00> : vector<16x128xf32>
    %126 = tpu.matmul %125, %1, %cst_56 {dimension_numbers = #tpu.dot_dimension_numbers<[1], [0], [0], [1], [0, 0, 1, 1], [], []>} : vector<16x16xbf16>, vector<16x128xbf16>, vector<16x128xf32> -> vector<16x128xf32>
    %127 = arith.truncf %126 : vector<16x128xf32> to vector<16x128xbf16>
    %cst_57 = arith.constant dense<0.000000e+00> : vector<16x128xf32>
    %128 = tpu.matmul %0, %127, %cst_57 {dimension_numbers = #tpu.dot_dimension_numbers<[1], [0], [0], [1], [0, 0, 1, 1], [], []>} : vector<16x16xbf16>, vector<16x128xbf16>, vector<16x128xf32> -> vector<16x128xf32>
    %129 = arith.mulf %115, %115 : vector<16x16xf32>
    %130 = arith.truncf %129 : vector<16x16xf32> to vector<16x16xbf16>
    %cst_58 = arith.constant dense<0.000000e+00> : vector<16x128xf32>
    %131 = tpu.matmul %130, %1, %cst_58 {dimension_numbers = #tpu.dot_dimension_numbers<[1], [0], [0], [1], [0, 0, 1, 1], [], []>} : vector<16x16xbf16>, vector<16x128xbf16>, vector<16x128xf32> -> vector<16x128xf32>
    %132 = arith.truncf %131 : vector<16x128xf32> to vector<16x128xbf16>
    %cst_59 = arith.constant dense<0.000000e+00> : vector<16x128xf32>
    %133 = tpu.matmul %0, %132, %cst_59 {dimension_numbers = #tpu.dot_dimension_numbers<[1], [0], [0], [1], [0, 0, 1, 1], [], []>} : vector<16x16xbf16>, vector<16x128xbf16>, vector<16x128xf32> -> vector<16x128xf32>
    %134 = arith.mulf %113, %115 : vector<16x16xf32>
    %135 = arith.truncf %134 : vector<16x16xf32> to vector<16x16xbf16>
    %cst_60 = arith.constant dense<0.000000e+00> : vector<16x128xf32>
    %136 = tpu.matmul %135, %1, %cst_60 {dimension_numbers = #tpu.dot_dimension_numbers<[1], [0], [0], [1], [0, 0, 1, 1], [], []>} : vector<16x16xbf16>, vector<16x128xbf16>, vector<16x128xf32> -> vector<16x128xf32>
    %137 = arith.truncf %136 : vector<16x128xf32> to vector<16x128xbf16>
    %cst_61 = arith.constant dense<0.000000e+00> : vector<16x128xf32>
    %138 = tpu.matmul %0, %137, %cst_61 {dimension_numbers = #tpu.dot_dimension_numbers<[1], [0], [0], [1], [0, 0, 1, 1], [], []>} : vector<16x16xbf16>, vector<16x128xbf16>, vector<16x128xf32> -> vector<16x128xf32>
    %139 = arith.mulf %119, %119 : vector<16x128xf32>
    %140 = arith.mulf %123, %123 : vector<16x128xf32>
    %141 = arith.mulf %119, %123 : vector<16x128xf32>
    %142 = arith.subf %128, %139 : vector<16x128xf32>
    %143 = arith.subf %133, %140 : vector<16x128xf32>
    %144 = arith.subf %138, %141 : vector<16x128xf32>
    %cst_62 = arith.constant 2.000000e+00 : f32
    %145 = vector.broadcast %cst_62 : f32 to vector<16x128xf32>
    %146 = arith.mulf %145, %144 : vector<16x128xf32>
    %cst_63 = arith.constant 8.99999984E-4 : f32
    %147 = vector.broadcast %cst_63 : f32 to vector<16x128xf32>
    %148 = arith.addf %146, %147 : vector<16x128xf32>
    %149 = arith.addf %142, %143 : vector<16x128xf32>
    %cst_64 = arith.constant 8.99999984E-4 : f32
    %150 = vector.broadcast %cst_64 : f32 to vector<16x128xf32>
    %151 = arith.addf %149, %150 : vector<16x128xf32>
    %152 = tpu.reciprocal %151 {approx = true} : vector<16x128xf32> -> vector<16x128xf32>
    %153 = arith.addf %139, %140 : vector<16x128xf32>
    %cst_65 = arith.constant 9.99999974E-5 : f32
    %154 = vector.broadcast %cst_65 : f32 to vector<16x128xf32>
    %155 = arith.addf %153, %154 : vector<16x128xf32>
    %156 = tpu.reciprocal %155 {approx = true} : vector<16x128xf32> -> vector<16x128xf32>
    %157 = arith.mulf %148, %152 : vector<16x128xf32>
    %cst_66 = arith.constant 2.000000e+00 : f32
    %158 = vector.broadcast %cst_66 : f32 to vector<16x128xf32>
    %159 = arith.mulf %158, %141 : vector<16x128xf32>
    %cst_67 = arith.constant 9.99999974E-5 : f32
    %160 = vector.broadcast %cst_67 : f32 to vector<16x128xf32>
    %161 = arith.addf %159, %160 : vector<16x128xf32>
    %162 = arith.mulf %161, %156 : vector<16x128xf32>
    %163 = arith.mulf %162, %157 : vector<16x128xf32>
    %164 = arith.addf %110, %163 : vector<16x128xf32>
    %165 = arith.addf %111, %157 : vector<16x128xf32>
    %166 = tpu.iota {dimensions = array<i32: 1>} : vector<16x128xi32>
    %c128_i32 = arith.constant 128 : i32
    %167 = arith.muli %arg1, %c128_i32 : i32
    %168 = vector.broadcast %167 : i32 to vector<16x128xi32>
    %169 = arith.addi %166, %168 : vector<16x128xi32>
    %c16_i32 = arith.constant 16 : i32
    %170 = vector.broadcast %c16_i32 : i32 to vector<16x128xi32>
    %171 = arith.cmpi slt, %169, %170 : vector<16x128xi32>
    %172 = arith.extui %171 : vector<16x128xi1> to vector<16x128xi32>
    %173 = arith.sitofp %172 : vector<16x128xi32> to vector<16x128xf32>
    %174 = arith.mulf %164, %173 : vector<16x128xf32>
    %175 = arith.mulf %165, %173 : vector<16x128xf32>
    %176 = vector.shape_cast %174 : vector<16x128xf32> to vector<1x16x128xf32>
    %cst_68 = arith.constant dense<0.000000e+00> : vector<1xf32>
    %177 = vector.multi_reduction <add>, %176, %cst_68 [1, 2] : vector<1x16x128xf32> to vector<1xf32>
    %178 = vector.shape_cast %177 : vector<1xf32> to vector<1x1x1xf32>
    %179 = vector.extract %178[0, 0, 0] : f32 from vector<1x1x1xf32>
    %180 = vector.broadcast %179 : f32 to vector<1x1xf32>
    %c0_69 = arith.constant 0 : index
    %c0_70 = arith.constant 0 : index
    %c0_71 = arith.constant 0 : index
    %c0_72 = arith.constant 0 : index
    %181 = vector.load %arg6[%c0_69, %c0_70, %c0_71, %c0_72] : memref<1x1x1x1xf32, #tpu.memory_space<vmem>>, vector<1x1x1x1xf32>
    %182 = vector.shape_cast %181 : vector<1x1x1x1xf32> to vector<1x1xf32>
    %183 = vector.shape_cast %180 : vector<1x1xf32> to vector<1x1x1x1xf32>
    tpu.vector_store %arg6[%c0_69, %c0_70, %c0_71, %c0_72], %183 {strides = array<i32>} : memref<1x1x1x1xf32, #tpu.memory_space<vmem>>, vector<1x1x1x1xf32>,
    %184 = vector.shape_cast %175 : vector<16x128xf32> to vector<1x16x128xf32>
    %cst_73 = arith.constant dense<0.000000e+00> : vector<1xf32>
    %185 = vector.multi_reduction <add>, %184, %cst_73 [1, 2] : vector<1x16x128xf32> to vector<1xf32>
    %186 = vector.shape_cast %185 : vector<1xf32> to vector<1x1x1xf32>
    %187 = vector.extract %186[0, 0, 0] : f32 from vector<1x1x1xf32>
    %188 = vector.broadcast %187 : f32 to vector<1x1xf32>
    %c0_74 = arith.constant 0 : index
    %c0_75 = arith.constant 0 : index
    %c0_76 = arith.constant 0 : index
    %c0_77 = arith.constant 0 : index
    %189 = vector.load %arg7[%c0_74, %c0_75, %c0_76, %c0_77] : memref<1x1x1x1xf32, #tpu.memory_space<vmem>>, vector<1x1x1x1xf32>
    %190 = vector.shape_cast %189 : vector<1x1x1x1xf32> to vector<1x1xf32>
    %191 = vector.shape_cast %188 : vector<1x1xf32> to vector<1x1x1x1xf32>
    tpu.vector_store %arg7[%c0_74, %c0_75, %c0_76, %c0_77], %191 {strides = array<i32>} : memref<1x1x1x1xf32, #tpu.memory_space<vmem>>, vector<1x1x1x1xf32>,
    return
  }
  func.func @transform_0(%arg0: i32, %arg1: i32) -> (i32, i32, i32) {
    %c0_i32 = arith.constant 0 : i32
    %c0_i32_0 = arith.constant 0 : i32
    %c0_i32_1 = arith.constant 0 : i32
    return %arg0, %c0_i32, %c0_i32_0 : i32, i32, i32
  }
  func.func @transform_1(%arg0: i32, %arg1: i32) -> (i32, i32, i32) {
    %c0_i32 = arith.constant 0 : i32
    %c0_i32_0 = arith.constant 0 : i32
    %c0_i32_1 = arith.constant 0 : i32
    return %arg0, %c0_i32, %c0_i32_0 : i32, i32, i32
  }
  func.func @transform_2(%arg0: i32, %arg1: i32) -> (i32, i32) {
    %c0_i32 = arith.constant 0 : i32
    %c0_i32_0 = arith.constant 0 : i32
    %c0_i32_1 = arith.constant 0 : i32
    return %c0_i32, %c0_i32_0 : i32, i32
  }
  func.func @transform_3(%arg0: i32, %arg1: i32) -> (i32, i32) {
    %c0_i32 = arith.constant 0 : i32
    %c0_i32_0 = arith.constant 0 : i32
    return %c0_i32, %arg1 : i32, i32
  }
  func.func @transform_4(%arg0: i32, %arg1: i32) -> (i32, i32, i32, i32) {
    %c0_i32 = arith.constant 0 : i32
    %c0_i32_0 = arith.constant 0 : i32
    %c0_i32_1 = arith.constant 0 : i32
    return %arg0, %arg1, %c0_i32, %c0_i32_0 : i32, i32, i32, i32
  }
  func.func @transform_5(%arg0: i32, %arg1: i32) -> (i32, i32, i32, i32) {
    %c0_i32 = arith.constant 0 : i32
    %c0_i32_0 = arith.constant 0 : i32
    %c0_i32_1 = arith.constant 0 : i32
    return %arg0, %arg1, %c0_i32, %c0_i32_0 : i32, i32, i32, i32
  }
}

module attributes {stable_mosaic.version = 11 : i64} {
  func.func @kernel(%arg0: i32, %arg1: i32, %arg2: memref<3x32x32xf32, #tpu.memory_space<vmem>>, %arg3: memref<3x32x32xf32, #tpu.memory_space<vmem>>, %arg4: memref<32x32xbf16, #tpu.memory_space<vmem>>, %arg5: memref<32x128xbf16, #tpu.memory_space<vmem>>, %arg6: memref<1x1x1x1xf32, #tpu.memory_space<vmem>>, %arg7: memref<1x1x1x1xf32, #tpu.memory_space<vmem>>) attributes {dimension_semantics = [#tpu.dimension_semantics<parallel>, #tpu.dimension_semantics<parallel>], iteration_bounds = array<i64: 2, 1>, scalar_prefetch = 0 : i64, scratch_operands = 0 : i64, tpu.core_type = #tpu.core_type<tc>, window_params = [{transform_indices = @transform_0, window_bounds = array<i64: 3, 32, 32>}, {transform_indices = @transform_1, window_bounds = array<i64: 3, 32, 32>}, {pipeline_mode = #tpu.pipeline_mode<synchronous>, transform_indices = @transform_2, window_bounds = array<i64: 32, 32>}, {transform_indices = @transform_3, window_bounds = array<i64: 32, 128>}, {transform_indices = @transform_4, window_bounds = array<i64: 1, 1, 1, 1>}, {transform_indices = @transform_5, window_bounds = array<i64: 1, 1, 1, 1>}]} {
    %c0 = arith.constant 0 : index
    %c0_0 = arith.constant 0 : index
    %0 = vector.load %arg4[%c0, %c0_0] : memref<32x32xbf16, #tpu.memory_space<vmem>>, vector<32x32xbf16>
    %c0_1 = arith.constant 0 : index
    %c0_2 = arith.constant 0 : index
    %1 = vector.load %arg5[%c0_1, %c0_2] : memref<32x128xbf16, #tpu.memory_space<vmem>>, vector<32x128xbf16>
    %cst = arith.constant 0.000000e+00 : f32
    %2 = vector.broadcast %cst : f32 to vector<32x128xf32>
    %cst_3 = arith.constant 0.000000e+00 : f32
    %3 = vector.broadcast %cst_3 : f32 to vector<32x128xf32>
    %c0_4 = arith.constant 0 : index
    %c0_5 = arith.constant 0 : index
    %c0_6 = arith.constant 0 : index
    %4 = vector.load %arg2[%c0_4, %c0_5, %c0_6] : memref<3x32x32xf32, #tpu.memory_space<vmem>>, vector<1x32x32xf32>
    %5 = vector.shape_cast %4 : vector<1x32x32xf32> to vector<32x32xf32>
    %c0_7 = arith.constant 0 : index
    %c0_8 = arith.constant 0 : index
    %c0_9 = arith.constant 0 : index
    %6 = vector.load %arg3[%c0_7, %c0_8, %c0_9] : memref<3x32x32xf32, #tpu.memory_space<vmem>>, vector<1x32x32xf32>
    %7 = vector.shape_cast %6 : vector<1x32x32xf32> to vector<32x32xf32>
    %8 = arith.truncf %5 : vector<32x32xf32> to vector<32x32xbf16>
    %cst_10 = arith.constant dense<0.000000e+00> : vector<32x128xf32>
    %9 = tpu.matmul %8, %1, %cst_10 {dimension_numbers = #tpu.dot_dimension_numbers<[1], [0], [0], [1], [0, 0, 1, 1], [], []>} : vector<32x32xbf16>, vector<32x128xbf16>, vector<32x128xf32> -> vector<32x128xf32>
    %10 = arith.truncf %9 : vector<32x128xf32> to vector<32x128xbf16>
    %cst_11 = arith.constant dense<0.000000e+00> : vector<32x128xf32>
    %11 = tpu.matmul %0, %10, %cst_11 {dimension_numbers = #tpu.dot_dimension_numbers<[1], [0], [0], [1], [0, 0, 1, 1], [], []>} : vector<32x32xbf16>, vector<32x128xbf16>, vector<32x128xf32> -> vector<32x128xf32>
    %12 = arith.truncf %7 : vector<32x32xf32> to vector<32x32xbf16>
    %cst_12 = arith.constant dense<0.000000e+00> : vector<32x128xf32>
    %13 = tpu.matmul %12, %1, %cst_12 {dimension_numbers = #tpu.dot_dimension_numbers<[1], [0], [0], [1], [0, 0, 1, 1], [], []>} : vector<32x32xbf16>, vector<32x128xbf16>, vector<32x128xf32> -> vector<32x128xf32>
    %14 = arith.truncf %13 : vector<32x128xf32> to vector<32x128xbf16>
    %cst_13 = arith.constant dense<0.000000e+00> : vector<32x128xf32>
    %15 = tpu.matmul %0, %14, %cst_13 {dimension_numbers = #tpu.dot_dimension_numbers<[1], [0], [0], [1], [0, 0, 1, 1], [], []>} : vector<32x32xbf16>, vector<32x128xbf16>, vector<32x128xf32> -> vector<32x128xf32>
    %16 = arith.mulf %5, %5 : vector<32x32xf32>
    %17 = arith.truncf %16 : vector<32x32xf32> to vector<32x32xbf16>
    %cst_14 = arith.constant dense<0.000000e+00> : vector<32x128xf32>
    %18 = tpu.matmul %17, %1, %cst_14 {dimension_numbers = #tpu.dot_dimension_numbers<[1], [0], [0], [1], [0, 0, 1, 1], [], []>} : vector<32x32xbf16>, vector<32x128xbf16>, vector<32x128xf32> -> vector<32x128xf32>
    %19 = arith.truncf %18 : vector<32x128xf32> to vector<32x128xbf16>
    %cst_15 = arith.constant dense<0.000000e+00> : vector<32x128xf32>
    %20 = tpu.matmul %0, %19, %cst_15 {dimension_numbers = #tpu.dot_dimension_numbers<[1], [0], [0], [1], [0, 0, 1, 1], [], []>} : vector<32x32xbf16>, vector<32x128xbf16>, vector<32x128xf32> -> vector<32x128xf32>
    %21 = arith.mulf %7, %7 : vector<32x32xf32>
    %22 = arith.truncf %21 : vector<32x32xf32> to vector<32x32xbf16>
    %cst_16 = arith.constant dense<0.000000e+00> : vector<32x128xf32>
    %23 = tpu.matmul %22, %1, %cst_16 {dimension_numbers = #tpu.dot_dimension_numbers<[1], [0], [0], [1], [0, 0, 1, 1], [], []>} : vector<32x32xbf16>, vector<32x128xbf16>, vector<32x128xf32> -> vector<32x128xf32>
    %24 = arith.truncf %23 : vector<32x128xf32> to vector<32x128xbf16>
    %cst_17 = arith.constant dense<0.000000e+00> : vector<32x128xf32>
    %25 = tpu.matmul %0, %24, %cst_17 {dimension_numbers = #tpu.dot_dimension_numbers<[1], [0], [0], [1], [0, 0, 1, 1], [], []>} : vector<32x32xbf16>, vector<32x128xbf16>, vector<32x128xf32> -> vector<32x128xf32>
    %26 = arith.mulf %5, %7 : vector<32x32xf32>
    %27 = arith.truncf %26 : vector<32x32xf32> to vector<32x32xbf16>
    %cst_18 = arith.constant dense<0.000000e+00> : vector<32x128xf32>
    %28 = tpu.matmul %27, %1, %cst_18 {dimension_numbers = #tpu.dot_dimension_numbers<[1], [0], [0], [1], [0, 0, 1, 1], [], []>} : vector<32x32xbf16>, vector<32x128xbf16>, vector<32x128xf32> -> vector<32x128xf32>
    %29 = arith.truncf %28 : vector<32x128xf32> to vector<32x128xbf16>
    %cst_19 = arith.constant dense<0.000000e+00> : vector<32x128xf32>
    %30 = tpu.matmul %0, %29, %cst_19 {dimension_numbers = #tpu.dot_dimension_numbers<[1], [0], [0], [1], [0, 0, 1, 1], [], []>} : vector<32x32xbf16>, vector<32x128xbf16>, vector<32x128xf32> -> vector<32x128xf32>
    %31 = arith.mulf %11, %11 : vector<32x128xf32>
    %32 = arith.mulf %15, %15 : vector<32x128xf32>
    %33 = arith.mulf %11, %15 : vector<32x128xf32>
    %34 = arith.subf %20, %31 : vector<32x128xf32>
    %35 = arith.subf %25, %32 : vector<32x128xf32>
    %36 = arith.subf %30, %33 : vector<32x128xf32>
    %cst_20 = arith.constant 2.000000e+00 : f32
    %37 = vector.broadcast %cst_20 : f32 to vector<32x128xf32>
    %38 = arith.mulf %37, %36 : vector<32x128xf32>
    %cst_21 = arith.constant 8.99999984E-4 : f32
    %39 = vector.broadcast %cst_21 : f32 to vector<32x128xf32>
    %40 = arith.addf %38, %39 : vector<32x128xf32>
    %41 = arith.addf %34, %35 : vector<32x128xf32>
    %cst_22 = arith.constant 8.99999984E-4 : f32
    %42 = vector.broadcast %cst_22 : f32 to vector<32x128xf32>
    %43 = arith.addf %41, %42 : vector<32x128xf32>
    %44 = tpu.reciprocal %43 {approx = true} : vector<32x128xf32> -> vector<32x128xf32>
    %45 = arith.addf %31, %32 : vector<32x128xf32>
    %cst_23 = arith.constant 9.99999974E-5 : f32
    %46 = vector.broadcast %cst_23 : f32 to vector<32x128xf32>
    %47 = arith.addf %45, %46 : vector<32x128xf32>
    %48 = tpu.reciprocal %47 {approx = true} : vector<32x128xf32> -> vector<32x128xf32>
    %49 = arith.mulf %40, %44 : vector<32x128xf32>
    %cst_24 = arith.constant 2.000000e+00 : f32
    %50 = vector.broadcast %cst_24 : f32 to vector<32x128xf32>
    %51 = arith.mulf %50, %33 : vector<32x128xf32>
    %cst_25 = arith.constant 9.99999974E-5 : f32
    %52 = vector.broadcast %cst_25 : f32 to vector<32x128xf32>
    %53 = arith.addf %51, %52 : vector<32x128xf32>
    %54 = arith.mulf %53, %48 : vector<32x128xf32>
    %55 = arith.mulf %54, %49 : vector<32x128xf32>
    %56 = arith.addf %2, %55 : vector<32x128xf32>
    %57 = arith.addf %3, %49 : vector<32x128xf32>
    %c1 = arith.constant 1 : index
    %c0_26 = arith.constant 0 : index
    %c0_27 = arith.constant 0 : index
    %58 = vector.load %arg2[%c1, %c0_26, %c0_27] : memref<3x32x32xf32, #tpu.memory_space<vmem>>, vector<1x32x32xf32>
    %59 = vector.shape_cast %58 : vector<1x32x32xf32> to vector<32x32xf32>
    %c1_28 = arith.constant 1 : index
    %c0_29 = arith.constant 0 : index
    %c0_30 = arith.constant 0 : index
    %60 = vector.load %arg3[%c1_28, %c0_29, %c0_30] : memref<3x32x32xf32, #tpu.memory_space<vmem>>, vector<1x32x32xf32>
    %61 = vector.shape_cast %60 : vector<1x32x32xf32> to vector<32x32xf32>
    %62 = arith.truncf %59 : vector<32x32xf32> to vector<32x32xbf16>
    %cst_31 = arith.constant dense<0.000000e+00> : vector<32x128xf32>
    %63 = tpu.matmul %62, %1, %cst_31 {dimension_numbers = #tpu.dot_dimension_numbers<[1], [0], [0], [1], [0, 0, 1, 1], [], []>} : vector<32x32xbf16>, vector<32x128xbf16>, vector<32x128xf32> -> vector<32x128xf32>
    %64 = arith.truncf %63 : vector<32x128xf32> to vector<32x128xbf16>
    %cst_32 = arith.constant dense<0.000000e+00> : vector<32x128xf32>
    %65 = tpu.matmul %0, %64, %cst_32 {dimension_numbers = #tpu.dot_dimension_numbers<[1], [0], [0], [1], [0, 0, 1, 1], [], []>} : vector<32x32xbf16>, vector<32x128xbf16>, vector<32x128xf32> -> vector<32x128xf32>
    %66 = arith.truncf %61 : vector<32x32xf32> to vector<32x32xbf16>
    %cst_33 = arith.constant dense<0.000000e+00> : vector<32x128xf32>
    %67 = tpu.matmul %66, %1, %cst_33 {dimension_numbers = #tpu.dot_dimension_numbers<[1], [0], [0], [1], [0, 0, 1, 1], [], []>} : vector<32x32xbf16>, vector<32x128xbf16>, vector<32x128xf32> -> vector<32x128xf32>
    %68 = arith.truncf %67 : vector<32x128xf32> to vector<32x128xbf16>
    %cst_34 = arith.constant dense<0.000000e+00> : vector<32x128xf32>
    %69 = tpu.matmul %0, %68, %cst_34 {dimension_numbers = #tpu.dot_dimension_numbers<[1], [0], [0], [1], [0, 0, 1, 1], [], []>} : vector<32x32xbf16>, vector<32x128xbf16>, vector<32x128xf32> -> vector<32x128xf32>
    %70 = arith.mulf %59, %59 : vector<32x32xf32>
    %71 = arith.truncf %70 : vector<32x32xf32> to vector<32x32xbf16>
    %cst_35 = arith.constant dense<0.000000e+00> : vector<32x128xf32>
    %72 = tpu.matmul %71, %1, %cst_35 {dimension_numbers = #tpu.dot_dimension_numbers<[1], [0], [0], [1], [0, 0, 1, 1], [], []>} : vector<32x32xbf16>, vector<32x128xbf16>, vector<32x128xf32> -> vector<32x128xf32>
    %73 = arith.truncf %72 : vector<32x128xf32> to vector<32x128xbf16>
    %cst_36 = arith.constant dense<0.000000e+00> : vector<32x128xf32>
    %74 = tpu.matmul %0, %73, %cst_36 {dimension_numbers = #tpu.dot_dimension_numbers<[1], [0], [0], [1], [0, 0, 1, 1], [], []>} : vector<32x32xbf16>, vector<32x128xbf16>, vector<32x128xf32> -> vector<32x128xf32>
    %75 = arith.mulf %61, %61 : vector<32x32xf32>
    %76 = arith.truncf %75 : vector<32x32xf32> to vector<32x32xbf16>
    %cst_37 = arith.constant dense<0.000000e+00> : vector<32x128xf32>
    %77 = tpu.matmul %76, %1, %cst_37 {dimension_numbers = #tpu.dot_dimension_numbers<[1], [0], [0], [1], [0, 0, 1, 1], [], []>} : vector<32x32xbf16>, vector<32x128xbf16>, vector<32x128xf32> -> vector<32x128xf32>
    %78 = arith.truncf %77 : vector<32x128xf32> to vector<32x128xbf16>
    %cst_38 = arith.constant dense<0.000000e+00> : vector<32x128xf32>
    %79 = tpu.matmul %0, %78, %cst_38 {dimension_numbers = #tpu.dot_dimension_numbers<[1], [0], [0], [1], [0, 0, 1, 1], [], []>} : vector<32x32xbf16>, vector<32x128xbf16>, vector<32x128xf32> -> vector<32x128xf32>
    %80 = arith.mulf %59, %61 : vector<32x32xf32>
    %81 = arith.truncf %80 : vector<32x32xf32> to vector<32x32xbf16>
    %cst_39 = arith.constant dense<0.000000e+00> : vector<32x128xf32>
    %82 = tpu.matmul %81, %1, %cst_39 {dimension_numbers = #tpu.dot_dimension_numbers<[1], [0], [0], [1], [0, 0, 1, 1], [], []>} : vector<32x32xbf16>, vector<32x128xbf16>, vector<32x128xf32> -> vector<32x128xf32>
    %83 = arith.truncf %82 : vector<32x128xf32> to vector<32x128xbf16>
    %cst_40 = arith.constant dense<0.000000e+00> : vector<32x128xf32>
    %84 = tpu.matmul %0, %83, %cst_40 {dimension_numbers = #tpu.dot_dimension_numbers<[1], [0], [0], [1], [0, 0, 1, 1], [], []>} : vector<32x32xbf16>, vector<32x128xbf16>, vector<32x128xf32> -> vector<32x128xf32>
    %85 = arith.mulf %65, %65 : vector<32x128xf32>
    %86 = arith.mulf %69, %69 : vector<32x128xf32>
    %87 = arith.mulf %65, %69 : vector<32x128xf32>
    %88 = arith.subf %74, %85 : vector<32x128xf32>
    %89 = arith.subf %79, %86 : vector<32x128xf32>
    %90 = arith.subf %84, %87 : vector<32x128xf32>
    %cst_41 = arith.constant 2.000000e+00 : f32
    %91 = vector.broadcast %cst_41 : f32 to vector<32x128xf32>
    %92 = arith.mulf %91, %90 : vector<32x128xf32>
    %cst_42 = arith.constant 8.99999984E-4 : f32
    %93 = vector.broadcast %cst_42 : f32 to vector<32x128xf32>
    %94 = arith.addf %92, %93 : vector<32x128xf32>
    %95 = arith.addf %88, %89 : vector<32x128xf32>
    %cst_43 = arith.constant 8.99999984E-4 : f32
    %96 = vector.broadcast %cst_43 : f32 to vector<32x128xf32>
    %97 = arith.addf %95, %96 : vector<32x128xf32>
    %98 = tpu.reciprocal %97 {approx = true} : vector<32x128xf32> -> vector<32x128xf32>
    %99 = arith.addf %85, %86 : vector<32x128xf32>
    %cst_44 = arith.constant 9.99999974E-5 : f32
    %100 = vector.broadcast %cst_44 : f32 to vector<32x128xf32>
    %101 = arith.addf %99, %100 : vector<32x128xf32>
    %102 = tpu.reciprocal %101 {approx = true} : vector<32x128xf32> -> vector<32x128xf32>
    %103 = arith.mulf %94, %98 : vector<32x128xf32>
    %cst_45 = arith.constant 2.000000e+00 : f32
    %104 = vector.broadcast %cst_45 : f32 to vector<32x128xf32>
    %105 = arith.mulf %104, %87 : vector<32x128xf32>
    %cst_46 = arith.constant 9.99999974E-5 : f32
    %106 = vector.broadcast %cst_46 : f32 to vector<32x128xf32>
    %107 = arith.addf %105, %106 : vector<32x128xf32>
    %108 = arith.mulf %107, %102 : vector<32x128xf32>
    %109 = arith.mulf %108, %103 : vector<32x128xf32>
    %110 = arith.addf %56, %109 : vector<32x128xf32>
    %111 = arith.addf %57, %103 : vector<32x128xf32>
    %c2 = arith.constant 2 : index
    %c0_47 = arith.constant 0 : index
    %c0_48 = arith.constant 0 : index
    %112 = vector.load %arg2[%c2, %c0_47, %c0_48] : memref<3x32x32xf32, #tpu.memory_space<vmem>>, vector<1x32x32xf32>
    %113 = vector.shape_cast %112 : vector<1x32x32xf32> to vector<32x32xf32>
    %c2_49 = arith.constant 2 : index
    %c0_50 = arith.constant 0 : index
    %c0_51 = arith.constant 0 : index
    %114 = vector.load %arg3[%c2_49, %c0_50, %c0_51] : memref<3x32x32xf32, #tpu.memory_space<vmem>>, vector<1x32x32xf32>
    %115 = vector.shape_cast %114 : vector<1x32x32xf32> to vector<32x32xf32>
    %116 = arith.truncf %113 : vector<32x32xf32> to vector<32x32xbf16>
    %cst_52 = arith.constant dense<0.000000e+00> : vector<32x128xf32>
    %117 = tpu.matmul %116, %1, %cst_52 {dimension_numbers = #tpu.dot_dimension_numbers<[1], [0], [0], [1], [0, 0, 1, 1], [], []>} : vector<32x32xbf16>, vector<32x128xbf16>, vector<32x128xf32> -> vector<32x128xf32>
    %118 = arith.truncf %117 : vector<32x128xf32> to vector<32x128xbf16>
    %cst_53 = arith.constant dense<0.000000e+00> : vector<32x128xf32>
    %119 = tpu.matmul %0, %118, %cst_53 {dimension_numbers = #tpu.dot_dimension_numbers<[1], [0], [0], [1], [0, 0, 1, 1], [], []>} : vector<32x32xbf16>, vector<32x128xbf16>, vector<32x128xf32> -> vector<32x128xf32>
    %120 = arith.truncf %115 : vector<32x32xf32> to vector<32x32xbf16>
    %cst_54 = arith.constant dense<0.000000e+00> : vector<32x128xf32>
    %121 = tpu.matmul %120, %1, %cst_54 {dimension_numbers = #tpu.dot_dimension_numbers<[1], [0], [0], [1], [0, 0, 1, 1], [], []>} : vector<32x32xbf16>, vector<32x128xbf16>, vector<32x128xf32> -> vector<32x128xf32>
    %122 = arith.truncf %121 : vector<32x128xf32> to vector<32x128xbf16>
    %cst_55 = arith.constant dense<0.000000e+00> : vector<32x128xf32>
    %123 = tpu.matmul %0, %122, %cst_55 {dimension_numbers = #tpu.dot_dimension_numbers<[1], [0], [0], [1], [0, 0, 1, 1], [], []>} : vector<32x32xbf16>, vector<32x128xbf16>, vector<32x128xf32> -> vector<32x128xf32>
    %124 = arith.mulf %113, %113 : vector<32x32xf32>
    %125 = arith.truncf %124 : vector<32x32xf32> to vector<32x32xbf16>
    %cst_56 = arith.constant dense<0.000000e+00> : vector<32x128xf32>
    %126 = tpu.matmul %125, %1, %cst_56 {dimension_numbers = #tpu.dot_dimension_numbers<[1], [0], [0], [1], [0, 0, 1, 1], [], []>} : vector<32x32xbf16>, vector<32x128xbf16>, vector<32x128xf32> -> vector<32x128xf32>
    %127 = arith.truncf %126 : vector<32x128xf32> to vector<32x128xbf16>
    %cst_57 = arith.constant dense<0.000000e+00> : vector<32x128xf32>
    %128 = tpu.matmul %0, %127, %cst_57 {dimension_numbers = #tpu.dot_dimension_numbers<[1], [0], [0], [1], [0, 0, 1, 1], [], []>} : vector<32x32xbf16>, vector<32x128xbf16>, vector<32x128xf32> -> vector<32x128xf32>
    %129 = arith.mulf %115, %115 : vector<32x32xf32>
    %130 = arith.truncf %129 : vector<32x32xf32> to vector<32x32xbf16>
    %cst_58 = arith.constant dense<0.000000e+00> : vector<32x128xf32>
    %131 = tpu.matmul %130, %1, %cst_58 {dimension_numbers = #tpu.dot_dimension_numbers<[1], [0], [0], [1], [0, 0, 1, 1], [], []>} : vector<32x32xbf16>, vector<32x128xbf16>, vector<32x128xf32> -> vector<32x128xf32>
    %132 = arith.truncf %131 : vector<32x128xf32> to vector<32x128xbf16>
    %cst_59 = arith.constant dense<0.000000e+00> : vector<32x128xf32>
    %133 = tpu.matmul %0, %132, %cst_59 {dimension_numbers = #tpu.dot_dimension_numbers<[1], [0], [0], [1], [0, 0, 1, 1], [], []>} : vector<32x32xbf16>, vector<32x128xbf16>, vector<32x128xf32> -> vector<32x128xf32>
    %134 = arith.mulf %113, %115 : vector<32x32xf32>
    %135 = arith.truncf %134 : vector<32x32xf32> to vector<32x32xbf16>
    %cst_60 = arith.constant dense<0.000000e+00> : vector<32x128xf32>
    %136 = tpu.matmul %135, %1, %cst_60 {dimension_numbers = #tpu.dot_dimension_numbers<[1], [0], [0], [1], [0, 0, 1, 1], [], []>} : vector<32x32xbf16>, vector<32x128xbf16>, vector<32x128xf32> -> vector<32x128xf32>
    %137 = arith.truncf %136 : vector<32x128xf32> to vector<32x128xbf16>
    %cst_61 = arith.constant dense<0.000000e+00> : vector<32x128xf32>
    %138 = tpu.matmul %0, %137, %cst_61 {dimension_numbers = #tpu.dot_dimension_numbers<[1], [0], [0], [1], [0, 0, 1, 1], [], []>} : vector<32x32xbf16>, vector<32x128xbf16>, vector<32x128xf32> -> vector<32x128xf32>
    %139 = arith.mulf %119, %119 : vector<32x128xf32>
    %140 = arith.mulf %123, %123 : vector<32x128xf32>
    %141 = arith.mulf %119, %123 : vector<32x128xf32>
    %142 = arith.subf %128, %139 : vector<32x128xf32>
    %143 = arith.subf %133, %140 : vector<32x128xf32>
    %144 = arith.subf %138, %141 : vector<32x128xf32>
    %cst_62 = arith.constant 2.000000e+00 : f32
    %145 = vector.broadcast %cst_62 : f32 to vector<32x128xf32>
    %146 = arith.mulf %145, %144 : vector<32x128xf32>
    %cst_63 = arith.constant 8.99999984E-4 : f32
    %147 = vector.broadcast %cst_63 : f32 to vector<32x128xf32>
    %148 = arith.addf %146, %147 : vector<32x128xf32>
    %149 = arith.addf %142, %143 : vector<32x128xf32>
    %cst_64 = arith.constant 8.99999984E-4 : f32
    %150 = vector.broadcast %cst_64 : f32 to vector<32x128xf32>
    %151 = arith.addf %149, %150 : vector<32x128xf32>
    %152 = tpu.reciprocal %151 {approx = true} : vector<32x128xf32> -> vector<32x128xf32>
    %153 = arith.addf %139, %140 : vector<32x128xf32>
    %cst_65 = arith.constant 9.99999974E-5 : f32
    %154 = vector.broadcast %cst_65 : f32 to vector<32x128xf32>
    %155 = arith.addf %153, %154 : vector<32x128xf32>
    %156 = tpu.reciprocal %155 {approx = true} : vector<32x128xf32> -> vector<32x128xf32>
    %157 = arith.mulf %148, %152 : vector<32x128xf32>
    %cst_66 = arith.constant 2.000000e+00 : f32
    %158 = vector.broadcast %cst_66 : f32 to vector<32x128xf32>
    %159 = arith.mulf %158, %141 : vector<32x128xf32>
    %cst_67 = arith.constant 9.99999974E-5 : f32
    %160 = vector.broadcast %cst_67 : f32 to vector<32x128xf32>
    %161 = arith.addf %159, %160 : vector<32x128xf32>
    %162 = arith.mulf %161, %156 : vector<32x128xf32>
    %163 = arith.mulf %162, %157 : vector<32x128xf32>
    %164 = arith.addf %110, %163 : vector<32x128xf32>
    %165 = arith.addf %111, %157 : vector<32x128xf32>
    %166 = tpu.iota {dimensions = array<i32: 1>} : vector<32x128xi32>
    %c128_i32 = arith.constant 128 : i32
    %167 = arith.muli %arg1, %c128_i32 : i32
    %168 = vector.broadcast %167 : i32 to vector<32x128xi32>
    %169 = arith.addi %166, %168 : vector<32x128xi32>
    %c32_i32 = arith.constant 32 : i32
    %170 = vector.broadcast %c32_i32 : i32 to vector<32x128xi32>
    %171 = arith.cmpi slt, %169, %170 : vector<32x128xi32>
    %172 = arith.extui %171 : vector<32x128xi1> to vector<32x128xi32>
    %173 = arith.sitofp %172 : vector<32x128xi32> to vector<32x128xf32>
    %174 = arith.mulf %164, %173 : vector<32x128xf32>
    %175 = arith.mulf %165, %173 : vector<32x128xf32>
    %176 = vector.shape_cast %174 : vector<32x128xf32> to vector<1x32x128xf32>
    %cst_68 = arith.constant dense<0.000000e+00> : vector<1xf32>
    %177 = vector.multi_reduction <add>, %176, %cst_68 [1, 2] : vector<1x32x128xf32> to vector<1xf32>
    %178 = vector.shape_cast %177 : vector<1xf32> to vector<1x1x1xf32>
    %179 = vector.extract %178[0, 0, 0] : f32 from vector<1x1x1xf32>
    %180 = vector.broadcast %179 : f32 to vector<1x1xf32>
    %c0_69 = arith.constant 0 : index
    %c0_70 = arith.constant 0 : index
    %c0_71 = arith.constant 0 : index
    %c0_72 = arith.constant 0 : index
    %181 = vector.load %arg6[%c0_69, %c0_70, %c0_71, %c0_72] : memref<1x1x1x1xf32, #tpu.memory_space<vmem>>, vector<1x1x1x1xf32>
    %182 = vector.shape_cast %181 : vector<1x1x1x1xf32> to vector<1x1xf32>
    %183 = vector.shape_cast %180 : vector<1x1xf32> to vector<1x1x1x1xf32>
    tpu.vector_store %arg6[%c0_69, %c0_70, %c0_71, %c0_72], %183 {strides = array<i32>} : memref<1x1x1x1xf32, #tpu.memory_space<vmem>>, vector<1x1x1x1xf32>,
    %184 = vector.shape_cast %175 : vector<32x128xf32> to vector<1x32x128xf32>
    %cst_73 = arith.constant dense<0.000000e+00> : vector<1xf32>
    %185 = vector.multi_reduction <add>, %184, %cst_73 [1, 2] : vector<1x32x128xf32> to vector<1xf32>
    %186 = vector.shape_cast %185 : vector<1xf32> to vector<1x1x1xf32>
    %187 = vector.extract %186[0, 0, 0] : f32 from vector<1x1x1xf32>
    %188 = vector.broadcast %187 : f32 to vector<1x1xf32>
    %c0_74 = arith.constant 0 : index
    %c0_75 = arith.constant 0 : index
    %c0_76 = arith.constant 0 : index
    %c0_77 = arith.constant 0 : index
    %189 = vector.load %arg7[%c0_74, %c0_75, %c0_76, %c0_77] : memref<1x1x1x1xf32, #tpu.memory_space<vmem>>, vector<1x1x1x1xf32>
    %190 = vector.shape_cast %189 : vector<1x1x1x1xf32> to vector<1x1xf32>
    %191 = vector.shape_cast %188 : vector<1x1xf32> to vector<1x1x1x1xf32>
    tpu.vector_store %arg7[%c0_74, %c0_75, %c0_76, %c0_77], %191 {strides = array<i32>} : memref<1x1x1x1xf32, #tpu.memory_space<vmem>>, vector<1x1x1x1xf32>,
    return
  }
  func.func @transform_0(%arg0: i32, %arg1: i32) -> (i32, i32, i32) {
    %c0_i32 = arith.constant 0 : i32
    %c0_i32_0 = arith.constant 0 : i32
    %c0_i32_1 = arith.constant 0 : i32
    return %arg0, %c0_i32, %c0_i32_0 : i32, i32, i32
  }
  func.func @transform_1(%arg0: i32, %arg1: i32) -> (i32, i32, i32) {
    %c0_i32 = arith.constant 0 : i32
    %c0_i32_0 = arith.constant 0 : i32
    %c0_i32_1 = arith.constant 0 : i32
    return %arg0, %c0_i32, %c0_i32_0 : i32, i32, i32
  }
  func.func @transform_2(%arg0: i32, %arg1: i32) -> (i32, i32) {
    %c0_i32 = arith.constant 0 : i32
    %c0_i32_0 = arith.constant 0 : i32
    %c0_i32_1 = arith.constant 0 : i32
    return %c0_i32, %c0_i32_0 : i32, i32
  }
  func.func @transform_3(%arg0: i32, %arg1: i32) -> (i32, i32) {
    %c0_i32 = arith.constant 0 : i32
    %c0_i32_0 = arith.constant 0 : i32
    return %c0_i32, %arg1 : i32, i32
  }
  func.func @transform_4(%arg0: i32, %arg1: i32) -> (i32, i32, i32, i32) {
    %c0_i32 = arith.constant 0 : i32
    %c0_i32_0 = arith.constant 0 : i32
    %c0_i32_1 = arith.constant 0 : i32
    return %arg0, %arg1, %c0_i32, %c0_i32_0 : i32, i32, i32, i32
  }
  func.func @transform_5(%arg0: i32, %arg1: i32) -> (i32, i32, i32, i32) {
    %c0_i32 = arith.constant 0 : i32
    %c0_i32_0 = arith.constant 0 : i32
    %c0_i32_1 = arith.constant 0 : i32
    return %arg0, %arg1, %c0_i32, %c0_i32_0 : i32, i32, i32, i32
  }
}

module attributes {stable_mosaic.version = 11 : i64} {
  func.func @kernel(%arg0: i32, %arg1: i32, %arg2: memref<3x2x2xf32, #tpu.memory_space<vmem>>, %arg3: memref<3x2x2xf32, #tpu.memory_space<vmem>>, %arg4: memref<3x2xbf16, #tpu.memory_space<vmem>>, %arg5: memref<2x128xbf16, #tpu.memory_space<vmem>>, %arg6: memref<1x1x1x1xf32, #tpu.memory_space<vmem>>, %arg7: memref<1x1x1x1xf32, #tpu.memory_space<vmem>>) attributes {dimension_semantics = [#tpu.dimension_semantics<parallel>, #tpu.dimension_semantics<parallel>], iteration_bounds = array<i64: 2, 1>, scalar_prefetch = 0 : i64, scratch_operands = 0 : i64, tpu.core_type = #tpu.core_type<tc>, window_params = [{transform_indices = @transform_0, window_bounds = array<i64: 3, 2, 2>}, {transform_indices = @transform_1, window_bounds = array<i64: 3, 2, 2>}, {pipeline_mode = #tpu.pipeline_mode<synchronous>, transform_indices = @transform_2, window_bounds = array<i64: 3, 2>}, {transform_indices = @transform_3, window_bounds = array<i64: 2, 128>}, {transform_indices = @transform_4, window_bounds = array<i64: 1, 1, 1, 1>}, {transform_indices = @transform_5, window_bounds = array<i64: 1, 1, 1, 1>}]} {
    %c0 = arith.constant 0 : index
    %c0_0 = arith.constant 0 : index
    %0 = vector.load %arg4[%c0, %c0_0] : memref<3x2xbf16, #tpu.memory_space<vmem>>, vector<3x2xbf16>
    %c0_1 = arith.constant 0 : index
    %c0_2 = arith.constant 0 : index
    %1 = vector.load %arg5[%c0_1, %c0_2] : memref<2x128xbf16, #tpu.memory_space<vmem>>, vector<2x128xbf16>
    %cst = arith.constant 0.000000e+00 : f32
    %2 = vector.broadcast %cst : f32 to vector<3x128xf32>
    %cst_3 = arith.constant 0.000000e+00 : f32
    %3 = vector.broadcast %cst_3 : f32 to vector<3x128xf32>
    %c0_4 = arith.constant 0 : index
    %c0_5 = arith.constant 0 : index
    %c0_6 = arith.constant 0 : index
    %4 = vector.load %arg2[%c0_4, %c0_5, %c0_6] : memref<3x2x2xf32, #tpu.memory_space<vmem>>, vector<1x2x2xf32>
    %5 = vector.shape_cast %4 : vector<1x2x2xf32> to vector<2x2xf32>
    %c0_7 = arith.constant 0 : index
    %c0_8 = arith.constant 0 : index
    %c0_9 = arith.constant 0 : index
    %6 = vector.load %arg3[%c0_7, %c0_8, %c0_9] : memref<3x2x2xf32, #tpu.memory_space<vmem>>, vector<1x2x2xf32>
    %7 = vector.shape_cast %6 : vector<1x2x2xf32> to vector<2x2xf32>
    %8 = arith.truncf %5 : vector<2x2xf32> to vector<2x2xbf16>
    %cst_10 = arith.constant dense<0.000000e+00> : vector<2x128xf32>
    %9 = tpu.matmul %8, %1, %cst_10 {dimension_numbers = #tpu.dot_dimension_numbers<[1], [0], [0], [1], [0, 0, 1, 1], [], []>} : vector<2x2xbf16>, vector<2x128xbf16>, vector<2x128xf32> -> vector<2x128xf32>
    %10 = arith.truncf %9 : vector<2x128xf32> to vector<2x128xbf16>
    %cst_11 = arith.constant dense<0.000000e+00> : vector<3x128xf32>
    %11 = tpu.matmul %0, %10, %cst_11 {dimension_numbers = #tpu.dot_dimension_numbers<[1], [0], [0], [1], [0, 0, 1, 1], [], []>} : vector<3x2xbf16>, vector<2x128xbf16>, vector<3x128xf32> -> vector<3x128xf32>
    %12 = arith.truncf %7 : vector<2x2xf32> to vector<2x2xbf16>
    %cst_12 = arith.constant dense<0.000000e+00> : vector<2x128xf32>
    %13 = tpu.matmul %12, %1, %cst_12 {dimension_numbers = #tpu.dot_dimension_numbers<[1], [0], [0], [1], [0, 0, 1, 1], [], []>} : vector<2x2xbf16>, vector<2x128xbf16>, vector<2x128xf32> -> vector<2x128xf32>
    %14 = arith.truncf %13 : vector<2x128xf32> to vector<2x128xbf16>
    %cst_13 = arith.constant dense<0.000000e+00> : vector<3x128xf32>
    %15 = tpu.matmul %0, %14, %cst_13 {dimension_numbers = #tpu.dot_dimension_numbers<[1], [0], [0], [1], [0, 0, 1, 1], [], []>} : vector<3x2xbf16>, vector<2x128xbf16>, vector<3x128xf32> -> vector<3x128xf32>
    %16 = arith.mulf %5, %5 : vector<2x2xf32>
    %17 = arith.truncf %16 : vector<2x2xf32> to vector<2x2xbf16>
    %cst_14 = arith.constant dense<0.000000e+00> : vector<2x128xf32>
    %18 = tpu.matmul %17, %1, %cst_14 {dimension_numbers = #tpu.dot_dimension_numbers<[1], [0], [0], [1], [0, 0, 1, 1], [], []>} : vector<2x2xbf16>, vector<2x128xbf16>, vector<2x128xf32> -> vector<2x128xf32>
    %19 = arith.truncf %18 : vector<2x128xf32> to vector<2x128xbf16>
    %cst_15 = arith.constant dense<0.000000e+00> : vector<3x128xf32>
    %20 = tpu.matmul %0, %19, %cst_15 {dimension_numbers = #tpu.dot_dimension_numbers<[1], [0], [0], [1], [0, 0, 1, 1], [], []>} : vector<3x2xbf16>, vector<2x128xbf16>, vector<3x128xf32> -> vector<3x128xf32>
    %21 = arith.mulf %7, %7 : vector<2x2xf32>
    %22 = arith.truncf %21 : vector<2x2xf32> to vector<2x2xbf16>
    %cst_16 = arith.constant dense<0.000000e+00> : vector<2x128xf32>
    %23 = tpu.matmul %22, %1, %cst_16 {dimension_numbers = #tpu.dot_dimension_numbers<[1], [0], [0], [1], [0, 0, 1, 1], [], []>} : vector<2x2xbf16>, vector<2x128xbf16>, vector<2x128xf32> -> vector<2x128xf32>
    %24 = arith.truncf %23 : vector<2x128xf32> to vector<2x128xbf16>
    %cst_17 = arith.constant dense<0.000000e+00> : vector<3x128xf32>
    %25 = tpu.matmul %0, %24, %cst_17 {dimension_numbers = #tpu.dot_dimension_numbers<[1], [0], [0], [1], [0, 0, 1, 1], [], []>} : vector<3x2xbf16>, vector<2x128xbf16>, vector<3x128xf32> -> vector<3x128xf32>
    %26 = arith.mulf %5, %7 : vector<2x2xf32>
    %27 = arith.truncf %26 : vector<2x2xf32> to vector<2x2xbf16>
    %cst_18 = arith.constant dense<0.000000e+00> : vector<2x128xf32>
    %28 = tpu.matmul %27, %1, %cst_18 {dimension_numbers = #tpu.dot_dimension_numbers<[1], [0], [0], [1], [0, 0, 1, 1], [], []>} : vector<2x2xbf16>, vector<2x128xbf16>, vector<2x128xf32> -> vector<2x128xf32>
    %29 = arith.truncf %28 : vector<2x128xf32> to vector<2x128xbf16>
    %cst_19 = arith.constant dense<0.000000e+00> : vector<3x128xf32>
    %30 = tpu.matmul %0, %29, %cst_19 {dimension_numbers = #tpu.dot_dimension_numbers<[1], [0], [0], [1], [0, 0, 1, 1], [], []>} : vector<3x2xbf16>, vector<2x128xbf16>, vector<3x128xf32> -> vector<3x128xf32>
    %31 = arith.mulf %11, %11 : vector<3x128xf32>
    %32 = arith.mulf %15, %15 : vector<3x128xf32>
    %33 = arith.mulf %11, %15 : vector<3x128xf32>
    %34 = arith.subf %20, %31 : vector<3x128xf32>
    %35 = arith.subf %25, %32 : vector<3x128xf32>
    %36 = arith.subf %30, %33 : vector<3x128xf32>
    %cst_20 = arith.constant 2.000000e+00 : f32
    %37 = vector.broadcast %cst_20 : f32 to vector<3x128xf32>
    %38 = arith.mulf %37, %36 : vector<3x128xf32>
    %cst_21 = arith.constant 8.99999984E-4 : f32
    %39 = vector.broadcast %cst_21 : f32 to vector<3x128xf32>
    %40 = arith.addf %38, %39 : vector<3x128xf32>
    %41 = arith.addf %34, %35 : vector<3x128xf32>
    %cst_22 = arith.constant 8.99999984E-4 : f32
    %42 = vector.broadcast %cst_22 : f32 to vector<3x128xf32>
    %43 = arith.addf %41, %42 : vector<3x128xf32>
    %44 = tpu.reciprocal %43 {approx = true} : vector<3x128xf32> -> vector<3x128xf32>
    %45 = arith.addf %31, %32 : vector<3x128xf32>
    %cst_23 = arith.constant 9.99999974E-5 : f32
    %46 = vector.broadcast %cst_23 : f32 to vector<3x128xf32>
    %47 = arith.addf %45, %46 : vector<3x128xf32>
    %48 = tpu.reciprocal %47 {approx = true} : vector<3x128xf32> -> vector<3x128xf32>
    %49 = arith.mulf %40, %44 : vector<3x128xf32>
    %cst_24 = arith.constant 2.000000e+00 : f32
    %50 = vector.broadcast %cst_24 : f32 to vector<3x128xf32>
    %51 = arith.mulf %50, %33 : vector<3x128xf32>
    %cst_25 = arith.constant 9.99999974E-5 : f32
    %52 = vector.broadcast %cst_25 : f32 to vector<3x128xf32>
    %53 = arith.addf %51, %52 : vector<3x128xf32>
    %54 = arith.mulf %53, %48 : vector<3x128xf32>
    %55 = arith.mulf %54, %49 : vector<3x128xf32>
    %56 = arith.addf %2, %55 : vector<3x128xf32>
    %57 = arith.addf %3, %49 : vector<3x128xf32>
    %c1 = arith.constant 1 : index
    %c0_26 = arith.constant 0 : index
    %c0_27 = arith.constant 0 : index
    %58 = vector.load %arg2[%c1, %c0_26, %c0_27] : memref<3x2x2xf32, #tpu.memory_space<vmem>>, vector<1x2x2xf32>
    %59 = vector.shape_cast %58 : vector<1x2x2xf32> to vector<2x2xf32>
    %c1_28 = arith.constant 1 : index
    %c0_29 = arith.constant 0 : index
    %c0_30 = arith.constant 0 : index
    %60 = vector.load %arg3[%c1_28, %c0_29, %c0_30] : memref<3x2x2xf32, #tpu.memory_space<vmem>>, vector<1x2x2xf32>
    %61 = vector.shape_cast %60 : vector<1x2x2xf32> to vector<2x2xf32>
    %62 = arith.truncf %59 : vector<2x2xf32> to vector<2x2xbf16>
    %cst_31 = arith.constant dense<0.000000e+00> : vector<2x128xf32>
    %63 = tpu.matmul %62, %1, %cst_31 {dimension_numbers = #tpu.dot_dimension_numbers<[1], [0], [0], [1], [0, 0, 1, 1], [], []>} : vector<2x2xbf16>, vector<2x128xbf16>, vector<2x128xf32> -> vector<2x128xf32>
    %64 = arith.truncf %63 : vector<2x128xf32> to vector<2x128xbf16>
    %cst_32 = arith.constant dense<0.000000e+00> : vector<3x128xf32>
    %65 = tpu.matmul %0, %64, %cst_32 {dimension_numbers = #tpu.dot_dimension_numbers<[1], [0], [0], [1], [0, 0, 1, 1], [], []>} : vector<3x2xbf16>, vector<2x128xbf16>, vector<3x128xf32> -> vector<3x128xf32>
    %66 = arith.truncf %61 : vector<2x2xf32> to vector<2x2xbf16>
    %cst_33 = arith.constant dense<0.000000e+00> : vector<2x128xf32>
    %67 = tpu.matmul %66, %1, %cst_33 {dimension_numbers = #tpu.dot_dimension_numbers<[1], [0], [0], [1], [0, 0, 1, 1], [], []>} : vector<2x2xbf16>, vector<2x128xbf16>, vector<2x128xf32> -> vector<2x128xf32>
    %68 = arith.truncf %67 : vector<2x128xf32> to vector<2x128xbf16>
    %cst_34 = arith.constant dense<0.000000e+00> : vector<3x128xf32>
    %69 = tpu.matmul %0, %68, %cst_34 {dimension_numbers = #tpu.dot_dimension_numbers<[1], [0], [0], [1], [0, 0, 1, 1], [], []>} : vector<3x2xbf16>, vector<2x128xbf16>, vector<3x128xf32> -> vector<3x128xf32>
    %70 = arith.mulf %59, %59 : vector<2x2xf32>
    %71 = arith.truncf %70 : vector<2x2xf32> to vector<2x2xbf16>
    %cst_35 = arith.constant dense<0.000000e+00> : vector<2x128xf32>
    %72 = tpu.matmul %71, %1, %cst_35 {dimension_numbers = #tpu.dot_dimension_numbers<[1], [0], [0], [1], [0, 0, 1, 1], [], []>} : vector<2x2xbf16>, vector<2x128xbf16>, vector<2x128xf32> -> vector<2x128xf32>
    %73 = arith.truncf %72 : vector<2x128xf32> to vector<2x128xbf16>
    %cst_36 = arith.constant dense<0.000000e+00> : vector<3x128xf32>
    %74 = tpu.matmul %0, %73, %cst_36 {dimension_numbers = #tpu.dot_dimension_numbers<[1], [0], [0], [1], [0, 0, 1, 1], [], []>} : vector<3x2xbf16>, vector<2x128xbf16>, vector<3x128xf32> -> vector<3x128xf32>
    %75 = arith.mulf %61, %61 : vector<2x2xf32>
    %76 = arith.truncf %75 : vector<2x2xf32> to vector<2x2xbf16>
    %cst_37 = arith.constant dense<0.000000e+00> : vector<2x128xf32>
    %77 = tpu.matmul %76, %1, %cst_37 {dimension_numbers = #tpu.dot_dimension_numbers<[1], [0], [0], [1], [0, 0, 1, 1], [], []>} : vector<2x2xbf16>, vector<2x128xbf16>, vector<2x128xf32> -> vector<2x128xf32>
    %78 = arith.truncf %77 : vector<2x128xf32> to vector<2x128xbf16>
    %cst_38 = arith.constant dense<0.000000e+00> : vector<3x128xf32>
    %79 = tpu.matmul %0, %78, %cst_38 {dimension_numbers = #tpu.dot_dimension_numbers<[1], [0], [0], [1], [0, 0, 1, 1], [], []>} : vector<3x2xbf16>, vector<2x128xbf16>, vector<3x128xf32> -> vector<3x128xf32>
    %80 = arith.mulf %59, %61 : vector<2x2xf32>
    %81 = arith.truncf %80 : vector<2x2xf32> to vector<2x2xbf16>
    %cst_39 = arith.constant dense<0.000000e+00> : vector<2x128xf32>
    %82 = tpu.matmul %81, %1, %cst_39 {dimension_numbers = #tpu.dot_dimension_numbers<[1], [0], [0], [1], [0, 0, 1, 1], [], []>} : vector<2x2xbf16>, vector<2x128xbf16>, vector<2x128xf32> -> vector<2x128xf32>
    %83 = arith.truncf %82 : vector<2x128xf32> to vector<2x128xbf16>
    %cst_40 = arith.constant dense<0.000000e+00> : vector<3x128xf32>
    %84 = tpu.matmul %0, %83, %cst_40 {dimension_numbers = #tpu.dot_dimension_numbers<[1], [0], [0], [1], [0, 0, 1, 1], [], []>} : vector<3x2xbf16>, vector<2x128xbf16>, vector<3x128xf32> -> vector<3x128xf32>
    %85 = arith.mulf %65, %65 : vector<3x128xf32>
    %86 = arith.mulf %69, %69 : vector<3x128xf32>
    %87 = arith.mulf %65, %69 : vector<3x128xf32>
    %88 = arith.subf %74, %85 : vector<3x128xf32>
    %89 = arith.subf %79, %86 : vector<3x128xf32>
    %90 = arith.subf %84, %87 : vector<3x128xf32>
    %cst_41 = arith.constant 2.000000e+00 : f32
    %91 = vector.broadcast %cst_41 : f32 to vector<3x128xf32>
    %92 = arith.mulf %91, %90 : vector<3x128xf32>
    %cst_42 = arith.constant 8.99999984E-4 : f32
    %93 = vector.broadcast %cst_42 : f32 to vector<3x128xf32>
    %94 = arith.addf %92, %93 : vector<3x128xf32>
    %95 = arith.addf %88, %89 : vector<3x128xf32>
    %cst_43 = arith.constant 8.99999984E-4 : f32
    %96 = vector.broadcast %cst_43 : f32 to vector<3x128xf32>
    %97 = arith.addf %95, %96 : vector<3x128xf32>
    %98 = tpu.reciprocal %97 {approx = true} : vector<3x128xf32> -> vector<3x128xf32>
    %99 = arith.addf %85, %86 : vector<3x128xf32>
    %cst_44 = arith.constant 9.99999974E-5 : f32
    %100 = vector.broadcast %cst_44 : f32 to vector<3x128xf32>
    %101 = arith.addf %99, %100 : vector<3x128xf32>
    %102 = tpu.reciprocal %101 {approx = true} : vector<3x128xf32> -> vector<3x128xf32>
    %103 = arith.mulf %94, %98 : vector<3x128xf32>
    %cst_45 = arith.constant 2.000000e+00 : f32
    %104 = vector.broadcast %cst_45 : f32 to vector<3x128xf32>
    %105 = arith.mulf %104, %87 : vector<3x128xf32>
    %cst_46 = arith.constant 9.99999974E-5 : f32
    %106 = vector.broadcast %cst_46 : f32 to vector<3x128xf32>
    %107 = arith.addf %105, %106 : vector<3x128xf32>
    %108 = arith.mulf %107, %102 : vector<3x128xf32>
    %109 = arith.mulf %108, %103 : vector<3x128xf32>
    %110 = arith.addf %56, %109 : vector<3x128xf32>
    %111 = arith.addf %57, %103 : vector<3x128xf32>
    %c2 = arith.constant 2 : index
    %c0_47 = arith.constant 0 : index
    %c0_48 = arith.constant 0 : index
    %112 = vector.load %arg2[%c2, %c0_47, %c0_48] : memref<3x2x2xf32, #tpu.memory_space<vmem>>, vector<1x2x2xf32>
    %113 = vector.shape_cast %112 : vector<1x2x2xf32> to vector<2x2xf32>
    %c2_49 = arith.constant 2 : index
    %c0_50 = arith.constant 0 : index
    %c0_51 = arith.constant 0 : index
    %114 = vector.load %arg3[%c2_49, %c0_50, %c0_51] : memref<3x2x2xf32, #tpu.memory_space<vmem>>, vector<1x2x2xf32>
    %115 = vector.shape_cast %114 : vector<1x2x2xf32> to vector<2x2xf32>
    %116 = arith.truncf %113 : vector<2x2xf32> to vector<2x2xbf16>
    %cst_52 = arith.constant dense<0.000000e+00> : vector<2x128xf32>
    %117 = tpu.matmul %116, %1, %cst_52 {dimension_numbers = #tpu.dot_dimension_numbers<[1], [0], [0], [1], [0, 0, 1, 1], [], []>} : vector<2x2xbf16>, vector<2x128xbf16>, vector<2x128xf32> -> vector<2x128xf32>
    %118 = arith.truncf %117 : vector<2x128xf32> to vector<2x128xbf16>
    %cst_53 = arith.constant dense<0.000000e+00> : vector<3x128xf32>
    %119 = tpu.matmul %0, %118, %cst_53 {dimension_numbers = #tpu.dot_dimension_numbers<[1], [0], [0], [1], [0, 0, 1, 1], [], []>} : vector<3x2xbf16>, vector<2x128xbf16>, vector<3x128xf32> -> vector<3x128xf32>
    %120 = arith.truncf %115 : vector<2x2xf32> to vector<2x2xbf16>
    %cst_54 = arith.constant dense<0.000000e+00> : vector<2x128xf32>
    %121 = tpu.matmul %120, %1, %cst_54 {dimension_numbers = #tpu.dot_dimension_numbers<[1], [0], [0], [1], [0, 0, 1, 1], [], []>} : vector<2x2xbf16>, vector<2x128xbf16>, vector<2x128xf32> -> vector<2x128xf32>
    %122 = arith.truncf %121 : vector<2x128xf32> to vector<2x128xbf16>
    %cst_55 = arith.constant dense<0.000000e+00> : vector<3x128xf32>
    %123 = tpu.matmul %0, %122, %cst_55 {dimension_numbers = #tpu.dot_dimension_numbers<[1], [0], [0], [1], [0, 0, 1, 1], [], []>} : vector<3x2xbf16>, vector<2x128xbf16>, vector<3x128xf32> -> vector<3x128xf32>
    %124 = arith.mulf %113, %113 : vector<2x2xf32>
    %125 = arith.truncf %124 : vector<2x2xf32> to vector<2x2xbf16>
    %cst_56 = arith.constant dense<0.000000e+00> : vector<2x128xf32>
    %126 = tpu.matmul %125, %1, %cst_56 {dimension_numbers = #tpu.dot_dimension_numbers<[1], [0], [0], [1], [0, 0, 1, 1], [], []>} : vector<2x2xbf16>, vector<2x128xbf16>, vector<2x128xf32> -> vector<2x128xf32>
    %127 = arith.truncf %126 : vector<2x128xf32> to vector<2x128xbf16>
    %cst_57 = arith.constant dense<0.000000e+00> : vector<3x128xf32>
    %128 = tpu.matmul %0, %127, %cst_57 {dimension_numbers = #tpu.dot_dimension_numbers<[1], [0], [0], [1], [0, 0, 1, 1], [], []>} : vector<3x2xbf16>, vector<2x128xbf16>, vector<3x128xf32> -> vector<3x128xf32>
    %129 = arith.mulf %115, %115 : vector<2x2xf32>
    %130 = arith.truncf %129 : vector<2x2xf32> to vector<2x2xbf16>
    %cst_58 = arith.constant dense<0.000000e+00> : vector<2x128xf32>
    %131 = tpu.matmul %130, %1, %cst_58 {dimension_numbers = #tpu.dot_dimension_numbers<[1], [0], [0], [1], [0, 0, 1, 1], [], []>} : vector<2x2xbf16>, vector<2x128xbf16>, vector<2x128xf32> -> vector<2x128xf32>
    %132 = arith.truncf %131 : vector<2x128xf32> to vector<2x128xbf16>
    %cst_59 = arith.constant dense<0.000000e+00> : vector<3x128xf32>
    %133 = tpu.matmul %0, %132, %cst_59 {dimension_numbers = #tpu.dot_dimension_numbers<[1], [0], [0], [1], [0, 0, 1, 1], [], []>} : vector<3x2xbf16>, vector<2x128xbf16>, vector<3x128xf32> -> vector<3x128xf32>
    %134 = arith.mulf %113, %115 : vector<2x2xf32>
    %135 = arith.truncf %134 : vector<2x2xf32> to vector<2x2xbf16>
    %cst_60 = arith.constant dense<0.000000e+00> : vector<2x128xf32>
    %136 = tpu.matmul %135, %1, %cst_60 {dimension_numbers = #tpu.dot_dimension_numbers<[1], [0], [0], [1], [0, 0, 1, 1], [], []>} : vector<2x2xbf16>, vector<2x128xbf16>, vector<2x128xf32> -> vector<2x128xf32>
    %137 = arith.truncf %136 : vector<2x128xf32> to vector<2x128xbf16>
    %cst_61 = arith.constant dense<0.000000e+00> : vector<3x128xf32>
    %138 = tpu.matmul %0, %137, %cst_61 {dimension_numbers = #tpu.dot_dimension_numbers<[1], [0], [0], [1], [0, 0, 1, 1], [], []>} : vector<3x2xbf16>, vector<2x128xbf16>, vector<3x128xf32> -> vector<3x128xf32>
    %139 = arith.mulf %119, %119 : vector<3x128xf32>
    %140 = arith.mulf %123, %123 : vector<3x128xf32>
    %141 = arith.mulf %119, %123 : vector<3x128xf32>
    %142 = arith.subf %128, %139 : vector<3x128xf32>
    %143 = arith.subf %133, %140 : vector<3x128xf32>
    %144 = arith.subf %138, %141 : vector<3x128xf32>
    %cst_62 = arith.constant 2.000000e+00 : f32
    %145 = vector.broadcast %cst_62 : f32 to vector<3x128xf32>
    %146 = arith.mulf %145, %144 : vector<3x128xf32>
    %cst_63 = arith.constant 8.99999984E-4 : f32
    %147 = vector.broadcast %cst_63 : f32 to vector<3x128xf32>
    %148 = arith.addf %146, %147 : vector<3x128xf32>
    %149 = arith.addf %142, %143 : vector<3x128xf32>
    %cst_64 = arith.constant 8.99999984E-4 : f32
    %150 = vector.broadcast %cst_64 : f32 to vector<3x128xf32>
    %151 = arith.addf %149, %150 : vector<3x128xf32>
    %152 = tpu.reciprocal %151 {approx = true} : vector<3x128xf32> -> vector<3x128xf32>
    %153 = arith.addf %139, %140 : vector<3x128xf32>
    %cst_65 = arith.constant 9.99999974E-5 : f32
    %154 = vector.broadcast %cst_65 : f32 to vector<3x128xf32>
    %155 = arith.addf %153, %154 : vector<3x128xf32>
    %156 = tpu.reciprocal %155 {approx = true} : vector<3x128xf32> -> vector<3x128xf32>
    %157 = arith.mulf %148, %152 : vector<3x128xf32>
    %cst_66 = arith.constant 2.000000e+00 : f32
    %158 = vector.broadcast %cst_66 : f32 to vector<3x128xf32>
    %159 = arith.mulf %158, %141 : vector<3x128xf32>
    %cst_67 = arith.constant 9.99999974E-5 : f32
    %160 = vector.broadcast %cst_67 : f32 to vector<3x128xf32>
    %161 = arith.addf %159, %160 : vector<3x128xf32>
    %162 = arith.mulf %161, %156 : vector<3x128xf32>
    %163 = arith.mulf %162, %157 : vector<3x128xf32>
    %164 = arith.addf %110, %163 : vector<3x128xf32>
    %165 = arith.addf %111, %157 : vector<3x128xf32>
    %166 = tpu.iota {dimensions = array<i32: 1>} : vector<3x128xi32>
    %c128_i32 = arith.constant 128 : i32
    %167 = arith.muli %arg1, %c128_i32 : i32
    %168 = vector.broadcast %167 : i32 to vector<3x128xi32>
    %169 = arith.addi %166, %168 : vector<3x128xi32>
    %c3_i32 = arith.constant 3 : i32
    %170 = vector.broadcast %c3_i32 : i32 to vector<3x128xi32>
    %171 = arith.cmpi slt, %169, %170 : vector<3x128xi32>
    %172 = arith.extui %171 : vector<3x128xi1> to vector<3x128xi32>
    %173 = arith.sitofp %172 : vector<3x128xi32> to vector<3x128xf32>
    %174 = arith.mulf %164, %173 : vector<3x128xf32>
    %175 = arith.mulf %165, %173 : vector<3x128xf32>
    %176 = vector.shape_cast %174 : vector<3x128xf32> to vector<1x3x128xf32>
    %cst_68 = arith.constant dense<0.000000e+00> : vector<1xf32>
    %177 = vector.multi_reduction <add>, %176, %cst_68 [1, 2] : vector<1x3x128xf32> to vector<1xf32>
    %178 = vector.shape_cast %177 : vector<1xf32> to vector<1x1x1xf32>
    %179 = vector.extract %178[0, 0, 0] : f32 from vector<1x1x1xf32>
    %180 = vector.broadcast %179 : f32 to vector<1x1xf32>
    %c0_69 = arith.constant 0 : index
    %c0_70 = arith.constant 0 : index
    %c0_71 = arith.constant 0 : index
    %c0_72 = arith.constant 0 : index
    %181 = vector.load %arg6[%c0_69, %c0_70, %c0_71, %c0_72] : memref<1x1x1x1xf32, #tpu.memory_space<vmem>>, vector<1x1x1x1xf32>
    %182 = vector.shape_cast %181 : vector<1x1x1x1xf32> to vector<1x1xf32>
    %183 = vector.shape_cast %180 : vector<1x1xf32> to vector<1x1x1x1xf32>
    tpu.vector_store %arg6[%c0_69, %c0_70, %c0_71, %c0_72], %183 {strides = array<i32>} : memref<1x1x1x1xf32, #tpu.memory_space<vmem>>, vector<1x1x1x1xf32>,
    %184 = vector.shape_cast %175 : vector<3x128xf32> to vector<1x3x128xf32>
    %cst_73 = arith.constant dense<0.000000e+00> : vector<1xf32>
    %185 = vector.multi_reduction <add>, %184, %cst_73 [1, 2] : vector<1x3x128xf32> to vector<1xf32>
    %186 = vector.shape_cast %185 : vector<1xf32> to vector<1x1x1xf32>
    %187 = vector.extract %186[0, 0, 0] : f32 from vector<1x1x1xf32>
    %188 = vector.broadcast %187 : f32 to vector<1x1xf32>
    %c0_74 = arith.constant 0 : index
    %c0_75 = arith.constant 0 : index
    %c0_76 = arith.constant 0 : index
    %c0_77 = arith.constant 0 : index
    %189 = vector.load %arg7[%c0_74, %c0_75, %c0_76, %c0_77] : memref<1x1x1x1xf32, #tpu.memory_space<vmem>>, vector<1x1x1x1xf32>
    %190 = vector.shape_cast %189 : vector<1x1x1x1xf32> to vector<1x1xf32>
    %191 = vector.shape_cast %188 : vector<1x1xf32> to vector<1x1x1x1xf32>
    tpu.vector_store %arg7[%c0_74, %c0_75, %c0_76, %c0_77], %191 {strides = array<i32>} : memref<1x1x1x1xf32, #tpu.memory_space<vmem>>, vector<1x1x1x1xf32>,
    return
  }
  func.func @transform_0(%arg0: i32, %arg1: i32) -> (i32, i32, i32) {
    %c0_i32 = arith.constant 0 : i32
    %c0_i32_0 = arith.constant 0 : i32
    %c0_i32_1 = arith.constant 0 : i32
    return %arg0, %c0_i32, %c0_i32_0 : i32, i32, i32
  }
  func.func @transform_1(%arg0: i32, %arg1: i32) -> (i32, i32, i32) {
    %c0_i32 = arith.constant 0 : i32
    %c0_i32_0 = arith.constant 0 : i32
    %c0_i32_1 = arith.constant 0 : i32
    return %arg0, %c0_i32, %c0_i32_0 : i32, i32, i32
  }
  func.func @transform_2(%arg0: i32, %arg1: i32) -> (i32, i32) {
    %c0_i32 = arith.constant 0 : i32
    %c0_i32_0 = arith.constant 0 : i32
    %c0_i32_1 = arith.constant 0 : i32
    return %c0_i32, %c0_i32_0 : i32, i32
  }
  func.func @transform_3(%arg0: i32, %arg1: i32) -> (i32, i32) {
    %c0_i32 = arith.constant 0 : i32
    %c0_i32_0 = arith.constant 0 : i32
    return %c0_i32, %arg1 : i32, i32
  }
  func.func @transform_4(%arg0: i32, %arg1: i32) -> (i32, i32, i32, i32) {
    %c0_i32 = arith.constant 0 : i32
    %c0_i32_0 = arith.constant 0 : i32
    %c0_i32_1 = arith.constant 0 : i32
    return %arg0, %arg1, %c0_i32, %c0_i32_0 : i32, i32, i32, i32
  }
  func.func @transform_5(%arg0: i32, %arg1: i32) -> (i32, i32, i32, i32) {
    %c0_i32 = arith.constant 0 : i32
    %c0_i32_0 = arith.constant 0 : i32
    %c0_i32_1 = arith.constant 0 : i32
    return %arg0, %arg1, %c0_i32, %c0_i32_0 : i32, i32, i32, i32
  }
}

module attributes {stable_mosaic.version = 11 : i64} {
  func.func @_logsum_kernel(%arg0: i32, %arg1: memref<8x128xf32, #tpu.memory_space<vmem>>, %arg2: memref<1x1x128xf32, #tpu.memory_space<vmem>>) attributes {dimension_semantics = [#tpu.dimension_semantics<parallel>], iteration_bounds = array<i64: 1>, scalar_prefetch = 0 : i64, scratch_operands = 0 : i64, tpu.core_type = #tpu.core_type<tc>, window_params = [{transform_indices = @transform_0, window_bounds = array<i64: 8, 128>}, {transform_indices = @transform_1, window_bounds = array<i64: 1, 1, 128>}]} {
    %c0 = arith.constant 0 : index
    %c0_0 = arith.constant 0 : index
    %0 = vector.load %arg1[%c0, %c0_0] : memref<8x128xf32, #tpu.memory_space<vmem>>, vector<8x128xf32>
    %1 = math.log %0 : vector<8x128xf32>
    %cst = arith.constant dense<0.000000e+00> : vector<128xf32>
    %2 = vector.multi_reduction <add>, %1, %cst [0] : vector<8x128xf32> to vector<128xf32>
    %3 = vector.shape_cast %2 : vector<128xf32> to vector<1x128xf32>
    %c0_1 = arith.constant 0 : index
    %c0_2 = arith.constant 0 : index
    %c0_3 = arith.constant 0 : index
    %4 = vector.load %arg2[%c0_1, %c0_2, %c0_3] : memref<1x1x128xf32, #tpu.memory_space<vmem>>, vector<1x1x128xf32>
    %5 = vector.shape_cast %4 : vector<1x1x128xf32> to vector<1x128xf32>
    %6 = vector.shape_cast %3 : vector<1x128xf32> to vector<1x1x128xf32>
    tpu.vector_store %arg2[%c0_1, %c0_2, %c0_3], %6 {strides = array<i32>} : memref<1x1x128xf32, #tpu.memory_space<vmem>>, vector<1x1x128xf32>,
    return
  }
  func.func @transform_0(%arg0: i32) -> (i32, i32) {
    %c0_i32 = arith.constant 0 : i32
    %c0_i32_0 = arith.constant 0 : i32
    return %arg0, %c0_i32 : i32, i32
  }
  func.func @transform_1(%arg0: i32) -> (i32, i32, i32) {
    %c0_i32 = arith.constant 0 : i32
    %c0_i32_0 = arith.constant 0 : i32
    %c0_i32_1 = arith.constant 0 : i32
    return %arg0, %c0_i32, %c0_i32_0 : i32, i32, i32
  }
}

</mosaic_0001>

<bundles_post_ra>
// kernel: _dvc_loss_device.12
= control target key start
LH: loop header
LB: loop body
LE: loop exit
PB: predicated region body
PF: predicated region fallthrough
CT: control target
= control target key end

     0   :  { %11 = vsyncpa [#allocation3], 0  ;;  %s2689_s0 = inlined_call_operand.vmem [shape: f32[6,4,4], index: 0, kind: input, shape index: {}]   ;;  %s2690_s1 = inlined_call_operand.vmem [shape: f32[6,4,4], index: 1, kind: input, shape index: {}]   ;;  %s2691_s2 = inlined_call_operand.vmem [shape: bf16[5,4], index: 2, kind: input, shape index: {}]   ;;  %s2692_s3 = inlined_call_operand.vmem [shape: bf16[4,128], index: 3, kind: input, shape index: {}]   ;;  %s2693_s4 = inlined_call_operand.hbm [shape: f32[2,1,1,1], index: 4, kind: output, shape index: {0}]   ;;  %s2694_s5 = inlined_call_operand.vmem [shape: f32[2,1,1,1], index: 5, kind: output, shape index: {1}]  }
   0x1   :  { %13 = vsyncpa [#allocation3 + $0x1], 0  ;;  %s2355_s18 = smov 0   ;;  %s2357_s19 = smov 0  }
   0x2   :  { %s2359_s20 = smov 0   ;;  %s2361_s21 = smov 0  }
   0x3   :  { %s2363_s22 = smov 0   ;;  %s2365_s23 = smov 0  }
   0x4 LB: > { %s1883_s24 = sadd.s32 4294967295, %s2320_s23   ;;  %s1884_s25 = sadd.s32 4294967294, %s2320_s23   ;;  %s2320_s23 = sphi %s2365_s23, %s19_s23   ;;  %s2316_s22 = sphi %s2363_s22, %s2701_s22   ;;  %s2312_s21 = sphi %s2361_s21, %s2700_s21   ;;  %s2308_s20 = sphi %s2359_s20, %s2699_s20   ;;  %s2304_s19 = sphi %s2357_s19, %s2698_s19   ;;  %s2300_s18 = sphi %s2355_s18, %s2697_s18  }
   0x5   : > { %s31_s26 = sadd.s32 1, %s2316_s22  ;;  %s139_s27 = sadd.s32 1, %s2308_s20 }
   0x6   : > { %p33_p0 = scmp.ge.s32.totalorder %s31_s26, 2  ;;  %p149_p1 = scmp.ne.s32.totalorder %s2308_s20, %s2304_s19 }
   0x7   : > { %p150_p2 = scmp.eq.s32.totalorder %s1883_s24, 1  ;;  %p155_p3 = scmp.ne.s32.totalorder %s2304_s19, %s2300_s18 }
   0x8   : > { %s2703_s26 = smov (%p33_p0, %s31_s26), 0  ;;  %p156_p5 = scmp.eq.s32.totalorder %s1884_s25, 1 }
   0x9   : > { %p2395_p4 = por %p150_p2, %p149_p1  ;;  %s134_s29 = ssub.s32 %s2316_s22, %s2703_s26 }
   0xa   : > { %p1888_p6 = scmp.ge.s32.totalorder %s2320_s23, 1  ;;  %p137_p7 = scmp.eq.s32.totalorder %s134_s29, 0 }
   0xb   : > { %p2402_p8 = por %p156_p5, %p155_p3  ;;  %p230_p9 = scmp.lt.s32.totalorder %s2320_s23, 3 }
   0xc   : > { %s2408_s6 = scalar_select %p137_p7, %s2308_s20, %s139_s27  }
   0xd   : > { %p231_p10 = pnand %p1888_p6, %p230_p9 }
   0xe   : > { %v296_v0 = vld [vmem:[%s2692_s3] sm:$0x3] (!%p231_p10)  ;;  %vm304_vm0 = vcmask (!%p231_p10), 1041408   ;;  %s272_s9 = smul.u32 (!%p231_p10), 3, %s2312_s21  ;;  %v2322_v1 = vmov (!%p231_p10), 0.0   ;;  %vm2323_vm1 = vmmov (!%p231_p10), 0  }
   0xf   : > { %234 = sbr.rel (%p231_p10) target bundleno = 810 (0x32a), region = 36  ;;  %1989 = vmatprep.subr.bf16.mxu0 (!%p231_p10), %v2322_v1  ;;  %v2416_v2 = vsel (!%p231_p10), %vm304_vm0, %v296_v0, 0  ;;  %1991 = vmatprep.mubr.msk.bf16.mxu0 (!%p231_p10), %vm2323_vm1, %v2322_v1  ;;  %vm300_vm2 = vcmask (!%p231_p10), 31744   ;;  %v2533_v39 = vld [vmem:[%s2691_s2] sm:$0x7] (!%p231_p10)  ;;  %vm1717_vm4 = vcmask (!%p231_p10), 1044480  }
  0x10   : > { %1990 = vmatpush3.bf16.msra.mxu0 (!%p231_p10), %v2416_v2  ;;  %p273_p11 = scmp.lt.s32.totalorder (!%p231_p10), %s272_s9, 5  ;;  %1995 = vmatprep.subr.bf16.mxu1 (!%p231_p10), %v2322_v1  ;;  %s262_s25 = sand.u32 (!%p231_p10), 1, %s2304_s19   ;;  %vm1729_vm5 = vcmask (!%p231_p10), 0  }
  0x11   : > { %2001 = vmatprep.subr.bf16.mxu0 (!%p231_p10), %v2322_v1  ;;  %1997 = vmatprep.mubr.msk.bf16.mxu1 (!%p231_p10), %vm2323_vm1, %v2322_v1  ;;  %p288_p12 = scmp.lt.s32.totalorder (!%p231_p10), %s2312_s21, 1  ;;  %s1926_s27 = sshll.u32 (!%p231_p10), %s2312_s21, 4 }
  0x12   : > { %s263_s29 = scalar_lea.vmem (!%p231_p10), [#allocation2], %s262_s25  ;;  %s1744_s15 = scalar_lea.sflag (!%p231_p10), [#allocation3], %s262_s25 }
  0x13   : > { %s1763_s7 = sshll.u32 (!%p231_p10), %s263_s29, 4  ;;  %s2324_s17 = smov (!%p231_p10), [#allocation2]   ;;  %s2633_s7 = int_to_ptr.vmem [resolvable:$true] %s1763_s7 }
  0x14   : > { %s2246_s24 = sshll.u32 (!%p231_p10), %s2324_s17, 4  ;;  %s2247_s24 = int_to_ptr.vmem [resolvable:$false] %s2246_s24 }
  0x15   : > { %p2249_p2 = scmp.lt.s32.totalorder (!%p231_p10), %s2633_s7, %s2247_s24 }
  0x16   : > { %s2705_s9 = smov (!%p273_p11, %s272_s9), 5  ;;  %s2707_s21 = smov (!%p288_p12, %s2312_s21), 1 }
  0x17   : > { %s1889_s10 = sshll.u32 %s2705_s9, 2  ;;  %s293_s14 = scalar_lea.vmem %s2694_s5, %s2707_s21 }
  0x18   : > { %s2428_s13 = scalar_lea.vmem %s2689_s0, %s1889_s10  ;;  %s2434_s16 = scalar_lea.vmem %s2690_s1, %s1889_s10 }
  0x19   : > { %v297_v3 = vld [vmem:[%s2428_s13] sm:$0xf]  ;;  %v2443_v6 = vld [vmem:[%s2428_s13 + $0x8] sm:$0xf]  ;;  %v1901_v16 = vld [vmem:[%s2428_s13 + $0x4] sm:$0xf]  ;;  %s2631_s10 = scalar_lea.hbm %s2693_s4, %s1926_s27 }
  0x1a   : > { %v299_v4 = vpack.c.bf16 %v297_v3, %v297_v3  ;;  %v298_v5 = vld [vmem:[%s2434_s16] sm:$0xf]  ;;  %v2446_v7 = vld [vmem:[%s2434_s16 + $0x8] sm:$0xf]  ;;  %v483_v10 = vmul.f32 %v297_v3, %v297_v3  ;;  %v775_v17 = vpack.c.bf16 %v1901_v16, %v1901_v16  ;;  %v1902_v18 = vld [vmem:[%s2434_s16 + $0x4] sm:$0xf]  ;;  %v951_v20 = vmul.f32 %v1901_v16, %v1901_v16 }
  0x1b   : > { %v2450_v8 = vmul.f32 %v2446_v7, %v2443_v6  ;;  %v395_v9 = vpack.c.bf16 %v298_v5, %v298_v5  ;;  %v572_v12 = vmul.f32 %v298_v5, %v298_v5  ;;  %v661_v14 = vmul.f32 %v298_v5, %v297_v3  ;;  %s2242_s16 = scalar_lea.vmem %s2633_s7, 16  ;;  %s2248_s27 = scalar_lea.vmem %s2247_s24, 32 }
  0x1c   : > { %1992 = vmatmul.mubr.msk.bf16.vlgmr.msra.gmra.mrb[0].mxu0 %vm300_vm2, %v299_v4  ;;  %v484_v11 = vpack.c.bf16 %v483_v10, %v483_v10  ;;  %v863_v19 = vpack.c.bf16 %v1902_v18, %v1902_v18  ;;  %v952_v21 = vpack.c.bf16 %v951_v20, %v951_v20  ;;  %v1040_v22 = vmul.f32 %v1902_v18, %v1902_v18  ;;  %p2243_p13 = scmp.ne.s32.totalorder %s2633_s7, %s2242_s16  ;;  %p2250_p3 = scmp.lt.s32.totalorder %s2248_s27, %s2242_s16 }
  0x1d   : > { %2002 = vmatpush3.bf16.msra.mxu0 %v2416_v2  ;;  %2003 = vmatprep.mubr.msk.bf16.mxu0 %vm2323_vm1, %v2322_v1  ;;  %v573_v13 = vpack.c.bf16 %v572_v12, %v572_v12  ;;  %v662_v15 = vpack.c.bf16 %v661_v14, %v661_v14  ;;  %v1129_v24 = vmul.f32 %v1902_v18, %v1901_v16 }
  0x1e   : > { %2013 = vmatprep.subr.bf16.mxu0 %v2322_v1  ;;  %v1041_v23 = vpack.c.bf16 %v1040_v22, %v1040_v22  ;;  %v1243_v26 = vpack.c.bf16 %v2443_v6, %v2443_v6  ;;  %v1331_v27 = vpack.c.bf16 %v2446_v7, %v2446_v7  ;;  %v1419_v28 = vmul.f32 %v2443_v6, %v2443_v6  ;;  %p2244_p0 = pnand %p2243_p13, %p2395_p4  ;;  %p2251_p5 = por %p2250_p3, %p2249_p2 }
  0x1f   : > { %v1130_v25 = vpack.c.bf16 %v1129_v24, %v1129_v24  ;;  %v1508_v30 = vmul.f32 %v2446_v7, %v2446_v7  ;;  %v1598_v32 = vpack.c.bf16 %v2450_v8, %v2450_v8 }
  0x20   : > { %v1420_v29 = vpack.c.bf16 %v1419_v28, %v1419_v28  ;;  %p2245_p1 = pneg %p2244_p0 }
  0x21   : > { %v1509_v31 = vpack.c.bf16 %v1508_v30, %v1508_v30 }
  0x22   : > { %p2252_p6 = pnand %p2251_p5, %p2245_p1 }
  0x24   : > { %2004 = vmatmul.mubr.msk.bf16.vlgmr.msra.gmra.mrb[4].mxu0 %vm300_vm2, %v395_v9 }
  0x25   : > { %2014 = vmatpush3.bf16.msra.mxu0 %v2416_v2  ;;  %2015 = vmatprep.mubr.msk.bf16.mxu0 %vm2323_vm1, %v2322_v1 }
  0x26   : > { %2025 = vmatprep.subr.bf16.mxu0 %v2322_v1 }
  0x2c   : > { %2016 = vmatmul.mubr.msk.bf16.vlgmr.msra.gmra.mrb[8].mxu0 %vm300_vm2, %v484_v11 }
  0x2d   : > { %2026 = vmatpush3.bf16.msra.mxu0 %v2416_v2  ;;  %2027 = vmatprep.mubr.msk.bf16.mxu0 %vm2323_vm1, %v2322_v1 }
  0x2e   : > { %2037 = vmatprep.subr.bf16.mxu0 %v2322_v1 }
  0x34   : > { %2028 = vmatmul.mubr.msk.bf16.vlgmr.msra.gmra.mrb[12].mxu0 %vm300_vm2, %v573_v13 }
  0x35   : > { %2038 = vmatpush3.bf16.msra.mxu0 %v2416_v2  ;;  %2039 = vmatprep.mubr.msk.bf16.mxu0 %vm2323_vm1, %v2322_v1 }
  0x36   : > { %2049 = vmatprep.subr.bf16.mxu0 %v2322_v1 }
  0x3c   : > { %2040 = vmatmul.mubr.msk.bf16.vlgmr.msra.gmra.mrb[16].mxu0 %vm300_vm2, %v662_v15 }
  0x3d   : > { %2050 = vmatpush3.bf16.msra.mxu0 %v2416_v2  ;;  %2051 = vmatprep.mubr.msk.bf16.mxu0 %vm2323_vm1, %v2322_v1 }
  0x3e   : > { %2061 = vmatprep.subr.bf16.mxu0 %v2322_v1 }
  0x44   : > { %2052 = vmatmul.mubr.msk.bf16.vlgmr.msra.gmra.mrb[20].mxu0 %vm300_vm2, %v775_v17 }
  0x45   : > { %2062 = vmatpush3.bf16.msra.mxu0 %v2416_v2  ;;  %2063 = vmatprep.mubr.msk.bf16.mxu0 %vm2323_vm1, %v2322_v1 }
  0x46   : > { %2073 = vmatprep.subr.bf16.mxu0 %v2322_v1 }
  0x4c   : > { %2064 = vmatmul.mubr.msk.bf16.vlgmr.msra.gmra.mrb[24].mxu0 %vm300_vm2, %v863_v19 }
  0x4d   : > { %2074 = vmatpush3.bf16.msra.mxu0 %v2416_v2  ;;  %2075 = vmatprep.mubr.msk.bf16.mxu0 %vm2323_vm1, %v2322_v1 }
  0x4e   : > { %2085 = vmatprep.subr.bf16.mxu0 %v2322_v1 }
  0x54   : > { %2076 = vmatmul.mubr.msk.bf16.vlgmr.msra.gmra.mrb[28].mxu0 %vm300_vm2, %v952_v21 }
  0x55   : > { %2086 = vmatpush3.bf16.msra.mxu0 %v2416_v2  ;;  %2087 = vmatprep.mubr.msk.bf16.mxu0 %vm2323_vm1, %v2322_v1 }
  0x56   : > { %2097 = vmatprep.subr.bf16.mxu0 %v2322_v1 }
  0x5c   : > { %2088 = vmatmul.mubr.msk.bf16.vlgmr.msra.gmra.mrb[32].mxu0 %vm300_vm2, %v1041_v23 }
  0x5d   : > { %2098 = vmatpush3.bf16.msra.mxu0 %v2416_v2  ;;  %2099 = vmatprep.mubr.msk.bf16.mxu0 %vm2323_vm1, %v2322_v1 }
  0x5e   : > { %2109 = vmatprep.subr.bf16.mxu0 %v2322_v1 }
  0x64   : > { %2100 = vmatmul.mubr.msk.bf16.vlgmr.msra.gmra.mrb[36].mxu0 %vm300_vm2, %v1130_v25 }
  0x65   : > { %2110 = vmatpush3.bf16.msra.mxu0 %v2416_v2  ;;  %2111 = vmatprep.mubr.msk.bf16.mxu0 %vm2323_vm1, %v2322_v1 }
  0x66   : > { %2121 = vmatprep.subr.bf16.mxu0 %v2322_v1 }
  0x6c   : > { %2112 = vmatmul.mubr.msk.bf16.vlgmr.msra.gmra.mrb[40].mxu0 %vm300_vm2, %v1243_v26 }
  0x6d   : > { %2122 = vmatpush3.bf16.msra.mxu0 %v2416_v2  ;;  %2123 = vmatprep.mubr.msk.bf16.mxu0 %vm2323_vm1, %v2322_v1 }
  0x6e   : > { %2133 = vmatprep.subr.bf16.mxu0 %v2322_v1 }
  0x74   : > { %2124 = vmatmul.mubr.msk.bf16.vlgmr.msra.gmra.mrb[44].mxu0 %vm300_vm2, %v1331_v27 }
  0x75   : > { %2134 = vmatpush3.bf16.msra.mxu0 %v2416_v2  ;;  %2135 = vmatprep.mubr.msk.bf16.mxu0 %vm2323_vm1, %v2322_v1 }
  0x76   : > { %2145 = vmatprep.subr.bf16.mxu0 %v2322_v1 }
  0x7c   : > { %2136 = vmatmul.mubr.msk.bf16.vlgmr.msra.gmra.mrb[48].mxu0 %vm300_vm2, %v1420_v29 }
  0x7d   : > { %2146 = vmatpush3.bf16.msra.mxu0 %v2416_v2  ;;  %2147 = vmatprep.mubr.msk.bf16.mxu0 %vm2323_vm1, %v2322_v1 }
  0x7e   : > { %2157 = vmatprep.subr.bf16.mxu0 %v2322_v1 }
  0x84   : > { %2148 = vmatmul.mubr.msk.bf16.vlgmr.msra.gmra.mrb[52].mxu0 %vm300_vm2, %v1509_v31 }
  0x85   : > { %2158 = vmatpush3.bf16.msra.mxu0 %v2416_v2  ;;  %2159 = vmatprep.mubr.msk.bf16.mxu0 %vm2323_vm1, %v2322_v1 }
  0x8c   : > { %2160 = vmatmul.mubr.msk.bf16.vlgmr.msra.gmra.mrb[56].mxu0 %vm300_vm2, %v1598_v32 }
  0xef   : > { %v342_v33 = vpop.f32.mrb[0].mxu0 }
  0xf0   : > { %v348_v34 = vpack.c.bf16 %v342_v33, %v342_v33  ;;  %v1993_v35 = vpop.f32.mrb[1].mxu0 }
  0xf1   : > { %v345_v36 = vpop.f32.mrb[2].mxu0 }
  0xf2   : > { %v1994_v37 = vpop.f32.mrb[3].mxu0  ;;  %v353_v38 = vsel %vm304_vm0, %v348_v34, 0 }
  0xf3   : > { %1996 = vmatpush3.bf16.msra.mxu1 %v353_v38 }
  0xf4   : > { %2007 = vmatprep.subr.bf16.mxu1 %v2322_v1 }
  0xf6   : > { %1998 = vmatmul.mubr.msk.bf16.vlgmr.msra.gmra.mrb[0].mxu1 %vm300_vm2, %v2533_v39 }
  0xf7   : > { %v433_v40 = vpop.f32.mrb[4].mxu0  ;;  %2009 = vmatprep.mubr.msk.bf16.mxu1 %vm2323_vm1, %v2322_v1 }
  0xf8   : > { %v439_v41 = vpack.c.bf16 %v433_v40, %v433_v40  ;;  %v2005_v42 = vpop.f32.mrb[5].mxu0 }
  0xf9   : > { %v436_v43 = vpop.f32.mrb[6].mxu0 }
  0xfa   : > { %v441_v44 = vsel %vm304_vm0, %v439_v41, 0  ;;  %v2006_v45 = vpop.f32.mrb[7].mxu0 }
  0xfb   : > { %2008 = vmatpush3.bf16.msra.mxu1 %v441_v44 }
  0xfc   : > { %2019 = vmatprep.subr.bf16.mxu1 %v2322_v1 }
  0xfe   : > { %2010 = vmatmul.mubr.msk.bf16.vlgmr.msra.gmra.mrb[4].mxu1 %vm300_vm2, %v2533_v39 }
  0xff   : > { %v522_v46 = vpop.f32.mrb[8].mxu0  ;;  %2021 = vmatprep.mubr.msk.bf16.mxu1 %vm2323_vm1, %v2322_v1 }
 0x100   : > { %v528_v47 = vpack.c.bf16 %v522_v46, %v522_v46  ;;  %v2017_v48 = vpop.f32.mrb[9].mxu0 }
 0x101   : > { %v525_v49 = vpop.f32.mrb[10].mxu0 }
 0x102   : > { %v530_v50 = vsel %vm304_vm0, %v528_v47, 0  ;;  %v2018_v51 = vpop.f32.mrb[11].mxu0 }
 0x103   : > { %2020 = vmatpush3.bf16.msra.mxu1 %v530_v50 }
 0x104   : > { %2031 = vmatprep.subr.bf16.mxu1 %v2322_v1 }
 0x106   : > { %2022 = vmatmul.mubr.msk.bf16.vlgmr.msra.gmra.mrb[8].mxu1 %vm300_vm2, %v2533_v39 }
 0x107   : > { %v611_v52 = vpop.f32.mrb[12].mxu0  ;;  %2033 = vmatprep.mubr.msk.bf16.mxu1 %vm2323_vm1, %v2322_v1 }
 0x108   : > { %v617_v53 = vpack.c.bf16 %v611_v52, %v611_v52  ;;  %v2029_v54 = vpop.f32.mrb[13].mxu0 }
 0x109   : > { %v614_v55 = vpop.f32.mrb[14].mxu0 }
 0x10a   : > { %v619_v56 = vsel %vm304_vm0, %v617_v53, 0  ;;  %v2030_v57 = vpop.f32.mrb[15].mxu0 }
 0x10b   : > { %2032 = vmatpush3.bf16.msra.mxu1 %v619_v56 }
 0x10c   : > { %2043 = vmatprep.subr.bf16.mxu1 %v2322_v1 }
 0x10e   : > { %2034 = vmatmul.mubr.msk.bf16.vlgmr.msra.gmra.mrb[12].mxu1 %vm300_vm2, %v2533_v39 }
 0x10f   : > { %v700_v58 = vpop.f32.mrb[16].mxu0  ;;  %2045 = vmatprep.mubr.msk.bf16.mxu1 %vm2323_vm1, %v2322_v1 }
 0x110   : > { %v706_v59 = vpack.c.bf16 %v700_v58, %v700_v58  ;;  %v2041_v60 = vpop.f32.mrb[17].mxu0 }
 0x111   : > { %v703_v61 = vpop.f32.mrb[18].mxu0 }
 0x112   : > { %v708_v62 = vsel %vm304_vm0, %v706_v59, 0  ;;  %v2042_v63 = vpop.f32.mrb[19].mxu0 }
 0x113   : > { %2044 = vmatpush3.bf16.msra.mxu1 %v708_v62 }
 0x114   : > { %2055 = vmatprep.subr.bf16.mxu1 %v2322_v1 }
 0x116   : > { %2046 = vmatmul.mubr.msk.bf16.vlgmr.msra.gmra.mrb[16].mxu1 %vm300_vm2, %v2533_v39 }
 0x117   : > { %v813_v0 = vpop.f32.mrb[20].mxu0  ;;  %2057 = vmatprep.mubr.msk.bf16.mxu1 %vm2323_vm1, %v2322_v1 }
 0x118   : > { %v819_v2 = vpack.c.bf16 %v813_v0, %v813_v0  ;;  %v2053_v3 = vpop.f32.mrb[21].mxu0 }
 0x119   : > { %v816_v4 = vpop.f32.mrb[22].mxu0 }
 0x11a   : > { %v821_v5 = vsel %vm304_vm0, %v819_v2, 0  ;;  %v2054_v6 = vpop.f32.mrb[23].mxu0 }
 0x11b   : > { %2056 = vmatpush3.bf16.msra.mxu1 %v821_v5 }
 0x11c   : > { %2067 = vmatprep.subr.bf16.mxu1 %v2322_v1 }
 0x11e   : > { %2058 = vmatmul.mubr.msk.bf16.vlgmr.msra.gmra.mrb[20].mxu1 %vm300_vm2, %v2533_v39 }
 0x11f   : > { %v901_v7 = vpop.f32.mrb[24].mxu0  ;;  %2069 = vmatprep.mubr.msk.bf16.mxu1 %vm2323_vm1, %v2322_v1 }
 0x120   : > { %v907_v8 = vpack.c.bf16 %v901_v7, %v901_v7  ;;  %v2065_v9 = vpop.f32.mrb[25].mxu0 }
 0x121   : > { %v904_v10 = vpop.f32.mrb[26].mxu0 }
 0x122   : > { %v909_v11 = vsel %vm304_vm0, %v907_v8, 0  ;;  %v2066_v12 = vpop.f32.mrb[27].mxu0 }
 0x123   : > { %2068 = vmatpush3.bf16.msra.mxu1 %v909_v11 }
 0x124   : > { %2079 = vmatprep.subr.bf16.mxu1 %v2322_v1 }
 0x126   : > { %2070 = vmatmul.mubr.msk.bf16.vlgmr.msra.gmra.mrb[24].mxu1 %vm300_vm2, %v2533_v39 }
 0x127   : > { %v990_v13 = vpop.f32.mrb[28].mxu0  ;;  %2081 = vmatprep.mubr.msk.bf16.mxu1 %vm2323_vm1, %v2322_v1 }
 0x128   : > { %v996_v14 = vpack.c.bf16 %v990_v13, %v990_v13  ;;  %v2077_v15 = vpop.f32.mrb[29].mxu0 }
 0x129   : > { %v993_v16 = vpop.f32.mrb[30].mxu0 }
 0x12a   : > { %v998_v17 = vsel %vm304_vm0, %v996_v14, 0  ;;  %v2078_v18 = vpop.f32.mrb[31].mxu0 }
 0x12b   : > { %2080 = vmatpush3.bf16.msra.mxu1 %v998_v17 }
 0x12c   : > { %2091 = vmatprep.subr.bf16.mxu1 %v2322_v1 }
 0x12e   : > { %2082 = vmatmul.mubr.msk.bf16.vlgmr.msra.gmra.mrb[28].mxu1 %vm300_vm2, %v2533_v39 }
 0x12f   : > { %v1079_v19 = vpop.f32.mrb[32].mxu0  ;;  %2093 = vmatprep.mubr.msk.bf16.mxu1 %vm2323_vm1, %v2322_v1 }
 0x130   : > { %v1085_v20 = vpack.c.bf16 %v1079_v19, %v1079_v19  ;;  %v2089_v21 = vpop.f32.mrb[33].mxu0 }
 0x131   : > { %v1082_v22 = vpop.f32.mrb[34].mxu0 }
 0x132   : > { %v1087_v23 = vsel %vm304_vm0, %v1085_v20, 0  ;;  %v2090_v24 = vpop.f32.mrb[35].mxu0 }
 0x133   : > { %2092 = vmatpush3.bf16.msra.mxu1 %v1087_v23 }
 0x134   : > { %2103 = vmatprep.subr.bf16.mxu1 %v2322_v1 }
 0x136   : > { %2094 = vmatmul.mubr.msk.bf16.vlgmr.msra.gmra.mrb[32].mxu1 %vm300_vm2, %v2533_v39 }
 0x137   : > { %v1168_v25 = vpop.f32.mrb[36].mxu0  ;;  %2105 = vmatprep.mubr.msk.bf16.mxu1 %vm2323_vm1, %v2322_v1 }
 0x138   : > { %v1174_v26 = vpack.c.bf16 %v1168_v25, %v1168_v25  ;;  %v2101_v27 = vpop.f32.mrb[37].mxu0 }
 0x139   : > { %v1171_v28 = vpop.f32.mrb[38].mxu0 }
 0x13a   : > { %v1176_v29 = vsel %vm304_vm0, %v1174_v26, 0  ;;  %v2102_v30 = vpop.f32.mrb[39].mxu0 }
 0x13b   : > { %2104 = vmatpush3.bf16.msra.mxu1 %v1176_v29 }
 0x13c   : > { %2115 = vmatprep.subr.bf16.mxu1 %v2322_v1 }
 0x13e   : > { %2106 = vmatmul.mubr.msk.bf16.vlgmr.msra.gmra.mrb[36].mxu1 %vm300_vm2, %v2533_v39 }
 0x13f   : > { %v1281_v31 = vpop.f32.mrb[40].mxu0  ;;  %2117 = vmatprep.mubr.msk.bf16.mxu1 %vm2323_vm1, %v2322_v1 }
 0x140   : > { %v1287_v32 = vpack.c.bf16 %v1281_v31, %v1281_v31  ;;  %v2113_v33 = vpop.f32.mrb[41].mxu0 }
 0x141   : > { %v1284_v34 = vpop.f32.mrb[42].mxu0 }
 0x142   : > { %v1289_v35 = vsel %vm304_vm0, %v1287_v32, 0  ;;  %v2114_v36 = vpop.f32.mrb[43].mxu0 }
 0x143   : > { %2116 = vmatpush3.bf16.msra.mxu1 %v1289_v35 }
 0x144   : > { %2127 = vmatprep.subr.bf16.mxu1 %v2322_v1 }
 0x146   : > { %2118 = vmatmul.mubr.msk.bf16.vlgmr.msra.gmra.mrb[40].mxu1 %vm300_vm2, %v2533_v39 }
 0x147   : > { %v1369_v37 = vpop.f32.mrb[44].mxu0  ;;  %2129 = vmatprep.mubr.msk.bf16.mxu1 %vm2323_vm1, %v2322_v1 }
 0x148   : > { %v1375_v38 = vpack.c.bf16 %v1369_v37, %v1369_v37  ;;  %v2125_v40 = vpop.f32.mrb[45].mxu0 }
 0x149   : > { %v1372_v41 = vpop.f32.mrb[46].mxu0 }
 0x14a   : > { %v1377_v42 = vsel %vm304_vm0, %v1375_v38, 0  ;;  %v2126_v43 = vpop.f32.mrb[47].mxu0 }
 0x14b   : > { %2128 = vmatpush3.bf16.msra.mxu1 %v1377_v42 }
 0x14c   : > { %2139 = vmatprep.subr.bf16.mxu1 %v2322_v1 }
 0x14e   : > { %2130 = vmatmul.mubr.msk.bf16.vlgmr.msra.gmra.mrb[44].mxu1 %vm300_vm2, %v2533_v39 }
 0x14f   : > { %v1458_v44 = vpop.f32.mrb[48].mxu0  ;;  %2141 = vmatprep.mubr.msk.bf16.mxu1 %vm2323_vm1, %v2322_v1 }
 0x150   : > { %v1464_v45 = vpack.c.bf16 %v1458_v44, %v1458_v44  ;;  %v2137_v46 = vpop.f32.mrb[49].mxu0 }
 0x151   : > { %v1461_v47 = vpop.f32.mrb[50].mxu0 }
 0x152   : > { %v1466_v48 = vsel %vm304_vm0, %v1464_v45, 0  ;;  %v2138_v49 = vpop.f32.mrb[51].mxu0 }
 0x153   : > { %2140 = vmatpush3.bf16.msra.mxu1 %v1466_v48 }
 0x154   : > { %2151 = vmatprep.subr.bf16.mxu1 %v2322_v1 }
 0x156   : > { %2142 = vmatmul.mubr.msk.bf16.vlgmr.msra.gmra.mrb[48].mxu1 %vm300_vm2, %v2533_v39 }
 0x157   : > { %v1547_v50 = vpop.f32.mrb[52].mxu0  ;;  %2153 = vmatprep.mubr.msk.bf16.mxu1 %vm2323_vm1, %v2322_v1 }
 0x158   : > { %v1553_v51 = vpack.c.bf16 %v1547_v50, %v1547_v50  ;;  %v2149_v52 = vpop.f32.mrb[53].mxu0 }
 0x159   : > { %v1550_v53 = vpop.f32.mrb[54].mxu0 }
 0x15a   : > { %v1555_v54 = vsel %vm304_vm0, %v1553_v51, 0  ;;  %v2150_v55 = vpop.f32.mrb[55].mxu0 }
 0x15b   : > { %2152 = vmatpush3.bf16.msra.mxu1 %v1555_v54 }
 0x15c   : > { %2163 = vmatprep.subr.bf16.mxu1 %v2322_v1 }
 0x15e   : > { %2154 = vmatmul.mubr.msk.bf16.vlgmr.msra.gmra.mrb[52].mxu1 %vm300_vm2, %v2533_v39 }
 0x15f   : > { %v1636_v56 = vpop.f32.mrb[56].mxu0  ;;  %2165 = vmatprep.mubr.msk.bf16.mxu1 %vm2323_vm1, %v2322_v1 }
 0x160   : > { %v1642_v57 = vpack.c.bf16 %v1636_v56, %v1636_v56  ;;  %v2161_v58 = vpop.f32.mrb[57].mxu0 }
 0x161   : > { %v1639_v59 = vpop.f32.mrb[58].mxu0 }
 0x162   : > { %v1644_v60 = vsel %vm304_vm0, %v1642_v57, 0  ;;  %v2162_v61 = vpop.f32.mrb[59].mxu0 }
 0x163   : > { %2164 = vmatpush3.bf16.msra.mxu1 %v1644_v60 }
 0x166   : > { %2166 = vmatmul.mubr.msk.bf16.vlgmr.msra.gmra.mrb[56].mxu1 %vm300_vm2, %v2533_v39 }
 0x1c9   : > { %v389_v62 = vpop.f32.mrb[0].mxu1 }
 0x1ca   : > { %v1999_v63 = vpop.f32.mrb[1].mxu1  ;;  %v750_v4 = vmul.f32 %v389_v62, %v389_v62 }
 0x1cb   : > { %v392_v0 = vpop.f32.mrb[2].mxu1 }
 0x1cc   : > { %v2000_v2 = vpop.f32.mrb[3].mxu1 }
 0x1d1   : > { %v477_v3 = vpop.f32.mrb[4].mxu1 }
 0x1d2   : > { %v751_v5 = vmul.f32 %v477_v3, %v477_v3  ;;  %v752_v6 = vmul.f32 %v477_v3, %v389_v62  ;;  %v2011_v7 = vpop.f32.mrb[5].mxu1 }
 0x1d3   : > { %v480_v8 = vpop.f32.mrb[6].mxu1 }
 0x1d4   : > { %v761_v9 = vadd.f32 %v751_v5, %v750_v4  ;;  %v2012_v10 = vpop.f32.mrb[7].mxu1  ;;  %v765_v39 = vmul.f32 2.0, %v752_v6 }
 0x1d6   : > { %v762_v11 = vadd.f32 0.0001, %v761_v9  ;;  %v766_v17 = vadd.f32 0.0001, %v765_v39 }
 0x1d8   : > { %2230 = vrcp.f32 %v762_v11 }
 0x1d9   : > { %v566_v12 = vpop.f32.mrb[8].mxu1 }
 0x1da   : > { %v753_v13 = vsub.f32 %v566_v12, %v750_v4  ;;  %v2023_v14 = vpop.f32.mrb[9].mxu1 }
 0x1db   : > { %v569_v15 = vpop.f32.mrb[10].mxu1 }
 0x1dc   : > { %v2024_v16 = vpop.f32.mrb[11].mxu1 }
 0x1e1   : > { %v655_v18 = vpop.f32.mrb[12].mxu1 }
 0x1e2   : > { %v2231_v19 = vpop.eup %2230  ;;  %v754_v20 = vsub.f32 %v655_v18, %v751_v5  ;;  %v2035_v21 = vpop.f32.mrb[13].mxu1 }
 0x1e3   : > { %v767_v22 = vmul.f32 %v2231_v19, %v766_v17  ;;  %v658_v23 = vpop.f32.mrb[14].mxu1 }
 0x1e4   : > { %v758_v24 = vadd.f32 %v754_v20, %v753_v13  ;;  %v2036_v25 = vpop.f32.mrb[15].mxu1 }
 0x1e6   : > { %v759_v26 = vadd.f32 0.0009, %v758_v24 }
 0x1e8   : > { %2232 = vrcp.f32 %v759_v26 }
 0x1e9   : > { %v744_v27 = vpop.f32.mrb[16].mxu1 }
 0x1ea   : > { %v755_v28 = vsub.f32 %v744_v27, %v752_v6  ;;  %v2047_v29 = vpop.f32.mrb[17].mxu1 }
 0x1eb   : > { %v747_v30 = vpop.f32.mrb[18].mxu1 }
 0x1ec   : > { %v2048_v31 = vpop.f32.mrb[19].mxu1  ;;  %v756_v32 = vmul.f32 2.0, %v755_v28 }
 0x1ee   : > { %v757_v33 = vadd.f32 0.0009, %v756_v32 }
 0x1f1   : > { %v857_v34 = vpop.f32.mrb[20].mxu1 }
 0x1f2   : > { %v2233_v35 = vpop.eup %2232  ;;  %v2059_v36 = vpop.f32.mrb[21].mxu1  ;;  %v1218_v43 = vmul.f32 %v857_v34, %v857_v34 }
 0x1f3   : > { %v764_v37 = vmul.f32 %v2233_v35, %v757_v33  ;;  %v860_v38 = vpop.f32.mrb[22].mxu1 }
 0x1f4   : > { %v2060_v40 = vpop.f32.mrb[23].mxu1 }
 0x1f5   : > { %v768_v41 = vmul.f32 %v767_v22, %v764_v37 }
 0x1f9   : > { %v945_v42 = vpop.f32.mrb[24].mxu1 }
 0x1fa   : > { %v1219_v44 = vmul.f32 %v945_v42, %v945_v42  ;;  %v1220_v45 = vmul.f32 %v945_v42, %v857_v34  ;;  %v2071_v46 = vpop.f32.mrb[25].mxu1 }
 0x1fb   : > { %v948_v47 = vpop.f32.mrb[26].mxu1 }
 0x1fc   : > { %v1229_v48 = vadd.f32 %v1219_v44, %v1218_v43  ;;  %v2072_v49 = vpop.f32.mrb[27].mxu1  ;;  %v1233_v56 = vmul.f32 2.0, %v1220_v45 }
 0x1fe   : > { %v1230_v50 = vadd.f32 0.0001, %v1229_v48  ;;  %v1234_v57 = vadd.f32 0.0001, %v1233_v56 }
 0x200   : > { %2234 = vrcp.f32 %v1230_v50 }
 0x201   : > { %v1034_v51 = vpop.f32.mrb[28].mxu1 }
 0x202   : > { %v1221_v52 = vsub.f32 %v1034_v51, %v1218_v43  ;;  %v2083_v53 = vpop.f32.mrb[29].mxu1  ;;  %v1707_v51 = vlaneseq }
 0x203   : > { %v1037_v54 = vpop.f32.mrb[30].mxu1 }
 0x204   : > { %v2084_v55 = vpop.f32.mrb[31].mxu1  ;;  %v1708_v53 = vand.u32 127, %v1707_v51 }
 0x206   : > { %vm1712_vm3 = vcmp.lt.s32.totalorder %v1708_v53, 5 }
 0x209   : > { %v1123_v58 = vpop.f32.mrb[32].mxu1 }
 0x20a   : > { %v2235_v59 = vpop.eup %2234  ;;  %v1222_v60 = vsub.f32 %v1123_v58, %v1219_v44  ;;  %v2095_v61 = vpop.f32.mrb[33].mxu1 }
 0x20b   : > { %v1235_v62 = vmul.f32 %v2235_v59, %v1234_v57  ;;  %v1126_v63 = vpop.f32.mrb[34].mxu1  ;;  %v1925_v59 = vsel %vm1712_vm3, 1.0, %v2322_v1 }
 0x20c   : > { %v1226_v0 = vadd.f32 %v1222_v60, %v1221_v52  ;;  %v2096_v2 = vpop.f32.mrb[35].mxu1 }
 0x20e   : > { %v1227_v3 = vadd.f32 0.0009, %v1226_v0 }
 0x210   : > { %2236 = vrcp.f32 %v1227_v3 }
 0x211   : > { %v1212_v4 = vpop.f32.mrb[36].mxu1 }
 0x212   : > { %v1223_v5 = vsub.f32 %v1212_v4, %v1220_v45  ;;  %v2107_v6 = vpop.f32.mrb[37].mxu1 }
 0x213   : > { %v1215_v7 = vpop.f32.mrb[38].mxu1 }
 0x214   : > { %v2108_v8 = vpop.f32.mrb[39].mxu1  ;;  %v1224_v9 = vmul.f32 2.0, %v1223_v5 }
 0x216   : > { %v1225_v10 = vadd.f32 0.0009, %v1224_v9 }
 0x219   : > { %v1325_v11 = vpop.f32.mrb[40].mxu1 }
 0x21a   : > { %v2237_v12 = vpop.eup %2236  ;;  %v2119_v13 = vpop.f32.mrb[41].mxu1  ;;  %v1686_v20 = vmul.f32 %v1325_v11, %v1325_v11 }
 0x21b   : > { %v1232_v14 = vmul.f32 %v2237_v12, %v1225_v10  ;;  %v1328_v15 = vpop.f32.mrb[42].mxu1 }
 0x21c   : > { %v2120_v16 = vpop.f32.mrb[43].mxu1 }
 0x21d   : > { %v1236_v39 = vmul.f32 %v1235_v62, %v1232_v14  ;;  %v1238_v17 = vadd.f32 %v1232_v14, %v764_v37 }
 0x21f   : > { %v1237_v18 = vadd.f32 %v1236_v39, %v768_v41 }
 0x221   : > { %v1413_v19 = vpop.f32.mrb[44].mxu1 }
 0x222   : > { %v1687_v21 = vmul.f32 %v1413_v19, %v1413_v19  ;;  %v1688_v22 = vmul.f32 %v1413_v19, %v1325_v11  ;;  %v2131_v23 = vpop.f32.mrb[45].mxu1 }
 0x223   : > { %v1416_v24 = vpop.f32.mrb[46].mxu1 }
 0x224   : > { %v1697_v25 = vadd.f32 %v1687_v21, %v1686_v20  ;;  %v2132_v26 = vpop.f32.mrb[47].mxu1  ;;  %v1701_v33 = vmul.f32 2.0, %v1688_v22 }
 0x226   : > { %v1698_v27 = vadd.f32 0.0001, %v1697_v25  ;;  %v1702_v34 = vadd.f32 0.0001, %v1701_v33 }
 0x228   : > { %2238 = vrcp.f32 %v1698_v27 }
 0x229   : > { %v1502_v28 = vpop.f32.mrb[48].mxu1 }
 0x22a   : > { %v1689_v29 = vsub.f32 %v1502_v28, %v1686_v20  ;;  %v2143_v30 = vpop.f32.mrb[49].mxu1 }
 0x22b   : > { %v1505_v31 = vpop.f32.mrb[50].mxu1 }
 0x22c   : > { %v2144_v32 = vpop.f32.mrb[51].mxu1 }
 0x231   : > { %v1591_v35 = vpop.f32.mrb[52].mxu1 }
 0x232   : > { %v2239_v36 = vpop.eup %2238  ;;  %v1690_v37 = vsub.f32 %v1591_v35, %v1687_v21  ;;  %v2155_v38 = vpop.f32.mrb[53].mxu1 }
 0x233   : > { %v1703_v40 = vmul.f32 %v2239_v36, %v1702_v34  ;;  %v1594_v41 = vpop.f32.mrb[54].mxu1 }
 0x234   : > { %v1694_v42 = vadd.f32 %v1690_v37, %v1689_v29  ;;  %v2156_v43 = vpop.f32.mrb[55].mxu1 }
 0x236   : > { %v1695_v44 = vadd.f32 0.0009, %v1694_v42 }
 0x238   : > { %2240 = vrcp.f32 %v1695_v44 }
 0x239   : > { %v1680_v45 = vpop.f32.mrb[56].mxu1 }
 0x23a   : > { %v1691_v46 = vsub.f32 %v1680_v45, %v1688_v22  ;;  %v2167_v47 = vpop.f32.mrb[57].mxu1 }
 0x23b   : > { %v1683_v48 = vpop.f32.mrb[58].mxu1 }
 0x23c   : > { %v2168_v49 = vpop.f32.mrb[59].mxu1  ;;  %v1692_v50 = vmul.f32 2.0, %v1691_v46 }
 0x23e   : > { %v1693_v52 = vadd.f32 0.0009, %v1692_v50 }
 0x242   : > { %v2241_v54 = vpop.eup %2240 }
 0x243   : > { %v1700_v55 = vmul.f32 %v2241_v54, %v1693_v52 }
 0x245   : > { %v1704_v56 = vmul.f32 %v1703_v40, %v1700_v55  ;;  %v1706_v57 = vadd.f32 %v1700_v55, %v1238_v17 }
 0x247   : > { %v1705_v58 = vadd.f32 %v1704_v56, %v1237_v18  ;;  %v1716_v62 = vmul.f32 %v1925_v59, %v1706_v57 }
 0x249   : > { %v1715_v60 = vmul.f32 %v1925_v59, %v1705_v58  ;;  %v1731_v63 = vsel %vm1717_vm4, %v1716_v62, 0.0 }
 0x24b   : > { %v1718_v61 = vsel %vm1717_vm4, %v1715_v60, 0.0 }
 0x24c   : > { %1719 = vadd.xlane.f32.xlu0 %v1718_v61 }
 0x250   : > { %1732 = vadd.xlane.f32.xlu0 %v1731_v63 }
 0x2d9   : > { %v1720_v0 = vpop.xlane.xlu0 %1719 }
 0x2da   : > { %v1721_v2 = vrot.slane %v1720_v0, 4 }
 0x2dc   : > { %v1722_v3 = vadd.f32 %v1721_v2, %v1720_v0 }
 0x2dd   : > { %v1733_v4 = vpop.xlane.xlu0 %1732 }
 0x2de   : > { %v1723_v5 = vrot.slane %v1722_v3, 2  ;;  %v1734_v6 = vrot.slane %v1733_v4, 4 }
 0x2e0   : > { %v1735_v7 = vadd.f32 %v1734_v6, %v1733_v4  ;;  %v1724_v8 = vadd.f32 %v1723_v5, %v1722_v3 }
 0x2e2   : > { %v1736_v1 = vrot.slane %v1735_v7, 2  ;;  %v1725_v9 = vrot.slane %v1724_v8, 1 }
 0x2e4   : > { %v1737_v10 = vadd.f32 %v1736_v1, %v1735_v7  ;;  %v1726_v11 = vadd.f32 %v1725_v9, %v1724_v8 }
 0x2e6   : > { %2169 = vpush %v1726_v11  ;;  %v1738_v12 = vrot.slane %v1737_v10, 1 }
 0x2e8   : > { %v1739_v13 = vadd.f32 %v1738_v12, %v1737_v10 }
 0x2ea   : > { %2171 = vpush %v1739_v13 }
 0x317   : > { %s2170_s11 = spop %2169 }
 0x318   : > { %v1728_v14 = vstv %s2170_s11 }
 0x319   : > { %1730 = vst.msk [vmem:[%s263_s29] sm:$0x1] %vm1729_vm5, %v1728_v14 }
 0x31a   : > { %2255 = shalt.err (!%p2252_p6)
}
 0x31b   : > { %s2256_s25 = scalar_lea.hbm %s2631_s10, 16  ;;  %s2260_s9 = scalar_lea.hbm %s2693_s4, 32 }
 0x31c   : > { %p2257_p7 = scmp.ne.s32.totalorder %s2631_s10, %s2256_s25  ;;  %p2261_p11 = scmp.lt.u32.totalorder %s2631_s10, %s2693_s4 }
 0x31d   : > { %p2262_p12 = scmp.lt.u32.totalorder %s2260_s9, %s2256_s25  ;;  %p2264_p0 = scmp.lt.u32.totalorder %s2256_s25, %s2631_s10 }
 0x31e   : > { %p2258_p9 = pnand %p2257_p7, %p2395_p4 }
 0x31f   : > { %p2263_p13 = por %p2262_p12, %p2261_p11 }
 0x320   : > { %p2259_p10 = pneg %p2258_p9 }
 0x321   : > { %p2265_p1 = por %p2264_p0, %p2263_p13 }
 0x323   : > { %p2266_p2 = pnand %p2265_p1, %p2259_p10 }
 0x325   : > { %2269 = shalt.err (!%p2266_p2)
}
 0x326   : > { %2173 = dma.vmem_to_hbm [thread:$0]  (%p2395_p4), %s2633_s7, 16, %s2631_s10, %s1744_s15  }
 0x327   : > { %s2172_s13 = spop %2171 }
 0x328   : > { %v1741_v15 = vstv %s2172_s13 }
 0x329   : > { %1742 = vst.msk [vmem:[%s293_s14] sm:$0x1] %vm1729_vm5, %v1741_v15 }
 0x32a PF: > { %p2179_p3 = scmp.ge.s32.totalorder %s2320_s23, 2  ;;  %s1778_s24 = sand.u32 1, %s2300_s18  }
 0x32b   : > { %s1779_s28 = scalar_lea.sflag [#allocation3], %s1778_s24 }
 0x32c   : > { %p2176_p5 = pnand %p2179_p3, %p2402_p8 }
 0x32e   : > { %2295 = dma.done.wait (!%p2176_p5), %s1779_s28, 16  }
 0x32f   : > { %2297 = vsyncadd (!%p2176_p5), %s1779_s28, 4294967280  ;;  %s19_s23 = sadd.s32 1, %s2320_s23   ;;  %s2697_s18 = smov %s2304_s19 }
 0x330   : > { %p16_p4 = scmp.ge.s32.totalorder %s19_s23, 4   ;;  %s2698_s19 = smov %s2308_s20 }
 0x331   : > { %s2699_s20 = smov %s2408_s6  ;;  %s2700_s21 = smov %s2316_s22 }
 0x332   : > { %s2701_s22 = smov %s2703_s26  ;;  %18 = sbr.rel (!%p16_p4) target bundleno = 4 (0x4), region = 93 }
 0x339   :  { %1792 = vsyncpa [#allocation3], 1 }
 0x33a   :  { %1794 = vsyncpa [#allocation3 + $0x1], 1 }

// kernel: _dvc_loss_device.11
= control target key start
LH: loop header
LB: loop body
LE: loop exit
PB: predicated region body
PF: predicated region fallthrough
CT: control target
= control target key end

     0   :  { %11 = vsyncpa [#allocation3], 0  ;;  %s2817_s0 = inlined_call_operand.vmem [shape: f32[6,8,8], index: 0, kind: input, shape index: {}]   ;;  %s2818_s1 = inlined_call_operand.vmem [shape: f32[6,8,8], index: 1, kind: input, shape index: {}]   ;;  %s2819_s2 = inlined_call_operand.vmem [shape: bf16[9,8], index: 2, kind: input, shape index: {}]   ;;  %s2820_s3 = inlined_call_operand.vmem [shape: bf16[8,128], index: 3, kind: input, shape index: {}]   ;;  %s2821_s4 = inlined_call_operand.hbm [shape: f32[2,1,1,1], index: 4, kind: output, shape index: {0}]   ;;  %s2822_s5 = inlined_call_operand.vmem [shape: f32[2,1,1,1], index: 5, kind: output, shape index: {1}]  }
   0x1   :  { %13 = vsyncpa [#allocation3 + $0x1], 0  ;;  %s2457_s18 = smov 0   ;;  %s2459_s19 = smov 0  }
   0x2   :  { %s2461_s20 = smov 0   ;;  %s2463_s21 = smov 0  }
   0x3   :  { %s2465_s22 = smov 0   ;;  %s2467_s23 = smov 0  }
   0x4 LB: > { %s1971_s24 = sadd.s32 4294967295, %s2422_s23   ;;  %s1972_s25 = sadd.s32 4294967294, %s2422_s23   ;;  %s2422_s23 = sphi %s2467_s23, %s19_s23   ;;  %s2418_s22 = sphi %s2465_s22, %s2829_s22   ;;  %s2414_s21 = sphi %s2463_s21, %s2828_s21   ;;  %s2410_s20 = sphi %s2461_s20, %s2827_s20   ;;  %s2406_s19 = sphi %s2459_s19, %s2826_s19   ;;  %s2402_s18 = sphi %s2457_s18, %s2825_s18  }
   0x5   : > { %s31_s26 = sadd.s32 1, %s2418_s22  ;;  %s139_s27 = sadd.s32 1, %s2410_s20 }
   0x6   : > { %p33_p0 = scmp.ge.s32.totalorder %s31_s26, 2  ;;  %p149_p1 = scmp.ne.s32.totalorder %s2410_s20, %s2406_s19 }
   0x7   : > { %p150_p2 = scmp.eq.s32.totalorder %s1971_s24, 1  ;;  %p155_p3 = scmp.ne.s32.totalorder %s2406_s19, %s2402_s18 }
   0x8   : > { %s2831_s26 = smov (%p33_p0, %s31_s26), 0  ;;  %p156_p5 = scmp.eq.s32.totalorder %s1972_s25, 1 }
   0x9   : > { %p2497_p4 = por %p150_p2, %p149_p1  ;;  %s134_s29 = ssub.s32 %s2418_s22, %s2831_s26 }
   0xa   : > { %p1976_p6 = scmp.ge.s32.totalorder %s2422_s23, 1  ;;  %p137_p7 = scmp.eq.s32.totalorder %s134_s29, 0 }
   0xb   : > { %p2504_p8 = por %p156_p5, %p155_p3  ;;  %p230_p9 = scmp.lt.s32.totalorder %s2422_s23, 3 }
   0xc   : > { %s2510_s6 = scalar_select %p137_p7, %s2410_s20, %s139_s27  }
   0xd   : > { %p231_p10 = pnand %p1976_p6, %p230_p9 }
   0xe   : > { %v297_v0 = vld [vmem:[%s2820_s3] sm:$0xf] (!%p231_p10)  ;;  %vm305_vm0 = vcmask (!%p231_p10), 1043456   ;;  %s272_s9 = smul.u32 (!%p231_p10), 3, %s2414_s21  ;;  %v2424_v1 = vmov (!%p231_p10), 0.0   ;;  %vm2425_vm1 = vmmov (!%p231_p10), 0  }
   0xf   : > { %234 = sbr.rel (%p231_p10) target bundleno = 814 (0x32e), region = 36  ;;  %2078 = vmatprep.subr.bf16.mxu0 (!%p231_p10), %v2424_v1  ;;  %v2518_v2 = vsel (!%p231_p10), %vm305_vm0, %v297_v0, 0  ;;  %2080 = vmatprep.mubr.msk.bf16.mxu0 (!%p231_p10), %vm2425_vm1, %v2424_v1  ;;  %vm301_vm2 = vcmask (!%p231_p10), 64512   ;;  %v2635_v39 = vld [vmem:[%s2819_s2] sm:$0x1f] (!%p231_p10)   ;;  %vm1803_vm4 = vcmask (!%p231_p10), 1040384  }
  0x10   : > { %2079 = vmatpush3.bf16.msra.mxu0 (!%p231_p10), %v2518_v2  ;;  %p273_p11 = scmp.lt.s32.totalorder (!%p231_p10), %s272_s9, 5  ;;  %2084 = vmatprep.subr.bf16.mxu1 (!%p231_p10), %v2424_v1  ;;  %s262_s25 = sand.u32 (!%p231_p10), 1, %s2406_s19   ;;  %vm1816_vm5 = vcmask (!%p231_p10), 0  }
  0x11   : > { %2090 = vmatprep.subr.bf16.mxu0 (!%p231_p10), %v2424_v1  ;;  %2086 = vmatprep.mubr.msk.bf16.mxu1 (!%p231_p10), %vm2425_vm1, %v2424_v1  ;;  %p288_p12 = scmp.lt.s32.totalorder (!%p231_p10), %s2414_s21, 1  ;;  %s2015_s27 = sshll.u32 (!%p231_p10), %s2414_s21, 4 }
  0x12   : > { %s263_s29 = scalar_lea.vmem (!%p231_p10), [#allocation2], %s262_s25  ;;  %s1832_s15 = scalar_lea.sflag (!%p231_p10), [#allocation3], %s262_s25 }
  0x13   : > { %s1851_s7 = sshll.u32 (!%p231_p10), %s263_s29, 4  ;;  %s2426_s17 = smov (!%p231_p10), [#allocation2]   ;;  %s2761_s7 = int_to_ptr.vmem [resolvable:$true] %s1851_s7 }
  0x14   : > { %s2348_s24 = sshll.u32 (!%p231_p10), %s2426_s17, 4  ;;  %s2349_s24 = int_to_ptr.vmem [resolvable:$false] %s2348_s24 }
  0x15   : > { %p2351_p2 = scmp.lt.s32.totalorder (!%p231_p10), %s2761_s7, %s2349_s24 }
  0x16   : > { %s2833_s9 = smov (!%p273_p11, %s272_s9), 5  ;;  %s2835_s21 = smov (!%p288_p12, %s2414_s21), 1 }
  0x17   : > { %s1977_s10 = sshll.u32 %s2833_s9, 3  ;;  %s293_s14 = scalar_lea.vmem %s2822_s5, %s2835_s21 }
  0x18   : > { %s2530_s13 = scalar_lea.vmem %s2817_s0, %s1977_s10  ;;  %s2536_s16 = scalar_lea.vmem %s2818_s1, %s1977_s10 }
  0x19   : > { %v298_v3 = vld [vmem:[%s2530_s13] sm:$0xff]  ;;  %v2545_v6 = vld [vmem:[%s2530_s13 + $0x10] sm:$0xff]  ;;  %v1990_v16 = vld [vmem:[%s2530_s13 + $0x8] sm:$0xff]  ;;  %s2759_s10 = scalar_lea.hbm %s2821_s4, %s2015_s27  ;;  %s2350_s27 = scalar_lea.vmem %s2349_s24, 32 }
  0x1a   : > { %v300_v4 = vpack.c.bf16 %v298_v3, %v298_v3  ;;  %v299_v5 = vld [vmem:[%s2536_s16] sm:$0xff]  ;;  %v2548_v7 = vld [vmem:[%s2536_s16 + $0x10] sm:$0xff]  ;;  %v491_v10 = vmul.f32 %v298_v3, %v298_v3  ;;  %v807_v17 = vpack.c.bf16 %v1990_v16, %v1990_v16  ;;  %v1991_v18 = vld [vmem:[%s2536_s16 + $0x8] sm:$0xff]  ;;  %v985_v20 = vmul.f32 %v1990_v16, %v1990_v16  ;;  %s2344_s16 = scalar_lea.vmem %s2761_s7, 16 }
  0x1b   : > { %v2552_v8 = vmul.f32 %v2548_v7, %v2545_v6  ;;  %v402_v9 = vpack.c.bf16 %v299_v5, %v299_v5  ;;  %v581_v12 = vmul.f32 %v299_v5, %v299_v5  ;;  %v671_v14 = vmul.f32 %v299_v5, %v298_v3  ;;  %p2345_p13 = scmp.ne.s32.totalorder %s2761_s7, %s2344_s16  ;;  %p2352_p3 = scmp.lt.s32.totalorder %s2350_s27, %s2344_s16 }
  0x1c   : > { %2081 = vmatmul.mubr.msk.bf16.vlgmr.msra.gmra.mrb[0].mxu0 %vm301_vm2, %v300_v4  ;;  %v492_v11 = vpack.c.bf16 %v491_v10, %v491_v10  ;;  %v896_v19 = vpack.c.bf16 %v1991_v18, %v1991_v18  ;;  %v986_v21 = vpack.c.bf16 %v985_v20, %v985_v20  ;;  %v1075_v22 = vmul.f32 %v1991_v18, %v1991_v18 }
  0x1d   : > { %2091 = vmatpush3.bf16.msra.mxu0 %v2518_v2  ;;  %2092 = vmatprep.mubr.msk.bf16.mxu0 %vm2425_vm1, %v2424_v1  ;;  %v582_v13 = vpack.c.bf16 %v581_v12, %v581_v12  ;;  %v672_v15 = vpack.c.bf16 %v671_v14, %v671_v14  ;;  %v1165_v24 = vmul.f32 %v1991_v18, %v1990_v16  ;;  %p2346_p0 = pnand %p2345_p13, %p2497_p4  ;;  %p2353_p5 = por %p2352_p3, %p2351_p2 }
  0x1e   : > { %2102 = vmatprep.subr.bf16.mxu0 %v2424_v1  ;;  %v1076_v23 = vpack.c.bf16 %v1075_v22, %v1075_v22  ;;  %v1301_v26 = vpack.c.bf16 %v2545_v6, %v2545_v6  ;;  %v1390_v27 = vpack.c.bf16 %v2548_v7, %v2548_v7  ;;  %v1479_v28 = vmul.f32 %v2545_v6, %v2545_v6 }
  0x1f   : > { %v1166_v25 = vpack.c.bf16 %v1165_v24, %v1165_v24  ;;  %v1569_v30 = vmul.f32 %v2548_v7, %v2548_v7  ;;  %v1660_v32 = vpack.c.bf16 %v2552_v8, %v2552_v8  ;;  %p2347_p1 = pneg %p2346_p0 }
  0x20   : > { %v1480_v29 = vpack.c.bf16 %v1479_v28, %v1479_v28 }
  0x21   : > { %v1570_v31 = vpack.c.bf16 %v1569_v30, %v1569_v30  ;;  %p2354_p6 = pnand %p2353_p5, %p2347_p1 }
  0x24   : > { %2093 = vmatmul.mubr.msk.bf16.vlgmr.msra.gmra.mrb[4].mxu0 %vm301_vm2, %v402_v9 }
  0x25   : > { %2103 = vmatpush3.bf16.msra.mxu0 %v2518_v2  ;;  %2104 = vmatprep.mubr.msk.bf16.mxu0 %vm2425_vm1, %v2424_v1 }
  0x26   : > { %2114 = vmatprep.subr.bf16.mxu0 %v2424_v1 }
  0x2c   : > { %2105 = vmatmul.mubr.msk.bf16.vlgmr.msra.gmra.mrb[8].mxu0 %vm301_vm2, %v492_v11 }
  0x2d   : > { %2115 = vmatpush3.bf16.msra.mxu0 %v2518_v2  ;;  %2116 = vmatprep.mubr.msk.bf16.mxu0 %vm2425_vm1, %v2424_v1 }
  0x2e   : > { %2126 = vmatprep.subr.bf16.mxu0 %v2424_v1 }
  0x34   : > { %2117 = vmatmul.mubr.msk.bf16.vlgmr.msra.gmra.mrb[12].mxu0 %vm301_vm2, %v582_v13 }
  0x35   : > { %2127 = vmatpush3.bf16.msra.mxu0 %v2518_v2  ;;  %2128 = vmatprep.mubr.msk.bf16.mxu0 %vm2425_vm1, %v2424_v1 }
  0x36   : > { %2138 = vmatprep.subr.bf16.mxu0 %v2424_v1 }
  0x3c   : > { %2129 = vmatmul.mubr.msk.bf16.vlgmr.msra.gmra.mrb[16].mxu0 %vm301_vm2, %v672_v15 }
  0x3d   : > { %2139 = vmatpush3.bf16.msra.mxu0 %v2518_v2  ;;  %2140 = vmatprep.mubr.msk.bf16.mxu0 %vm2425_vm1, %v2424_v1 }
  0x3e   : > { %2150 = vmatprep.subr.bf16.mxu0 %v2424_v1 }
  0x44   : > { %2141 = vmatmul.mubr.msk.bf16.vlgmr.msra.gmra.mrb[20].mxu0 %vm301_vm2, %v807_v17 }
  0x45   : > { %2151 = vmatpush3.bf16.msra.mxu0 %v2518_v2  ;;  %2152 = vmatprep.mubr.msk.bf16.mxu0 %vm2425_vm1, %v2424_v1 }
  0x46   : > { %2162 = vmatprep.subr.bf16.mxu0 %v2424_v1 }
  0x4c   : > { %2153 = vmatmul.mubr.msk.bf16.vlgmr.msra.gmra.mrb[24].mxu0 %vm301_vm2, %v896_v19 }
  0x4d   : > { %2163 = vmatpush3.bf16.msra.mxu0 %v2518_v2  ;;  %2164 = vmatprep.mubr.msk.bf16.mxu0 %vm2425_vm1, %v2424_v1 }
  0x4e   : > { %2174 = vmatprep.subr.bf16.mxu0 %v2424_v1 }
  0x54   : > { %2165 = vmatmul.mubr.msk.bf16.vlgmr.msra.gmra.mrb[28].mxu0 %vm301_vm2, %v986_v21 }
  0x55   : > { %2175 = vmatpush3.bf16.msra.mxu0 %v2518_v2  ;;  %2176 = vmatprep.mubr.msk.bf16.mxu0 %vm2425_vm1, %v2424_v1 }
  0x56   : > { %2186 = vmatprep.subr.bf16.mxu0 %v2424_v1 }
  0x5c   : > { %2177 = vmatmul.mubr.msk.bf16.vlgmr.msra.gmra.mrb[32].mxu0 %vm301_vm2, %v1076_v23 }
  0x5d   : > { %2187 = vmatpush3.bf16.msra.mxu0 %v2518_v2  ;;  %2188 = vmatprep.mubr.msk.bf16.mxu0 %vm2425_vm1, %v2424_v1 }
  0x5e   : > { %2198 = vmatprep.subr.bf16.mxu0 %v2424_v1 }
  0x64   : > { %2189 = vmatmul.mubr.msk.bf16.vlgmr.msra.gmra.mrb[36].mxu0 %vm301_vm2, %v1166_v25 }
  0x65   : > { %2199 = vmatpush3.bf16.msra.mxu0 %v2518_v2  ;;  %2200 = vmatprep.mubr.msk.bf16.mxu0 %vm2425_vm1, %v2424_v1 }
  0x66   : > { %2210 = vmatprep.subr.bf16.mxu0 %v2424_v1 }
  0x6c   : > { %2201 = vmatmul.mubr.msk.bf16.vlgmr.msra.gmra.mrb[40].mxu0 %vm301_vm2, %v1301_v26 }
  0x6d   : > { %2211 = vmatpush3.bf16.msra.mxu0 %v2518_v2  ;;  %2212 = vmatprep.mubr.msk.bf16.mxu0 %vm2425_vm1, %v2424_v1 }
  0x6e   : > { %2222 = vmatprep.subr.bf16.mxu0 %v2424_v1 }
  0x74   : > { %2213 = vmatmul.mubr.msk.bf16.vlgmr.msra.gmra.mrb[44].mxu0 %vm301_vm2, %v1390_v27 }
  0x75   : > { %2223 = vmatpush3.bf16.msra.mxu0 %v2518_v2  ;;  %2224 = vmatprep.mubr.msk.bf16.mxu0 %vm2425_vm1, %v2424_v1 }
  0x76   : > { %2234 = vmatprep.subr.bf16.mxu0 %v2424_v1 }
  0x7c   : > { %2225 = vmatmul.mubr.msk.bf16.vlgmr.msra.gmra.mrb[48].mxu0 %vm301_vm2, %v1480_v29 }
  0x7d   : > { %2235 = vmatpush3.bf16.msra.mxu0 %v2518_v2  ;;  %2236 = vmatprep.mubr.msk.bf16.mxu0 %vm2425_vm1, %v2424_v1 }
  0x7e   : > { %2246 = vmatprep.subr.bf16.mxu0 %v2424_v1 }
  0x84   : > { %2237 = vmatmul.mubr.msk.bf16.vlgmr.msra.gmra.mrb[52].mxu0 %vm301_vm2, %v1570_v31 }
  0x85   : > { %2247 = vmatpush3.bf16.msra.mxu0 %v2518_v2  ;;  %2248 = vmatprep.mubr.msk.bf16.mxu0 %vm2425_vm1, %v2424_v1 }
  0x8c   : > { %2249 = vmatmul.mubr.msk.bf16.vlgmr.msra.gmra.mrb[56].mxu0 %vm301_vm2, %v1660_v32 }
  0xef   : > { %v343_v33 = vpop.f32.mrb[0].mxu0 }
  0xf0   : > { %v349_v34 = vpack.c.bf16 %v343_v33, %v343_v33  ;;  %v2082_v35 = vpop.f32.mrb[1].mxu0 }
  0xf1   : > { %v346_v36 = vpop.f32.mrb[2].mxu0 }
  0xf2   : > { %v2083_v37 = vpop.f32.mrb[3].mxu0  ;;  %v359_v38 = vsel %vm305_vm0, %v349_v34, 0 }
  0xf3   : > { %2085 = vmatpush3.bf16.msra.mxu1 %v359_v38 }
  0xf4   : > { %2096 = vmatprep.subr.bf16.mxu1 %v2424_v1 }
  0xf6   : > { %2087 = vmatmul.mubr.msk.bf16.vlgmr.msra.gmra.mrb[0].mxu1 %vm301_vm2, %v2635_v39 }
  0xf7   : > { %v440_v40 = vpop.f32.mrb[4].mxu0  ;;  %2098 = vmatprep.mubr.msk.bf16.mxu1 %vm2425_vm1, %v2424_v1 }
  0xf8   : > { %v446_v41 = vpack.c.bf16 %v440_v40, %v440_v40  ;;  %v2094_v42 = vpop.f32.mrb[5].mxu0 }
  0xf9   : > { %v443_v43 = vpop.f32.mrb[6].mxu0 }
  0xfa   : > { %v448_v44 = vsel %vm305_vm0, %v446_v41, 0  ;;  %v2095_v45 = vpop.f32.mrb[7].mxu0 }
  0xfb   : > { %2097 = vmatpush3.bf16.msra.mxu1 %v448_v44 }
  0xfc   : > { %2108 = vmatprep.subr.bf16.mxu1 %v2424_v1 }
  0xfe   : > { %2099 = vmatmul.mubr.msk.bf16.vlgmr.msra.gmra.mrb[4].mxu1 %vm301_vm2, %v2635_v39 }
  0xff   : > { %v530_v46 = vpop.f32.mrb[8].mxu0  ;;  %2110 = vmatprep.mubr.msk.bf16.mxu1 %vm2425_vm1, %v2424_v1 }
 0x100   : > { %v536_v47 = vpack.c.bf16 %v530_v46, %v530_v46  ;;  %v2106_v48 = vpop.f32.mrb[9].mxu0 }
 0x101   : > { %v533_v49 = vpop.f32.mrb[10].mxu0 }
 0x102   : > { %v538_v50 = vsel %vm305_vm0, %v536_v47, 0  ;;  %v2107_v51 = vpop.f32.mrb[11].mxu0 }
 0x103   : > { %2109 = vmatpush3.bf16.msra.mxu1 %v538_v50 }
 0x104   : > { %2120 = vmatprep.subr.bf16.mxu1 %v2424_v1 }
 0x106   : > { %2111 = vmatmul.mubr.msk.bf16.vlgmr.msra.gmra.mrb[8].mxu1 %vm301_vm2, %v2635_v39 }
 0x107   : > { %v620_v52 = vpop.f32.mrb[12].mxu0  ;;  %2122 = vmatprep.mubr.msk.bf16.mxu1 %vm2425_vm1, %v2424_v1 }
 0x108   : > { %v626_v53 = vpack.c.bf16 %v620_v52, %v620_v52  ;;  %v2118_v54 = vpop.f32.mrb[13].mxu0 }
 0x109   : > { %v623_v55 = vpop.f32.mrb[14].mxu0 }
 0x10a   : > { %v628_v56 = vsel %vm305_vm0, %v626_v53, 0  ;;  %v2119_v57 = vpop.f32.mrb[15].mxu0 }
 0x10b   : > { %2121 = vmatpush3.bf16.msra.mxu1 %v628_v56 }
 0x10c   : > { %2132 = vmatprep.subr.bf16.mxu1 %v2424_v1 }
 0x10e   : > { %2123 = vmatmul.mubr.msk.bf16.vlgmr.msra.gmra.mrb[12].mxu1 %vm301_vm2, %v2635_v39 }
 0x10f   : > { %v710_v58 = vpop.f32.mrb[16].mxu0  ;;  %2134 = vmatprep.mubr.msk.bf16.mxu1 %vm2425_vm1, %v2424_v1 }
 0x110   : > { %v716_v59 = vpack.c.bf16 %v710_v58, %v710_v58  ;;  %v2130_v60 = vpop.f32.mrb[17].mxu0 }
 0x111   : > { %v713_v61 = vpop.f32.mrb[18].mxu0 }
 0x112   : > { %v718_v62 = vsel %vm305_vm0, %v716_v59, 0  ;;  %v2131_v63 = vpop.f32.mrb[19].mxu0 }
 0x113   : > { %2133 = vmatpush3.bf16.msra.mxu1 %v718_v62 }
 0x114   : > { %2144 = vmatprep.subr.bf16.mxu1 %v2424_v1 }
 0x116   : > { %2135 = vmatmul.mubr.msk.bf16.vlgmr.msra.gmra.mrb[16].mxu1 %vm301_vm2, %v2635_v39 }
 0x117   : > { %v845_v0 = vpop.f32.mrb[20].mxu0  ;;  %2146 = vmatprep.mubr.msk.bf16.mxu1 %vm2425_vm1, %v2424_v1 }
 0x118   : > { %v851_v2 = vpack.c.bf16 %v845_v0, %v845_v0  ;;  %v2142_v3 = vpop.f32.mrb[21].mxu0 }
 0x119   : > { %v848_v4 = vpop.f32.mrb[22].mxu0 }
 0x11a   : > { %v853_v5 = vsel %vm305_vm0, %v851_v2, 0  ;;  %v2143_v6 = vpop.f32.mrb[23].mxu0 }
 0x11b   : > { %2145 = vmatpush3.bf16.msra.mxu1 %v853_v5 }
 0x11c   : > { %2156 = vmatprep.subr.bf16.mxu1 %v2424_v1 }
 0x11e   : > { %2147 = vmatmul.mubr.msk.bf16.vlgmr.msra.gmra.mrb[20].mxu1 %vm301_vm2, %v2635_v39 }
 0x11f   : > { %v934_v7 = vpop.f32.mrb[24].mxu0  ;;  %2158 = vmatprep.mubr.msk.bf16.mxu1 %vm2425_vm1, %v2424_v1 }
 0x120   : > { %v940_v8 = vpack.c.bf16 %v934_v7, %v934_v7  ;;  %v2154_v9 = vpop.f32.mrb[25].mxu0 }
 0x121   : > { %v937_v10 = vpop.f32.mrb[26].mxu0 }
 0x122   : > { %v942_v11 = vsel %vm305_vm0, %v940_v8, 0  ;;  %v2155_v12 = vpop.f32.mrb[27].mxu0 }
 0x123   : > { %2157 = vmatpush3.bf16.msra.mxu1 %v942_v11 }
 0x124   : > { %2168 = vmatprep.subr.bf16.mxu1 %v2424_v1 }
 0x126   : > { %2159 = vmatmul.mubr.msk.bf16.vlgmr.msra.gmra.mrb[24].mxu1 %vm301_vm2, %v2635_v39 }
 0x127   : > { %v1024_v13 = vpop.f32.mrb[28].mxu0  ;;  %2170 = vmatprep.mubr.msk.bf16.mxu1 %vm2425_vm1, %v2424_v1 }
 0x128   : > { %v1030_v14 = vpack.c.bf16 %v1024_v13, %v1024_v13  ;;  %v2166_v15 = vpop.f32.mrb[29].mxu0 }
 0x129   : > { %v1027_v16 = vpop.f32.mrb[30].mxu0 }
 0x12a   : > { %v1032_v17 = vsel %vm305_vm0, %v1030_v14, 0  ;;  %v2167_v18 = vpop.f32.mrb[31].mxu0 }
 0x12b   : > { %2169 = vmatpush3.bf16.msra.mxu1 %v1032_v17 }
 0x12c   : > { %2180 = vmatprep.subr.bf16.mxu1 %v2424_v1 }
 0x12e   : > { %2171 = vmatmul.mubr.msk.bf16.vlgmr.msra.gmra.mrb[28].mxu1 %vm301_vm2, %v2635_v39 }
 0x12f   : > { %v1114_v19 = vpop.f32.mrb[32].mxu0  ;;  %2182 = vmatprep.mubr.msk.bf16.mxu1 %vm2425_vm1, %v2424_v1 }
 0x130   : > { %v1120_v20 = vpack.c.bf16 %v1114_v19, %v1114_v19  ;;  %v2178_v21 = vpop.f32.mrb[33].mxu0 }
 0x131   : > { %v1117_v22 = vpop.f32.mrb[34].mxu0 }
 0x132   : > { %v1122_v23 = vsel %vm305_vm0, %v1120_v20, 0  ;;  %v2179_v24 = vpop.f32.mrb[35].mxu0 }
 0x133   : > { %2181 = vmatpush3.bf16.msra.mxu1 %v1122_v23 }
 0x134   : > { %2192 = vmatprep.subr.bf16.mxu1 %v2424_v1 }
 0x136   : > { %2183 = vmatmul.mubr.msk.bf16.vlgmr.msra.gmra.mrb[32].mxu1 %vm301_vm2, %v2635_v39 }
 0x137   : > { %v1204_v25 = vpop.f32.mrb[36].mxu0  ;;  %2194 = vmatprep.mubr.msk.bf16.mxu1 %vm2425_vm1, %v2424_v1 }
 0x138   : > { %v1210_v26 = vpack.c.bf16 %v1204_v25, %v1204_v25  ;;  %v2190_v27 = vpop.f32.mrb[37].mxu0 }
 0x139   : > { %v1207_v28 = vpop.f32.mrb[38].mxu0 }
 0x13a   : > { %v1212_v29 = vsel %vm305_vm0, %v1210_v26, 0  ;;  %v2191_v30 = vpop.f32.mrb[39].mxu0 }
 0x13b   : > { %2193 = vmatpush3.bf16.msra.mxu1 %v1212_v29 }
 0x13c   : > { %2204 = vmatprep.subr.bf16.mxu1 %v2424_v1 }
 0x13e   : > { %2195 = vmatmul.mubr.msk.bf16.vlgmr.msra.gmra.mrb[36].mxu1 %vm301_vm2, %v2635_v39 }
 0x13f   : > { %v1339_v31 = vpop.f32.mrb[40].mxu0  ;;  %2206 = vmatprep.mubr.msk.bf16.mxu1 %vm2425_vm1, %v2424_v1 }
 0x140   : > { %v1345_v32 = vpack.c.bf16 %v1339_v31, %v1339_v31  ;;  %v2202_v33 = vpop.f32.mrb[41].mxu0 }
 0x141   : > { %v1342_v34 = vpop.f32.mrb[42].mxu0 }
 0x142   : > { %v1347_v35 = vsel %vm305_vm0, %v1345_v32, 0  ;;  %v2203_v36 = vpop.f32.mrb[43].mxu0 }
 0x143   : > { %2205 = vmatpush3.bf16.msra.mxu1 %v1347_v35 }
 0x144   : > { %2216 = vmatprep.subr.bf16.mxu1 %v2424_v1 }
 0x146   : > { %2207 = vmatmul.mubr.msk.bf16.vlgmr.msra.gmra.mrb[40].mxu1 %vm301_vm2, %v2635_v39 }
 0x147   : > { %v1428_v37 = vpop.f32.mrb[44].mxu0  ;;  %2218 = vmatprep.mubr.msk.bf16.mxu1 %vm2425_vm1, %v2424_v1 }
 0x148   : > { %v1434_v38 = vpack.c.bf16 %v1428_v37, %v1428_v37  ;;  %v2214_v40 = vpop.f32.mrb[45].mxu0 }
 0x149   : > { %v1431_v41 = vpop.f32.mrb[46].mxu0 }
 0x14a   : > { %v1436_v42 = vsel %vm305_vm0, %v1434_v38, 0  ;;  %v2215_v43 = vpop.f32.mrb[47].mxu0 }
 0x14b   : > { %2217 = vmatpush3.bf16.msra.mxu1 %v1436_v42 }
 0x14c   : > { %2228 = vmatprep.subr.bf16.mxu1 %v2424_v1 }
 0x14e   : > { %2219 = vmatmul.mubr.msk.bf16.vlgmr.msra.gmra.mrb[44].mxu1 %vm301_vm2, %v2635_v39 }
 0x14f   : > { %v1518_v44 = vpop.f32.mrb[48].mxu0  ;;  %2230 = vmatprep.mubr.msk.bf16.mxu1 %vm2425_vm1, %v2424_v1 }
 0x150   : > { %v1524_v45 = vpack.c.bf16 %v1518_v44, %v1518_v44  ;;  %v2226_v46 = vpop.f32.mrb[49].mxu0 }
 0x151   : > { %v1521_v47 = vpop.f32.mrb[50].mxu0 }
 0x152   : > { %v1526_v48 = vsel %vm305_vm0, %v1524_v45, 0  ;;  %v2227_v49 = vpop.f32.mrb[51].mxu0 }
 0x153   : > { %2229 = vmatpush3.bf16.msra.mxu1 %v1526_v48 }
 0x154   : > { %2240 = vmatprep.subr.bf16.mxu1 %v2424_v1 }
 0x156   : > { %2231 = vmatmul.mubr.msk.bf16.vlgmr.msra.gmra.mrb[48].mxu1 %vm301_vm2, %v2635_v39 }
 0x157   : > { %v1608_v50 = vpop.f32.mrb[52].mxu0  ;;  %2242 = vmatprep.mubr.msk.bf16.mxu1 %vm2425_vm1, %v2424_v1 }
 0x158   : > { %v1614_v51 = vpack.c.bf16 %v1608_v50, %v1608_v50  ;;  %v2238_v52 = vpop.f32.mrb[53].mxu0 }
 0x159   : > { %v1611_v53 = vpop.f32.mrb[54].mxu0 }
 0x15a   : > { %v1616_v54 = vsel %vm305_vm0, %v1614_v51, 0  ;;  %v2239_v55 = vpop.f32.mrb[55].mxu0 }
 0x15b   : > { %2241 = vmatpush3.bf16.msra.mxu1 %v1616_v54 }
 0x15c   : > { %2252 = vmatprep.subr.bf16.mxu1 %v2424_v1 }
 0x15e   : > { %2243 = vmatmul.mubr.msk.bf16.vlgmr.msra.gmra.mrb[52].mxu1 %vm301_vm2, %v2635_v39 }
 0x15f   : > { %v1698_v56 = vpop.f32.mrb[56].mxu0  ;;  %2254 = vmatprep.mubr.msk.bf16.mxu1 %vm2425_vm1, %v2424_v1 }
 0x160   : > { %v1704_v57 = vpack.c.bf16 %v1698_v56, %v1698_v56  ;;  %v2250_v58 = vpop.f32.mrb[57].mxu0 }
 0x161   : > { %v1701_v59 = vpop.f32.mrb[58].mxu0 }
 0x162   : > { %v1706_v60 = vsel %vm305_vm0, %v1704_v57, 0  ;;  %v2251_v61 = vpop.f32.mrb[59].mxu0 }
 0x163   : > { %2253 = vmatpush3.bf16.msra.mxu1 %v1706_v60 }
 0x166   : > { %2255 = vmatmul.mubr.msk.bf16.vlgmr.msra.gmra.mrb[56].mxu1 %vm301_vm2, %v2635_v39 }
 0x1c9   : > { %v395_v62 = vpop.f32.mrb[0].mxu1 }
 0x1ca   : > { %v2088_v63 = vpop.f32.mrb[1].mxu1  ;;  %v761_v4 = vmul.f32 %v395_v62, %v395_v62 }
 0x1cb   : > { %v398_v0 = vpop.f32.mrb[2].mxu1 }
 0x1cc   : > { %v2089_v2 = vpop.f32.mrb[3].mxu1  ;;  %v762_v9 = vmul.f32 %v398_v0, %v398_v0 }
 0x1d1   : > { %v484_v3 = vpop.f32.mrb[4].mxu1 }
 0x1d2   : > { %v763_v5 = vmul.f32 %v484_v3, %v484_v3  ;;  %v765_v6 = vmul.f32 %v484_v3, %v395_v62  ;;  %v2100_v7 = vpop.f32.mrb[5].mxu1 }
 0x1d3   : > { %v487_v8 = vpop.f32.mrb[6].mxu1 }
 0x1d4   : > { %v783_v10 = vadd.f32 %v763_v5, %v761_v4  ;;  %v764_v11 = vmul.f32 %v487_v8, %v487_v8  ;;  %v766_v12 = vmul.f32 %v487_v8, %v398_v0  ;;  %v2101_v13 = vpop.f32.mrb[7].mxu1  ;;  %v791_v22 = vmul.f32 2.0, %v765_v6 }
 0x1d6   : > { %v785_v14 = vadd.f32 0.0001, %v783_v10  ;;  %v784_v15 = vadd.f32 %v764_v11, %v762_v9  ;;  %v792_v23 = vmul.f32 2.0, %v766_v12  ;;  %v793_v24 = vadd.f32 0.0001, %v791_v22 }
 0x1d8   : > { %2320 = vrcp.f32 %v785_v14  ;;  %v786_v16 = vadd.f32 0.0001, %v784_v15  ;;  %v794_v30 = vadd.f32 0.0001, %v792_v23 }
 0x1d9   : > { %v574_v39 = vpop.f32.mrb[8].mxu1 }
 0x1da   : > { %2322 = vrcp.f32 %v786_v16  ;;  %v767_v17 = vsub.f32 %v574_v39, %v761_v4  ;;  %v2112_v18 = vpop.f32.mrb[9].mxu1 }
 0x1db   : > { %v577_v19 = vpop.f32.mrb[10].mxu1 }
 0x1dc   : > { %v768_v20 = vsub.f32 %v577_v19, %v762_v9  ;;  %v2113_v21 = vpop.f32.mrb[11].mxu1 }
 0x1e1   : > { %v664_v25 = vpop.f32.mrb[12].mxu1 }
 0x1e2   : > { %v2321_v26 = vpop.eup %2320  ;;  %v769_v27 = vsub.f32 %v664_v25, %v763_v5  ;;  %v2124_v28 = vpop.f32.mrb[13].mxu1 }
 0x1e3   : > { %v795_v29 = vmul.f32 %v2321_v26, %v793_v24  ;;  %v667_v31 = vpop.f32.mrb[14].mxu1 }
 0x1e4   : > { %v2323_v32 = vpop.eup %2322  ;;  %v777_v33 = vadd.f32 %v769_v27, %v767_v17  ;;  %v770_v34 = vsub.f32 %v667_v31, %v764_v11  ;;  %v2125_v35 = vpop.f32.mrb[15].mxu1 }
 0x1e5   : > { %v796_v36 = vmul.f32 %v2323_v32, %v794_v30 }
 0x1e6   : > { %v779_v37 = vadd.f32 0.0009, %v777_v33  ;;  %v778_v38 = vadd.f32 %v770_v34, %v768_v20 }
 0x1e8   : > { %2324 = vrcp.f32 %v779_v37  ;;  %v780_v40 = vadd.f32 0.0009, %v778_v38 }
 0x1e9   : > { %v754_v41 = vpop.f32.mrb[16].mxu1 }
 0x1ea   : > { %2326 = vrcp.f32 %v780_v40  ;;  %v771_v42 = vsub.f32 %v754_v41, %v765_v6  ;;  %v2136_v43 = vpop.f32.mrb[17].mxu1 }
 0x1eb   : > { %v757_v44 = vpop.f32.mrb[18].mxu1 }
 0x1ec   : > { %v772_v45 = vsub.f32 %v757_v44, %v766_v12  ;;  %v2137_v46 = vpop.f32.mrb[19].mxu1  ;;  %v773_v47 = vmul.f32 2.0, %v771_v42 }
 0x1ee   : > { %v774_v48 = vmul.f32 2.0, %v772_v45  ;;  %v775_v49 = vadd.f32 0.0009, %v773_v47 }
 0x1f0   : > { %v776_v54 = vadd.f32 0.0009, %v774_v48 }
 0x1f1   : > { %v889_v50 = vpop.f32.mrb[20].mxu1 }
 0x1f2   : > { %v2325_v51 = vpop.eup %2324  ;;  %v2148_v52 = vpop.f32.mrb[21].mxu1  ;;  %v1255_v62 = vmul.f32 %v889_v50, %v889_v50 }
 0x1f3   : > { %v2723_v53 = vmul.f32 %v2325_v51, %v775_v49  ;;  %v892_v55 = vpop.f32.mrb[22].mxu1 }
 0x1f4   : > { %v2327_v56 = vpop.eup %2326  ;;  %v2149_v57 = vpop.f32.mrb[23].mxu1  ;;  %v1256_v4 = vmul.f32 %v892_v55, %v892_v55 }
 0x1f5   : > { %v2726_v58 = vmul.f32 %v795_v29, %v2723_v53  ;;  %v2728_v59 = vmul.f32 %v2327_v56, %v776_v54 }
 0x1f7   : > { %v2731_v60 = vmul.f32 %v796_v36, %v2728_v59 }
 0x1f9   : > { %v978_v61 = vpop.f32.mrb[24].mxu1 }
 0x1fa   : > { %v1257_v63 = vmul.f32 %v978_v61, %v978_v61  ;;  %v1259_v0 = vmul.f32 %v978_v61, %v889_v50  ;;  %v2160_v2 = vpop.f32.mrb[25].mxu1 }
 0x1fb   : > { %v981_v3 = vpop.f32.mrb[26].mxu1 }
 0x1fc   : > { %v1277_v5 = vadd.f32 %v1257_v63, %v1255_v62  ;;  %v1258_v6 = vmul.f32 %v981_v3, %v981_v3  ;;  %v1260_v7 = vmul.f32 %v981_v3, %v892_v55  ;;  %v2161_v8 = vpop.f32.mrb[27].mxu1  ;;  %v1285_v17 = vmul.f32 2.0, %v1259_v0 }
 0x1fe   : > { %v1279_v9 = vadd.f32 0.0001, %v1277_v5  ;;  %v1278_v10 = vadd.f32 %v1258_v6, %v1256_v4  ;;  %v1286_v18 = vmul.f32 2.0, %v1260_v7  ;;  %v1287_v19 = vadd.f32 0.0001, %v1285_v17 }
 0x200   : > { %2328 = vrcp.f32 %v1279_v9  ;;  %v1280_v11 = vadd.f32 0.0001, %v1278_v10  ;;  %v1288_v25 = vadd.f32 0.0001, %v1286_v18 }
 0x201   : > { %v1068_v12 = vpop.f32.mrb[28].mxu1 }
 0x202   : > { %2330 = vrcp.f32 %v1280_v11  ;;  %v1261_v13 = vsub.f32 %v1068_v12, %v1255_v62  ;;  %v2172_v14 = vpop.f32.mrb[29].mxu1 }
 0x203   : > { %v1071_v15 = vpop.f32.mrb[30].mxu1 }
 0x204   : > { %v1262_v16 = vsub.f32 %v1071_v15, %v1256_v4  ;;  %v2173_v39 = vpop.f32.mrb[31].mxu1 }
 0x209   : > { %v1158_v20 = vpop.f32.mrb[32].mxu1 }
 0x20a   : > { %v2329_v21 = vpop.eup %2328  ;;  %v1263_v22 = vsub.f32 %v1158_v20, %v1257_v63  ;;  %v2184_v23 = vpop.f32.mrb[33].mxu1 }
 0x20b   : > { %v1289_v24 = vmul.f32 %v2329_v21, %v1287_v19  ;;  %v1161_v26 = vpop.f32.mrb[34].mxu1 }
 0x20c   : > { %v2331_v27 = vpop.eup %2330  ;;  %v1271_v28 = vadd.f32 %v1263_v22, %v1261_v13  ;;  %v1264_v29 = vsub.f32 %v1161_v26, %v1258_v6  ;;  %v2185_v30 = vpop.f32.mrb[35].mxu1 }
 0x20d   : > { %v1290_v31 = vmul.f32 %v2331_v27, %v1288_v25 }
 0x20e   : > { %v1273_v32 = vadd.f32 0.0009, %v1271_v28  ;;  %v1272_v33 = vadd.f32 %v1264_v29, %v1262_v16 }
 0x210   : > { %2332 = vrcp.f32 %v1273_v32  ;;  %v1274_v34 = vadd.f32 0.0009, %v1272_v33 }
 0x211   : > { %v1248_v35 = vpop.f32.mrb[36].mxu1 }
 0x212   : > { %2334 = vrcp.f32 %v1274_v34  ;;  %v1265_v36 = vsub.f32 %v1248_v35, %v1259_v0  ;;  %v2196_v37 = vpop.f32.mrb[37].mxu1 }
 0x213   : > { %v1251_v38 = vpop.f32.mrb[38].mxu1 }
 0x214   : > { %v1266_v40 = vsub.f32 %v1251_v38, %v1260_v7  ;;  %v2197_v41 = vpop.f32.mrb[39].mxu1  ;;  %v1267_v42 = vmul.f32 2.0, %v1265_v36 }
 0x215   : > { %v1791_v41 = vlaneseq }
 0x216   : > { %v1268_v43 = vmul.f32 2.0, %v1266_v40  ;;  %v1269_v44 = vadd.f32 0.0009, %v1267_v42 }
 0x218   : > { %v1270_v49 = vadd.f32 0.0009, %v1268_v43 }
 0x219   : > { %v1383_v45 = vpop.f32.mrb[40].mxu1 }
 0x21a   : > { %v2333_v46 = vpop.eup %2332  ;;  %v2208_v47 = vpop.f32.mrb[41].mxu1  ;;  %v1749_v2 = vmul.f32 %v1383_v45, %v1383_v45 }
 0x21b   : > { %v1283_v48 = vmul.f32 %v2333_v46, %v1269_v44  ;;  %v1386_v50 = vpop.f32.mrb[42].mxu1  ;;  %v1792_v44 = vand.u32 127, %v1791_v41 }
 0x21c   : > { %v2335_v51 = vpop.eup %2334  ;;  %v2209_v52 = vpop.f32.mrb[43].mxu1  ;;  %v1750_v7 = vmul.f32 %v1386_v50, %v1386_v50 }
 0x21d   : > { %v1291_v54 = vmul.f32 %v1289_v24, %v1283_v48  ;;  %v2734_v55 = vadd.f32 %v1283_v48, %v2723_v53  ;;  %v1284_v56 = vmul.f32 %v2335_v51, %v1270_v49  ;;  %vm1796_vm3 = vcmp.lt.s32.totalorder %v1792_v44, 9 }
 0x21f   : > { %v1292_v57 = vmul.f32 %v1290_v31, %v1284_v56  ;;  %v2737_v61 = vadd.f32 %v1284_v56, %v2728_v59  ;;  %v2740_v62 = vadd.f32 %v1291_v54, %v2726_v58 }
 0x221   : > { %v1472_v63 = vpop.f32.mrb[44].mxu1  ;;  %v2743_v0 = vadd.f32 %v1292_v57, %v2731_v60 }
 0x222   : > { %v1751_v3 = vmul.f32 %v1472_v63, %v1472_v63  ;;  %v1753_v4 = vmul.f32 %v1472_v63, %v1383_v45  ;;  %v2220_v5 = vpop.f32.mrb[45].mxu1  ;;  %v2014_v63 = vsel %vm1796_vm3, 1.0, %v2424_v1 }
 0x223   : > { %v1475_v6 = vpop.f32.mrb[46].mxu1 }
 0x224   : > { %v1771_v53 = vadd.f32 %v1751_v3, %v1749_v2  ;;  %v1752_v8 = vmul.f32 %v1475_v6, %v1475_v6  ;;  %v1754_v9 = vmul.f32 %v1475_v6, %v1386_v50  ;;  %v2221_v10 = vpop.f32.mrb[47].mxu1  ;;  %v1779_v39 = vmul.f32 2.0, %v1753_v4 }
 0x226   : > { %v1773_v11 = vadd.f32 0.0001, %v1771_v53  ;;  %v1772_v59 = vadd.f32 %v1752_v8, %v1750_v7  ;;  %v1780_v17 = vmul.f32 2.0, %v1754_v9  ;;  %v1781_v18 = vadd.f32 0.0001, %v1779_v39 }
 0x228   : > { %2336 = vrcp.f32 %v1773_v11  ;;  %v1774_v12 = vadd.f32 0.0001, %v1772_v59  ;;  %v1782_v24 = vadd.f32 0.0001, %v1780_v17 }
 0x229   : > { %v1562_v58 = vpop.f32.mrb[48].mxu1 }
 0x22a   : > { %2338 = vrcp.f32 %v1774_v12  ;;  %v1755_v13 = vsub.f32 %v1562_v58, %v1749_v2  ;;  %v2232_v14 = vpop.f32.mrb[49].mxu1 }
 0x22b   : > { %v1565_v60 = vpop.f32.mrb[50].mxu1 }
 0x22c   : > { %v1756_v15 = vsub.f32 %v1565_v60, %v1750_v7  ;;  %v2233_v16 = vpop.f32.mrb[51].mxu1 }
 0x231   : > { %v1652_v19 = vpop.f32.mrb[52].mxu1 }
 0x232   : > { %v2337_v20 = vpop.eup %2336  ;;  %v1757_v21 = vsub.f32 %v1652_v19, %v1751_v3  ;;  %v2244_v22 = vpop.f32.mrb[53].mxu1 }
 0x233   : > { %v1783_v23 = vmul.f32 %v2337_v20, %v1781_v18  ;;  %v1655_v25 = vpop.f32.mrb[54].mxu1 }
 0x234   : > { %v2339_v26 = vpop.eup %2338  ;;  %v1765_v27 = vadd.f32 %v1757_v21, %v1755_v13  ;;  %v1758_v28 = vsub.f32 %v1655_v25, %v1752_v8  ;;  %v2245_v29 = vpop.f32.mrb[55].mxu1 }
 0x235   : > { %v1784_v30 = vmul.f32 %v2339_v26, %v1782_v24 }
 0x236   : > { %v1767_v31 = vadd.f32 0.0009, %v1765_v27  ;;  %v1766_v32 = vadd.f32 %v1758_v28, %v1756_v15 }
 0x238   : > { %2340 = vrcp.f32 %v1767_v31  ;;  %v1768_v33 = vadd.f32 0.0009, %v1766_v32 }
 0x239   : > { %v1742_v34 = vpop.f32.mrb[56].mxu1 }
 0x23a   : > { %2342 = vrcp.f32 %v1768_v33  ;;  %v1759_v35 = vsub.f32 %v1742_v34, %v1753_v4  ;;  %v2256_v36 = vpop.f32.mrb[57].mxu1 }
 0x23b   : > { %v1745_v37 = vpop.f32.mrb[58].mxu1 }
 0x23c   : > { %v1760_v38 = vsub.f32 %v1745_v37, %v1754_v9  ;;  %v2257_v40 = vpop.f32.mrb[59].mxu1  ;;  %v1761_v42 = vmul.f32 2.0, %v1759_v35 }
 0x23e   : > { %v1762_v43 = vmul.f32 2.0, %v1760_v38  ;;  %v1763_v45 = vadd.f32 0.0009, %v1761_v42 }
 0x240   : > { %v1764_v48 = vadd.f32 0.0009, %v1762_v43 }
 0x242   : > { %v2341_v46 = vpop.eup %2340 }
 0x243   : > { %v1777_v47 = vmul.f32 %v2341_v46, %v1763_v45 }
 0x244   : > { %v2343_v49 = vpop.eup %2342 }
 0x245   : > { %v1785_v50 = vmul.f32 %v1783_v23, %v1777_v47  ;;  %v1778_v51 = vmul.f32 %v2343_v49, %v1764_v48  ;;  %v1789_v52 = vadd.f32 %v1777_v47, %v2734_v55 }
 0x247   : > { %v1786_v54 = vmul.f32 %v1784_v30, %v1778_v51  ;;  %v1790_v56 = vadd.f32 %v1778_v51, %v2737_v61  ;;  %v1787_v57 = vadd.f32 %v1785_v50, %v2740_v62  ;;  %v1801_v4 = vmul.f32 %v2014_v63, %v1789_v52 }
 0x249   : > { %v1788_v2 = vadd.f32 %v1786_v54, %v2743_v0  ;;  %v1802_v3 = vmul.f32 %v2014_v63, %v1790_v56  ;;  %v1799_v7 = vmul.f32 %v2014_v63, %v1787_v57 }
 0x24b   : > { %v1800_v5 = vmul.f32 %v2014_v63, %v1788_v2  ;;  %v1818_v6 = vsel %vm1803_vm4, %v1802_v3, 0.0 }
 0x24c   : > { %v1819_v53 = vadd.f32 %v1818_v6, %v1801_v4 }
 0x24d   : > { %v1804_v8 = vsel %vm1803_vm4, %v1800_v5, 0.0 }
 0x24e   : > { %v1805_v9 = vadd.f32 %v1804_v8, %v1799_v7 }
 0x250   : > { %1806 = vadd.xlane.f32.xlu0 %v1805_v9 }
 0x254   : > { %1820 = vadd.xlane.f32.xlu0 %v1819_v53 }
 0x2dd   : > { %v1807_v55 = vpop.xlane.xlu0 %1806 }
 0x2de   : > { %v1808_v61 = vrot.slane %v1807_v55, 4 }
 0x2e0   : > { %v1809_v62 = vadd.f32 %v1808_v61, %v1807_v55 }
 0x2e1   : > { %v1821_v1 = vpop.xlane.xlu0 %1820 }
 0x2e2   : > { %v1810_v10 = vrot.slane %v1809_v62, 2  ;;  %v1822_v11 = vrot.slane %v1821_v1, 4 }
 0x2e4   : > { %v1823_v0 = vadd.f32 %v1822_v11, %v1821_v1  ;;  %v1811_v59 = vadd.f32 %v1810_v10, %v1809_v62 }
 0x2e6   : > { %v1824_v12 = vrot.slane %v1823_v0, 2  ;;  %v1812_v58 = vrot.slane %v1811_v59, 1 }
 0x2e8   : > { %v1825_v13 = vadd.f32 %v1824_v12, %v1823_v0  ;;  %v1813_v14 = vadd.f32 %v1812_v58, %v1811_v59 }
 0x2ea   : > { %2258 = vpush %v1813_v14  ;;  %v1826_v60 = vrot.slane %v1825_v13, 1 }
 0x2ec   : > { %v1827_v15 = vadd.f32 %v1826_v60, %v1825_v13 }
 0x2ee   : > { %2260 = vpush %v1827_v15 }
 0x31b   : > { %s2259_s11 = spop %2258 }
 0x31c   : > { %v1815_v16 = vstv %s2259_s11 }
 0x31d   : > { %1817 = vst.msk [vmem:[%s263_s29] sm:$0x1] %vm1816_vm5, %v1815_v16 }
 0x31e   : > { %2357 = shalt.err (!%p2354_p6)
}
 0x31f   : > { %s2358_s25 = scalar_lea.hbm %s2759_s10, 16  ;;  %s2362_s9 = scalar_lea.hbm %s2821_s4, 32 }
 0x320   : > { %p2359_p7 = scmp.ne.s32.totalorder %s2759_s10, %s2358_s25  ;;  %p2363_p11 = scmp.lt.u32.totalorder %s2759_s10, %s2821_s4 }
 0x321   : > { %p2364_p12 = scmp.lt.u32.totalorder %s2362_s9, %s2358_s25  ;;  %p2366_p0 = scmp.lt.u32.totalorder %s2358_s25, %s2759_s10 }
 0x322   : > { %p2360_p9 = pnand %p2359_p7, %p2497_p4 }
 0x323   : > { %p2365_p13 = por %p2364_p12, %p2363_p11 }
 0x324   : > { %p2361_p10 = pneg %p2360_p9 }
 0x325   : > { %p2367_p1 = por %p2366_p0, %p2365_p13 }
 0x327   : > { %p2368_p2 = pnand %p2367_p1, %p2361_p10 }
 0x329   : > { %2371 = shalt.err (!%p2368_p2)
}
 0x32a   : > { %2262 = dma.vmem_to_hbm [thread:$0]  (%p2497_p4), %s2761_s7, 16, %s2759_s10, %s1832_s15  }
 0x32b   : > { %s2261_s13 = spop %2260 }
 0x32c   : > { %v1829_v39 = vstv %s2261_s13 }
 0x32d   : > { %1830 = vst.msk [vmem:[%s293_s14] sm:$0x1] %vm1816_vm5, %v1829_v39 }
 0x32e PF: > { %p2268_p3 = scmp.ge.s32.totalorder %s2422_s23, 2  ;;  %s1866_s24 = sand.u32 1, %s2402_s18  }
 0x32f   : > { %s1867_s28 = scalar_lea.sflag [#allocation3], %s1866_s24 }
 0x330   : > { %p2265_p5 = pnand %p2268_p3, %p2504_p8 }
 0x332   : > { %2397 = dma.done.wait (!%p2265_p5), %s1867_s28, 16  }
 0x333   : > { %2399 = vsyncadd (!%p2265_p5), %s1867_s28, 4294967280  ;;  %s19_s23 = sadd.s32 1, %s2422_s23   ;;  %s2825_s18 = smov %s2406_s19 }
 0x334   : > { %p16_p4 = scmp.ge.s32.totalorder %s19_s23, 4   ;;  %s2826_s19 = smov %s2410_s20 }
 0x335   : > { %s2827_s20 = smov %s2510_s6  ;;  %s2828_s21 = smov %s2418_s22 }
 0x336   : > { %s2829_s22 = smov %s2831_s26  ;;  %18 = sbr.rel (!%p16_p4) target bundleno = 4 (0x4), region = 93 }
 0x33d   :  { %1880 = vsyncpa [#allocation3], 1 }
 0x33e   :  { %1882 = vsyncpa [#allocation3 + $0x1], 1 }

// kernel: _dvc_loss_device.10
= control target key start
LH: loop header
LB: loop body
LE: loop exit
PB: predicated region body
PF: predicated region fallthrough
CT: control target
= control target key end

     0   :  { %11 = vsyncpa [#allocation3], 0  ;;  %s2823_s0 = inlined_call_operand.vmem [shape: f32[6,16,16], index: 0, kind: input, shape index: {}]   ;;  %s2824_s1 = inlined_call_operand.vmem [shape: f32[6,16,16], index: 1, kind: input, shape index: {}]   ;;  %s2825_s2 = inlined_call_operand.vmem [shape: bf16[16,16], index: 2, kind: input, shape index: {}]   ;;  %s2826_s3 = inlined_call_operand.vmem [shape: bf16[16,128], index: 3, kind: input, shape index: {}]   ;;  %s2827_s4 = inlined_call_operand.hbm [shape: f32[2,1,1,1], index: 4, kind: output, shape index: {0}]   ;;  %s2828_s5 = inlined_call_operand.vmem [shape: f32[2,1,1,1], index: 5, kind: output, shape index: {1}]  }
   0x1   :  { %13 = vsyncpa [#allocation3 + $0x1], 0  ;;  %s2458_s18 = smov 0   ;;  %s2460_s19 = smov 0  }
   0x2   :  { %s2462_s20 = smov 0   ;;  %s2464_s21 = smov 0  }
   0x3   :  { %s2466_s22 = smov 0   ;;  %s2468_s23 = smov 0  }
   0x4 LB: > { %s1962_s24 = sadd.s32 4294967295, %s2423_s23   ;;  %s1963_s25 = sadd.s32 4294967294, %s2423_s23   ;;  %s2423_s23 = sphi %s2468_s23, %s19_s23   ;;  %s2419_s22 = sphi %s2466_s22, %s2835_s22   ;;  %s2415_s21 = sphi %s2464_s21, %s2834_s21   ;;  %s2411_s20 = sphi %s2462_s20, %s2833_s20   ;;  %s2407_s19 = sphi %s2460_s19, %s2832_s19   ;;  %s2403_s18 = sphi %s2458_s18, %s2831_s18  }
   0x5   : > { %s31_s26 = sadd.s32 1, %s2419_s22  ;;  %s139_s27 = sadd.s32 1, %s2411_s20 }
   0x6   : > { %p33_p0 = scmp.ge.s32.totalorder %s31_s26, 2  ;;  %p149_p1 = scmp.ne.s32.totalorder %s2411_s20, %s2407_s19 }
   0x7   : > { %p150_p2 = scmp.eq.s32.totalorder %s1962_s24, 1  ;;  %p155_p3 = scmp.ne.s32.totalorder %s2407_s19, %s2403_s18 }
   0x8   : > { %s2837_s26 = smov (%p33_p0, %s31_s26), 0  ;;  %p156_p5 = scmp.eq.s32.totalorder %s1963_s25, 1 }
   0x9   : > { %p2498_p4 = por %p150_p2, %p149_p1  ;;  %s134_s29 = ssub.s32 %s2419_s22, %s2837_s26 }
   0xa   : > { %p1967_p6 = scmp.ge.s32.totalorder %s2423_s23, 1  ;;  %p137_p7 = scmp.eq.s32.totalorder %s134_s29, 0 }
   0xb   : > { %p2505_p8 = por %p156_p5, %p155_p3  ;;  %p232_p9 = scmp.lt.s32.totalorder %s2423_s23, 3 }
   0xc   : > { %s2511_s6 = scalar_select %p137_p7, %s2411_s20, %s139_s27  }
   0xd   : > { %p233_p10 = pnand %p1967_p6, %p232_p9 }
   0xe   : > { %v2516_v0 = vld [vmem:[%s2826_s3] sm:$0xff] (!%p233_p10)   ;;  %v2425_v1 = vmov (!%p233_p10), 0.0   ;;  %s276_s9 = smul.u32 (!%p233_p10), 3, %s2415_s21  ;;  %vm2426_vm0 = vmmov (!%p233_p10), 0   ;;  %vm316_vm1 = vcmask (!%p233_p10), 130048   ;;  %s266_s25 = sand.u32 (!%p233_p10), 1, %s2407_s19  }
   0xf   : > { %236 = sbr.rel (%p233_p10) target bundleno = 814 (0x32e), region = 36  ;;  %2078 = vmatprep.subr.bf16.mxu0 (!%p233_p10), %v2425_v1  ;;  %2084 = vmatprep.subr.bf16.mxu1 (!%p233_p10), %v2425_v1  ;;  %v2655_v52 = vld [vmem:[%s2825_s2] sm:$0xff] (!%p233_p10)   ;;  %p294_p12 = scmp.lt.s32.totalorder (!%p233_p10), %s2415_s21, 1  ;;  %vm1808_vm3 = vcmask (!%p233_p10), 0  }
  0x10   : > { %2079 = vmatpush3.bf16.msra.mxu0 (!%p233_p10), %v2516_v0  ;;  %2080 = vmatprep.mubr.msk.bf16.mxu0 (!%p233_p10), %vm2426_vm0, %v2425_v1  ;;  %p277_p11 = scmp.lt.s32.totalorder (!%p233_p10), %s276_s9, 5  ;;  %s2013_s27 = sshll.u32 (!%p233_p10), %s2415_s21, 4 }
  0x11   : > { %2090 = vmatprep.subr.bf16.mxu0 (!%p233_p10), %v2425_v1  ;;  %2086 = vmatprep.mubr.msk.bf16.mxu1 (!%p233_p10), %vm2426_vm0, %v2425_v1  ;;  %s267_s29 = scalar_lea.vmem (!%p233_p10), [#allocation2], %s266_s25  ;;  %s1823_s15 = scalar_lea.sflag (!%p233_p10), [#allocation3], %s266_s25 }
  0x12   : > { %s1842_s7 = sshll.u32 (!%p233_p10), %s267_s29, 4  ;;  %s2427_s17 = smov (!%p233_p10), [#allocation2]   ;;  %s2767_s7 = int_to_ptr.vmem [resolvable:$true] %s1842_s7 }
  0x13   : > { %s2349_s24 = sshll.u32 (!%p233_p10), %s2427_s17, 4  ;;  %s2350_s24 = int_to_ptr.vmem [resolvable:$false] %s2349_s24 }
  0x14   : > { %p2352_p2 = scmp.lt.s32.totalorder (!%p233_p10), %s2767_s7, %s2350_s24 }
  0x16   : > { %s2839_s9 = smov (!%p277_p11, %s276_s9), 5  ;;  %s2841_s21 = smov (!%p294_p12, %s2415_s21), 1 }
  0x17   : > { %s2016_s10 = sshll.u32 %s2839_s9, 4  ;;  %s299_s14 = scalar_lea.vmem %s2828_s5, %s2841_s21 }
  0x18   : > { %s2530_s13 = scalar_lea.vmem %s2823_s0, %s2016_s10  ;;  %s2537_s16 = scalar_lea.vmem %s2824_s1, %s2016_s10 }
  0x19   : > { %v305_v2 = vld [vmem:[%s2530_s13] sm:$0xff]  ;;  %v306_v3 = vld [vmem:[%s2530_s13 + $0x8] sm:$0xff]  ;;  %v1984_v24 = vld [vmem:[%s2530_s13 + $0x10] sm:$0xff]  ;;  %s2765_s10 = scalar_lea.hbm %s2827_s4, %s2013_s27  ;;  %s2351_s27 = scalar_lea.vmem %s2350_s24, 32 }
  0x1a   : > { %v309_v4 = vpack.c.bf16 %v306_v3, %v305_v2  ;;  %v307_v5 = vld [vmem:[%s2537_s16] sm:$0xff]  ;;  %v308_v6 = vld [vmem:[%s2537_s16 + $0x8] sm:$0xff]  ;;  %v498_v15 = vmul.f32 %v305_v2, %v305_v2  ;;  %v499_v16 = vmul.f32 %v306_v3, %v306_v3  ;;  %v1985_v25 = vld [vmem:[%s2530_s13 + $0x18] sm:$0xff]  ;;  %v987_v30 = vmul.f32 %v1984_v24, %v1984_v24 }
  0x1b   : > { %v2547_v7 = vld [vmem:[%s2530_s13 + $0x20] sm:$0xff]  ;;  %v411_v8 = vpack.c.bf16 %v308_v6, %v307_v5  ;;  %v2550_v9 = vld [vmem:[%s2530_s13 + $0x28] sm:$0xff]  ;;  %v587_v18 = vmul.f32 %v307_v5, %v307_v5  ;;  %v588_v19 = vmul.f32 %v308_v6, %v308_v6  ;;  %v676_v21 = vmul.f32 %v307_v5, %v305_v2  ;;  %v1986_v27 = vld [vmem:[%s2537_s16 + $0x10] sm:$0xff] }
  0x1c   : > { %2081 = vmatmul.mubr.msk.bf16.vlgmr.msra.gmra.mrb[0].mxu0 %vm316_vm1, %v309_v4  ;;  %v2553_v10 = vld [vmem:[%s2537_s16 + $0x20] sm:$0xff]  ;;  %v2556_v11 = vld [vmem:[%s2537_s16 + $0x28] sm:$0xff]  ;;  %v500_v17 = vpack.c.bf16 %v499_v16, %v498_v15  ;;  %v677_v22 = vmul.f32 %v308_v6, %v306_v3  ;;  %v813_v26 = vpack.c.bf16 %v1985_v25, %v1984_v24  ;;  %v1987_v28 = vld [vmem:[%s2537_s16 + $0x18] sm:$0xff]  ;;  %v988_v31 = vmul.f32 %v1985_v25, %v1985_v25  ;;  %s2345_s16 = scalar_lea.vmem %s2767_s7, 16 }
  0x1d   : > { %2091 = vmatpush3.bf16.msra.mxu0 %v2516_v0  ;;  %2092 = vmatprep.mubr.msk.bf16.mxu0 %vm2426_vm0, %v2425_v1  ;;  %v2560_v12 = vmul.f32 %v2553_v10, %v2547_v7  ;;  %v2564_v13 = vmul.f32 %v2556_v11, %v2550_v9  ;;  %v589_v20 = vpack.c.bf16 %v588_v19, %v587_v18  ;;  %p2346_p13 = scmp.ne.s32.totalorder %s2767_s7, %s2345_s16  ;;  %p2353_p3 = scmp.lt.s32.totalorder %s2351_s27, %s2345_s16 }
  0x1e   : > { %2102 = vmatprep.subr.bf16.mxu0 %v2425_v1  ;;  %v678_v23 = vpack.c.bf16 %v677_v22, %v676_v21  ;;  %v900_v29 = vpack.c.bf16 %v1987_v28, %v1986_v27  ;;  %v989_v32 = vpack.c.bf16 %v988_v31, %v987_v30  ;;  %v1076_v33 = vmul.f32 %v1986_v27, %v1986_v27 }
  0x1f   : > { %v1656_v14 = vpack.c.bf16 %v2564_v13, %v2560_v12  ;;  %v1077_v34 = vmul.f32 %v1987_v28, %v1987_v28  ;;  %v1165_v36 = vmul.f32 %v1986_v27, %v1984_v24  ;;  %v1166_v37 = vmul.f32 %v1987_v28, %v1985_v25  ;;  %p2347_p0 = pnand %p2346_p13, %p2498_p4  ;;  %p2354_p5 = por %p2353_p3, %p2352_p2 }
  0x20   : > { %v1302_v39 = vpack.c.bf16 %v2550_v9, %v2547_v7  ;;  %v1389_v40 = vpack.c.bf16 %v2556_v11, %v2553_v10  ;;  %v1476_v41 = vmul.f32 %v2547_v7, %v2547_v7  ;;  %v1477_v42 = vmul.f32 %v2550_v9, %v2550_v9 }
  0x21   : > { %v1078_v35 = vpack.c.bf16 %v1077_v34, %v1076_v33  ;;  %v1167_v38 = vpack.c.bf16 %v1166_v37, %v1165_v36  ;;  %v1565_v44 = vmul.f32 %v2553_v10, %v2553_v10  ;;  %v1566_v45 = vmul.f32 %v2556_v11, %v2556_v11  ;;  %p2348_p1 = pneg %p2347_p0 }
  0x22   : > { %v1478_v43 = vpack.c.bf16 %v1477_v42, %v1476_v41 }
  0x23   : > { %v1567_v46 = vpack.c.bf16 %v1566_v45, %v1565_v44  ;;  %p2355_p6 = pnand %p2354_p5, %p2348_p1 }
  0x24   : > { %2093 = vmatmul.mubr.msk.bf16.vlgmr.msra.gmra.mrb[4].mxu0 %vm316_vm1, %v411_v8 }
  0x25   : > { %2103 = vmatpush3.bf16.msra.mxu0 %v2516_v0  ;;  %2104 = vmatprep.mubr.msk.bf16.mxu0 %vm2426_vm0, %v2425_v1 }
  0x26   : > { %2114 = vmatprep.subr.bf16.mxu0 %v2425_v1 }
  0x2c   : > { %2105 = vmatmul.mubr.msk.bf16.vlgmr.msra.gmra.mrb[8].mxu0 %vm316_vm1, %v500_v17 }
  0x2d   : > { %2115 = vmatpush3.bf16.msra.mxu0 %v2516_v0  ;;  %2116 = vmatprep.mubr.msk.bf16.mxu0 %vm2426_vm0, %v2425_v1 }
  0x2e   : > { %2126 = vmatprep.subr.bf16.mxu0 %v2425_v1 }
  0x34   : > { %2117 = vmatmul.mubr.msk.bf16.vlgmr.msra.gmra.mrb[12].mxu0 %vm316_vm1, %v589_v20 }
  0x35   : > { %2127 = vmatpush3.bf16.msra.mxu0 %v2516_v0  ;;  %2128 = vmatprep.mubr.msk.bf16.mxu0 %vm2426_vm0, %v2425_v1 }
  0x36   : > { %2138 = vmatprep.subr.bf16.mxu0 %v2425_v1 }
  0x3c   : > { %2129 = vmatmul.mubr.msk.bf16.vlgmr.msra.gmra.mrb[16].mxu0 %vm316_vm1, %v678_v23 }
  0x3d   : > { %2139 = vmatpush3.bf16.msra.mxu0 %v2516_v0  ;;  %2140 = vmatprep.mubr.msk.bf16.mxu0 %vm2426_vm0, %v2425_v1 }
  0x3e   : > { %2150 = vmatprep.subr.bf16.mxu0 %v2425_v1 }
  0x44   : > { %2141 = vmatmul.mubr.msk.bf16.vlgmr.msra.gmra.mrb[20].mxu0 %vm316_vm1, %v813_v26 }
  0x45   : > { %2151 = vmatpush3.bf16.msra.mxu0 %v2516_v0  ;;  %2152 = vmatprep.mubr.msk.bf16.mxu0 %vm2426_vm0, %v2425_v1 }
  0x46   : > { %2162 = vmatprep.subr.bf16.mxu0 %v2425_v1 }
  0x4c   : > { %2153 = vmatmul.mubr.msk.bf16.vlgmr.msra.gmra.mrb[24].mxu0 %vm316_vm1, %v900_v29 }
  0x4d   : > { %2163 = vmatpush3.bf16.msra.mxu0 %v2516_v0  ;;  %2164 = vmatprep.mubr.msk.bf16.mxu0 %vm2426_vm0, %v2425_v1 }
  0x4e   : > { %2174 = vmatprep.subr.bf16.mxu0 %v2425_v1 }
  0x54   : > { %2165 = vmatmul.mubr.msk.bf16.vlgmr.msra.gmra.mrb[28].mxu0 %vm316_vm1, %v989_v32 }
  0x55   : > { %2175 = vmatpush3.bf16.msra.mxu0 %v2516_v0  ;;  %2176 = vmatprep.mubr.msk.bf16.mxu0 %vm2426_vm0, %v2425_v1 }
  0x56   : > { %2186 = vmatprep.subr.bf16.mxu0 %v2425_v1 }
  0x5c   : > { %2177 = vmatmul.mubr.msk.bf16.vlgmr.msra.gmra.mrb[32].mxu0 %vm316_vm1, %v1078_v35 }
  0x5d   : > { %2187 = vmatpush3.bf16.msra.mxu0 %v2516_v0  ;;  %2188 = vmatprep.mubr.msk.bf16.mxu0 %vm2426_vm0, %v2425_v1 }
  0x5e   : > { %2198 = vmatprep.subr.bf16.mxu0 %v2425_v1 }
  0x64   : > { %2189 = vmatmul.mubr.msk.bf16.vlgmr.msra.gmra.mrb[36].mxu0 %vm316_vm1, %v1167_v38 }
  0x65   : > { %2199 = vmatpush3.bf16.msra.mxu0 %v2516_v0  ;;  %2200 = vmatprep.mubr.msk.bf16.mxu0 %vm2426_vm0, %v2425_v1 }
  0x66   : > { %2210 = vmatprep.subr.bf16.mxu0 %v2425_v1 }
  0x6c   : > { %2201 = vmatmul.mubr.msk.bf16.vlgmr.msra.gmra.mrb[40].mxu0 %vm316_vm1, %v1302_v39 }
  0x6d   : > { %2211 = vmatpush3.bf16.msra.mxu0 %v2516_v0  ;;  %2212 = vmatprep.mubr.msk.bf16.mxu0 %vm2426_vm0, %v2425_v1 }
  0x6e   : > { %2222 = vmatprep.subr.bf16.mxu0 %v2425_v1 }
  0x74   : > { %2213 = vmatmul.mubr.msk.bf16.vlgmr.msra.gmra.mrb[44].mxu0 %vm316_vm1, %v1389_v40 }
  0x75   : > { %2223 = vmatpush3.bf16.msra.mxu0 %v2516_v0  ;;  %2224 = vmatprep.mubr.msk.bf16.mxu0 %vm2426_vm0, %v2425_v1 }
  0x76   : > { %2234 = vmatprep.subr.bf16.mxu0 %v2425_v1 }
  0x7c   : > { %2225 = vmatmul.mubr.msk.bf16.vlgmr.msra.gmra.mrb[48].mxu0 %vm316_vm1, %v1478_v43 }
  0x7d   : > { %2235 = vmatpush3.bf16.msra.mxu0 %v2516_v0  ;;  %2236 = vmatprep.mubr.msk.bf16.mxu0 %vm2426_vm0, %v2425_v1 }
  0x7e   : > { %2246 = vmatprep.subr.bf16.mxu0 %v2425_v1 }
  0x84   : > { %2237 = vmatmul.mubr.msk.bf16.vlgmr.msra.gmra.mrb[52].mxu0 %vm316_vm1, %v1567_v46 }
  0x85   : > { %2247 = vmatpush3.bf16.msra.mxu0 %v2516_v0  ;;  %2248 = vmatprep.mubr.msk.bf16.mxu0 %vm2426_vm0, %v2425_v1 }
  0x8c   : > { %2249 = vmatmul.mubr.msk.bf16.vlgmr.msra.gmra.mrb[56].mxu0 %vm316_vm1, %v1656_v14 }
  0xef   : > { %v354_v47 = vpop.f32.mrb[0].mxu0 }
  0xf0   : > { %v2082_v48 = vpop.f32.mrb[1].mxu0 }
  0xf1   : > { %v357_v49 = vpop.f32.mrb[2].mxu0 }
  0xf2   : > { %v361_v50 = vpack.c.bf16 %v357_v49, %v354_v47  ;;  %v2083_v51 = vpop.f32.mrb[3].mxu0 }
  0xf4   : > { %2085 = vmatpush3.bf16.msra.mxu1 %v361_v50 }
  0xf5   : > { %2096 = vmatprep.subr.bf16.mxu1 %v2425_v1 }
  0xf7   : > { %2087 = vmatmul.mubr.msk.bf16.vlgmr.msra.gmra.mrb[0].mxu1 %vm316_vm1, %v2655_v52  ;;  %v449_v53 = vpop.f32.mrb[4].mxu0 }
  0xf8   : > { %v2094_v54 = vpop.f32.mrb[5].mxu0  ;;  %2098 = vmatprep.mubr.msk.bf16.mxu1 %vm2426_vm0, %v2425_v1 }
  0xf9   : > { %v452_v55 = vpop.f32.mrb[6].mxu0 }
  0xfa   : > { %v456_v56 = vpack.c.bf16 %v452_v55, %v449_v53  ;;  %v2095_v57 = vpop.f32.mrb[7].mxu0 }
  0xfc   : > { %2097 = vmatpush3.bf16.msra.mxu1 %v456_v56 }
  0xfd   : > { %2108 = vmatprep.subr.bf16.mxu1 %v2425_v1 }
  0xff   : > { %2099 = vmatmul.mubr.msk.bf16.vlgmr.msra.gmra.mrb[4].mxu1 %vm316_vm1, %v2655_v52  ;;  %v538_v58 = vpop.f32.mrb[8].mxu0 }
 0x100   : > { %v2106_v59 = vpop.f32.mrb[9].mxu0  ;;  %2110 = vmatprep.mubr.msk.bf16.mxu1 %vm2426_vm0, %v2425_v1 }
 0x101   : > { %v541_v60 = vpop.f32.mrb[10].mxu0 }
 0x102   : > { %v545_v61 = vpack.c.bf16 %v541_v60, %v538_v58  ;;  %v2107_v62 = vpop.f32.mrb[11].mxu0 }
 0x104   : > { %2109 = vmatpush3.bf16.msra.mxu1 %v545_v61 }
 0x105   : > { %2120 = vmatprep.subr.bf16.mxu1 %v2425_v1 }
 0x107   : > { %2111 = vmatmul.mubr.msk.bf16.vlgmr.msra.gmra.mrb[8].mxu1 %vm316_vm1, %v2655_v52  ;;  %v627_v63 = vpop.f32.mrb[12].mxu0 }
 0x108   : > { %v2118_v0 = vpop.f32.mrb[13].mxu0  ;;  %2122 = vmatprep.mubr.msk.bf16.mxu1 %vm2426_vm0, %v2425_v1 }
 0x109   : > { %v630_v2 = vpop.f32.mrb[14].mxu0 }
 0x10a   : > { %v634_v3 = vpack.c.bf16 %v630_v2, %v627_v63  ;;  %v2119_v4 = vpop.f32.mrb[15].mxu0 }
 0x10c   : > { %2121 = vmatpush3.bf16.msra.mxu1 %v634_v3 }
 0x10d   : > { %2132 = vmatprep.subr.bf16.mxu1 %v2425_v1 }
 0x10f   : > { %2123 = vmatmul.mubr.msk.bf16.vlgmr.msra.gmra.mrb[12].mxu1 %vm316_vm1, %v2655_v52  ;;  %v716_v5 = vpop.f32.mrb[16].mxu0 }
 0x110   : > { %v2130_v6 = vpop.f32.mrb[17].mxu0  ;;  %2134 = vmatprep.mubr.msk.bf16.mxu1 %vm2426_vm0, %v2425_v1 }
 0x111   : > { %v719_v7 = vpop.f32.mrb[18].mxu0 }
 0x112   : > { %v723_v8 = vpack.c.bf16 %v719_v7, %v716_v5  ;;  %v2131_v9 = vpop.f32.mrb[19].mxu0 }
 0x114   : > { %2133 = vmatpush3.bf16.msra.mxu1 %v723_v8 }
 0x115   : > { %2144 = vmatprep.subr.bf16.mxu1 %v2425_v1 }
 0x117   : > { %2135 = vmatmul.mubr.msk.bf16.vlgmr.msra.gmra.mrb[16].mxu1 %vm316_vm1, %v2655_v52  ;;  %v851_v10 = vpop.f32.mrb[20].mxu0 }
 0x118   : > { %v2142_v11 = vpop.f32.mrb[21].mxu0  ;;  %2146 = vmatprep.mubr.msk.bf16.mxu1 %vm2426_vm0, %v2425_v1 }
 0x119   : > { %v854_v12 = vpop.f32.mrb[22].mxu0 }
 0x11a   : > { %v858_v13 = vpack.c.bf16 %v854_v12, %v851_v10  ;;  %v2143_v14 = vpop.f32.mrb[23].mxu0 }
 0x11c   : > { %2145 = vmatpush3.bf16.msra.mxu1 %v858_v13 }
 0x11d   : > { %2156 = vmatprep.subr.bf16.mxu1 %v2425_v1 }
 0x11f   : > { %2147 = vmatmul.mubr.msk.bf16.vlgmr.msra.gmra.mrb[20].mxu1 %vm316_vm1, %v2655_v52  ;;  %v938_v15 = vpop.f32.mrb[24].mxu0 }
 0x120   : > { %v2154_v16 = vpop.f32.mrb[25].mxu0  ;;  %2158 = vmatprep.mubr.msk.bf16.mxu1 %vm2426_vm0, %v2425_v1 }
 0x121   : > { %v941_v17 = vpop.f32.mrb[26].mxu0 }
 0x122   : > { %v945_v18 = vpack.c.bf16 %v941_v17, %v938_v15  ;;  %v2155_v19 = vpop.f32.mrb[27].mxu0 }
 0x124   : > { %2157 = vmatpush3.bf16.msra.mxu1 %v945_v18 }
 0x125   : > { %2168 = vmatprep.subr.bf16.mxu1 %v2425_v1 }
 0x127   : > { %2159 = vmatmul.mubr.msk.bf16.vlgmr.msra.gmra.mrb[24].mxu1 %vm316_vm1, %v2655_v52  ;;  %v1027_v20 = vpop.f32.mrb[28].mxu0 }
 0x128   : > { %v2166_v21 = vpop.f32.mrb[29].mxu0  ;;  %2170 = vmatprep.mubr.msk.bf16.mxu1 %vm2426_vm0, %v2425_v1 }
 0x129   : > { %v1030_v22 = vpop.f32.mrb[30].mxu0 }
 0x12a   : > { %v1034_v23 = vpack.c.bf16 %v1030_v22, %v1027_v20  ;;  %v2167_v24 = vpop.f32.mrb[31].mxu0 }
 0x12c   : > { %2169 = vmatpush3.bf16.msra.mxu1 %v1034_v23 }
 0x12d   : > { %2180 = vmatprep.subr.bf16.mxu1 %v2425_v1 }
 0x12f   : > { %2171 = vmatmul.mubr.msk.bf16.vlgmr.msra.gmra.mrb[28].mxu1 %vm316_vm1, %v2655_v52  ;;  %v1116_v25 = vpop.f32.mrb[32].mxu0 }
 0x130   : > { %v2178_v26 = vpop.f32.mrb[33].mxu0  ;;  %2182 = vmatprep.mubr.msk.bf16.mxu1 %vm2426_vm0, %v2425_v1 }
 0x131   : > { %v1119_v27 = vpop.f32.mrb[34].mxu0 }
 0x132   : > { %v1123_v28 = vpack.c.bf16 %v1119_v27, %v1116_v25  ;;  %v2179_v29 = vpop.f32.mrb[35].mxu0 }
 0x134   : > { %2181 = vmatpush3.bf16.msra.mxu1 %v1123_v28 }
 0x135   : > { %2192 = vmatprep.subr.bf16.mxu1 %v2425_v1 }
 0x137   : > { %2183 = vmatmul.mubr.msk.bf16.vlgmr.msra.gmra.mrb[32].mxu1 %vm316_vm1, %v2655_v52  ;;  %v1205_v30 = vpop.f32.mrb[36].mxu0 }
 0x138   : > { %v2190_v31 = vpop.f32.mrb[37].mxu0  ;;  %2194 = vmatprep.mubr.msk.bf16.mxu1 %vm2426_vm0, %v2425_v1 }
 0x139   : > { %v1208_v32 = vpop.f32.mrb[38].mxu0 }
 0x13a   : > { %v1212_v33 = vpack.c.bf16 %v1208_v32, %v1205_v30  ;;  %v2191_v34 = vpop.f32.mrb[39].mxu0 }
 0x13c   : > { %2193 = vmatpush3.bf16.msra.mxu1 %v1212_v33 }
 0x13d   : > { %2204 = vmatprep.subr.bf16.mxu1 %v2425_v1 }
 0x13f   : > { %2195 = vmatmul.mubr.msk.bf16.vlgmr.msra.gmra.mrb[36].mxu1 %vm316_vm1, %v2655_v52  ;;  %v1340_v35 = vpop.f32.mrb[40].mxu0 }
 0x140   : > { %v2202_v36 = vpop.f32.mrb[41].mxu0  ;;  %2206 = vmatprep.mubr.msk.bf16.mxu1 %vm2426_vm0, %v2425_v1 }
 0x141   : > { %v1343_v37 = vpop.f32.mrb[42].mxu0 }
 0x142   : > { %v1347_v38 = vpack.c.bf16 %v1343_v37, %v1340_v35  ;;  %v2203_v39 = vpop.f32.mrb[43].mxu0 }
 0x144   : > { %2205 = vmatpush3.bf16.msra.mxu1 %v1347_v38 }
 0x145   : > { %2216 = vmatprep.subr.bf16.mxu1 %v2425_v1 }
 0x147   : > { %2207 = vmatmul.mubr.msk.bf16.vlgmr.msra.gmra.mrb[40].mxu1 %vm316_vm1, %v2655_v52  ;;  %v1427_v40 = vpop.f32.mrb[44].mxu0 }
 0x148   : > { %v2214_v41 = vpop.f32.mrb[45].mxu0  ;;  %2218 = vmatprep.mubr.msk.bf16.mxu1 %vm2426_vm0, %v2425_v1 }
 0x149   : > { %v1430_v42 = vpop.f32.mrb[46].mxu0 }
 0x14a   : > { %v1434_v43 = vpack.c.bf16 %v1430_v42, %v1427_v40  ;;  %v2215_v44 = vpop.f32.mrb[47].mxu0 }
 0x14c   : > { %2217 = vmatpush3.bf16.msra.mxu1 %v1434_v43 }
 0x14d   : > { %2228 = vmatprep.subr.bf16.mxu1 %v2425_v1 }
 0x14f   : > { %2219 = vmatmul.mubr.msk.bf16.vlgmr.msra.gmra.mrb[44].mxu1 %vm316_vm1, %v2655_v52  ;;  %v1516_v45 = vpop.f32.mrb[48].mxu0 }
 0x150   : > { %v2226_v46 = vpop.f32.mrb[49].mxu0  ;;  %2230 = vmatprep.mubr.msk.bf16.mxu1 %vm2426_vm0, %v2425_v1 }
 0x151   : > { %v1519_v47 = vpop.f32.mrb[50].mxu0 }
 0x152   : > { %v1523_v48 = vpack.c.bf16 %v1519_v47, %v1516_v45  ;;  %v2227_v49 = vpop.f32.mrb[51].mxu0 }
 0x154   : > { %2229 = vmatpush3.bf16.msra.mxu1 %v1523_v48 }
 0x155   : > { %2240 = vmatprep.subr.bf16.mxu1 %v2425_v1 }
 0x157   : > { %2231 = vmatmul.mubr.msk.bf16.vlgmr.msra.gmra.mrb[48].mxu1 %vm316_vm1, %v2655_v52  ;;  %v1605_v50 = vpop.f32.mrb[52].mxu0 }
 0x158   : > { %v2238_v51 = vpop.f32.mrb[53].mxu0  ;;  %2242 = vmatprep.mubr.msk.bf16.mxu1 %vm2426_vm0, %v2425_v1 }
 0x159   : > { %v1608_v53 = vpop.f32.mrb[54].mxu0 }
 0x15a   : > { %v1612_v54 = vpack.c.bf16 %v1608_v53, %v1605_v50  ;;  %v2239_v55 = vpop.f32.mrb[55].mxu0 }
 0x15c   : > { %2241 = vmatpush3.bf16.msra.mxu1 %v1612_v54 }
 0x15d   : > { %2252 = vmatprep.subr.bf16.mxu1 %v2425_v1 }
 0x15f   : > { %2243 = vmatmul.mubr.msk.bf16.vlgmr.msra.gmra.mrb[52].mxu1 %vm316_vm1, %v2655_v52  ;;  %v1694_v56 = vpop.f32.mrb[56].mxu0 }
 0x160   : > { %v2250_v57 = vpop.f32.mrb[57].mxu0  ;;  %2254 = vmatprep.mubr.msk.bf16.mxu1 %vm2426_vm0, %v2425_v1 }
 0x161   : > { %v1697_v58 = vpop.f32.mrb[58].mxu0 }
 0x162   : > { %v1701_v59 = vpack.c.bf16 %v1697_v58, %v1694_v56  ;;  %v2251_v60 = vpop.f32.mrb[59].mxu0 }
 0x164   : > { %2253 = vmatpush3.bf16.msra.mxu1 %v1701_v59 }
 0x167   : > { %2255 = vmatmul.mubr.msk.bf16.vlgmr.msra.gmra.mrb[56].mxu1 %vm316_vm1, %v2655_v52 }
 0x1ca   : > { %v404_v61 = vpop.f32.mrb[0].mxu1 }
 0x1cb   : > { %v2088_v62 = vpop.f32.mrb[1].mxu1  ;;  %v765_v3 = vmul.f32 %v404_v61, %v404_v61 }
 0x1cc   : > { %v407_v63 = vpop.f32.mrb[2].mxu1 }
 0x1cd   : > { %v2089_v0 = vpop.f32.mrb[3].mxu1  ;;  %v766_v8 = vmul.f32 %v407_v63, %v407_v63 }
 0x1d2   : > { %v491_v2 = vpop.f32.mrb[4].mxu1 }
 0x1d3   : > { %v767_v4 = vmul.f32 %v491_v2, %v491_v2  ;;  %v769_v5 = vmul.f32 %v491_v2, %v404_v61  ;;  %v2100_v6 = vpop.f32.mrb[5].mxu1 }
 0x1d4   : > { %v494_v7 = vpop.f32.mrb[6].mxu1 }
 0x1d5   : > { %v787_v9 = vadd.f32 %v767_v4, %v765_v3  ;;  %v768_v10 = vmul.f32 %v494_v7, %v494_v7  ;;  %v770_v11 = vmul.f32 %v494_v7, %v407_v63  ;;  %v2101_v12 = vpop.f32.mrb[7].mxu1  ;;  %v795_v21 = vmul.f32 2.0, %v769_v5 }
 0x1d7   : > { %v789_v13 = vadd.f32 0.0001, %v787_v9  ;;  %v788_v14 = vadd.f32 %v768_v10, %v766_v8  ;;  %v796_v22 = vmul.f32 2.0, %v770_v11  ;;  %v797_v23 = vadd.f32 0.0001, %v795_v21 }
 0x1d9   : > { %2321 = vrcp.f32 %v789_v13  ;;  %v790_v15 = vadd.f32 0.0001, %v788_v14  ;;  %v798_v29 = vadd.f32 0.0001, %v796_v22 }
 0x1da   : > { %v580_v52 = vpop.f32.mrb[8].mxu1 }
 0x1db   : > { %2323 = vrcp.f32 %v790_v15  ;;  %v771_v16 = vsub.f32 %v580_v52, %v765_v3  ;;  %v2112_v17 = vpop.f32.mrb[9].mxu1 }
 0x1dc   : > { %v583_v18 = vpop.f32.mrb[10].mxu1 }
 0x1dd   : > { %v772_v19 = vsub.f32 %v583_v18, %v766_v8  ;;  %v2113_v20 = vpop.f32.mrb[11].mxu1 }
 0x1e2   : > { %v669_v24 = vpop.f32.mrb[12].mxu1 }
 0x1e3   : > { %v2322_v25 = vpop.eup %2321  ;;  %v773_v26 = vsub.f32 %v669_v24, %v767_v4  ;;  %v2124_v27 = vpop.f32.mrb[13].mxu1 }
 0x1e4   : > { %v799_v28 = vmul.f32 %v2322_v25, %v797_v23  ;;  %v672_v30 = vpop.f32.mrb[14].mxu1 }
 0x1e5   : > { %v2324_v31 = vpop.eup %2323  ;;  %v781_v32 = vadd.f32 %v773_v26, %v771_v16  ;;  %v774_v33 = vsub.f32 %v672_v30, %v768_v10  ;;  %v2125_v34 = vpop.f32.mrb[15].mxu1 }
 0x1e6   : > { %v800_v35 = vmul.f32 %v2324_v31, %v798_v29 }
 0x1e7   : > { %v783_v36 = vadd.f32 0.0009, %v781_v32  ;;  %v782_v37 = vadd.f32 %v774_v33, %v772_v19 }
 0x1e9   : > { %2325 = vrcp.f32 %v783_v36  ;;  %v784_v38 = vadd.f32 0.0009, %v782_v37 }
 0x1ea   : > { %v758_v39 = vpop.f32.mrb[16].mxu1 }
 0x1eb   : > { %2327 = vrcp.f32 %v784_v38  ;;  %v775_v40 = vsub.f32 %v758_v39, %v769_v5  ;;  %v2136_v41 = vpop.f32.mrb[17].mxu1 }
 0x1ec   : > { %v761_v42 = vpop.f32.mrb[18].mxu1 }
 0x1ed   : > { %v776_v43 = vsub.f32 %v761_v42, %v770_v11  ;;  %v2137_v44 = vpop.f32.mrb[19].mxu1  ;;  %v777_v45 = vmul.f32 2.0, %v775_v40 }
 0x1ef   : > { %v778_v46 = vmul.f32 2.0, %v776_v43  ;;  %v779_v47 = vadd.f32 0.0009, %v777_v45 }
 0x1f1   : > { %v780_v53 = vadd.f32 0.0009, %v778_v46 }
 0x1f2   : > { %v893_v48 = vpop.f32.mrb[20].mxu1 }
 0x1f3   : > { %v2326_v49 = vpop.eup %2325  ;;  %v2148_v50 = vpop.f32.mrb[21].mxu1  ;;  %v1254_v61 = vmul.f32 %v893_v48, %v893_v48 }
 0x1f4   : > { %v2729_v51 = vmul.f32 %v2326_v49, %v779_v47  ;;  %v896_v54 = vpop.f32.mrb[22].mxu1 }
 0x1f5   : > { %v2328_v55 = vpop.eup %2327  ;;  %v2149_v56 = vpop.f32.mrb[23].mxu1  ;;  %v1255_v3 = vmul.f32 %v896_v54, %v896_v54 }
 0x1f6   : > { %v2732_v57 = vmul.f32 %v799_v28, %v2729_v51  ;;  %v2734_v58 = vmul.f32 %v2328_v55, %v780_v53 }
 0x1f8   : > { %v2737_v59 = vmul.f32 %v800_v35, %v2734_v58 }
 0x1fa   : > { %v980_v60 = vpop.f32.mrb[24].mxu1 }
 0x1fb   : > { %v1256_v62 = vmul.f32 %v980_v60, %v980_v60  ;;  %v1258_v63 = vmul.f32 %v980_v60, %v893_v48  ;;  %v2160_v0 = vpop.f32.mrb[25].mxu1 }
 0x1fc   : > { %v983_v2 = vpop.f32.mrb[26].mxu1 }
 0x1fd   : > { %v1276_v4 = vadd.f32 %v1256_v62, %v1254_v61  ;;  %v1257_v5 = vmul.f32 %v983_v2, %v983_v2  ;;  %v1259_v6 = vmul.f32 %v983_v2, %v896_v54  ;;  %v2161_v7 = vpop.f32.mrb[27].mxu1  ;;  %v1284_v16 = vmul.f32 2.0, %v1258_v63 }
 0x1ff   : > { %v1278_v8 = vadd.f32 0.0001, %v1276_v4  ;;  %v1277_v9 = vadd.f32 %v1257_v5, %v1255_v3  ;;  %v1285_v17 = vmul.f32 2.0, %v1259_v6  ;;  %v1286_v18 = vadd.f32 0.0001, %v1284_v16 }
 0x201   : > { %2329 = vrcp.f32 %v1278_v8  ;;  %v1279_v10 = vadd.f32 0.0001, %v1277_v9  ;;  %v1287_v24 = vadd.f32 0.0001, %v1285_v17 }
 0x202   : > { %v1069_v11 = vpop.f32.mrb[28].mxu1 }
 0x203   : > { %2331 = vrcp.f32 %v1279_v10  ;;  %v1260_v12 = vsub.f32 %v1069_v11, %v1254_v61  ;;  %v2172_v13 = vpop.f32.mrb[29].mxu1 }
 0x204   : > { %v1072_v14 = vpop.f32.mrb[30].mxu1 }
 0x205   : > { %v1261_v15 = vsub.f32 %v1072_v14, %v1255_v3  ;;  %v2173_v52 = vpop.f32.mrb[31].mxu1 }
 0x20a   : > { %v1158_v19 = vpop.f32.mrb[32].mxu1 }
 0x20b   : > { %v2330_v20 = vpop.eup %2329  ;;  %v1262_v21 = vsub.f32 %v1158_v19, %v1256_v62  ;;  %v2184_v22 = vpop.f32.mrb[33].mxu1 }
 0x20c   : > { %v1288_v23 = vmul.f32 %v2330_v20, %v1286_v18  ;;  %v1161_v25 = vpop.f32.mrb[34].mxu1 }
 0x20d   : > { %v2332_v26 = vpop.eup %2331  ;;  %v1270_v27 = vadd.f32 %v1262_v21, %v1260_v12  ;;  %v1263_v28 = vsub.f32 %v1161_v25, %v1257_v5  ;;  %v2185_v29 = vpop.f32.mrb[35].mxu1 }
 0x20e   : > { %v1289_v30 = vmul.f32 %v2332_v26, %v1287_v24 }
 0x20f   : > { %v1272_v31 = vadd.f32 0.0009, %v1270_v27  ;;  %v1271_v32 = vadd.f32 %v1263_v28, %v1261_v15 }
 0x211   : > { %2333 = vrcp.f32 %v1272_v31  ;;  %v1273_v33 = vadd.f32 0.0009, %v1271_v32 }
 0x212   : > { %v1247_v34 = vpop.f32.mrb[36].mxu1 }
 0x213   : > { %2335 = vrcp.f32 %v1273_v33  ;;  %v1264_v35 = vsub.f32 %v1247_v34, %v1258_v63  ;;  %v2196_v36 = vpop.f32.mrb[37].mxu1 }
 0x214   : > { %v1250_v37 = vpop.f32.mrb[38].mxu1 }
 0x215   : > { %v1265_v38 = vsub.f32 %v1250_v37, %v1259_v6  ;;  %v2197_v39 = vpop.f32.mrb[39].mxu1  ;;  %v1266_v40 = vmul.f32 2.0, %v1264_v35  ;;  %v1785_v37 = vlaneseq }
 0x217   : > { %v1267_v41 = vmul.f32 2.0, %v1265_v38  ;;  %v1268_v42 = vadd.f32 0.0009, %v1266_v40 }
 0x219   : > { %v1269_v47 = vadd.f32 0.0009, %v1267_v41 }
 0x21a   : > { %v1382_v43 = vpop.f32.mrb[40].mxu1 }
 0x21b   : > { %v2334_v44 = vpop.eup %2333  ;;  %v2208_v45 = vpop.f32.mrb[41].mxu1  ;;  %v1743_v0 = vmul.f32 %v1382_v43, %v1382_v43 }
 0x21c   : > { %v1282_v46 = vmul.f32 %v2334_v44, %v1268_v42  ;;  %v1385_v48 = vpop.f32.mrb[42].mxu1  ;;  %v1786_v42 = vand.u32 127, %v1785_v37 }
 0x21d   : > { %v2336_v49 = vpop.eup %2335  ;;  %v2209_v50 = vpop.f32.mrb[43].mxu1  ;;  %v1744_v6 = vmul.f32 %v1385_v48, %v1385_v48 }
 0x21e   : > { %v1290_v53 = vmul.f32 %v1288_v23, %v1282_v46  ;;  %v2740_v54 = vadd.f32 %v1282_v46, %v2729_v51  ;;  %v1283_v55 = vmul.f32 %v2336_v49, %v1269_v47  ;;  %vm1790_vm2 = vcmp.lt.s32.totalorder %v1786_v42, 16 }
 0x220   : > { %v1291_v56 = vmul.f32 %v1289_v30, %v1283_v55  ;;  %v2743_v60 = vadd.f32 %v1283_v55, %v2734_v58  ;;  %v2746_v61 = vadd.f32 %v1290_v53, %v2732_v57  ;;  %v2012_v53 = vsel %vm1790_vm2, 1.0, %v2425_v1 }
 0x222   : > { %v1469_v62 = vpop.f32.mrb[44].mxu1  ;;  %v2749_v63 = vadd.f32 %v1291_v56, %v2737_v59 }
 0x223   : > { %v1745_v2 = vmul.f32 %v1469_v62, %v1469_v62  ;;  %v1747_v3 = vmul.f32 %v1469_v62, %v1382_v43  ;;  %v2220_v4 = vpop.f32.mrb[45].mxu1 }
 0x224   : > { %v1472_v5 = vpop.f32.mrb[46].mxu1 }
 0x225   : > { %v1765_v51 = vadd.f32 %v1745_v2, %v1743_v0  ;;  %v1746_v7 = vmul.f32 %v1472_v5, %v1472_v5  ;;  %v1748_v8 = vmul.f32 %v1472_v5, %v1385_v48  ;;  %v2221_v9 = vpop.f32.mrb[47].mxu1  ;;  %v1773_v52 = vmul.f32 2.0, %v1747_v3 }
 0x227   : > { %v1767_v10 = vadd.f32 0.0001, %v1765_v51  ;;  %v1766_v58 = vadd.f32 %v1746_v7, %v1744_v6  ;;  %v1774_v16 = vmul.f32 2.0, %v1748_v8  ;;  %v1775_v17 = vadd.f32 0.0001, %v1773_v52 }
 0x229   : > { %2337 = vrcp.f32 %v1767_v10  ;;  %v1768_v11 = vadd.f32 0.0001, %v1766_v58  ;;  %v1776_v23 = vadd.f32 0.0001, %v1774_v16 }
 0x22a   : > { %v1558_v57 = vpop.f32.mrb[48].mxu1 }
 0x22b   : > { %2339 = vrcp.f32 %v1768_v11  ;;  %v1749_v12 = vsub.f32 %v1558_v57, %v1743_v0  ;;  %v2232_v13 = vpop.f32.mrb[49].mxu1 }
 0x22c   : > { %v1561_v59 = vpop.f32.mrb[50].mxu1 }
 0x22d   : > { %v1750_v14 = vsub.f32 %v1561_v59, %v1744_v6  ;;  %v2233_v15 = vpop.f32.mrb[51].mxu1 }
 0x232   : > { %v1647_v18 = vpop.f32.mrb[52].mxu1 }
 0x233   : > { %v2338_v19 = vpop.eup %2337  ;;  %v1751_v20 = vsub.f32 %v1647_v18, %v1745_v2  ;;  %v2244_v21 = vpop.f32.mrb[53].mxu1 }
 0x234   : > { %v1777_v22 = vmul.f32 %v2338_v19, %v1775_v17  ;;  %v1650_v24 = vpop.f32.mrb[54].mxu1 }
 0x235   : > { %v2340_v25 = vpop.eup %2339  ;;  %v1759_v26 = vadd.f32 %v1751_v20, %v1749_v12  ;;  %v1752_v27 = vsub.f32 %v1650_v24, %v1746_v7  ;;  %v2245_v28 = vpop.f32.mrb[55].mxu1 }
 0x236   : > { %v1778_v29 = vmul.f32 %v2340_v25, %v1776_v23 }
 0x237   : > { %v1761_v30 = vadd.f32 0.0009, %v1759_v26  ;;  %v1760_v31 = vadd.f32 %v1752_v27, %v1750_v14 }
 0x239   : > { %2341 = vrcp.f32 %v1761_v30  ;;  %v1762_v32 = vadd.f32 0.0009, %v1760_v31 }
 0x23a   : > { %v1736_v33 = vpop.f32.mrb[56].mxu1 }
 0x23b   : > { %2343 = vrcp.f32 %v1762_v32  ;;  %v1753_v34 = vsub.f32 %v1736_v33, %v1747_v3  ;;  %v2256_v35 = vpop.f32.mrb[57].mxu1 }
 0x23c   : > { %v1739_v36 = vpop.f32.mrb[58].mxu1 }
 0x23d   : > { %v1754_v38 = vsub.f32 %v1739_v36, %v1748_v8  ;;  %v2257_v39 = vpop.f32.mrb[59].mxu1  ;;  %v1755_v40 = vmul.f32 2.0, %v1753_v34 }
 0x23f   : > { %v1756_v41 = vmul.f32 2.0, %v1754_v38  ;;  %v1757_v43 = vadd.f32 0.0009, %v1755_v40 }
 0x241   : > { %v1758_v46 = vadd.f32 0.0009, %v1756_v41 }
 0x243   : > { %v2342_v44 = vpop.eup %2341 }
 0x244   : > { %v1771_v45 = vmul.f32 %v2342_v44, %v1757_v43 }
 0x245   : > { %v2344_v47 = vpop.eup %2343 }
 0x246   : > { %v1779_v48 = vmul.f32 %v1777_v22, %v1771_v45  ;;  %v1772_v49 = vmul.f32 %v2344_v47, %v1758_v46  ;;  %v1783_v50 = vadd.f32 %v1771_v45, %v2740_v54 }
 0x248   : > { %v1780_v55 = vmul.f32 %v1778_v29, %v1772_v49  ;;  %v1781_v56 = vadd.f32 %v1779_v48, %v2746_v61  ;;  %v1784_v62 = vadd.f32 %v1772_v49, %v2743_v60  ;;  %v1795_v2 = vmul.f32 %v2012_v53, %v1783_v50 }
 0x24a   : > { %v1782_v0 = vadd.f32 %v1780_v55, %v2749_v63  ;;  %v1796_v3 = vmul.f32 %v2012_v53, %v1784_v62  ;;  %v1793_v4 = vmul.f32 %v2012_v53, %v1781_v56 }
 0x24c   : > { %v1794_v5 = vmul.f32 %v2012_v53, %v1782_v0  ;;  %v1810_v6 = vadd.f32 %v1796_v3, %v1795_v2 }
 0x24e   : > { %v1797_v51 = vadd.f32 %v1794_v5, %v1793_v4 }
 0x250   : > { %1798 = vadd.xlane.f32.xlu0 %v1797_v51 }
 0x254   : > { %1811 = vadd.xlane.f32.xlu0 %v1810_v6 }
 0x2dd   : > { %v1799_v7 = vpop.xlane.xlu0 %1798 }
 0x2de   : > { %v1800_v54 = vrot.slane %v1799_v7, 4 }
 0x2e0   : > { %v1801_v1 = vadd.f32 %v1800_v54, %v1799_v7 }
 0x2e1   : > { %v1812_v8 = vpop.xlane.xlu0 %1811 }
 0x2e2   : > { %v1802_v61 = vrot.slane %v1801_v1, 2  ;;  %v1813_v9 = vrot.slane %v1812_v8, 4 }
 0x2e4   : > { %v1814_v60 = vadd.f32 %v1813_v9, %v1812_v8  ;;  %v1803_v63 = vadd.f32 %v1802_v61, %v1801_v1 }
 0x2e6   : > { %v1815_v10 = vrot.slane %v1814_v60, 2  ;;  %v1804_v58 = vrot.slane %v1803_v63, 1 }
 0x2e8   : > { %v1816_v11 = vadd.f32 %v1815_v10, %v1814_v60  ;;  %v1805_v57 = vadd.f32 %v1804_v58, %v1803_v63 }
 0x2ea   : > { %2258 = vpush %v1805_v57  ;;  %v1817_v12 = vrot.slane %v1816_v11, 1 }
 0x2ec   : > { %v1818_v13 = vadd.f32 %v1817_v12, %v1816_v11 }
 0x2ee   : > { %2260 = vpush %v1818_v13 }
 0x31b   : > { %s2259_s11 = spop %2258 }
 0x31c   : > { %v1807_v59 = vstv %s2259_s11 }
 0x31d   : > { %1809 = vst.msk [vmem:[%s267_s29] sm:$0x1] %vm1808_vm3, %v1807_v59 }
 0x31e   : > { %2358 = shalt.err (!%p2355_p6)
}
 0x31f   : > { %s2359_s25 = scalar_lea.hbm %s2765_s10, 16  ;;  %s2363_s9 = scalar_lea.hbm %s2827_s4, 32 }
 0x320   : > { %p2360_p7 = scmp.ne.s32.totalorder %s2765_s10, %s2359_s25  ;;  %p2364_p11 = scmp.lt.u32.totalorder %s2765_s10, %s2827_s4 }
 0x321   : > { %p2365_p12 = scmp.lt.u32.totalorder %s2363_s9, %s2359_s25  ;;  %p2367_p0 = scmp.lt.u32.totalorder %s2359_s25, %s2765_s10 }
 0x322   : > { %p2361_p9 = pnand %p2360_p7, %p2498_p4 }
 0x323   : > { %p2366_p13 = por %p2365_p12, %p2364_p11 }
 0x324   : > { %p2362_p10 = pneg %p2361_p9 }
 0x325   : > { %p2368_p1 = por %p2367_p0, %p2366_p13 }
 0x327   : > { %p2369_p2 = pnand %p2368_p1, %p2362_p10 }
 0x329   : > { %2372 = shalt.err (!%p2369_p2)
}
 0x32a   : > { %2262 = dma.vmem_to_hbm [thread:$0]  (%p2498_p4), %s2767_s7, 16, %s2765_s10, %s1823_s15  }
 0x32b   : > { %s2261_s13 = spop %2260 }
 0x32c   : > { %v1820_v14 = vstv %s2261_s13 }
 0x32d   : > { %1821 = vst.msk [vmem:[%s299_s14] sm:$0x1] %vm1808_vm3, %v1820_v14 }
 0x32e PF: > { %p2268_p3 = scmp.ge.s32.totalorder %s2423_s23, 2  ;;  %s1857_s24 = sand.u32 1, %s2403_s18  }
 0x32f   : > { %s1858_s28 = scalar_lea.sflag [#allocation3], %s1857_s24 }
 0x330   : > { %p2265_p5 = pnand %p2268_p3, %p2505_p8 }
 0x332   : > { %2398 = dma.done.wait (!%p2265_p5), %s1858_s28, 16  }
 0x333   : > { %2400 = vsyncadd (!%p2265_p5), %s1858_s28, 4294967280  ;;  %s19_s23 = sadd.s32 1, %s2423_s23   ;;  %s2831_s18 = smov %s2407_s19 }
 0x334   : > { %p16_p4 = scmp.ge.s32.totalorder %s19_s23, 4   ;;  %s2832_s19 = smov %s2411_s20 }
 0x335   : > { %s2833_s20 = smov %s2511_s6  ;;  %s2834_s21 = smov %s2419_s22 }
 0x336   : > { %s2835_s22 = smov %s2837_s26  ;;  %18 = sbr.rel (!%p16_p4) target bundleno = 4 (0x4), region = 93 }
 0x33d   :  { %1871 = vsyncpa [#allocation3], 1 }
 0x33e   :  { %1873 = vsyncpa [#allocation3 + $0x1], 1 }

// kernel: _dvc_loss_device.8
= control target key start
LH: loop header
LB: loop body
LE: loop exit
PB: predicated region body
PF: predicated region fallthrough
CT: control target
= control target key end

     0   :  { %s40_s0 = inlined_call_operand.vmem [shape: f32[8,128], index: 0, kind: input, shape index: {}]   ;;  %s41_s1 = inlined_call_operand.vmem [shape: f32[1,1,128], index: 1, kind: output, shape index: {}]  }
   0x1   :  { %v8_v0 = vld [vmem:[%s40_s0] sm:$0xff] }
   0x2   :  { %22 = vlog2.f32 %v8_v0 }
   0xc   :  { %v23_v1 = vpop.eup %22 }
   0xd   :  { %v10_v2 = vmul.f32 0.6931472, %v23_v1 }
   0xf   :  { %v11_v3 = vrot.slane %v10_v2, 4 }
  0x11   :  { %v12_v4 = vadd.f32 %v11_v3, %v10_v2 }
  0x13   :  { %v13_v5 = vrot.slane %v12_v4, 2 }
  0x15   :  { %v14_v6 = vadd.f32 %v13_v5, %v12_v4 }
  0x17   :  { %v15_v7 = vrot.slane %v14_v6, 1 }
  0x19   :  { %v16_v8 = vadd.f32 %v15_v7, %v14_v6 }
  0x1b   :  { %17 = vst [vmem:[%s41_s1] sm:$0x1] %v16_v8 }

// kernel: _dvc_loss_device.9
= control target key start
LH: loop header
LB: loop body
LE: loop exit
PB: predicated region body
PF: predicated region fallthrough
CT: control target
= control target key end

     0   :  { %11 = vsyncpa [#allocation3], 0  ;;  %s3632_s0 = inlined_call_operand.vmem [shape: f32[6,32,32], index: 0, kind: input, shape index: {}]   ;;  %s3633_s1 = inlined_call_operand.vmem [shape: f32[6,32,32], index: 1, kind: input, shape index: {}]   ;;  %s3634_s2 = inlined_call_operand.vmem [shape: bf16[32,32], index: 2, kind: input, shape index: {}]   ;;  %s3635_s3 = inlined_call_operand.vmem [shape: bf16[32,128], index: 3, kind: input, shape index: {}]   ;;  %s3636_s4 = inlined_call_operand.hbm [shape: f32[2,1,1,1], index: 4, kind: output, shape index: {0}]   ;;  %s3637_s5 = inlined_call_operand.vmem [shape: f32[2,1,1,1], index: 5, kind: output, shape index: {1}]  }
   0x1   :  { %13 = vsyncpa [#allocation3 + $0x1], 0  ;;  %s3139_s18 = smov 0   ;;  %s3141_s19 = smov 0  }
   0x2   :  { %s3143_s20 = smov 0   ;;  %s3145_s21 = smov 0  }
   0x3   :  { %s3147_s22 = smov 0   ;;  %s3149_s23 = smov 0  }
   0x4 LB: > { %s2459_s24 = sadd.s32 4294967295, %s3105_s23   ;;  %s2460_s25 = sadd.s32 4294967294, %s3105_s23   ;;  %s3105_s23 = sphi %s3149_s23, %s19_s23   ;;  %s3101_s22 = sphi %s3147_s22, %s3644_s22   ;;  %s3097_s21 = sphi %s3145_s21, %s3643_s21   ;;  %s3093_s20 = sphi %s3143_s20, %s3642_s20   ;;  %s3089_s19 = sphi %s3141_s19, %s3641_s19   ;;  %s3085_s18 = sphi %s3139_s18, %s3640_s18  }
   0x5   : > { %s31_s26 = sadd.s32 1, %s3101_s22  ;;  %s139_s27 = sadd.s32 1, %s3093_s20 }
   0x6   : > { %p33_p0 = scmp.ge.s32.totalorder %s31_s26, 2  ;;  %p149_p1 = scmp.ne.s32.totalorder %s3093_s20, %s3089_s19 }
   0x7   : > { %p150_p2 = scmp.eq.s32.totalorder %s2459_s24, 1  ;;  %p155_p3 = scmp.ne.s32.totalorder %s3089_s19, %s3085_s18 }
   0x8   : > { %s3646_s26 = smov (%p33_p0, %s31_s26), 0  ;;  %p156_p5 = scmp.eq.s32.totalorder %s2460_s25, 1 }
   0x9   : > { %p3179_p4 = por %p150_p2, %p149_p1  ;;  %s134_s29 = ssub.s32 %s3101_s22, %s3646_s26 }
   0xa   : > { %p2464_p6 = scmp.ge.s32.totalorder %s3105_s23, 1  ;;  %p137_p7 = scmp.eq.s32.totalorder %s134_s29, 0 }
   0xb   : > { %p3186_p8 = por %p156_p5, %p155_p3  ;;  %p232_p9 = scmp.lt.s32.totalorder %s3105_s23, 3 }
   0xc   : > { %s3192_s6 = scalar_select %p137_p7, %s3093_s20, %s139_s27  }
   0xd   : > { %p233_p10 = pnand %p2464_p6, %p232_p9 }
   0xe   : > { %v3197_v0 = vld [vmem:[%s3635_s3] sm:$0xff] (!%p233_p10)   ;;  %s276_s9 = smul.u32 (!%p233_p10), 3, %s3097_s21  ;;  %v3203_v1 = vld [vmem:[%s3635_s3 + $0x8] sm:$0xff] (!%p233_p10)   ;;  %vm331_vm0 = vcmask (!%p233_p10), 261120   ;;  %s266_s8 = sand.u32 (!%p233_p10), 1, %s3089_s19   ;;  %vm2303_vm2 = vcmask (!%p233_p10), 0  }
   0xf   : > { %236 = sbr.rel (%p233_p10) target bundleno = 826 (0x33a), region = 36  ;;  %2675 = vmatprep.subr.bf16.mxu0 (!%p233_p10), %v3197_v0  ;;  %p294_p12 = scmp.lt.s32.totalorder (!%p233_p10), %s3097_s21, 1 }
  0x10   : > { %p277_p11 = scmp.lt.s32.totalorder (!%p233_p10), %s276_s9, 5  ;;  %2676 = vmatpush3.bf16.msra.mxu0 (!%p233_p10), %v3197_v0  ;;  %s267_s10 = scalar_lea.vmem (!%p233_p10), [#allocation2], %s266_s8 }
  0x11   : > { %2677 = vmatprep.subr.bf16.mxu0 (!%p233_p10), %v3203_v1  ;;  %s2339_s11 = sshll.u32 (!%p233_p10), %s267_s10, 4  ;;  %s2320_s25 = scalar_lea.sflag (!%p233_p10), [#allocation3], %s266_s8  ;;  %s3576_s11 = int_to_ptr.vmem [resolvable:$true] %s2339_s11 }
  0x12   : > { %s3027_s27 = scalar_lea.vmem (!%p233_p10), %s3576_s11, 16  ;;  %s3108_s29 = smov (!%p233_p10), [#allocation2]  }
  0x13   : > { %p3028_p13 = scmp.ne.s32.totalorder (!%p233_p10), %s3576_s11, %s3027_s27  ;;  %s3031_s7 = sshll.u32 (!%p233_p10), %s3108_s29, 4  ;;  %s3032_s7 = int_to_ptr.vmem [resolvable:$false] %s3031_s7 }
  0x14   : > { %2678 = vmatpush3.bf16.msra.mxu0 (!%p233_p10), %v3203_v1  ;;  %p3034_p2 = scmp.lt.s32.totalorder (!%p233_p10), %s3576_s11, %s3032_s7 }
  0x15   : > { %2691 = vmatprep.subr.bf16.mxu0 (!%p233_p10), %v3197_v0  ;;  %p3029_p0 = pnand (!%p233_p10), %p3028_p13, %p3179_p4 }
  0x16   : > { %s3648_s9 = smov (!%p277_p11, %s276_s9), 5 }
  0x17   : > { %s2553_s12 = sshll.u32 %s3648_s9, 5  ;;  %s2550_s9 = sshll.u32 %s3097_s21, 4 }
  0x18   : > { %s3212_s15 = scalar_lea.vmem %s3632_s0, %s2553_s12  ;;  %s3217_s24 = scalar_lea.vmem %s3633_s1, %s2553_s12 }
  0x19   : > { %v309_v2 = vld [vmem:[%s3212_s15] sm:$0xff]  ;;  %v310_v3 = vld [vmem:[%s3212_s15 + $0x8] sm:$0xff]  ;;  %v311_v7 = vld [vmem:[%s3212_s15 + $0x10] sm:$0xff]  ;;  %s3650_s21 = smov (!%p294_p12, %s3097_s21), 1  ;;  %s3574_s14 = scalar_lea.hbm %s3636_s4, %s2550_s9 }
  0x1a   : > { %v313_v4 = vld [vmem:[%s3217_s24] sm:$0xff]  ;;  %v314_v5 = vld [vmem:[%s3217_s24 + $0x8] sm:$0xff]  ;;  %v317_v6 = vpack.c.bf16 %v310_v3, %v309_v2  ;;  %v312_v8 = vld [vmem:[%s3212_s15 + $0x18] sm:$0xff]  ;;  %v562_v11 = vmul.f32 %v309_v2, %v309_v2  ;;  %v563_v12 = vmul.f32 %v310_v3, %v310_v3  ;;  %v564_v17 = vmul.f32 %v311_v7, %v311_v7  ;;  %p3030_p1 = pneg %p3029_p0  ;;  %s3033_s9 = scalar_lea.vmem %s3032_s7, 32 }
  0x1b   : > { %v318_v9 = vpack.c.bf16 %v312_v8, %v311_v7  ;;  %v454_v10 = vpack.c.bf16 %v314_v5, %v313_v4  ;;  %v315_v13 = vld [vmem:[%s3217_s24 + $0x10] sm:$0xff]  ;;  %v316_v14 = vld [vmem:[%s3217_s24 + $0x18] sm:$0xff]  ;;  %v565_v18 = vmul.f32 %v312_v8, %v312_v8  ;;  %v674_v19 = vmul.f32 %v313_v4, %v313_v4  ;;  %v3240_v21 = vld [vmem:[%s3212_s15 + $0x40] sm:$0xff]  ;;  %p3035_p3 = scmp.lt.s32.totalorder %s3033_s9, %s3027_s27 }
  0x1c   : > { %2679 = vmatprep.mubr.msk.bf16.mxu0 %vm331_vm0, %v317_v6  ;;  %v455_v15 = vpack.c.bf16 %v316_v14, %v315_v13  ;;  %v566_v16 = vpack.c.bf16 %v563_v12, %v562_v11  ;;  %v675_v20 = vmul.f32 %v314_v5, %v314_v5  ;;  %v3243_v22 = vld [vmem:[%s3212_s15 + $0x48] sm:$0xff]  ;;  %v3246_v23 = vld [vmem:[%s3217_s24 + $0x40] sm:$0xff]  ;;  %v3249_v24 = vld [vmem:[%s3212_s15 + $0x50] sm:$0xff]  ;;  %v676_v37 = vmul.f32 %v315_v13, %v315_v13 }
  0x1d   : > { %2680 = vmatmul.mubr.msk.bf16.vlgmr.msra.gmra.mrb[0].mxu0 %vm331_vm0, %v318_v9  ;;  %v3252_v25 = vld [vmem:[%s3217_s24 + $0x48] sm:$0xff]  ;;  %v3255_v26 = vld [vmem:[%s3217_s24 + $0x50] sm:$0xff]  ;;  %v3259_v27 = vmul.f32 %v3246_v23, %v3240_v21  ;;  %v567_v28 = vpack.c.bf16 %v565_v18, %v564_v17  ;;  %v3262_v29 = vld [vmem:[%s3212_s15 + $0x58] sm:$0xff]  ;;  %v677_v38 = vmul.f32 %v316_v14, %v316_v14  ;;  %v786_v39 = vmul.f32 %v313_v4, %v309_v2  ;;  %p3036_p5 = por %p3035_p3, %p3034_p2 }
  0x1e   : > { %2692 = vmatpush3.bf16.msra.mxu0 %v3197_v0  ;;  %2695 = vmatprep.mubr.msk.bf16.mxu0 %vm331_vm0, %v454_v10  ;;  %v3265_v30 = vld [vmem:[%s3217_s24 + $0x58] sm:$0xff]  ;;  %v3269_v31 = vmul.f32 %v3252_v25, %v3243_v22  ;;  %v3273_v32 = vmul.f32 %v3255_v26, %v3249_v24  ;;  %v678_v33 = vpack.c.bf16 %v675_v20, %v674_v19  ;;  %v2493_v45 = vld [vmem:[%s3212_s15 + $0x20] sm:$0xff]  ;;  %v2494_v46 = vld [vmem:[%s3212_s15 + $0x28] sm:$0xff] }
  0x1f   : > { %2693 = vmatprep.subr.bf16.mxu0 %v3203_v1  ;;  %v3278_v34 = vmul.f32 %v3265_v30, %v3262_v29  ;;  %v787_v40 = vmul.f32 %v314_v5, %v310_v3  ;;  %v679_v41 = vpack.c.bf16 %v677_v38, %v676_v37  ;;  %v788_v43 = vmul.f32 %v315_v13, %v311_v7  ;;  %v2495_v49 = vld [vmem:[%s3212_s15 + $0x30] sm:$0xff]  ;;  %v2496_v50 = vld [vmem:[%s3212_s15 + $0x38] sm:$0xff]  ;;  %v2497_v51 = vld [vmem:[%s3217_s24 + $0x20] sm:$0xff]  ;;  %p3037_p6 = pnand %p3036_p5, %p3030_p1 }
  0x20   : > { %v2082_v35 = vpack.c.bf16 %v3269_v31, %v3259_v27  ;;  %v789_v44 = vmul.f32 %v316_v14, %v312_v8  ;;  %v992_v48 = vpack.c.bf16 %v2494_v46, %v2493_v45  ;;  %v2498_v52 = vld [vmem:[%s3217_s24 + $0x28] sm:$0xff]  ;;  %v993_v53 = vpack.c.bf16 %v2496_v50, %v2495_v49  ;;  %v2499_v55 = vld [vmem:[%s3217_s24 + $0x30] sm:$0xff]  ;;  %v2500_v56 = vld [vmem:[%s3217_s24 + $0x38] sm:$0xff]  ;;  %s299_s24 = scalar_lea.vmem %s3637_s5, %s3650_s21 }
  0x21   : > { %v2083_v36 = vpack.c.bf16 %v3278_v34, %v3273_v32  ;;  %v790_v42 = vpack.c.bf16 %v787_v40, %v786_v39  ;;  %v1100_v54 = vpack.c.bf16 %v2498_v52, %v2497_v51  ;;  %v1208_v57 = vmul.f32 %v2493_v45, %v2493_v45 }
  0x22   : > { %2694 = vmatpush3.bf16.msra.mxu0 %v3203_v1  ;;  %v791_v47 = vpack.c.bf16 %v789_v44, %v788_v43  ;;  %v1209_v58 = vmul.f32 %v2494_v46, %v2494_v46  ;;  %v1101_v59 = vpack.c.bf16 %v2500_v56, %v2499_v55  ;;  %v1210_v61 = vmul.f32 %v2495_v49, %v2495_v49 }
  0x23   : > { %2707 = vmatprep.subr.bf16.mxu0 %v3197_v0  ;;  %v1211_v62 = vmul.f32 %v2496_v50, %v2496_v50  ;;  %v1320_v63 = vmul.f32 %v2497_v51, %v2497_v51  ;;  %v1321_v2 = vmul.f32 %v2498_v52, %v2498_v52  ;;  %v1322_v5 = vmul.f32 %v2499_v55, %v2499_v55 }
  0x24   : > { %v1212_v60 = vpack.c.bf16 %v1209_v58, %v1208_v57  ;;  %v1323_v6 = vmul.f32 %v2500_v56, %v2500_v56  ;;  %v1432_v7 = vmul.f32 %v2497_v51, %v2493_v45  ;;  %v1433_v8 = vmul.f32 %v2498_v52, %v2494_v46 }
  0x25   : > { %2696 = vmatmul.mubr.msk.bf16.vlgmr.msra.gmra.mrb[4].mxu0 %vm331_vm0, %v455_v15  ;;  %v1213_v3 = vpack.c.bf16 %v1211_v62, %v1210_v61  ;;  %v1324_v4 = vpack.c.bf16 %v1321_v2, %v1320_v63  ;;  %v1434_v11 = vmul.f32 %v2499_v55, %v2495_v49  ;;  %v1435_v12 = vmul.f32 %v2500_v56, %v2496_v50 }
  0x26   : > { %2708 = vmatpush3.bf16.msra.mxu0 %v3197_v0  ;;  %2711 = vmatprep.mubr.msk.bf16.mxu0 %vm331_vm0, %v566_v16  ;;  %v1325_v9 = vpack.c.bf16 %v1323_v6, %v1322_v5  ;;  %v1436_v10 = vpack.c.bf16 %v1433_v8, %v1432_v7  ;;  %v1638_v14 = vpack.c.bf16 %v3243_v22, %v3240_v21 }
  0x27   : > { %2709 = vmatprep.subr.bf16.mxu0 %v3203_v1  ;;  %v1437_v13 = vpack.c.bf16 %v1435_v12, %v1434_v11  ;;  %v1639_v15 = vpack.c.bf16 %v3262_v29, %v3249_v24  ;;  %v1746_v16 = vpack.c.bf16 %v3252_v25, %v3246_v23  ;;  %v1854_v17 = vmul.f32 %v3240_v21, %v3240_v21 }
  0x28   : > { %v1855_v18 = vmul.f32 %v3243_v22, %v3243_v22  ;;  %v1747_v19 = vpack.c.bf16 %v3265_v30, %v3255_v26  ;;  %v1857_v21 = vmul.f32 %v3262_v29, %v3262_v29  ;;  %v1966_v22 = vmul.f32 %v3246_v23, %v3246_v23 }
  0x29   : > { %v1968_v23 = vmul.f32 %v3255_v26, %v3255_v26 }
  0x2a   : > { %2710 = vmatpush3.bf16.msra.mxu0 %v3203_v1  ;;  %v1858_v20 = vpack.c.bf16 %v1855_v18, %v1854_v17 }
  0x2b   : > { %2723 = vmatprep.subr.bf16.mxu0 %v3197_v0 }
  0x2d   : > { %2712 = vmatmul.mubr.msk.bf16.vlgmr.msra.gmra.mrb[8].mxu0 %vm331_vm0, %v567_v28  ;;  %v1856_v28 = vmul.f32 %v3249_v24, %v3249_v24  ;;  %v3376_v24 = vld [vmem:[%s3634_s2] sm:$0xff]  }
  0x2e   : > { %2724 = vmatpush3.bf16.msra.mxu0 %v3197_v0  ;;  %2727 = vmatprep.mubr.msk.bf16.mxu0 %vm331_vm0, %v678_v33  ;;  %v1967_v33 = vmul.f32 %v3252_v25, %v3252_v25  ;;  %v1969_v25 = vmul.f32 %v3265_v30, %v3265_v30 }
  0x2f   : > { %2725 = vmatprep.subr.bf16.mxu0 %v3203_v1  ;;  %v1859_v37 = vpack.c.bf16 %v1857_v21, %v1856_v28  ;;  %2687 = vmatprep.mubr.msk.bf16.mxu1 %vm331_vm0, %v3376_v24 }
  0x30   : > { %v1970_v38 = vpack.c.bf16 %v1967_v33, %v1966_v22  ;;  %v1971_v29 = vpack.c.bf16 %v1969_v25, %v1968_v23 }
  0x32   : > { %2726 = vmatpush3.bf16.msra.mxu0 %v3203_v1 }
  0x33   : > { %2739 = vmatprep.subr.bf16.mxu0 %v3197_v0 }
  0x35   : > { %2728 = vmatmul.mubr.msk.bf16.vlgmr.msra.gmra.mrb[12].mxu0 %vm331_vm0, %v679_v41 }
  0x36   : > { %2740 = vmatpush3.bf16.msra.mxu0 %v3197_v0  ;;  %2743 = vmatprep.mubr.msk.bf16.mxu0 %vm331_vm0, %v790_v42 }
  0x37   : > { %2741 = vmatprep.subr.bf16.mxu0 %v3203_v1 }
  0x3a   : > { %2742 = vmatpush3.bf16.msra.mxu0 %v3203_v1 }
  0x3b   : > { %2755 = vmatprep.subr.bf16.mxu0 %v3197_v0 }
  0x3d   : > { %2744 = vmatmul.mubr.msk.bf16.vlgmr.msra.gmra.mrb[16].mxu0 %vm331_vm0, %v791_v47 }
  0x3e   : > { %2756 = vmatpush3.bf16.msra.mxu0 %v3197_v0  ;;  %2759 = vmatprep.mubr.msk.bf16.mxu0 %vm331_vm0, %v992_v48 }
  0x3f   : > { %2757 = vmatprep.subr.bf16.mxu0 %v3203_v1 }
  0x42   : > { %2758 = vmatpush3.bf16.msra.mxu0 %v3203_v1 }
  0x43   : > { %2771 = vmatprep.subr.bf16.mxu0 %v3197_v0 }
  0x45   : > { %2760 = vmatmul.mubr.msk.bf16.vlgmr.msra.gmra.mrb[20].mxu0 %vm331_vm0, %v993_v53 }
  0x46   : > { %2772 = vmatpush3.bf16.msra.mxu0 %v3197_v0  ;;  %2775 = vmatprep.mubr.msk.bf16.mxu0 %vm331_vm0, %v1100_v54 }
  0x47   : > { %2773 = vmatprep.subr.bf16.mxu0 %v3203_v1 }
  0x4a   : > { %2774 = vmatpush3.bf16.msra.mxu0 %v3203_v1 }
  0x4b   : > { %2787 = vmatprep.subr.bf16.mxu0 %v3197_v0 }
  0x4d   : > { %2776 = vmatmul.mubr.msk.bf16.vlgmr.msra.gmra.mrb[24].mxu0 %vm331_vm0, %v1101_v59 }
  0x4e   : > { %2788 = vmatpush3.bf16.msra.mxu0 %v3197_v0  ;;  %2791 = vmatprep.mubr.msk.bf16.mxu0 %vm331_vm0, %v1212_v60 }
  0x4f   : > { %2789 = vmatprep.subr.bf16.mxu0 %v3203_v1 }
  0x52   : > { %2790 = vmatpush3.bf16.msra.mxu0 %v3203_v1 }
  0x53   : > { %2803 = vmatprep.subr.bf16.mxu0 %v3197_v0 }
  0x55   : > { %2792 = vmatmul.mubr.msk.bf16.vlgmr.msra.gmra.mrb[28].mxu0 %vm331_vm0, %v1213_v3 }
  0x56   : > { %2804 = vmatpush3.bf16.msra.mxu0 %v3197_v0  ;;  %2807 = vmatprep.mubr.msk.bf16.mxu0 %vm331_vm0, %v1324_v4 }
  0x57   : > { %2805 = vmatprep.subr.bf16.mxu0 %v3203_v1 }
  0x5a   : > { %2806 = vmatpush3.bf16.msra.mxu0 %v3203_v1 }
  0x5b   : > { %2819 = vmatprep.subr.bf16.mxu0 %v3197_v0 }
  0x5d   : > { %2808 = vmatmul.mubr.msk.bf16.vlgmr.msra.gmra.mrb[32].mxu0 %vm331_vm0, %v1325_v9 }
  0x5e   : > { %2820 = vmatpush3.bf16.msra.mxu0 %v3197_v0  ;;  %2823 = vmatprep.mubr.msk.bf16.mxu0 %vm331_vm0, %v1436_v10 }
  0x5f   : > { %2821 = vmatprep.subr.bf16.mxu0 %v3203_v1 }
  0x62   : > { %2822 = vmatpush3.bf16.msra.mxu0 %v3203_v1 }
  0x63   : > { %2835 = vmatprep.subr.bf16.mxu0 %v3197_v0 }
  0x65   : > { %2824 = vmatmul.mubr.msk.bf16.vlgmr.msra.gmra.mrb[36].mxu0 %vm331_vm0, %v1437_v13 }
  0x66   : > { %2836 = vmatpush3.bf16.msra.mxu0 %v3197_v0  ;;  %2839 = vmatprep.mubr.msk.bf16.mxu0 %vm331_vm0, %v1638_v14 }
  0x67   : > { %2837 = vmatprep.subr.bf16.mxu0 %v3203_v1 }
  0x6a   : > { %2838 = vmatpush3.bf16.msra.mxu0 %v3203_v1 }
  0x6b   : > { %2851 = vmatprep.subr.bf16.mxu0 %v3197_v0 }
  0x6d   : > { %2840 = vmatmul.mubr.msk.bf16.vlgmr.msra.gmra.mrb[40].mxu0 %vm331_vm0, %v1639_v15 }
  0x6e   : > { %2852 = vmatpush3.bf16.msra.mxu0 %v3197_v0  ;;  %2855 = vmatprep.mubr.msk.bf16.mxu0 %vm331_vm0, %v1746_v16 }
  0x6f   : > { %2853 = vmatprep.subr.bf16.mxu0 %v3203_v1 }
  0x72   : > { %2854 = vmatpush3.bf16.msra.mxu0 %v3203_v1 }
  0x73   : > { %2867 = vmatprep.subr.bf16.mxu0 %v3197_v0 }
  0x75   : > { %2856 = vmatmul.mubr.msk.bf16.vlgmr.msra.gmra.mrb[44].mxu0 %vm331_vm0, %v1747_v19 }
  0x76   : > { %2868 = vmatpush3.bf16.msra.mxu0 %v3197_v0  ;;  %2871 = vmatprep.mubr.msk.bf16.mxu0 %vm331_vm0, %v1858_v20 }
  0x77   : > { %2869 = vmatprep.subr.bf16.mxu0 %v3203_v1 }
  0x7a   : > { %2870 = vmatpush3.bf16.msra.mxu0 %v3203_v1 }
  0x7b   : > { %2883 = vmatprep.subr.bf16.mxu0 %v3197_v0 }
  0x7d   : > { %2872 = vmatmul.mubr.msk.bf16.vlgmr.msra.gmra.mrb[48].mxu0 %vm331_vm0, %v1859_v37 }
  0x7e   : > { %2884 = vmatpush3.bf16.msra.mxu0 %v3197_v0  ;;  %2887 = vmatprep.mubr.msk.bf16.mxu0 %vm331_vm0, %v1970_v38 }
  0x7f   : > { %2885 = vmatprep.subr.bf16.mxu0 %v3203_v1 }
  0x82   : > { %2886 = vmatpush3.bf16.msra.mxu0 %v3203_v1 }
  0x83   : > { %2899 = vmatprep.subr.bf16.mxu0 %v3197_v0 }
  0x85   : > { %2888 = vmatmul.mubr.msk.bf16.vlgmr.msra.gmra.mrb[52].mxu0 %vm331_vm0, %v1971_v29 }
  0x86   : > { %2900 = vmatpush3.bf16.msra.mxu0 %v3197_v0  ;;  %2903 = vmatprep.mubr.msk.bf16.mxu0 %vm331_vm0, %v2082_v35 }
  0x87   : > { %2901 = vmatprep.subr.bf16.mxu0 %v3203_v1 }
  0x8a   : > { %2902 = vmatpush3.bf16.msra.mxu0 %v3203_v1  ;;  %v3405_v1 = vld [vmem:[%s3634_s2 + $0x8] sm:$0xff]  }
  0x8d   : > { %2904 = vmatmul.mubr.msk.bf16.vlgmr.msra.gmra.mrb[56].mxu0 %vm331_vm0, %v2083_v36 }
  0xf0   : > { %v2681_v26 = vpop.f32.mrb[0].mxu0 }
  0xf1   : > { %v372_v30 = vpop.f32.mrb[1].mxu0 }
  0xf2   : > { %v2682_v39 = vpop.f32.mrb[2].mxu0 }
  0xf3   : > { %v388_v40 = vpack.c.bf16 %v2682_v39, %v2681_v26  ;;  %v375_v41 = vpop.f32.mrb[3].mxu0 }
  0xf4   : > { %v387_v0 = vpack.c.bf16 %v375_v41, %v372_v30 }
  0xf6   : > { %2683 = vmatprep.subr.bf16.mxu1 %v387_v0 }
  0xf7   : > { %2684 = vmatpush3.bf16.msra.mxu1 %v387_v0 }
  0xf8   : > { %2685 = vmatprep.subr.bf16.mxu1 %v388_v40  ;;  %v2697_v27 = vpop.f32.mrb[4].mxu0 }
  0xf9   : > { %v496_v31 = vpop.f32.mrb[5].mxu0 }
  0xfa   : > { %v2698_v35 = vpop.f32.mrb[6].mxu0 }
  0xfb   : > { %v512_v32 = vpack.c.bf16 %v2698_v35, %v2697_v27  ;;  %2686 = vmatpush3.bf16.msra.mxu1 %v388_v40  ;;  %v499_v34 = vpop.f32.mrb[7].mxu0 }
  0xfc   : > { %v511_v36 = vpack.c.bf16 %v499_v34, %v496_v31 }
  0xfe   : > { %2688 = vmatmul.mubr.msk.bf16.vlgmr.msra.gmra.mrb[0].mxu1 %vm331_vm0, %v3405_v1  ;;  %2699 = vmatprep.subr.bf16.mxu1 %v511_v36 }
  0xff   : > { %2700 = vmatpush3.bf16.msra.mxu1 %v511_v36  ;;  %2703 = vmatprep.mubr.msk.bf16.mxu1 %vm331_vm0, %v3376_v24 }
 0x100   : > { %2701 = vmatprep.subr.bf16.mxu1 %v512_v32  ;;  %v2713_v42 = vpop.f32.mrb[8].mxu0 }
 0x101   : > { %v608_v43 = vpop.f32.mrb[9].mxu0 }
 0x102   : > { %v2714_v44 = vpop.f32.mrb[10].mxu0 }
 0x103   : > { %v624_v45 = vpack.c.bf16 %v2714_v44, %v2713_v42  ;;  %2702 = vmatpush3.bf16.msra.mxu1 %v512_v32  ;;  %v611_v46 = vpop.f32.mrb[11].mxu0 }
 0x104   : > { %v623_v47 = vpack.c.bf16 %v611_v46, %v608_v43 }
 0x106   : > { %2704 = vmatmul.mubr.msk.bf16.vlgmr.msra.gmra.mrb[4].mxu1 %vm331_vm0, %v3405_v1  ;;  %2715 = vmatprep.subr.bf16.mxu1 %v623_v47 }
 0x107   : > { %2716 = vmatpush3.bf16.msra.mxu1 %v623_v47  ;;  %2719 = vmatprep.mubr.msk.bf16.mxu1 %vm331_vm0, %v3376_v24 }
 0x108   : > { %2717 = vmatprep.subr.bf16.mxu1 %v624_v45  ;;  %v2729_v48 = vpop.f32.mrb[12].mxu0 }
 0x109   : > { %v720_v49 = vpop.f32.mrb[13].mxu0 }
 0x10a   : > { %v2730_v50 = vpop.f32.mrb[14].mxu0 }
 0x10b   : > { %v736_v51 = vpack.c.bf16 %v2730_v50, %v2729_v48  ;;  %2718 = vmatpush3.bf16.msra.mxu1 %v624_v45  ;;  %v723_v52 = vpop.f32.mrb[15].mxu0 }
 0x10c   : > { %v735_v53 = vpack.c.bf16 %v723_v52, %v720_v49 }
 0x10e   : > { %2720 = vmatmul.mubr.msk.bf16.vlgmr.msra.gmra.mrb[8].mxu1 %vm331_vm0, %v3405_v1  ;;  %2731 = vmatprep.subr.bf16.mxu1 %v735_v53 }
 0x10f   : > { %2732 = vmatpush3.bf16.msra.mxu1 %v735_v53  ;;  %2735 = vmatprep.mubr.msk.bf16.mxu1 %vm331_vm0, %v3376_v24 }
 0x110   : > { %2733 = vmatprep.subr.bf16.mxu1 %v736_v51  ;;  %v2745_v54 = vpop.f32.mrb[16].mxu0 }
 0x111   : > { %v832_v55 = vpop.f32.mrb[17].mxu0 }
 0x112   : > { %v2746_v56 = vpop.f32.mrb[18].mxu0 }
 0x113   : > { %v848_v57 = vpack.c.bf16 %v2746_v56, %v2745_v54  ;;  %2734 = vmatpush3.bf16.msra.mxu1 %v736_v51  ;;  %v835_v58 = vpop.f32.mrb[19].mxu0 }
 0x114   : > { %v847_v59 = vpack.c.bf16 %v835_v58, %v832_v55 }
 0x116   : > { %2736 = vmatmul.mubr.msk.bf16.vlgmr.msra.gmra.mrb[12].mxu1 %vm331_vm0, %v3405_v1  ;;  %2747 = vmatprep.subr.bf16.mxu1 %v847_v59 }
 0x117   : > { %2748 = vmatpush3.bf16.msra.mxu1 %v847_v59  ;;  %2751 = vmatprep.mubr.msk.bf16.mxu1 %vm331_vm0, %v3376_v24 }
 0x118   : > { %2749 = vmatprep.subr.bf16.mxu1 %v848_v57  ;;  %v2761_v60 = vpop.f32.mrb[20].mxu0 }
 0x119   : > { %v1034_v61 = vpop.f32.mrb[21].mxu0 }
 0x11a   : > { %v2762_v62 = vpop.f32.mrb[22].mxu0 }
 0x11b   : > { %v1050_v63 = vpack.c.bf16 %v2762_v62, %v2761_v60  ;;  %2750 = vmatpush3.bf16.msra.mxu1 %v848_v57  ;;  %v1037_v2 = vpop.f32.mrb[23].mxu0 }
 0x11c   : > { %v1049_v3 = vpack.c.bf16 %v1037_v2, %v1034_v61 }
 0x11e   : > { %2752 = vmatmul.mubr.msk.bf16.vlgmr.msra.gmra.mrb[16].mxu1 %vm331_vm0, %v3405_v1  ;;  %2763 = vmatprep.subr.bf16.mxu1 %v1049_v3 }
 0x11f   : > { %2764 = vmatpush3.bf16.msra.mxu1 %v1049_v3  ;;  %2767 = vmatprep.mubr.msk.bf16.mxu1 %vm331_vm0, %v3376_v24 }
 0x120   : > { %2765 = vmatprep.subr.bf16.mxu1 %v1050_v63  ;;  %v2777_v4 = vpop.f32.mrb[24].mxu0 }
 0x121   : > { %v1142_v5 = vpop.f32.mrb[25].mxu0 }
 0x122   : > { %v2778_v6 = vpop.f32.mrb[26].mxu0 }
 0x123   : > { %v1158_v7 = vpack.c.bf16 %v2778_v6, %v2777_v4  ;;  %2766 = vmatpush3.bf16.msra.mxu1 %v1050_v63  ;;  %v1145_v8 = vpop.f32.mrb[27].mxu0 }
 0x124   : > { %v1157_v9 = vpack.c.bf16 %v1145_v8, %v1142_v5 }
 0x126   : > { %2768 = vmatmul.mubr.msk.bf16.vlgmr.msra.gmra.mrb[20].mxu1 %vm331_vm0, %v3405_v1  ;;  %2779 = vmatprep.subr.bf16.mxu1 %v1157_v9 }
 0x127   : > { %2780 = vmatpush3.bf16.msra.mxu1 %v1157_v9  ;;  %2783 = vmatprep.mubr.msk.bf16.mxu1 %vm331_vm0, %v3376_v24 }
 0x128   : > { %2781 = vmatprep.subr.bf16.mxu1 %v1158_v7  ;;  %v2793_v10 = vpop.f32.mrb[28].mxu0 }
 0x129   : > { %v1254_v11 = vpop.f32.mrb[29].mxu0 }
 0x12a   : > { %v2794_v12 = vpop.f32.mrb[30].mxu0 }
 0x12b   : > { %v1270_v13 = vpack.c.bf16 %v2794_v12, %v2793_v10  ;;  %2782 = vmatpush3.bf16.msra.mxu1 %v1158_v7  ;;  %v1257_v14 = vpop.f32.mrb[31].mxu0 }
 0x12c   : > { %v1269_v15 = vpack.c.bf16 %v1257_v14, %v1254_v11 }
 0x12e   : > { %2784 = vmatmul.mubr.msk.bf16.vlgmr.msra.gmra.mrb[24].mxu1 %vm331_vm0, %v3405_v1  ;;  %2795 = vmatprep.subr.bf16.mxu1 %v1269_v15 }
 0x12f   : > { %2796 = vmatpush3.bf16.msra.mxu1 %v1269_v15  ;;  %2799 = vmatprep.mubr.msk.bf16.mxu1 %vm331_vm0, %v3376_v24 }
 0x130   : > { %2797 = vmatprep.subr.bf16.mxu1 %v1270_v13  ;;  %v2809_v16 = vpop.f32.mrb[32].mxu0 }
 0x131   : > { %v1366_v17 = vpop.f32.mrb[33].mxu0 }
 0x132   : > { %v2810_v18 = vpop.f32.mrb[34].mxu0 }
 0x133   : > { %v1382_v19 = vpack.c.bf16 %v2810_v18, %v2809_v16  ;;  %2798 = vmatpush3.bf16.msra.mxu1 %v1270_v13  ;;  %v1369_v20 = vpop.f32.mrb[35].mxu0 }
 0x134   : > { %v1381_v28 = vpack.c.bf16 %v1369_v20, %v1366_v17 }
 0x136   : > { %2800 = vmatmul.mubr.msk.bf16.vlgmr.msra.gmra.mrb[28].mxu1 %vm331_vm0, %v3405_v1  ;;  %2811 = vmatprep.subr.bf16.mxu1 %v1381_v28 }
 0x137   : > { %2812 = vmatpush3.bf16.msra.mxu1 %v1381_v28  ;;  %2815 = vmatprep.mubr.msk.bf16.mxu1 %vm331_vm0, %v3376_v24 }
 0x138   : > { %2813 = vmatprep.subr.bf16.mxu1 %v1382_v19  ;;  %v2825_v21 = vpop.f32.mrb[36].mxu0 }
 0x139   : > { %v1478_v22 = vpop.f32.mrb[37].mxu0 }
 0x13a   : > { %v2826_v33 = vpop.f32.mrb[38].mxu0 }
 0x13b   : > { %v1494_v37 = vpack.c.bf16 %v2826_v33, %v2825_v21  ;;  %2814 = vmatpush3.bf16.msra.mxu1 %v1382_v19  ;;  %v1481_v38 = vpop.f32.mrb[39].mxu0 }
 0x13c   : > { %v1493_v23 = vpack.c.bf16 %v1481_v38, %v1478_v22 }
 0x13e   : > { %2816 = vmatmul.mubr.msk.bf16.vlgmr.msra.gmra.mrb[32].mxu1 %vm331_vm0, %v3405_v1  ;;  %2827 = vmatprep.subr.bf16.mxu1 %v1493_v23 }
 0x13f   : > { %2828 = vmatpush3.bf16.msra.mxu1 %v1493_v23  ;;  %2831 = vmatprep.mubr.msk.bf16.mxu1 %vm331_vm0, %v3376_v24 }
 0x140   : > { %2829 = vmatprep.subr.bf16.mxu1 %v1494_v37  ;;  %v2841_v25 = vpop.f32.mrb[40].mxu0 }
 0x141   : > { %v1680_v29 = vpop.f32.mrb[41].mxu0 }
 0x142   : > { %v2842_v26 = vpop.f32.mrb[42].mxu0 }
 0x143   : > { %v1696_v30 = vpack.c.bf16 %v2842_v26, %v2841_v25  ;;  %2830 = vmatpush3.bf16.msra.mxu1 %v1494_v37  ;;  %v1683_v39 = vpop.f32.mrb[43].mxu0 }
 0x144   : > { %v1695_v40 = vpack.c.bf16 %v1683_v39, %v1680_v29 }
 0x146   : > { %2832 = vmatmul.mubr.msk.bf16.vlgmr.msra.gmra.mrb[36].mxu1 %vm331_vm0, %v3405_v1  ;;  %2843 = vmatprep.subr.bf16.mxu1 %v1695_v40 }
 0x147   : > { %2844 = vmatpush3.bf16.msra.mxu1 %v1695_v40  ;;  %2847 = vmatprep.mubr.msk.bf16.mxu1 %vm331_vm0, %v3376_v24 }
 0x148   : > { %2845 = vmatprep.subr.bf16.mxu1 %v1696_v30  ;;  %v2857_v41 = vpop.f32.mrb[44].mxu0 }
 0x149   : > { %v1788_v0 = vpop.f32.mrb[45].mxu0 }
 0x14a   : > { %v2858_v27 = vpop.f32.mrb[46].mxu0 }
 0x14b   : > { %v1804_v31 = vpack.c.bf16 %v2858_v27, %v2857_v41  ;;  %2846 = vmatpush3.bf16.msra.mxu1 %v1696_v30  ;;  %v1791_v35 = vpop.f32.mrb[47].mxu0 }
 0x14c   : > { %v1803_v32 = vpack.c.bf16 %v1791_v35, %v1788_v0 }
 0x14e   : > { %2848 = vmatmul.mubr.msk.bf16.vlgmr.msra.gmra.mrb[40].mxu1 %vm331_vm0, %v3405_v1  ;;  %2859 = vmatprep.subr.bf16.mxu1 %v1803_v32 }
 0x14f   : > { %2860 = vmatpush3.bf16.msra.mxu1 %v1803_v32  ;;  %2863 = vmatprep.mubr.msk.bf16.mxu1 %vm331_vm0, %v3376_v24 }
 0x150   : > { %2861 = vmatprep.subr.bf16.mxu1 %v1804_v31  ;;  %v2873_v34 = vpop.f32.mrb[48].mxu0 }
 0x151   : > { %v1900_v36 = vpop.f32.mrb[49].mxu0 }
 0x152   : > { %v2874_v42 = vpop.f32.mrb[50].mxu0 }
 0x153   : > { %v1916_v43 = vpack.c.bf16 %v2874_v42, %v2873_v34  ;;  %2862 = vmatpush3.bf16.msra.mxu1 %v1804_v31  ;;  %v1903_v44 = vpop.f32.mrb[51].mxu0 }
 0x154   : > { %v1915_v45 = vpack.c.bf16 %v1903_v44, %v1900_v36 }
 0x156   : > { %2864 = vmatmul.mubr.msk.bf16.vlgmr.msra.gmra.mrb[44].mxu1 %vm331_vm0, %v3405_v1  ;;  %2875 = vmatprep.subr.bf16.mxu1 %v1915_v45 }
 0x157   : > { %2876 = vmatpush3.bf16.msra.mxu1 %v1915_v45  ;;  %2879 = vmatprep.mubr.msk.bf16.mxu1 %vm331_vm0, %v3376_v24 }
 0x158   : > { %2877 = vmatprep.subr.bf16.mxu1 %v1916_v43  ;;  %v2889_v46 = vpop.f32.mrb[52].mxu0 }
 0x159   : > { %v2012_v47 = vpop.f32.mrb[53].mxu0 }
 0x15a   : > { %v2890_v48 = vpop.f32.mrb[54].mxu0 }
 0x15b   : > { %v2028_v49 = vpack.c.bf16 %v2890_v48, %v2889_v46  ;;  %2878 = vmatpush3.bf16.msra.mxu1 %v1916_v43  ;;  %v2015_v50 = vpop.f32.mrb[55].mxu0 }
 0x15c   : > { %v2027_v51 = vpack.c.bf16 %v2015_v50, %v2012_v47 }
 0x15e   : > { %2880 = vmatmul.mubr.msk.bf16.vlgmr.msra.gmra.mrb[48].mxu1 %vm331_vm0, %v3405_v1  ;;  %2891 = vmatprep.subr.bf16.mxu1 %v2027_v51 }
 0x15f   : > { %2892 = vmatpush3.bf16.msra.mxu1 %v2027_v51  ;;  %2895 = vmatprep.mubr.msk.bf16.mxu1 %vm331_vm0, %v3376_v24 }
 0x160   : > { %2893 = vmatprep.subr.bf16.mxu1 %v2028_v49  ;;  %v2905_v52 = vpop.f32.mrb[56].mxu0 }
 0x161   : > { %v2124_v53 = vpop.f32.mrb[57].mxu0 }
 0x162   : > { %v2906_v54 = vpop.f32.mrb[58].mxu0 }
 0x163   : > { %v2140_v55 = vpack.c.bf16 %v2906_v54, %v2905_v52  ;;  %2894 = vmatpush3.bf16.msra.mxu1 %v2028_v49  ;;  %v2127_v56 = vpop.f32.mrb[59].mxu0 }
 0x164   : > { %v2139_v57 = vpack.c.bf16 %v2127_v56, %v2124_v53 }
 0x166   : > { %2896 = vmatmul.mubr.msk.bf16.vlgmr.msra.gmra.mrb[52].mxu1 %vm331_vm0, %v3405_v1  ;;  %2907 = vmatprep.subr.bf16.mxu1 %v2139_v57 }
 0x167   : > { %2908 = vmatpush3.bf16.msra.mxu1 %v2139_v57  ;;  %2911 = vmatprep.mubr.msk.bf16.mxu1 %vm331_vm0, %v3376_v24 }
 0x168   : > { %2909 = vmatprep.subr.bf16.mxu1 %v2140_v55 }
 0x16b   : > { %2910 = vmatpush3.bf16.msra.mxu1 %v2140_v55 }
 0x16e   : > { %2912 = vmatmul.mubr.msk.bf16.vlgmr.msra.gmra.mrb[56].mxu1 %vm331_vm0, %v3405_v1 }
 0x1d1   : > { %v2689_v58 = vpop.f32.mrb[0].mxu1 }
 0x1d2   : > { %v439_v59 = vpop.f32.mrb[1].mxu1  ;;  %v900_v63 = vmul.f32 %v2689_v58, %v2689_v58 }
 0x1d3   : > { %v2690_v60 = vpop.f32.mrb[2].mxu1  ;;  %v898_v5 = vmul.f32 %v439_v59, %v439_v59 }
 0x1d4   : > { %v442_v61 = vpop.f32.mrb[3].mxu1  ;;  %v901_v8 = vmul.f32 %v2690_v60, %v2690_v60 }
 0x1d5   : > { %v899_v12 = vmul.f32 %v442_v61, %v442_v61 }
 0x1d9   : > { %v2705_v62 = vpop.f32.mrb[4].mxu1 }
 0x1da   : > { %v904_v2 = vmul.f32 %v2705_v62, %v2705_v62  ;;  %v3465_v3 = vmul.f32 %v2705_v62, %v2689_v58  ;;  %v547_v4 = vpop.f32.mrb[5].mxu1 }
 0x1db   : > { %v902_v6 = vmul.f32 %v547_v4, %v547_v4  ;;  %v3467_v7 = vmul.f32 %v547_v4, %v439_v59  ;;  %v2706_v24 = vpop.f32.mrb[6].mxu1 }
 0x1dc   : > { %v944_v9 = vadd.f32 %v904_v2, %v900_v63  ;;  %v905_v10 = vmul.f32 %v2706_v24, %v2706_v24  ;;  %v3469_v11 = vmul.f32 %v2706_v24, %v2690_v60  ;;  %v550_v1 = vpop.f32.mrb[7].mxu1  ;;  %v960_v29 = vmul.f32 2.0, %v3465_v3 }
 0x1dd   : > { %v942_v13 = vadd.f32 %v902_v6, %v898_v5  ;;  %v903_v14 = vmul.f32 %v550_v1, %v550_v1  ;;  %v3471_v15 = vmul.f32 %v550_v1, %v442_v61  ;;  %v958_v30 = vmul.f32 2.0, %v3467_v7 }
 0x1de   : > { %v948_v16 = vadd.f32 0.0001, %v944_v9  ;;  %v945_v17 = vadd.f32 %v905_v10, %v901_v8  ;;  %v961_v39 = vmul.f32 2.0, %v3469_v11  ;;  %v964_v41 = vadd.f32 0.0001, %v960_v29 }
 0x1df   : > { %v946_v18 = vadd.f32 0.0001, %v942_v13  ;;  %v943_v19 = vadd.f32 %v903_v14, %v899_v12  ;;  %v959_v40 = vmul.f32 2.0, %v3471_v15  ;;  %v962_v31 = vadd.f32 0.0001, %v958_v30 }
 0x1e0   : > { %2979 = vrcp.f32 %v948_v16  ;;  %v949_v20 = vadd.f32 0.0001, %v945_v17  ;;  %v965_v42 = vadd.f32 0.0001, %v961_v39 }
 0x1e1   : > { %2981 = vrcp.f32 %v946_v18  ;;  %v947_v28 = vadd.f32 0.0001, %v943_v19  ;;  %v2721_v21 = vpop.f32.mrb[8].mxu1  ;;  %v963_v47 = vadd.f32 0.0001, %v959_v40 }
 0x1e2   : > { %2983 = vrcp.f32 %v949_v20  ;;  %v912_v22 = vsub.f32 %v2721_v21, %v900_v63  ;;  %v659_v33 = vpop.f32.mrb[9].mxu1 }
 0x1e3   : > { %2985 = vrcp.f32 %v947_v28  ;;  %v910_v37 = vsub.f32 %v659_v33, %v898_v5  ;;  %v2722_v38 = vpop.f32.mrb[10].mxu1 }
 0x1e4   : > { %v913_v23 = vsub.f32 %v2722_v38, %v901_v8  ;;  %v662_v25 = vpop.f32.mrb[11].mxu1 }
 0x1e5   : > { %v911_v26 = vsub.f32 %v662_v25, %v899_v12 }
 0x1e9   : > { %v2737_v0 = vpop.f32.mrb[12].mxu1 }
 0x1ea   : > { %v2980_v27 = vpop.eup %2979  ;;  %v916_v35 = vsub.f32 %v2737_v0, %v904_v2  ;;  %v771_v32 = vpop.f32.mrb[13].mxu1 }
 0x1eb   : > { %v2982_v34 = vpop.eup %2981  ;;  %v968_v36 = vmul.f32 %v2980_v27, %v964_v41  ;;  %v914_v43 = vsub.f32 %v771_v32, %v902_v6  ;;  %v2738_v44 = vpop.f32.mrb[14].mxu1 }
 0x1ec   : > { %v2984_v45 = vpop.eup %2983  ;;  %v966_v46 = vmul.f32 %v2982_v34, %v962_v31  ;;  %v932_v48 = vadd.f32 %v916_v35, %v912_v22  ;;  %v917_v49 = vsub.f32 %v2738_v44, %v905_v10  ;;  %v774_v50 = vpop.f32.mrb[15].mxu1 }
 0x1ed   : > { %v2986_v51 = vpop.eup %2985  ;;  %v969_v52 = vmul.f32 %v2984_v45, %v965_v42  ;;  %v930_v53 = vadd.f32 %v914_v43, %v910_v37  ;;  %v915_v54 = vsub.f32 %v774_v50, %v903_v14 }
 0x1ee   : > { %v967_v55 = vmul.f32 %v2986_v51, %v963_v47  ;;  %v936_v56 = vadd.f32 0.0009, %v932_v48  ;;  %v933_v57 = vadd.f32 %v917_v49, %v913_v23 }
 0x1ef   : > { %v934_v58 = vadd.f32 0.0009, %v930_v53  ;;  %v931_v59 = vadd.f32 %v915_v54, %v911_v26 }
 0x1f0   : > { %2987 = vrcp.f32 %v936_v56  ;;  %v937_v60 = vadd.f32 0.0009, %v933_v57 }
 0x1f1   : > { %2989 = vrcp.f32 %v934_v58  ;;  %v935_v61 = vadd.f32 0.0009, %v931_v59  ;;  %v2753_v62 = vpop.f32.mrb[16].mxu1 }
 0x1f2   : > { %2991 = vrcp.f32 %v937_v60  ;;  %v920_v63 = vsub.f32 %v2753_v62, %v3465_v3  ;;  %v883_v2 = vpop.f32.mrb[17].mxu1 }
 0x1f3   : > { %2993 = vrcp.f32 %v935_v61  ;;  %v918_v4 = vsub.f32 %v883_v2, %v3467_v7  ;;  %v2754_v5 = vpop.f32.mrb[18].mxu1 }
 0x1f4   : > { %v921_v6 = vsub.f32 %v2754_v5, %v3469_v11  ;;  %v886_v24 = vpop.f32.mrb[19].mxu1  ;;  %v924_v8 = vmul.f32 2.0, %v920_v63 }
 0x1f5   : > { %v919_v9 = vsub.f32 %v886_v24, %v3471_v15  ;;  %v922_v10 = vmul.f32 2.0, %v918_v4 }
 0x1f6   : > { %v925_v1 = vmul.f32 2.0, %v921_v6  ;;  %v928_v13 = vadd.f32 0.0009, %v924_v8 }
 0x1f7   : > { %v923_v12 = vmul.f32 2.0, %v919_v9  ;;  %v926_v17 = vadd.f32 0.0009, %v922_v10 }
 0x1f8   : > { %v929_v20 = vadd.f32 0.0009, %v925_v1 }
 0x1f9   : > { %v2769_v14 = vpop.f32.mrb[20].mxu1  ;;  %v927_v11 = vadd.f32 0.0009, %v923_v12 }
 0x1fa   : > { %v2988_v16 = vpop.eup %2987  ;;  %v1085_v18 = vpop.f32.mrb[21].mxu1  ;;  %v1546_v30 = vmul.f32 %v2769_v14, %v2769_v14 }
 0x1fb   : > { %v2990_v3 = vpop.eup %2989  ;;  %v3481_v19 = vmul.f32 %v2988_v16, %v928_v13  ;;  %v2770_v7 = vpop.f32.mrb[22].mxu1  ;;  %v1544_v0 = vmul.f32 %v1085_v18, %v1085_v18 }
 0x1fc   : > { %v2992_v28 = vpop.eup %2991  ;;  %v3483_v21 = vmul.f32 %v2990_v3, %v926_v17  ;;  %v1088_v22 = vpop.f32.mrb[23].mxu1  ;;  %v1547_v32 = vmul.f32 %v2770_v7, %v2770_v7 }
 0x1fd   : > { %v2994_v33 = vpop.eup %2993  ;;  %v3486_v15 = vmul.f32 %v968_v36, %v3481_v19  ;;  %v3488_v37 = vmul.f32 %v2992_v28, %v929_v20  ;;  %v1545_v44 = vmul.f32 %v1088_v22, %v1088_v22 }
 0x1fe   : > { %v3491_v38 = vmul.f32 %v966_v46, %v3483_v21  ;;  %v3493_v23 = vmul.f32 %v2994_v33, %v927_v11 }
 0x1ff   : > { %v3496_v25 = vmul.f32 %v969_v52, %v3488_v37 }
 0x200   : > { %v3499_v29 = vmul.f32 %v967_v55, %v3493_v23 }
 0x201   : > { %v2785_v26 = vpop.f32.mrb[24].mxu1 }
 0x202   : > { %v1550_v39 = vmul.f32 %v2785_v26, %v2785_v26  ;;  %v3501_v40 = vmul.f32 %v2785_v26, %v2769_v14  ;;  %v1193_v41 = vpop.f32.mrb[25].mxu1 }
 0x203   : > { %v1548_v27 = vmul.f32 %v1193_v41, %v1193_v41  ;;  %v3503_v31 = vmul.f32 %v1193_v41, %v1085_v18  ;;  %v2786_v35 = vpop.f32.mrb[26].mxu1 }
 0x204   : > { %v1590_v34 = vadd.f32 %v1550_v39, %v1546_v30  ;;  %v1551_v36 = vmul.f32 %v2786_v35, %v2786_v35  ;;  %v3505_v42 = vmul.f32 %v2786_v35, %v2770_v7  ;;  %v1196_v43 = vpop.f32.mrb[27].mxu1  ;;  %v1606_v61 = vmul.f32 2.0, %v3501_v40 }
 0x205   : > { %v1588_v45 = vadd.f32 %v1548_v27, %v1544_v0  ;;  %v1549_v46 = vmul.f32 %v1196_v43, %v1196_v43  ;;  %v3507_v47 = vmul.f32 %v1196_v43, %v1088_v22  ;;  %v1604_v63 = vmul.f32 2.0, %v3503_v31 }
 0x206   : > { %v1594_v48 = vadd.f32 0.0001, %v1590_v34  ;;  %v1591_v49 = vadd.f32 %v1551_v36, %v1547_v32  ;;  %v1607_v2 = vmul.f32 2.0, %v3505_v42  ;;  %v1610_v5 = vadd.f32 0.0001, %v1606_v61 }
 0x207   : > { %v1592_v50 = vadd.f32 0.0001, %v1588_v45  ;;  %v1589_v51 = vadd.f32 %v1549_v46, %v1545_v44  ;;  %v1605_v4 = vmul.f32 2.0, %v3507_v47  ;;  %v1608_v8 = vadd.f32 0.0001, %v1604_v63 }
 0x208   : > { %2995 = vrcp.f32 %v1594_v48  ;;  %v1595_v52 = vadd.f32 0.0001, %v1591_v49  ;;  %v1611_v13 = vadd.f32 0.0001, %v1607_v2 }
 0x209   : > { %2997 = vrcp.f32 %v1592_v50  ;;  %v1593_v53 = vadd.f32 0.0001, %v1589_v51  ;;  %v2801_v54 = vpop.f32.mrb[28].mxu1  ;;  %v1609_v3 = vadd.f32 0.0001, %v1605_v4 }
 0x20a   : > { %2999 = vrcp.f32 %v1595_v52  ;;  %v1558_v55 = vsub.f32 %v2801_v54, %v1546_v30  ;;  %v1305_v56 = vpop.f32.mrb[29].mxu1 }
 0x20b   : > { %3001 = vrcp.f32 %v1593_v53  ;;  %v1556_v57 = vsub.f32 %v1305_v56, %v1544_v0  ;;  %v2802_v58 = vpop.f32.mrb[30].mxu1 }
 0x20c   : > { %v1559_v59 = vsub.f32 %v2802_v58, %v1547_v32  ;;  %v1308_v60 = vpop.f32.mrb[31].mxu1 }
 0x20d   : > { %v1557_v62 = vsub.f32 %v1308_v60, %v1545_v44 }
 0x211   : > { %v2817_v6 = vpop.f32.mrb[32].mxu1 }
 0x212   : > { %v2996_v24 = vpop.eup %2995  ;;  %v1562_v9 = vsub.f32 %v2817_v6, %v1550_v39  ;;  %v1417_v10 = vpop.f32.mrb[33].mxu1 }
 0x213   : > { %v2998_v1 = vpop.eup %2997  ;;  %v1614_v12 = vmul.f32 %v2996_v24, %v1610_v5  ;;  %v1560_v14 = vsub.f32 %v1417_v10, %v1548_v27  ;;  %v2818_v16 = vpop.f32.mrb[34].mxu1 }
 0x214   : > { %v3000_v17 = vpop.eup %2999  ;;  %v1612_v18 = vmul.f32 %v2998_v1, %v1608_v8  ;;  %v1578_v20 = vadd.f32 %v1562_v9, %v1558_v55  ;;  %v1563_v7 = vsub.f32 %v2818_v16, %v1551_v36  ;;  %v1420_v28 = vpop.f32.mrb[35].mxu1 }
 0x215   : > { %v3002_v11 = vpop.eup %3001  ;;  %v1615_v22 = vmul.f32 %v3000_v17, %v1611_v13  ;;  %v1576_v33 = vadd.f32 %v1560_v14, %v1556_v57  ;;  %v1561_v26 = vsub.f32 %v1420_v28, %v1549_v46 }
 0x216   : > { %v1613_v30 = vmul.f32 %v3002_v11, %v1609_v3  ;;  %v1582_v41 = vadd.f32 0.0009, %v1578_v20  ;;  %v1579_v0 = vadd.f32 %v1563_v7, %v1559_v59 }
 0x217   : > { %v1580_v39 = vadd.f32 0.0009, %v1576_v33  ;;  %v1577_v35 = vadd.f32 %v1561_v26, %v1557_v62 }
 0x218   : > { %3003 = vrcp.f32 %v1582_v41  ;;  %v1583_v32 = vadd.f32 0.0009, %v1579_v0 }
 0x219   : > { %3005 = vrcp.f32 %v1580_v39  ;;  %v1581_v27 = vadd.f32 0.0009, %v1577_v35  ;;  %v2833_v34 = vpop.f32.mrb[36].mxu1 }
 0x21a   : > { %3007 = vrcp.f32 %v1583_v32  ;;  %v1566_v43 = vsub.f32 %v2833_v34, %v3501_v40  ;;  %v1529_v44 = vpop.f32.mrb[37].mxu1 }
 0x21b   : > { %3009 = vrcp.f32 %v1581_v27  ;;  %v1564_v36 = vsub.f32 %v1529_v44, %v3503_v31  ;;  %v2834_v45 = vpop.f32.mrb[38].mxu1 }
 0x21c   : > { %v1567_v46 = vsub.f32 %v2834_v45, %v3505_v42  ;;  %v1532_v48 = vpop.f32.mrb[39].mxu1  ;;  %v1570_v49 = vmul.f32 2.0, %v1566_v43 }
 0x21d   : > { %v1565_v50 = vsub.f32 %v1532_v48, %v3507_v47  ;;  %v1568_v51 = vmul.f32 2.0, %v1564_v36 }
 0x21e   : > { %v1571_v52 = vmul.f32 2.0, %v1567_v46  ;;  %v1574_v54 = vadd.f32 0.0009, %v1570_v49 }
 0x21f   : > { %v1569_v53 = vmul.f32 2.0, %v1565_v50  ;;  %v1572_v57 = vadd.f32 0.0009, %v1568_v51 }
 0x220   : > { %v1575_v60 = vadd.f32 0.0009, %v1571_v52 }
 0x221   : > { %v2849_v55 = vpop.f32.mrb[40].mxu1  ;;  %v1573_v63 = vadd.f32 0.0009, %v1569_v53 }
 0x222   : > { %v3004_v56 = vpop.eup %3003  ;;  %v1731_v58 = vpop.f32.mrb[41].mxu1 }
 0x223   : > { %v3006_v40 = vpop.eup %3005  ;;  %v1602_v59 = vmul.f32 %v3004_v56, %v1574_v54  ;;  %v2850_v61 = vpop.f32.mrb[42].mxu1  ;;  %v2190_v3 = vmul.f32 %v1731_v58, %v1731_v58 }
 0x224   : > { %v3008_v31 = vpop.eup %3007  ;;  %v1600_v62 = vmul.f32 %v3006_v40, %v1572_v57  ;;  %v1734_v42 = vpop.f32.mrb[43].mxu1  ;;  %v2193_v28 = vmul.f32 %v2850_v61, %v2850_v61 }
 0x225   : > { %v3010_v2 = vpop.eup %3009  ;;  %v1618_v4 = vmul.f32 %v1614_v12, %v1602_v59  ;;  %v3518_v47 = vadd.f32 %v1602_v59, %v3481_v19  ;;  %v1603_v5 = vmul.f32 %v3008_v31, %v1575_v60  ;;  %v2191_v33 = vmul.f32 %v1734_v42, %v1734_v42 }
 0x226   : > { %v1616_v6 = vmul.f32 %v1612_v18, %v1600_v62  ;;  %v3521_v24 = vadd.f32 %v1600_v62, %v3483_v21  ;;  %v1601_v8 = vmul.f32 %v3010_v2, %v1573_v63 }
 0x227   : > { %v3524_v9 = vadd.f32 %v1618_v4, %v3486_v15  ;;  %v1619_v10 = vmul.f32 %v1615_v22, %v1603_v5  ;;  %v3527_v1 = vadd.f32 %v1603_v5, %v3488_v37  ;;  %v2192_v15 = vmul.f32 %v2849_v55, %v2849_v55 }
 0x228   : > { %v3530_v13 = vadd.f32 %v1616_v6, %v3491_v38  ;;  %v1617_v12 = vmul.f32 %v1613_v30, %v1601_v8  ;;  %v3533_v19 = vadd.f32 %v1601_v8, %v3493_v23 }
 0x229   : > { %v2865_v14 = vpop.f32.mrb[44].mxu1  ;;  %v3536_v16 = vadd.f32 %v1619_v10, %v3496_v25 }
 0x22a   : > { %v3539_v21 = vadd.f32 %v1617_v12, %v3499_v29  ;;  %v2196_v17 = vmul.f32 %v2865_v14, %v2865_v14  ;;  %v3541_v18 = vmul.f32 %v2865_v14, %v2849_v55  ;;  %v1839_v37 = vpop.f32.mrb[45].mxu1 }
 0x22b   : > { %v2194_v20 = vmul.f32 %v1839_v37, %v1839_v37  ;;  %v3543_v38 = vmul.f32 %v1839_v37, %v1731_v58  ;;  %v2866_v7 = vpop.f32.mrb[46].mxu1 }
 0x22c   : > { %v2236_v23 = vadd.f32 %v2196_v17, %v2192_v15  ;;  %v2197_v11 = vmul.f32 %v2866_v7, %v2866_v7  ;;  %v3545_v22 = vmul.f32 %v2866_v7, %v2850_v61  ;;  %v1842_v25 = vpop.f32.mrb[47].mxu1  ;;  %v2252_v49 = vmul.f32 2.0, %v3541_v18 }
 0x22d   : > { %v2234_v26 = vadd.f32 %v2194_v20, %v2190_v3  ;;  %v2195_v29 = vmul.f32 %v1842_v25, %v1842_v25  ;;  %v3547_v30 = vmul.f32 %v1842_v25, %v1734_v42  ;;  %v2250_v51 = vmul.f32 2.0, %v3543_v38 }
 0x22e   : > { %v2240_v41 = vadd.f32 0.0001, %v2236_v23  ;;  %v2237_v0 = vadd.f32 %v2197_v11, %v2193_v28  ;;  %v2253_v52 = vmul.f32 2.0, %v3545_v22  ;;  %v2256_v54 = vadd.f32 0.0001, %v2252_v49 }
 0x22f   : > { %v2238_v39 = vadd.f32 0.0001, %v2234_v26  ;;  %v2235_v35 = vadd.f32 %v2195_v29, %v2191_v33  ;;  %v2251_v53 = vmul.f32 2.0, %v3547_v30  ;;  %v2254_v57 = vadd.f32 0.0001, %v2250_v51 }
 0x230   : > { %3011 = vrcp.f32 %v2240_v41  ;;  %v2241_v32 = vadd.f32 0.0001, %v2237_v0  ;;  %v2257_v61 = vadd.f32 0.0001, %v2253_v52  ;;  %v2274_v0 = vlaneseq }
 0x231   : > { %3013 = vrcp.f32 %v2238_v39  ;;  %v2239_v27 = vadd.f32 0.0001, %v2235_v35  ;;  %v2881_v34 = vpop.f32.mrb[48].mxu1  ;;  %v2255_v2 = vadd.f32 0.0001, %v2251_v53 }
 0x232   : > { %3015 = vrcp.f32 %v2241_v32  ;;  %v2204_v43 = vsub.f32 %v2881_v34, %v2192_v15  ;;  %v1951_v44 = vpop.f32.mrb[49].mxu1 }
 0x233   : > { %3017 = vrcp.f32 %v2239_v27  ;;  %v2202_v36 = vsub.f32 %v1951_v44, %v2190_v3  ;;  %v2882_v45 = vpop.f32.mrb[50].mxu1 }
 0x234   : > { %v2205_v46 = vsub.f32 %v2882_v45, %v2193_v28  ;;  %v1954_v48 = vpop.f32.mrb[51].mxu1 }
 0x235   : > { %v2203_v50 = vsub.f32 %v1954_v48, %v2191_v33 }
 0x239   : > { %v2897_v55 = vpop.f32.mrb[52].mxu1 }
 0x23a   : > { %v3012_v56 = vpop.eup %3011  ;;  %v2208_v58 = vsub.f32 %v2897_v55, %v2196_v17  ;;  %v2063_v40 = vpop.f32.mrb[53].mxu1 }
 0x23b   : > { %v3014_v59 = vpop.eup %3013  ;;  %v2260_v60 = vmul.f32 %v3012_v56, %v2256_v54  ;;  %v2206_v31 = vsub.f32 %v2063_v40, %v2194_v20  ;;  %v2898_v62 = vpop.f32.mrb[54].mxu1 }
 0x23c   : > { %v3016_v63 = vpop.eup %3015  ;;  %v2258_v42 = vmul.f32 %v3014_v59, %v2254_v57  ;;  %v2224_v4 = vadd.f32 %v2208_v58, %v2204_v43  ;;  %v2209_v5 = vsub.f32 %v2898_v62, %v2197_v11  ;;  %v2066_v6 = vpop.f32.mrb[55].mxu1  ;;  %v2275_v43 = vand.u32 127, %v2274_v0 }
 0x23d   : > { %v3018_v8 = vpop.eup %3017  ;;  %v2261_v10 = vmul.f32 %v3016_v63, %v2257_v61  ;;  %v2222_v12 = vadd.f32 %v2206_v31, %v2202_v36  ;;  %v2207_v14 = vsub.f32 %v2066_v6, %v2195_v29  ;;  %v3107_v58 = vmov 0.0  }
 0x23e   : > { %v2259_v15 = vmul.f32 %v3018_v8, %v2255_v2  ;;  %v2228_v37 = vadd.f32 0.0009, %v2224_v4  ;;  %v2225_v3 = vadd.f32 %v2209_v5, %v2205_v46  ;;  %vm2279_vm1 = vcmp.lt.s32.totalorder %v2275_v43, 32 }
 0x23f   : > { %v2226_v17 = vadd.f32 0.0009, %v2222_v12  ;;  %v2223_v7 = vadd.f32 %v2207_v14, %v2203_v50  ;;  %v2549_v40 = vsel %vm2279_vm1, 1.0, %v3107_v58 }
 0x240   : > { %3019 = vrcp.f32 %v2228_v37  ;;  %v2229_v28 = vadd.f32 0.0009, %v2225_v3 }
 0x241   : > { %3021 = vrcp.f32 %v2226_v17  ;;  %v2227_v20 = vadd.f32 0.0009, %v2223_v7  ;;  %v2913_v23 = vpop.f32.mrb[56].mxu1 }
 0x242   : > { %3023 = vrcp.f32 %v2229_v28  ;;  %v2212_v25 = vsub.f32 %v2913_v23, %v3541_v18  ;;  %v2175_v33 = vpop.f32.mrb[57].mxu1 }
 0x243   : > { %3025 = vrcp.f32 %v2227_v20  ;;  %v2210_v11 = vsub.f32 %v2175_v33, %v3543_v38  ;;  %v2914_v26 = vpop.f32.mrb[58].mxu1 }
 0x244   : > { %v2213_v29 = vsub.f32 %v2914_v26, %v3545_v22  ;;  %v2178_v41 = vpop.f32.mrb[59].mxu1  ;;  %v2216_v39 = vmul.f32 2.0, %v2212_v25 }
 0x245   : > { %v2211_v35 = vsub.f32 %v2178_v41, %v3547_v30  ;;  %v2214_v32 = vmul.f32 2.0, %v2210_v11 }
 0x246   : > { %v2217_v27 = vmul.f32 2.0, %v2213_v29  ;;  %v2220_v44 = vadd.f32 0.0009, %v2216_v39 }
 0x247   : > { %v2215_v34 = vmul.f32 2.0, %v2211_v35  ;;  %v2218_v45 = vadd.f32 0.0009, %v2214_v32 }
 0x248   : > { %v2221_v48 = vadd.f32 0.0009, %v2217_v27 }
 0x249   : > { %v2219_v50 = vadd.f32 0.0009, %v2215_v34 }
 0x24a   : > { %v3020_v36 = vpop.eup %3019 }
 0x24b   : > { %v3022_v18 = vpop.eup %3021  ;;  %v2248_v46 = vmul.f32 %v3020_v36, %v2220_v44 }
 0x24c   : > { %v3024_v49 = vpop.eup %3023  ;;  %v2246_v38 = vmul.f32 %v3022_v18, %v2218_v45 }
 0x24d   : > { %v3026_v22 = vpop.eup %3025  ;;  %v2264_v51 = vmul.f32 %v2260_v60, %v2248_v46  ;;  %v2272_v52 = vadd.f32 %v2248_v46, %v3518_v47  ;;  %v2249_v53 = vmul.f32 %v3024_v49, %v2221_v48 }
 0x24e   : > { %v2262_v30 = vmul.f32 %v2258_v42, %v2246_v38  ;;  %v2270_v54 = vadd.f32 %v2246_v38, %v3521_v24  ;;  %v2247_v55 = vmul.f32 %v3026_v22, %v2219_v50 }
 0x24f   : > { %v2265_v56 = vmul.f32 %v2261_v10, %v2249_v53  ;;  %v2268_v57 = vadd.f32 %v2264_v51, %v3524_v9  ;;  %v2273_v59 = vadd.f32 %v2249_v53, %v3527_v1  ;;  %v2288_v4 = vmul.f32 %v2549_v40, %v2272_v52 }
 0x250   : > { %v2266_v61 = vadd.f32 %v2262_v30, %v3530_v13  ;;  %v2263_v31 = vmul.f32 %v2259_v15, %v2247_v55  ;;  %v2271_v62 = vadd.f32 %v2247_v55, %v3533_v19  ;;  %v2286_v63 = vmul.f32 %v2549_v40, %v2270_v54 }
 0x251   : > { %v2269_v60 = vadd.f32 %v2265_v56, %v3536_v16  ;;  %v2284_v9 = vmul.f32 %v2549_v40, %v2268_v57  ;;  %v2289_v8 = vmul.f32 %v2549_v40, %v2273_v59 }
 0x252   : > { %v2267_v47 = vadd.f32 %v2263_v31, %v3539_v21  ;;  %v2287_v42 = vmul.f32 %v2549_v40, %v2271_v62  ;;  %v2282_v24 = vmul.f32 %v2549_v40, %v2266_v61 }
 0x253   : > { %v2285_v1 = vmul.f32 %v2549_v40, %v2269_v60 }
 0x254   : > { %v2283_v2 = vmul.f32 %v2549_v40, %v2267_v47  ;;  %v2305_v5 = vadd.f32 %v2287_v42, %v2286_v63 }
 0x256   : > { %v2290_v6 = vadd.f32 %v2283_v2, %v2282_v24  ;;  %v2306_v10 = vadd.f32 %v2305_v5, %v2288_v4 }
 0x258   : > { %v2291_v12 = vadd.f32 %v2290_v6, %v2284_v9  ;;  %v2307_v13 = vadd.f32 %v2306_v10, %v2289_v8 }
 0x25a   : > { %v2292_v14 = vadd.f32 %v2291_v12, %v2285_v1 }
 0x25c   : > { %2293 = vadd.xlane.f32.xlu0 %v2292_v14 }
 0x260   : > { %2308 = vadd.xlane.f32.xlu0 %v2307_v13 }
 0x2e9   : > { %v2294_v19 = vpop.xlane.xlu0 %2293 }
 0x2ea   : > { %v2295_v16 = vrot.slane %v2294_v19, 4 }
 0x2ec   : > { %v2296_v21 = vadd.f32 %v2295_v16, %v2294_v19 }
 0x2ed   : > { %v2309_v15 = vpop.xlane.xlu0 %2308 }
 0x2ee   : > { %v2297_v37 = vrot.slane %v2296_v21, 2  ;;  %v2310_v3 = vrot.slane %v2309_v15, 4 }
 0x2f0   : > { %v2311_v17 = vadd.f32 %v2310_v3, %v2309_v15  ;;  %v2298_v7 = vadd.f32 %v2297_v37, %v2296_v21 }
 0x2f2   : > { %v2312_v28 = vrot.slane %v2311_v17, 2  ;;  %v2299_v20 = vrot.slane %v2298_v7, 1 }
 0x2f4   : > { %v2313_v23 = vadd.f32 %v2312_v28, %v2311_v17  ;;  %v2300_v25 = vadd.f32 %v2299_v20, %v2298_v7 }
 0x2f6   : > { %2915 = vpush %v2300_v25  ;;  %v2314_v33 = vrot.slane %v2313_v23, 1 }
 0x2f8   : > { %v2315_v11 = vadd.f32 %v2314_v33, %v2313_v23 }
 0x2fa   : > { %2917 = vpush %v2315_v11 }
 0x327   : > { %s2916_s15 = spop %2915 }
 0x328   : > { %v2302_v26 = vstv %s2916_s15 }
 0x329   : > { %2304 = vst.msk [vmem:[%s267_s10] sm:$0x1] %vm2303_vm2, %v2302_v26 }
 0x32a   : > { %3040 = shalt.err (!%p3037_p6)
}
 0x32b   : > { %s3041_s8 = scalar_lea.hbm %s3574_s14, 16  ;;  %s3045_s13 = scalar_lea.hbm %s3636_s4, 32 }
 0x32c   : > { %p3042_p7 = scmp.ne.s32.totalorder %s3574_s14, %s3041_s8  ;;  %p3046_p11 = scmp.lt.u32.totalorder %s3574_s14, %s3636_s4 }
 0x32d   : > { %p3047_p12 = scmp.lt.u32.totalorder %s3045_s13, %s3041_s8  ;;  %p3049_p0 = scmp.lt.u32.totalorder %s3041_s8, %s3574_s14 }
 0x32e   : > { %p3043_p9 = pnand %p3042_p7, %p3179_p4 }
 0x32f   : > { %p3048_p13 = por %p3047_p12, %p3046_p11 }
 0x330   : > { %p3044_p10 = pneg %p3043_p9 }
 0x331   : > { %p3050_p1 = por %p3049_p0, %p3048_p13 }
 0x333   : > { %p3051_p2 = pnand %p3050_p1, %p3044_p10 }
 0x335   : > { %3054 = shalt.err (!%p3051_p2)
}
 0x336   : > { %2919 = dma.vmem_to_hbm [thread:$0]  (%p3179_p4), %s3576_s11, 16, %s3574_s14, %s2320_s25  }
 0x337   : > { %s2918_s17 = spop %2917 }
 0x338   : > { %v2317_v29 = vstv %s2918_s17 }
 0x339   : > { %2318 = vst.msk [vmem:[%s299_s24] sm:$0x1] %vm2303_vm2, %v2317_v29 }
 0x33a PF: > { %p2925_p3 = scmp.ge.s32.totalorder %s3105_s23, 2  ;;  %s2354_s7 = sand.u32 1, %s3085_s18  }
 0x33b   : > { %s2355_s28 = scalar_lea.sflag [#allocation3], %s2354_s7 }
 0x33c   : > { %p2922_p5 = pnand %p2925_p3, %p3186_p8 }
 0x33e   : > { %3080 = dma.done.wait (!%p2922_p5), %s2355_s28, 16  }
 0x33f   : > { %3082 = vsyncadd (!%p2922_p5), %s2355_s28, 4294967280  ;;  %s19_s23 = sadd.s32 1, %s3105_s23   ;;  %s3640_s18 = smov %s3089_s19 }
 0x340   : > { %p16_p4 = scmp.ge.s32.totalorder %s19_s23, 4   ;;  %s3641_s19 = smov %s3093_s20 }
 0x341   : > { %s3642_s20 = smov %s3192_s6  ;;  %s3643_s21 = smov %s3101_s22 }
 0x342   : > { %s3644_s22 = smov %s3646_s26  ;;  %18 = sbr.rel (!%p16_p4) target bundleno = 4 (0x4), region = 93 }
 0x349   :  { %2368 = vsyncpa [#allocation3], 1 }
 0x34a   :  { %2370 = vsyncpa [#allocation3 + $0x1], 1 }

// kernel: _dvc_loss_device.13
= control target key start
LH: loop header
LB: loop body
LE: loop exit
PB: predicated region body
PF: predicated region fallthrough
CT: control target
= control target key end

     0   :  { %11 = vsyncpa [#allocation3], 0  ;;  %s2673_s0 = inlined_call_operand.vmem [shape: f32[6,2,2], index: 0, kind: input, shape index: {}]   ;;  %s2674_s1 = inlined_call_operand.vmem [shape: f32[6,2,2], index: 1, kind: input, shape index: {}]   ;;  %s2675_s2 = inlined_call_operand.vmem [shape: bf16[3,2], index: 2, kind: input, shape index: {}]   ;;  %s2676_s3 = inlined_call_operand.vmem [shape: bf16[2,128], index: 3, kind: input, shape index: {}]   ;;  %s2677_s4 = inlined_call_operand.vmem [shape: f32[2,1,1,1], index: 4, kind: output, shape index: {0}]   ;;  %s2678_s5 = inlined_call_operand.hbm [shape: f32[2,1,1,1], index: 5, kind: output, shape index: {1}]  }
   0x1   :  { %13 = vsyncpa [#allocation3 + $0x1], 0  ;;  %s2349_s18 = smov 0   ;;  %s2351_s19 = smov 0  }
   0x2   :  { %s2353_s20 = smov 0   ;;  %s2355_s21 = smov 0  }
   0x3   :  { %s2357_s22 = smov 0   ;;  %s2359_s23 = smov 0  }
   0x4 LB: > { %s1877_s24 = sadd.s32 4294967295, %s2314_s23   ;;  %s1878_s25 = sadd.s32 4294967294, %s2314_s23   ;;  %s2314_s23 = sphi %s2359_s23, %s19_s23   ;;  %s2310_s22 = sphi %s2357_s22, %s2685_s22   ;;  %s2306_s21 = sphi %s2355_s21, %s2684_s21   ;;  %s2302_s20 = sphi %s2353_s20, %s2683_s20   ;;  %s2298_s19 = sphi %s2351_s19, %s2682_s19   ;;  %s2294_s18 = sphi %s2349_s18, %s2681_s18  }
   0x5   : > { %s31_s26 = sadd.s32 1, %s2310_s22  ;;  %s167_s27 = sadd.s32 1, %s2302_s20 }
   0x6   : > { %p33_p0 = scmp.ge.s32.totalorder %s31_s26, 2  ;;  %p177_p1 = scmp.ne.s32.totalorder %s2302_s20, %s2298_s19 }
   0x7   : > { %p178_p2 = scmp.eq.s32.totalorder %s1877_s24, 1  ;;  %p183_p3 = scmp.ne.s32.totalorder %s2298_s19, %s2294_s18 }
   0x8   : > { %s2687_s26 = smov (%p33_p0, %s31_s26), 0  ;;  %p184_p5 = scmp.eq.s32.totalorder %s1878_s25, 1 }
   0x9   : > { %p2389_p4 = por %p178_p2, %p177_p1  ;;  %s162_s29 = ssub.s32 %s2310_s22, %s2687_s26 }
   0xa   : > { %p1882_p6 = scmp.ge.s32.totalorder %s2314_s23, 1  ;;  %p165_p7 = scmp.eq.s32.totalorder %s162_s29, 0 }
   0xb   : > { %p2396_p8 = por %p184_p5, %p183_p3  ;;  %p229_p9 = scmp.lt.s32.totalorder %s2314_s23, 3 }
   0xc   : > { %s2402_s6 = scalar_select %p165_p7, %s2302_s20, %s167_s27  }
   0xd   : > { %p230_p10 = pnand %p1882_p6, %p229_p9 }
   0xe   : > { %v293_v0 = vld [vmem:[%s2676_s3] sm:$0x1] (!%p230_p10)  ;;  %vm301_vm0 = vcmask (!%p230_p10), 1040384   ;;  %s270_s9 = smul.u32 (!%p230_p10), 3, %s2306_s21  ;;  %v2316_v1 = vmov (!%p230_p10), 0.0   ;;  %vm2317_vm1 = vmmov (!%p230_p10), 0  }
   0xf   : > { %233 = sbr.rel (%p230_p10) target bundleno = 811 (0x32b), region = 36  ;;  %1983 = vmatprep.subr.bf16.mxu0 (!%p230_p10), %v2316_v1  ;;  %v2410_v2 = vsel (!%p230_p10), %vm301_vm0, %v293_v0, 0  ;;  %1985 = vmatprep.mubr.msk.bf16.mxu0 (!%p230_p10), %vm2317_vm1, %v2316_v1  ;;  %vm297_vm2 = vcmask (!%p230_p10), 15360   ;;  %v2527_v39 = vld [vmem:[%s2675_s2] sm:$0x3] (!%p230_p10)  ;;  %vm1714_vm4 = vcmask (!%p230_p10), 1042432  }
  0x10   : > { %1984 = vmatpush3.bf16.msra.mxu0 (!%p230_p10), %v2410_v2  ;;  %p271_p11 = scmp.lt.s32.totalorder (!%p230_p10), %s270_s9, 5  ;;  %1989 = vmatprep.subr.bf16.mxu1 (!%p230_p10), %v2316_v1  ;;  %p285_p12 = scmp.lt.s32.totalorder (!%p230_p10), %s2306_s21, 1  ;;  %vm1726_vm5 = vcmask (!%p230_p10), 0  }
  0x11   : > { %1995 = vmatprep.subr.bf16.mxu0 (!%p230_p10), %v2316_v1  ;;  %1991 = vmatprep.mubr.msk.bf16.mxu1 (!%p230_p10), %vm2317_vm1, %v2316_v1  ;;  %s268_s27 = sand.u32 (!%p230_p10), 1, %s2298_s19  }
  0x12   : > { %s269_s11 = scalar_lea.vmem (!%p230_p10), [#allocation2], %s268_s27  ;;  %s1747_s17 = scalar_lea.sflag (!%p230_p10), [#allocation3], %s268_s27 }
  0x13   : > { %s1763_s12 = sshll.u32 (!%p230_p10), %s269_s11, 4  ;;  %s2628_s12 = int_to_ptr.vmem [resolvable:$true] %s1763_s12 }
  0x14   : > { %s2236_s24 = scalar_lea.vmem (!%p230_p10), %s2628_s12, 16 }
  0x15   : > { %p2237_p13 = scmp.ne.s32.totalorder (!%p230_p10), %s2628_s12, %s2236_s24 }
  0x16   : > { %s2689_s9 = smov (!%p271_p11, %s270_s9), 5 }
  0x17   : > { %s1883_s10 = sshll.u32 %s2689_s9, 1  ;;  %p2238_p0 = pnand %p2237_p13, %p2389_p4 }
  0x18   : > { %s2422_s13 = scalar_lea.vmem %s2673_s0, %s1883_s10  ;;  %s2428_s16 = scalar_lea.vmem %s2674_s1, %s1883_s10 }
  0x19   : > { %v294_v3 = vld [vmem:[%s2422_s13] sm:$0x3]  ;;  %v2437_v6 = vld [vmem:[%s2422_s13 + $0x4] sm:$0x3]  ;;  %v1895_v16 = vld [vmem:[%s2422_s13 + $0x2] sm:$0x3]  ;;  %p2239_p1 = pneg %p2238_p0 }
  0x1a   : > { %v296_v4 = vpack.c.bf16 %v294_v3, %v294_v3  ;;  %v295_v5 = vld [vmem:[%s2428_s16] sm:$0x3]  ;;  %v2440_v7 = vld [vmem:[%s2428_s16 + $0x4] sm:$0x3]  ;;  %v480_v10 = vmul.f32 %v294_v3, %v294_v3  ;;  %v772_v17 = vpack.c.bf16 %v1895_v16, %v1895_v16  ;;  %v1896_v18 = vld [vmem:[%s2428_s16 + $0x2] sm:$0x3]  ;;  %v948_v20 = vmul.f32 %v1895_v16, %v1895_v16 }
  0x1b   : > { %v2444_v8 = vmul.f32 %v2440_v7, %v2437_v6  ;;  %v392_v9 = vpack.c.bf16 %v295_v5, %v295_v5  ;;  %v569_v12 = vmul.f32 %v295_v5, %v295_v5  ;;  %v658_v14 = vmul.f32 %v295_v5, %v294_v3  ;;  %s286_s25 = scalar_select %p285_p12, %s2306_s21, 1 }
  0x1c   : > { %1986 = vmatmul.mubr.msk.bf16.vlgmr.msra.gmra.mrb[0].mxu0 %vm297_vm2, %v296_v4  ;;  %v481_v11 = vpack.c.bf16 %v480_v10, %v480_v10  ;;  %v860_v19 = vpack.c.bf16 %v1896_v18, %v1896_v18  ;;  %v949_v21 = vpack.c.bf16 %v948_v20, %v948_v20  ;;  %v1037_v22 = vmul.f32 %v1896_v18, %v1896_v18  ;;  %s1920_s10 = sshll.u32 %s2306_s21, 4  ;;  %s2318_s21 = smov [#allocation2]  }
  0x1d   : > { %1996 = vmatpush3.bf16.msra.mxu0 %v2410_v2  ;;  %1997 = vmatprep.mubr.msk.bf16.mxu0 %vm2317_vm1, %v2316_v1  ;;  %v570_v13 = vpack.c.bf16 %v569_v12, %v569_v12  ;;  %v659_v15 = vpack.c.bf16 %v658_v14, %v658_v14  ;;  %v1126_v24 = vmul.f32 %v1896_v18, %v1895_v16  ;;  %s290_s8 = scalar_lea.vmem %s2677_s4, %s286_s25  ;;  %s2626_s15 = scalar_lea.hbm %s2678_s5, %s1920_s10 }
  0x1e   : > { %2007 = vmatprep.subr.bf16.mxu0 %v2316_v1  ;;  %v1038_v23 = vpack.c.bf16 %v1037_v22, %v1037_v22  ;;  %v1240_v26 = vpack.c.bf16 %v2437_v6, %v2437_v6  ;;  %v1328_v27 = vpack.c.bf16 %v2440_v7, %v2440_v7  ;;  %v1416_v28 = vmul.f32 %v2437_v6, %v2437_v6  ;;  %s2240_s25 = sshll.u32 %s2318_s21, 4  ;;  %s2241_s25 = int_to_ptr.vmem [resolvable:$false] %s2240_s25 }
  0x1f   : > { %v1127_v25 = vpack.c.bf16 %v1126_v24, %v1126_v24  ;;  %v1505_v30 = vmul.f32 %v2440_v7, %v2440_v7  ;;  %v1595_v32 = vpack.c.bf16 %v2444_v8, %v2444_v8  ;;  %s2242_s29 = scalar_lea.vmem %s2241_s25, 32  ;;  %p2243_p2 = scmp.lt.s32.totalorder %s2628_s12, %s2241_s25 }
  0x20   : > { %v1417_v29 = vpack.c.bf16 %v1416_v28, %v1416_v28  ;;  %p2244_p3 = scmp.lt.s32.totalorder %s2242_s29, %s2236_s24 }
  0x21   : > { %v1506_v31 = vpack.c.bf16 %v1505_v30, %v1505_v30 }
  0x22   : > { %p2245_p5 = por %p2244_p3, %p2243_p2 }
  0x24   : > { %1998 = vmatmul.mubr.msk.bf16.vlgmr.msra.gmra.mrb[4].mxu0 %vm297_vm2, %v392_v9  ;;  %p2246_p6 = pnand %p2245_p5, %p2239_p1 }
  0x25   : > { %2008 = vmatpush3.bf16.msra.mxu0 %v2410_v2  ;;  %2009 = vmatprep.mubr.msk.bf16.mxu0 %vm2317_vm1, %v2316_v1 }
  0x26   : > { %2019 = vmatprep.subr.bf16.mxu0 %v2316_v1 }
  0x2c   : > { %2010 = vmatmul.mubr.msk.bf16.vlgmr.msra.gmra.mrb[8].mxu0 %vm297_vm2, %v481_v11 }
  0x2d   : > { %2020 = vmatpush3.bf16.msra.mxu0 %v2410_v2  ;;  %2021 = vmatprep.mubr.msk.bf16.mxu0 %vm2317_vm1, %v2316_v1 }
  0x2e   : > { %2031 = vmatprep.subr.bf16.mxu0 %v2316_v1 }
  0x34   : > { %2022 = vmatmul.mubr.msk.bf16.vlgmr.msra.gmra.mrb[12].mxu0 %vm297_vm2, %v570_v13 }
  0x35   : > { %2032 = vmatpush3.bf16.msra.mxu0 %v2410_v2  ;;  %2033 = vmatprep.mubr.msk.bf16.mxu0 %vm2317_vm1, %v2316_v1 }
  0x36   : > { %2043 = vmatprep.subr.bf16.mxu0 %v2316_v1 }
  0x3c   : > { %2034 = vmatmul.mubr.msk.bf16.vlgmr.msra.gmra.mrb[16].mxu0 %vm297_vm2, %v659_v15 }
  0x3d   : > { %2044 = vmatpush3.bf16.msra.mxu0 %v2410_v2  ;;  %2045 = vmatprep.mubr.msk.bf16.mxu0 %vm2317_vm1, %v2316_v1 }
  0x3e   : > { %2055 = vmatprep.subr.bf16.mxu0 %v2316_v1 }
  0x44   : > { %2046 = vmatmul.mubr.msk.bf16.vlgmr.msra.gmra.mrb[20].mxu0 %vm297_vm2, %v772_v17 }
  0x45   : > { %2056 = vmatpush3.bf16.msra.mxu0 %v2410_v2  ;;  %2057 = vmatprep.mubr.msk.bf16.mxu0 %vm2317_vm1, %v2316_v1 }
  0x46   : > { %2067 = vmatprep.subr.bf16.mxu0 %v2316_v1 }
  0x4c   : > { %2058 = vmatmul.mubr.msk.bf16.vlgmr.msra.gmra.mrb[24].mxu0 %vm297_vm2, %v860_v19 }
  0x4d   : > { %2068 = vmatpush3.bf16.msra.mxu0 %v2410_v2  ;;  %2069 = vmatprep.mubr.msk.bf16.mxu0 %vm2317_vm1, %v2316_v1 }
  0x4e   : > { %2079 = vmatprep.subr.bf16.mxu0 %v2316_v1 }
  0x54   : > { %2070 = vmatmul.mubr.msk.bf16.vlgmr.msra.gmra.mrb[28].mxu0 %vm297_vm2, %v949_v21 }
  0x55   : > { %2080 = vmatpush3.bf16.msra.mxu0 %v2410_v2  ;;  %2081 = vmatprep.mubr.msk.bf16.mxu0 %vm2317_vm1, %v2316_v1 }
  0x56   : > { %2091 = vmatprep.subr.bf16.mxu0 %v2316_v1 }
  0x5c   : > { %2082 = vmatmul.mubr.msk.bf16.vlgmr.msra.gmra.mrb[32].mxu0 %vm297_vm2, %v1038_v23 }
  0x5d   : > { %2092 = vmatpush3.bf16.msra.mxu0 %v2410_v2  ;;  %2093 = vmatprep.mubr.msk.bf16.mxu0 %vm2317_vm1, %v2316_v1 }
  0x5e   : > { %2103 = vmatprep.subr.bf16.mxu0 %v2316_v1 }
  0x64   : > { %2094 = vmatmul.mubr.msk.bf16.vlgmr.msra.gmra.mrb[36].mxu0 %vm297_vm2, %v1127_v25 }
  0x65   : > { %2104 = vmatpush3.bf16.msra.mxu0 %v2410_v2  ;;  %2105 = vmatprep.mubr.msk.bf16.mxu0 %vm2317_vm1, %v2316_v1 }
  0x66   : > { %2115 = vmatprep.subr.bf16.mxu0 %v2316_v1 }
  0x6c   : > { %2106 = vmatmul.mubr.msk.bf16.vlgmr.msra.gmra.mrb[40].mxu0 %vm297_vm2, %v1240_v26 }
  0x6d   : > { %2116 = vmatpush3.bf16.msra.mxu0 %v2410_v2  ;;  %2117 = vmatprep.mubr.msk.bf16.mxu0 %vm2317_vm1, %v2316_v1 }
  0x6e   : > { %2127 = vmatprep.subr.bf16.mxu0 %v2316_v1 }
  0x74   : > { %2118 = vmatmul.mubr.msk.bf16.vlgmr.msra.gmra.mrb[44].mxu0 %vm297_vm2, %v1328_v27 }
  0x75   : > { %2128 = vmatpush3.bf16.msra.mxu0 %v2410_v2  ;;  %2129 = vmatprep.mubr.msk.bf16.mxu0 %vm2317_vm1, %v2316_v1 }
  0x76   : > { %2139 = vmatprep.subr.bf16.mxu0 %v2316_v1 }
  0x7c   : > { %2130 = vmatmul.mubr.msk.bf16.vlgmr.msra.gmra.mrb[48].mxu0 %vm297_vm2, %v1417_v29 }
  0x7d   : > { %2140 = vmatpush3.bf16.msra.mxu0 %v2410_v2  ;;  %2141 = vmatprep.mubr.msk.bf16.mxu0 %vm2317_vm1, %v2316_v1 }
  0x7e   : > { %2151 = vmatprep.subr.bf16.mxu0 %v2316_v1 }
  0x84   : > { %2142 = vmatmul.mubr.msk.bf16.vlgmr.msra.gmra.mrb[52].mxu0 %vm297_vm2, %v1506_v31 }
  0x85   : > { %2152 = vmatpush3.bf16.msra.mxu0 %v2410_v2  ;;  %2153 = vmatprep.mubr.msk.bf16.mxu0 %vm2317_vm1, %v2316_v1 }
  0x8c   : > { %2154 = vmatmul.mubr.msk.bf16.vlgmr.msra.gmra.mrb[56].mxu0 %vm297_vm2, %v1595_v32 }
  0xef   : > { %v339_v33 = vpop.f32.mrb[0].mxu0 }
  0xf0   : > { %v345_v34 = vpack.c.bf16 %v339_v33, %v339_v33  ;;  %v1987_v35 = vpop.f32.mrb[1].mxu0 }
  0xf1   : > { %v342_v36 = vpop.f32.mrb[2].mxu0 }
  0xf2   : > { %v1988_v37 = vpop.f32.mrb[3].mxu0  ;;  %v350_v38 = vsel %vm301_vm0, %v345_v34, 0 }
  0xf3   : > { %1990 = vmatpush3.bf16.msra.mxu1 %v350_v38 }
  0xf4   : > { %2001 = vmatprep.subr.bf16.mxu1 %v2316_v1 }
  0xf6   : > { %1992 = vmatmul.mubr.msk.bf16.vlgmr.msra.gmra.mrb[0].mxu1 %vm297_vm2, %v2527_v39 }
  0xf7   : > { %v430_v40 = vpop.f32.mrb[4].mxu0  ;;  %2003 = vmatprep.mubr.msk.bf16.mxu1 %vm2317_vm1, %v2316_v1 }
  0xf8   : > { %v436_v41 = vpack.c.bf16 %v430_v40, %v430_v40  ;;  %v1999_v42 = vpop.f32.mrb[5].mxu0 }
  0xf9   : > { %v433_v43 = vpop.f32.mrb[6].mxu0 }
  0xfa   : > { %v438_v44 = vsel %vm301_vm0, %v436_v41, 0  ;;  %v2000_v45 = vpop.f32.mrb[7].mxu0 }
  0xfb   : > { %2002 = vmatpush3.bf16.msra.mxu1 %v438_v44 }
  0xfc   : > { %2013 = vmatprep.subr.bf16.mxu1 %v2316_v1 }
  0xfe   : > { %2004 = vmatmul.mubr.msk.bf16.vlgmr.msra.gmra.mrb[4].mxu1 %vm297_vm2, %v2527_v39 }
  0xff   : > { %v519_v46 = vpop.f32.mrb[8].mxu0  ;;  %2015 = vmatprep.mubr.msk.bf16.mxu1 %vm2317_vm1, %v2316_v1 }
 0x100   : > { %v525_v47 = vpack.c.bf16 %v519_v46, %v519_v46  ;;  %v2011_v48 = vpop.f32.mrb[9].mxu0 }
 0x101   : > { %v522_v49 = vpop.f32.mrb[10].mxu0 }
 0x102   : > { %v527_v50 = vsel %vm301_vm0, %v525_v47, 0  ;;  %v2012_v51 = vpop.f32.mrb[11].mxu0 }
 0x103   : > { %2014 = vmatpush3.bf16.msra.mxu1 %v527_v50 }
 0x104   : > { %2025 = vmatprep.subr.bf16.mxu1 %v2316_v1 }
 0x106   : > { %2016 = vmatmul.mubr.msk.bf16.vlgmr.msra.gmra.mrb[8].mxu1 %vm297_vm2, %v2527_v39 }
 0x107   : > { %v608_v52 = vpop.f32.mrb[12].mxu0  ;;  %2027 = vmatprep.mubr.msk.bf16.mxu1 %vm2317_vm1, %v2316_v1 }
 0x108   : > { %v614_v53 = vpack.c.bf16 %v608_v52, %v608_v52  ;;  %v2023_v54 = vpop.f32.mrb[13].mxu0 }
 0x109   : > { %v611_v55 = vpop.f32.mrb[14].mxu0 }
 0x10a   : > { %v616_v56 = vsel %vm301_vm0, %v614_v53, 0  ;;  %v2024_v57 = vpop.f32.mrb[15].mxu0 }
 0x10b   : > { %2026 = vmatpush3.bf16.msra.mxu1 %v616_v56 }
 0x10c   : > { %2037 = vmatprep.subr.bf16.mxu1 %v2316_v1 }
 0x10e   : > { %2028 = vmatmul.mubr.msk.bf16.vlgmr.msra.gmra.mrb[12].mxu1 %vm297_vm2, %v2527_v39 }
 0x10f   : > { %v697_v58 = vpop.f32.mrb[16].mxu0  ;;  %2039 = vmatprep.mubr.msk.bf16.mxu1 %vm2317_vm1, %v2316_v1 }
 0x110   : > { %v703_v59 = vpack.c.bf16 %v697_v58, %v697_v58  ;;  %v2035_v60 = vpop.f32.mrb[17].mxu0 }
 0x111   : > { %v700_v61 = vpop.f32.mrb[18].mxu0 }
 0x112   : > { %v705_v62 = vsel %vm301_vm0, %v703_v59, 0  ;;  %v2036_v63 = vpop.f32.mrb[19].mxu0 }
 0x113   : > { %2038 = vmatpush3.bf16.msra.mxu1 %v705_v62 }
 0x114   : > { %2049 = vmatprep.subr.bf16.mxu1 %v2316_v1 }
 0x116   : > { %2040 = vmatmul.mubr.msk.bf16.vlgmr.msra.gmra.mrb[16].mxu1 %vm297_vm2, %v2527_v39 }
 0x117   : > { %v810_v0 = vpop.f32.mrb[20].mxu0  ;;  %2051 = vmatprep.mubr.msk.bf16.mxu1 %vm2317_vm1, %v2316_v1 }
 0x118   : > { %v816_v2 = vpack.c.bf16 %v810_v0, %v810_v0  ;;  %v2047_v3 = vpop.f32.mrb[21].mxu0 }
 0x119   : > { %v813_v4 = vpop.f32.mrb[22].mxu0 }
 0x11a   : > { %v818_v5 = vsel %vm301_vm0, %v816_v2, 0  ;;  %v2048_v6 = vpop.f32.mrb[23].mxu0 }
 0x11b   : > { %2050 = vmatpush3.bf16.msra.mxu1 %v818_v5 }
 0x11c   : > { %2061 = vmatprep.subr.bf16.mxu1 %v2316_v1 }
 0x11e   : > { %2052 = vmatmul.mubr.msk.bf16.vlgmr.msra.gmra.mrb[20].mxu1 %vm297_vm2, %v2527_v39 }
 0x11f   : > { %v898_v7 = vpop.f32.mrb[24].mxu0  ;;  %2063 = vmatprep.mubr.msk.bf16.mxu1 %vm2317_vm1, %v2316_v1 }
 0x120   : > { %v904_v8 = vpack.c.bf16 %v898_v7, %v898_v7  ;;  %v2059_v9 = vpop.f32.mrb[25].mxu0 }
 0x121   : > { %v901_v10 = vpop.f32.mrb[26].mxu0 }
 0x122   : > { %v906_v11 = vsel %vm301_vm0, %v904_v8, 0  ;;  %v2060_v12 = vpop.f32.mrb[27].mxu0 }
 0x123   : > { %2062 = vmatpush3.bf16.msra.mxu1 %v906_v11 }
 0x124   : > { %2073 = vmatprep.subr.bf16.mxu1 %v2316_v1 }
 0x126   : > { %2064 = vmatmul.mubr.msk.bf16.vlgmr.msra.gmra.mrb[24].mxu1 %vm297_vm2, %v2527_v39 }
 0x127   : > { %v987_v13 = vpop.f32.mrb[28].mxu0  ;;  %2075 = vmatprep.mubr.msk.bf16.mxu1 %vm2317_vm1, %v2316_v1 }
 0x128   : > { %v993_v14 = vpack.c.bf16 %v987_v13, %v987_v13  ;;  %v2071_v15 = vpop.f32.mrb[29].mxu0 }
 0x129   : > { %v990_v16 = vpop.f32.mrb[30].mxu0 }
 0x12a   : > { %v995_v17 = vsel %vm301_vm0, %v993_v14, 0  ;;  %v2072_v18 = vpop.f32.mrb[31].mxu0 }
 0x12b   : > { %2074 = vmatpush3.bf16.msra.mxu1 %v995_v17 }
 0x12c   : > { %2085 = vmatprep.subr.bf16.mxu1 %v2316_v1 }
 0x12e   : > { %2076 = vmatmul.mubr.msk.bf16.vlgmr.msra.gmra.mrb[28].mxu1 %vm297_vm2, %v2527_v39 }
 0x12f   : > { %v1076_v19 = vpop.f32.mrb[32].mxu0  ;;  %2087 = vmatprep.mubr.msk.bf16.mxu1 %vm2317_vm1, %v2316_v1 }
 0x130   : > { %v1082_v20 = vpack.c.bf16 %v1076_v19, %v1076_v19  ;;  %v2083_v21 = vpop.f32.mrb[33].mxu0 }
 0x131   : > { %v1079_v22 = vpop.f32.mrb[34].mxu0 }
 0x132   : > { %v1084_v23 = vsel %vm301_vm0, %v1082_v20, 0  ;;  %v2084_v24 = vpop.f32.mrb[35].mxu0 }
 0x133   : > { %2086 = vmatpush3.bf16.msra.mxu1 %v1084_v23 }
 0x134   : > { %2097 = vmatprep.subr.bf16.mxu1 %v2316_v1 }
 0x136   : > { %2088 = vmatmul.mubr.msk.bf16.vlgmr.msra.gmra.mrb[32].mxu1 %vm297_vm2, %v2527_v39 }
 0x137   : > { %v1165_v25 = vpop.f32.mrb[36].mxu0  ;;  %2099 = vmatprep.mubr.msk.bf16.mxu1 %vm2317_vm1, %v2316_v1 }
 0x138   : > { %v1171_v26 = vpack.c.bf16 %v1165_v25, %v1165_v25  ;;  %v2095_v27 = vpop.f32.mrb[37].mxu0 }
 0x139   : > { %v1168_v28 = vpop.f32.mrb[38].mxu0 }
 0x13a   : > { %v1173_v29 = vsel %vm301_vm0, %v1171_v26, 0  ;;  %v2096_v30 = vpop.f32.mrb[39].mxu0 }
 0x13b   : > { %2098 = vmatpush3.bf16.msra.mxu1 %v1173_v29 }
 0x13c   : > { %2109 = vmatprep.subr.bf16.mxu1 %v2316_v1 }
 0x13e   : > { %2100 = vmatmul.mubr.msk.bf16.vlgmr.msra.gmra.mrb[36].mxu1 %vm297_vm2, %v2527_v39 }
 0x13f   : > { %v1278_v31 = vpop.f32.mrb[40].mxu0  ;;  %2111 = vmatprep.mubr.msk.bf16.mxu1 %vm2317_vm1, %v2316_v1 }
 0x140   : > { %v1284_v32 = vpack.c.bf16 %v1278_v31, %v1278_v31  ;;  %v2107_v33 = vpop.f32.mrb[41].mxu0 }
 0x141   : > { %v1281_v34 = vpop.f32.mrb[42].mxu0 }
 0x142   : > { %v1286_v35 = vsel %vm301_vm0, %v1284_v32, 0  ;;  %v2108_v36 = vpop.f32.mrb[43].mxu0 }
 0x143   : > { %2110 = vmatpush3.bf16.msra.mxu1 %v1286_v35 }
 0x144   : > { %2121 = vmatprep.subr.bf16.mxu1 %v2316_v1 }
 0x146   : > { %2112 = vmatmul.mubr.msk.bf16.vlgmr.msra.gmra.mrb[40].mxu1 %vm297_vm2, %v2527_v39 }
 0x147   : > { %v1366_v37 = vpop.f32.mrb[44].mxu0  ;;  %2123 = vmatprep.mubr.msk.bf16.mxu1 %vm2317_vm1, %v2316_v1 }
 0x148   : > { %v1372_v38 = vpack.c.bf16 %v1366_v37, %v1366_v37  ;;  %v2119_v40 = vpop.f32.mrb[45].mxu0 }
 0x149   : > { %v1369_v41 = vpop.f32.mrb[46].mxu0 }
 0x14a   : > { %v1374_v42 = vsel %vm301_vm0, %v1372_v38, 0  ;;  %v2120_v43 = vpop.f32.mrb[47].mxu0 }
 0x14b   : > { %2122 = vmatpush3.bf16.msra.mxu1 %v1374_v42 }
 0x14c   : > { %2133 = vmatprep.subr.bf16.mxu1 %v2316_v1 }
 0x14e   : > { %2124 = vmatmul.mubr.msk.bf16.vlgmr.msra.gmra.mrb[44].mxu1 %vm297_vm2, %v2527_v39 }
 0x14f   : > { %v1455_v44 = vpop.f32.mrb[48].mxu0  ;;  %2135 = vmatprep.mubr.msk.bf16.mxu1 %vm2317_vm1, %v2316_v1 }
 0x150   : > { %v1461_v45 = vpack.c.bf16 %v1455_v44, %v1455_v44  ;;  %v2131_v46 = vpop.f32.mrb[49].mxu0 }
 0x151   : > { %v1458_v47 = vpop.f32.mrb[50].mxu0 }
 0x152   : > { %v1463_v48 = vsel %vm301_vm0, %v1461_v45, 0  ;;  %v2132_v49 = vpop.f32.mrb[51].mxu0 }
 0x153   : > { %2134 = vmatpush3.bf16.msra.mxu1 %v1463_v48 }
 0x154   : > { %2145 = vmatprep.subr.bf16.mxu1 %v2316_v1 }
 0x156   : > { %2136 = vmatmul.mubr.msk.bf16.vlgmr.msra.gmra.mrb[48].mxu1 %vm297_vm2, %v2527_v39 }
 0x157   : > { %v1544_v50 = vpop.f32.mrb[52].mxu0  ;;  %2147 = vmatprep.mubr.msk.bf16.mxu1 %vm2317_vm1, %v2316_v1 }
 0x158   : > { %v1550_v51 = vpack.c.bf16 %v1544_v50, %v1544_v50  ;;  %v2143_v52 = vpop.f32.mrb[53].mxu0 }
 0x159   : > { %v1547_v53 = vpop.f32.mrb[54].mxu0 }
 0x15a   : > { %v1552_v54 = vsel %vm301_vm0, %v1550_v51, 0  ;;  %v2144_v55 = vpop.f32.mrb[55].mxu0 }
 0x15b   : > { %2146 = vmatpush3.bf16.msra.mxu1 %v1552_v54 }
 0x15c   : > { %2157 = vmatprep.subr.bf16.mxu1 %v2316_v1 }
 0x15e   : > { %2148 = vmatmul.mubr.msk.bf16.vlgmr.msra.gmra.mrb[52].mxu1 %vm297_vm2, %v2527_v39 }
 0x15f   : > { %v1633_v56 = vpop.f32.mrb[56].mxu0  ;;  %2159 = vmatprep.mubr.msk.bf16.mxu1 %vm2317_vm1, %v2316_v1 }
 0x160   : > { %v1639_v57 = vpack.c.bf16 %v1633_v56, %v1633_v56  ;;  %v2155_v58 = vpop.f32.mrb[57].mxu0 }
 0x161   : > { %v1636_v59 = vpop.f32.mrb[58].mxu0 }
 0x162   : > { %v1641_v60 = vsel %vm301_vm0, %v1639_v57, 0  ;;  %v2156_v61 = vpop.f32.mrb[59].mxu0 }
 0x163   : > { %2158 = vmatpush3.bf16.msra.mxu1 %v1641_v60 }
 0x166   : > { %2160 = vmatmul.mubr.msk.bf16.vlgmr.msra.gmra.mrb[56].mxu1 %vm297_vm2, %v2527_v39 }
 0x1c9   : > { %v386_v62 = vpop.f32.mrb[0].mxu1 }
 0x1ca   : > { %v1993_v63 = vpop.f32.mrb[1].mxu1  ;;  %v747_v4 = vmul.f32 %v386_v62, %v386_v62 }
 0x1cb   : > { %v389_v0 = vpop.f32.mrb[2].mxu1 }
 0x1cc   : > { %v1994_v2 = vpop.f32.mrb[3].mxu1 }
 0x1d1   : > { %v474_v3 = vpop.f32.mrb[4].mxu1 }
 0x1d2   : > { %v748_v5 = vmul.f32 %v474_v3, %v474_v3  ;;  %v749_v6 = vmul.f32 %v474_v3, %v386_v62  ;;  %v2005_v7 = vpop.f32.mrb[5].mxu1 }
 0x1d3   : > { %v477_v8 = vpop.f32.mrb[6].mxu1 }
 0x1d4   : > { %v758_v9 = vadd.f32 %v748_v5, %v747_v4  ;;  %v2006_v10 = vpop.f32.mrb[7].mxu1  ;;  %v762_v39 = vmul.f32 2.0, %v749_v6 }
 0x1d6   : > { %v759_v11 = vadd.f32 0.0001, %v758_v9  ;;  %v763_v17 = vadd.f32 0.0001, %v762_v39 }
 0x1d8   : > { %2224 = vrcp.f32 %v759_v11 }
 0x1d9   : > { %v563_v12 = vpop.f32.mrb[8].mxu1 }
 0x1da   : > { %v750_v13 = vsub.f32 %v563_v12, %v747_v4  ;;  %v2017_v14 = vpop.f32.mrb[9].mxu1 }
 0x1db   : > { %v566_v15 = vpop.f32.mrb[10].mxu1 }
 0x1dc   : > { %v2018_v16 = vpop.f32.mrb[11].mxu1 }
 0x1e1   : > { %v652_v18 = vpop.f32.mrb[12].mxu1 }
 0x1e2   : > { %v2225_v19 = vpop.eup %2224  ;;  %v751_v20 = vsub.f32 %v652_v18, %v748_v5  ;;  %v2029_v21 = vpop.f32.mrb[13].mxu1 }
 0x1e3   : > { %v764_v22 = vmul.f32 %v2225_v19, %v763_v17  ;;  %v655_v23 = vpop.f32.mrb[14].mxu1 }
 0x1e4   : > { %v755_v24 = vadd.f32 %v751_v20, %v750_v13  ;;  %v2030_v25 = vpop.f32.mrb[15].mxu1 }
 0x1e6   : > { %v756_v26 = vadd.f32 0.0009, %v755_v24 }
 0x1e8   : > { %2226 = vrcp.f32 %v756_v26 }
 0x1e9   : > { %v741_v27 = vpop.f32.mrb[16].mxu1 }
 0x1ea   : > { %v752_v28 = vsub.f32 %v741_v27, %v749_v6  ;;  %v2041_v29 = vpop.f32.mrb[17].mxu1 }
 0x1eb   : > { %v744_v30 = vpop.f32.mrb[18].mxu1 }
 0x1ec   : > { %v2042_v31 = vpop.f32.mrb[19].mxu1  ;;  %v753_v32 = vmul.f32 2.0, %v752_v28 }
 0x1ee   : > { %v754_v33 = vadd.f32 0.0009, %v753_v32 }
 0x1f1   : > { %v854_v34 = vpop.f32.mrb[20].mxu1 }
 0x1f2   : > { %v2227_v35 = vpop.eup %2226  ;;  %v2053_v36 = vpop.f32.mrb[21].mxu1  ;;  %v1215_v43 = vmul.f32 %v854_v34, %v854_v34 }
 0x1f3   : > { %v761_v37 = vmul.f32 %v2227_v35, %v754_v33  ;;  %v857_v38 = vpop.f32.mrb[22].mxu1 }
 0x1f4   : > { %v2054_v40 = vpop.f32.mrb[23].mxu1 }
 0x1f5   : > { %v765_v41 = vmul.f32 %v764_v22, %v761_v37 }
 0x1f9   : > { %v942_v42 = vpop.f32.mrb[24].mxu1 }
 0x1fa   : > { %v1216_v44 = vmul.f32 %v942_v42, %v942_v42  ;;  %v1217_v45 = vmul.f32 %v942_v42, %v854_v34  ;;  %v2065_v46 = vpop.f32.mrb[25].mxu1 }
 0x1fb   : > { %v945_v47 = vpop.f32.mrb[26].mxu1 }
 0x1fc   : > { %v1226_v48 = vadd.f32 %v1216_v44, %v1215_v43  ;;  %v2066_v49 = vpop.f32.mrb[27].mxu1  ;;  %v1230_v56 = vmul.f32 2.0, %v1217_v45 }
 0x1fe   : > { %v1227_v50 = vadd.f32 0.0001, %v1226_v48  ;;  %v1231_v57 = vadd.f32 0.0001, %v1230_v56 }
 0x200   : > { %2228 = vrcp.f32 %v1227_v50 }
 0x201   : > { %v1031_v51 = vpop.f32.mrb[28].mxu1 }
 0x202   : > { %v1218_v52 = vsub.f32 %v1031_v51, %v1215_v43  ;;  %v2077_v53 = vpop.f32.mrb[29].mxu1  ;;  %v1704_v51 = vlaneseq }
 0x203   : > { %v1034_v54 = vpop.f32.mrb[30].mxu1 }
 0x204   : > { %v2078_v55 = vpop.f32.mrb[31].mxu1  ;;  %v1705_v53 = vand.u32 127, %v1704_v51 }
 0x206   : > { %vm1709_vm3 = vcmp.lt.s32.totalorder %v1705_v53, 3 }
 0x209   : > { %v1120_v58 = vpop.f32.mrb[32].mxu1 }
 0x20a   : > { %v2229_v59 = vpop.eup %2228  ;;  %v1219_v60 = vsub.f32 %v1120_v58, %v1216_v44  ;;  %v2089_v61 = vpop.f32.mrb[33].mxu1 }
 0x20b   : > { %v1232_v62 = vmul.f32 %v2229_v59, %v1231_v57  ;;  %v1123_v63 = vpop.f32.mrb[34].mxu1  ;;  %v1919_v59 = vsel %vm1709_vm3, 1.0, %v2316_v1 }
 0x20c   : > { %v1223_v0 = vadd.f32 %v1219_v60, %v1218_v52  ;;  %v2090_v2 = vpop.f32.mrb[35].mxu1 }
 0x20e   : > { %v1224_v3 = vadd.f32 0.0009, %v1223_v0 }
 0x210   : > { %2230 = vrcp.f32 %v1224_v3 }
 0x211   : > { %v1209_v4 = vpop.f32.mrb[36].mxu1 }
 0x212   : > { %v1220_v5 = vsub.f32 %v1209_v4, %v1217_v45  ;;  %v2101_v6 = vpop.f32.mrb[37].mxu1 }
 0x213   : > { %v1212_v7 = vpop.f32.mrb[38].mxu1 }
 0x214   : > { %v2102_v8 = vpop.f32.mrb[39].mxu1  ;;  %v1221_v9 = vmul.f32 2.0, %v1220_v5 }
 0x216   : > { %v1222_v10 = vadd.f32 0.0009, %v1221_v9 }
 0x219   : > { %v1322_v11 = vpop.f32.mrb[40].mxu1 }
 0x21a   : > { %v2231_v12 = vpop.eup %2230  ;;  %v2113_v13 = vpop.f32.mrb[41].mxu1  ;;  %v1683_v20 = vmul.f32 %v1322_v11, %v1322_v11 }
 0x21b   : > { %v1229_v14 = vmul.f32 %v2231_v12, %v1222_v10  ;;  %v1325_v15 = vpop.f32.mrb[42].mxu1 }
 0x21c   : > { %v2114_v16 = vpop.f32.mrb[43].mxu1 }
 0x21d   : > { %v1233_v39 = vmul.f32 %v1232_v62, %v1229_v14  ;;  %v1235_v17 = vadd.f32 %v1229_v14, %v761_v37 }
 0x21f   : > { %v1234_v18 = vadd.f32 %v1233_v39, %v765_v41 }
 0x221   : > { %v1410_v19 = vpop.f32.mrb[44].mxu1 }
 0x222   : > { %v1684_v21 = vmul.f32 %v1410_v19, %v1410_v19  ;;  %v1685_v22 = vmul.f32 %v1410_v19, %v1322_v11  ;;  %v2125_v23 = vpop.f32.mrb[45].mxu1 }
 0x223   : > { %v1413_v24 = vpop.f32.mrb[46].mxu1 }
 0x224   : > { %v1694_v25 = vadd.f32 %v1684_v21, %v1683_v20  ;;  %v2126_v26 = vpop.f32.mrb[47].mxu1  ;;  %v1698_v33 = vmul.f32 2.0, %v1685_v22 }
 0x226   : > { %v1695_v27 = vadd.f32 0.0001, %v1694_v25  ;;  %v1699_v34 = vadd.f32 0.0001, %v1698_v33 }
 0x228   : > { %2232 = vrcp.f32 %v1695_v27 }
 0x229   : > { %v1499_v28 = vpop.f32.mrb[48].mxu1 }
 0x22a   : > { %v1686_v29 = vsub.f32 %v1499_v28, %v1683_v20  ;;  %v2137_v30 = vpop.f32.mrb[49].mxu1 }
 0x22b   : > { %v1502_v31 = vpop.f32.mrb[50].mxu1 }
 0x22c   : > { %v2138_v32 = vpop.f32.mrb[51].mxu1 }
 0x231   : > { %v1588_v35 = vpop.f32.mrb[52].mxu1 }
 0x232   : > { %v2233_v36 = vpop.eup %2232  ;;  %v1687_v37 = vsub.f32 %v1588_v35, %v1684_v21  ;;  %v2149_v38 = vpop.f32.mrb[53].mxu1 }
 0x233   : > { %v1700_v40 = vmul.f32 %v2233_v36, %v1699_v34  ;;  %v1591_v41 = vpop.f32.mrb[54].mxu1 }
 0x234   : > { %v1691_v42 = vadd.f32 %v1687_v37, %v1686_v29  ;;  %v2150_v43 = vpop.f32.mrb[55].mxu1 }
 0x236   : > { %v1692_v44 = vadd.f32 0.0009, %v1691_v42 }
 0x238   : > { %2234 = vrcp.f32 %v1692_v44 }
 0x239   : > { %v1677_v45 = vpop.f32.mrb[56].mxu1 }
 0x23a   : > { %v1688_v46 = vsub.f32 %v1677_v45, %v1685_v22  ;;  %v2161_v47 = vpop.f32.mrb[57].mxu1 }
 0x23b   : > { %v1680_v48 = vpop.f32.mrb[58].mxu1 }
 0x23c   : > { %v2162_v49 = vpop.f32.mrb[59].mxu1  ;;  %v1689_v50 = vmul.f32 2.0, %v1688_v46 }
 0x23e   : > { %v1690_v52 = vadd.f32 0.0009, %v1689_v50 }
 0x242   : > { %v2235_v54 = vpop.eup %2234 }
 0x243   : > { %v1697_v55 = vmul.f32 %v2235_v54, %v1690_v52 }
 0x245   : > { %v1701_v56 = vmul.f32 %v1700_v40, %v1697_v55  ;;  %v1703_v57 = vadd.f32 %v1697_v55, %v1235_v17 }
 0x247   : > { %v1702_v58 = vadd.f32 %v1701_v56, %v1234_v18  ;;  %v1713_v62 = vmul.f32 %v1919_v59, %v1703_v57 }
 0x249   : > { %v1712_v60 = vmul.f32 %v1919_v59, %v1702_v58  ;;  %v1728_v63 = vsel %vm1714_vm4, %v1713_v62, 0.0 }
 0x24b   : > { %v1715_v61 = vsel %vm1714_vm4, %v1712_v60, 0.0 }
 0x24c   : > { %1716 = vadd.xlane.f32.xlu0 %v1715_v61 }
 0x250   : > { %1729 = vadd.xlane.f32.xlu0 %v1728_v63 }
 0x2d9   : > { %v1717_v0 = vpop.xlane.xlu0 %1716 }
 0x2da   : > { %v1718_v2 = vrot.slane %v1717_v0, 4 }
 0x2dc   : > { %v1719_v3 = vadd.f32 %v1718_v2, %v1717_v0 }
 0x2dd   : > { %v1730_v4 = vpop.xlane.xlu0 %1729 }
 0x2de   : > { %v1720_v5 = vrot.slane %v1719_v3, 2  ;;  %v1731_v6 = vrot.slane %v1730_v4, 4 }
 0x2e0   : > { %v1732_v7 = vadd.f32 %v1731_v6, %v1730_v4  ;;  %v1721_v8 = vadd.f32 %v1720_v5, %v1719_v3 }
 0x2e2   : > { %v1733_v1 = vrot.slane %v1732_v7, 2  ;;  %v1722_v9 = vrot.slane %v1721_v8, 1 }
 0x2e4   : > { %v1734_v10 = vadd.f32 %v1733_v1, %v1732_v7  ;;  %v1723_v11 = vadd.f32 %v1722_v9, %v1721_v8 }
 0x2e6   : > { %2163 = vpush %v1723_v11  ;;  %v1735_v12 = vrot.slane %v1734_v10, 1 }
 0x2e8   : > { %v1736_v13 = vadd.f32 %v1735_v12, %v1734_v10 }
 0x2ea   : > { %2165 = vpush %v1736_v13 }
 0x317   : > { %s2164_s9 = spop %2163 }
 0x318   : > { %v1725_v14 = vstv %s2164_s9 }
 0x319   : > { %1727 = vst.msk [vmem:[%s290_s8] sm:$0x1] %vm1726_vm5, %v1725_v14 }
 0x31b   : > { %s2166_s16 = spop %2165 }
 0x31c   : > { %v1738_v15 = vstv %s2166_s16 }
 0x31d   : > { %1739 = vst.msk [vmem:[%s269_s11] sm:$0x1] %vm1726_vm5, %v1738_v15 }
 0x31e   : > { %2249 = shalt.err (!%p2246_p6)
}
 0x31f   : > { %s2250_s27 = scalar_lea.hbm %s2626_s15, 16  ;;  %s2254_s9 = scalar_lea.hbm %s2678_s5, 32 }
 0x320   : > { %p2251_p7 = scmp.ne.s32.totalorder %s2626_s15, %s2250_s27  ;;  %p2255_p11 = scmp.lt.u32.totalorder %s2626_s15, %s2678_s5 }
 0x321   : > { %p2256_p12 = scmp.lt.u32.totalorder %s2254_s9, %s2250_s27  ;;  %p2258_p0 = scmp.lt.u32.totalorder %s2250_s27, %s2626_s15 }
 0x322   : > { %p2252_p9 = pnand %p2251_p7, %p2389_p4 }
 0x323   : > { %p2257_p13 = por %p2256_p12, %p2255_p11 }
 0x324   : > { %p2253_p10 = pneg %p2252_p9 }
 0x325   : > { %p2259_p1 = por %p2258_p0, %p2257_p13 }
 0x327   : > { %p2260_p2 = pnand %p2259_p1, %p2253_p10 }
 0x329   : > { %2263 = shalt.err (!%p2260_p2)
}
 0x32a   : > { %2167 = dma.vmem_to_hbm [thread:$0]  (%p2389_p4), %s2628_s12, 16, %s2626_s15, %s1747_s17  }
 0x32b PF: > { %p2173_p3 = scmp.ge.s32.totalorder %s2314_s23, 2  ;;  %s1784_s13 = sand.u32 1, %s2294_s18  }
 0x32c   : > { %s1785_s14 = scalar_lea.sflag [#allocation3], %s1784_s13 }
 0x32d   : > { %p2170_p5 = pnand %p2173_p3, %p2396_p8 }
 0x32f   : > { %2289 = dma.done.wait (!%p2170_p5), %s1785_s14, 16  }
 0x330   : > { %2291 = vsyncadd (!%p2170_p5), %s1785_s14, 4294967280  ;;  %s19_s23 = sadd.s32 1, %s2314_s23   ;;  %s2681_s18 = smov %s2298_s19 }
 0x331   : > { %p16_p6 = scmp.ge.s32.totalorder %s19_s23, 4   ;;  %s2682_s19 = smov %s2302_s20 }
 0x332   : > { %s2683_s20 = smov %s2402_s6  ;;  %s2684_s21 = smov %s2310_s22 }
 0x333   : > { %s2685_s22 = smov %s2687_s26  ;;  %18 = sbr.rel (!%p16_p6) target bundleno = 4 (0x4), region = 93 }
 0x33a   :  { %1789 = vsyncpa [#allocation3], 1 }
 0x33b   :  { %1791 = vsyncpa [#allocation3 + $0x1], 1 }

</bundles_post_ra>
